<compile_context>
chip_gen: v7x
topology: tpu7x:2x2x1
jax: 0.10.0
libtpu: 0.0.40
codegen_flags: <defaults>
</compile_context>

<pallas_src>
import jax
import jax.numpy as jnp
from jax.experimental import pallas as pl
from jax.experimental.pallas import tpu as pltpu

EPS = 1e-5  # PyTorch InstanceNorm2d default (affine=False, biased variance)

# Conv-matmul operand dtype (see header note).
MATMUL_DTYPE = jnp.float32


def _pick_block_batch(n):
    """Samples per grid step.

    Target >= 8 samples/step so per-step input+output DMA is >= 32+32 KiB and
    the ~0.35us per-step pipeline overhead is amortized, but keep at least two
    grid steps whenever n >= 2 so v7x's two TensorCores both get work.
    """
    bb = min(8, max(n, 1))
    while bb > 1 and -(-n // bb) < 2:
        bb //= 2
    return max(bb, 1)


def _make_kernel(width, L, C1):
    """Kernel for one grid step: Bb lane-concatenated samples, (C, L=Bb*HW)."""

    def conv3x3(a, w_st, mask):
        # a: (c_in, L); w_st: (9*C1, c_in) taps stacked along M;
        # mask: (9*C1, L) resident source-side validity mask.
        # One MXU matmul covers all 9 taps; the masked rows are lane-rolled to
        # their spatial offsets and tree-accumulated.  Mask periodicity in HW
        # zeroes any roll wrap across samples / array ends.
        z = jnp.dot(w_st.astype(MATMUL_DTYPE), a.astype(MATMUL_DTYPE),
                    preferred_element_type=jnp.float32)        # (9*C1, L)
        z = z * mask
        parts = []
        for kh in range(3):
            for kw in range(3):
                t = kh * 3 + kw
                d = (kh - 1) * width + (kw - 1)
                zt = z[t * C1:(t + 1) * C1, :]                  # 8-aligned rows
                if d != 0:
                    zt = pltpu.roll(zt, shift=(-d) % L, axis=1)
                parts.append(zt)
        while len(parts) > 1:                                   # pairwise tree add
            nxt = [parts[i] + parts[i + 1] for i in range(0, len(parts) - 1, 2)]
            if len(parts) % 2:
                nxt.append(parts[-1])
            parts = nxt
        return parts[0]                                         # (C1, L)

    def kernel(x_ref, w1_ref, w2_ref, w3_ref, mask_ref, sel_ref, ind_ref, o_ref):
        # x_ref   : (Cin, L)     Bb lane-concatenated input samples
        # w1_ref  : (9*C1, Cin)  conv1 weights, taps stacked along M
        # w2_ref  : (9*C1, C1)   conv2 weights
        # w3_ref  : (Cout, C1)   final 1x1 projection
        # mask_ref: (9*C1, L)    resident tap validity mask (pre-broadcast)
        # sel_ref : (L, Bb)      per-sample mean selector (1/HW in own segment)
        # ind_ref : (Bb, L)      per-sample segment indicator (0/1)
        # o_ref   : (Cout, L)    lane-dense output
        mask = mask_ref[...]
        sel = sel_ref[...]
        ind = ind_ref[...]

        def inorm_relu(a):
            # InstanceNorm2d per (sample, channel) over each HW lane segment
            # (biased variance, no affine) + ReLU, via resident selector dots.
            mean = jnp.dot(a, sel, preferred_element_type=jnp.float32)      # (C1, Bb)
            ex2 = jnp.dot(a * a, sel, preferred_element_type=jnp.float32)   # (C1, Bb)
            var = jnp.maximum(ex2 - mean * mean, 0.0)   # guard one-pass cancellation
            inv = jax.lax.rsqrt(var + EPS)                                   # EUP
            coef = jnp.concatenate([inv, -mean * inv], axis=0)               # (2*C1, Bb)
            full = jnp.dot(coef, ind, preferred_element_type=jnp.float32)    # (2*C1, L)
            return jnp.maximum(a * full[:C1, :] + full[C1:, :], 0.0)

        y1 = inorm_relu(conv3x3(x_ref[...], w1_ref[...], mask))
        y2 = inorm_relu(conv3x3(y1, w2_ref[...], mask))
        out = jnp.dot(w3_ref[...].astype(MATMUL_DTYPE), y2.astype(MATMUL_DTYPE),
                      preferred_element_type=jnp.float32)                    # (Cout, L)
        o_ref[...] = out.astype(o_ref.dtype)

    return kernel


@jax.jit
def dfilter_forward(x_nchw, w1_oihw, w2_oihw, w3_oihw):
    """DFilter forward.  x: (N, Cin, H, W) f32; weights in PyTorch OIHW layout
    ((C1, Cin, 3, 3), (C1, C1, 3, 3), (Cout, C1, 1, 1)).  Returns NCHW f32."""
    N, Cin, H, W = x_nchw.shape
    C1 = w1_oihw.shape[0]
    Cout = w3_oihw.shape[0]
    HW = H * W

    Bb = _pick_block_batch(N)
    G = -(-N // Bb)            # grid steps (>= 2 whenever N >= 2)
    Np = G * Bb                # padded batch
    L = Bb * HW                # lanes per step

    x_p = x_nchw if Np == N else jnp.pad(
        x_nchw, ((0, Np - N), (0, 0), (0, 0), (0, 0)))
    # Lane-concatenate: (Cin, Np*HW), samples contiguous along the lane axis.
    x2d = jnp.transpose(x_p, (1, 0, 2, 3)).reshape(Cin, Np * HW)

    # Taps stacked along M: w_st[(kh*3+kw)*C1 + co, ci] = w[co, ci, kh, kw].
    w1_st = jnp.transpose(w1_oihw, (2, 3, 0, 1)).reshape(9 * C1, Cin)
    w2_st = jnp.transpose(w2_oihw, (2, 3, 0, 1)).reshape(9 * C1, C1)
    w3_mat = w3_oihw.reshape(Cout, C1)

    # Resident source-side tap validity mask (9*C1, L): lane q (in-sample
    # coords (row, col)) may feed tap (dh, dw) iff its reader q-d is a genuine
    # in-image neighbour in the SAME sample; global roll-wrap readers zeroed.
    pos = jnp.arange(L, dtype=jnp.int32)
    q = pos % HW
    row = q // W
    col = q % W
    tap_rows = []
    for kh in range(3):
        for kw in range(3):
            dh, dw = kh - 1, kw - 1
            d = dh * W + dw
            ok = ((row - dh >= 0) & (row - dh <= H - 1) &
                  (col - dw >= 0) & (col - dw <= W - 1) &
                  (pos - d >= 0) & (pos - d <= L - 1))
            tap_rows.append(jnp.broadcast_to(
                ok.astype(jnp.float32)[None, :], (C1, L)))
    mask = jnp.concatenate(tap_rows, axis=0)                         # (9*C1, L)

    # Per-sample segment selector / indicator for the segmented InstanceNorm.
    seg = pos // HW
    sids = jnp.arange(Bb, dtype=jnp.int32)
    sel = (seg[:, None] == sids[None, :]).astype(jnp.float32) / HW   # (L, Bb)
    ind = (sids[:, None] == seg[None, :]).astype(jnp.float32)        # (Bb, L)

    kernel = _make_kernel(W, L, C1)

    out2d = pl.pallas_call(
        kernel,
        out_shape=jax.ShapeDtypeStruct((Cout, Np * HW), jnp.float32),
        grid_spec=pltpu.PrefetchScalarGridSpec(
            num_scalar_prefetch=0,
            grid=(G,),  # batch-blocked; each step handles Bb samples
            in_specs=[
                pl.BlockSpec((Cin, L), lambda g: (0, g)),
                pl.BlockSpec((9 * C1, Cin), lambda g: (0, 0)),
                pl.BlockSpec((9 * C1, C1), lambda g: (0, 0)),
                pl.BlockSpec((Cout, C1), lambda g: (0, 0)),
                pl.BlockSpec((9 * C1, L), lambda g: (0, 0)),
                pl.BlockSpec((L, Bb), lambda g: (0, 0)),
                pl.BlockSpec((Bb, L), lambda g: (0, 0)),
            ],
            out_specs=pl.BlockSpec((Cout, L), lambda g: (0, g)),
        ),
        # "parallel" lets v7x shard the (>=2-step) batch axis over its two TCs;
        # if profiling shows it does not shard, switch to pltpu.CORE_PARALLEL.
        compiler_params=pltpu.CompilerParams(
            dimension_semantics=("parallel",)),
    )(x2d, w1_st, w2_st, w3_mat, mask, sel, ind)

    out = out2d.reshape(Cout, Np, H, W).transpose(1, 0, 2, 3)
    return out[:N] if Np != N else out


def ref_forward(x, w1, w2, w3):
    """Pure-JAX reference of the same DFilter forward (for verification)."""
    def conv(a, w):
        return jax.lax.conv_general_dilated(
            a, w, window_strides=(1, 1), padding='SAME',
            dimension_numbers=('NCHW', 'OIHW', 'NCHW'))

    def inorm_relu(y):
        m = jnp.mean(y, axis=(2, 3), keepdims=True)
        v = jnp.mean((y - m) ** 2, axis=(2, 3), keepdims=True)
        return jnp.maximum((y - m) * jax.lax.rsqrt(v + EPS), 0.0)

    y = inorm_relu(conv(x, w1))
    y = inorm_relu(conv(y, w2))
    return conv(y, w3)


if __name__ == "__main__":
    key = jax.random.PRNGKey(0)
    kx, k1, k2, k3 = jax.random.split(key, 4)

    # Small shapes, but a large enough batch (16) to exercise the batched
    # (Bb=8, 2 grid steps) kernel path.
    N, Cin, H, W = 16, 4, 16, 16
    C1, Cout = 8, 4

    x = jax.random.normal(kx, (N, Cin, H, W), jnp.float32)
    w1 = jax.random.normal(k1, (C1, Cin, 3, 3), jnp.float32) * 0.1
    w2 = jax.random.normal(k2, (C1, C1, 3, 3), jnp.float32) * 0.1
    w3 = jax.random.normal(k3, (Cout, C1, 1, 1), jnp.float32) * 0.1

    out = jax.block_until_ready(dfilter_forward(x, w1, w2, w3))

    ref = ref_forward(x, w1, w2, w3)
    assert out.shape == (N, Cout, H, W), out.shape
    err = float(jnp.max(jnp.abs(out - ref)))
    assert jnp.allclose(out, ref, rtol=2e-4, atol=2e-4), f"max abs err = {err}"

    print("KERNEL_OK")
</pallas_src>

<mosaic_0001>
module attributes {stable_mosaic.version = 11 : i64} {
  func.func @kernel(%arg0: i32, %arg1: memref<4x2048xf32, #tpu.memory_space<vmem>>, %arg2: memref<72x4xf32, #tpu.memory_space<vmem>>, %arg3: memref<72x8xf32, #tpu.memory_space<vmem>>, %arg4: memref<4x8xf32, #tpu.memory_space<vmem>>, %arg5: memref<72x2048xf32, #tpu.memory_space<vmem>>, %arg6: memref<2048x8xf32, #tpu.memory_space<vmem>>, %arg7: memref<8x2048xf32, #tpu.memory_space<vmem>>, %arg8: memref<4x2048xf32, #tpu.memory_space<vmem>>) attributes {dimension_semantics = [#tpu.dimension_semantics<parallel>], iteration_bounds = array<i64: 2>, scalar_prefetch = 0 : i64, scratch_operands = 0 : i64, tpu.core_type = #tpu.core_type<tc>, window_params = [{transform_indices = @transform_0, window_bounds = array<i64: 4, 2048>}, {pipeline_mode = #tpu.pipeline_mode<synchronous>, transform_indices = @transform_1, window_bounds = array<i64: 72, 4>}, {pipeline_mode = #tpu.pipeline_mode<synchronous>, transform_indices = @transform_2, window_bounds = array<i64: 72, 8>}, {pipeline_mode = #tpu.pipeline_mode<synchronous>, transform_indices = @transform_3, window_bounds = array<i64: 4, 8>}, {pipeline_mode = #tpu.pipeline_mode<synchronous>, transform_indices = @transform_4, window_bounds = array<i64: 72, 2048>}, {pipeline_mode = #tpu.pipeline_mode<synchronous>, transform_indices = @transform_5, window_bounds = array<i64: 2048, 8>}, {pipeline_mode = #tpu.pipeline_mode<synchronous>, transform_indices = @transform_6, window_bounds = array<i64: 8, 2048>}, {transform_indices = @transform_7, window_bounds = array<i64: 4, 2048>}]} {
    %c0 = arith.constant 0 : index
    %c0_0 = arith.constant 0 : index
    %0 = vector.load %arg5[%c0, %c0_0] : memref<72x2048xf32, #tpu.memory_space<vmem>>, vector<72x2048xf32>
    %c0_1 = arith.constant 0 : index
    %c0_2 = arith.constant 0 : index
    %1 = vector.load %arg6[%c0_1, %c0_2] : memref<2048x8xf32, #tpu.memory_space<vmem>>, vector<2048x8xf32>
    %c0_3 = arith.constant 0 : index
    %c0_4 = arith.constant 0 : index
    %2 = vector.load %arg7[%c0_3, %c0_4] : memref<8x2048xf32, #tpu.memory_space<vmem>>, vector<8x2048xf32>
    %c0_5 = arith.constant 0 : index
    %c0_6 = arith.constant 0 : index
    %3 = vector.load %arg1[%c0_5, %c0_6] : memref<4x2048xf32, #tpu.memory_space<vmem>>, vector<4x2048xf32>
    %c0_7 = arith.constant 0 : index
    %c0_8 = arith.constant 0 : index
    %4 = vector.load %arg2[%c0_7, %c0_8] : memref<72x4xf32, #tpu.memory_space<vmem>>, vector<72x4xf32>
    %cst = arith.constant dense<0.000000e+00> : vector<72x2048xf32>
    %5 = tpu.matmul %4, %3, %cst {dimension_numbers = #tpu.dot_dimension_numbers<[1], [0], [0], [1], [0, 0, 1, 1], [], []>} : vector<72x4xf32>, vector<4x2048xf32>, vector<72x2048xf32> -> vector<72x2048xf32>
    %6 = arith.mulf %5, %0 : vector<72x2048xf32>
    %7 = vector.extract_strided_slice %6 {offsets = [0, 0], sizes = [8, 2048], strides = [1, 1]} : vector<72x2048xf32> to vector<8x2048xf32>
    %c17_i32 = arith.constant 17 : i32
    %8 = tpu.dynamic_rotate %7 by %c17_i32 dim 1 : vector<8x2048xf32>, i32 -> vector<8x2048xf32>
    %9 = vector.extract_strided_slice %6 {offsets = [8, 0], sizes = [8, 2048], strides = [1, 1]} : vector<72x2048xf32> to vector<8x2048xf32>
    %c16_i32 = arith.constant 16 : i32
    %10 = tpu.dynamic_rotate %9 by %c16_i32 dim 1 : vector<8x2048xf32>, i32 -> vector<8x2048xf32>
    %11 = vector.extract_strided_slice %6 {offsets = [16, 0], sizes = [8, 2048], strides = [1, 1]} : vector<72x2048xf32> to vector<8x2048xf32>
    %c15_i32 = arith.constant 15 : i32
    %12 = tpu.dynamic_rotate %11 by %c15_i32 dim 1 : vector<8x2048xf32>, i32 -> vector<8x2048xf32>
    %13 = vector.extract_strided_slice %6 {offsets = [24, 0], sizes = [8, 2048], strides = [1, 1]} : vector<72x2048xf32> to vector<8x2048xf32>
    %c1_i32 = arith.constant 1 : i32
    %14 = tpu.dynamic_rotate %13 by %c1_i32 dim 1 : vector<8x2048xf32>, i32 -> vector<8x2048xf32>
    %15 = vector.extract_strided_slice %6 {offsets = [32, 0], sizes = [8, 2048], strides = [1, 1]} : vector<72x2048xf32> to vector<8x2048xf32>
    %16 = vector.extract_strided_slice %6 {offsets = [40, 0], sizes = [8, 2048], strides = [1, 1]} : vector<72x2048xf32> to vector<8x2048xf32>
    %c2047_i32 = arith.constant 2047 : i32
    %17 = tpu.dynamic_rotate %16 by %c2047_i32 dim 1 : vector<8x2048xf32>, i32 -> vector<8x2048xf32>
    %18 = vector.extract_strided_slice %6 {offsets = [48, 0], sizes = [8, 2048], strides = [1, 1]} : vector<72x2048xf32> to vector<8x2048xf32>
    %c2033_i32 = arith.constant 2033 : i32
    %19 = tpu.dynamic_rotate %18 by %c2033_i32 dim 1 : vector<8x2048xf32>, i32 -> vector<8x2048xf32>
    %20 = vector.extract_strided_slice %6 {offsets = [56, 0], sizes = [8, 2048], strides = [1, 1]} : vector<72x2048xf32> to vector<8x2048xf32>
    %c2032_i32 = arith.constant 2032 : i32
    %21 = tpu.dynamic_rotate %20 by %c2032_i32 dim 1 : vector<8x2048xf32>, i32 -> vector<8x2048xf32>
    %22 = vector.extract_strided_slice %6 {offsets = [64, 0], sizes = [8, 2048], strides = [1, 1]} : vector<72x2048xf32> to vector<8x2048xf32>
    %c2031_i32 = arith.constant 2031 : i32
    %23 = tpu.dynamic_rotate %22 by %c2031_i32 dim 1 : vector<8x2048xf32>, i32 -> vector<8x2048xf32>
    %24 = arith.addf %8, %10 : vector<8x2048xf32>
    %25 = arith.addf %12, %14 : vector<8x2048xf32>
    %26 = arith.addf %15, %17 : vector<8x2048xf32>
    %27 = arith.addf %19, %21 : vector<8x2048xf32>
    %28 = arith.addf %24, %25 : vector<8x2048xf32>
    %29 = arith.addf %26, %27 : vector<8x2048xf32>
    %30 = arith.addf %28, %29 : vector<8x2048xf32>
    %31 = arith.addf %30, %23 : vector<8x2048xf32>
    %cst_9 = arith.constant dense<0.000000e+00> : vector<8x8xf32>
    %32 = tpu.matmul %31, %1, %cst_9 {dimension_numbers = #tpu.dot_dimension_numbers<[1], [0], [0], [1], [0, 0, 1, 1], [], []>} : vector<8x2048xf32>, vector<2048x8xf32>, vector<8x8xf32> -> vector<8x8xf32>
    %33 = arith.mulf %31, %31 : vector<8x2048xf32>
    %cst_10 = arith.constant dense<0.000000e+00> : vector<8x8xf32>
    %34 = tpu.matmul %33, %1, %cst_10 {dimension_numbers = #tpu.dot_dimension_numbers<[1], [0], [0], [1], [0, 0, 1, 1], [], []>} : vector<8x2048xf32>, vector<2048x8xf32>, vector<8x8xf32> -> vector<8x8xf32>
    %35 = arith.mulf %32, %32 : vector<8x8xf32>
    %36 = arith.subf %34, %35 : vector<8x8xf32>
    %cst_11 = arith.constant 0.000000e+00 : f32
    %37 = vector.broadcast %cst_11 : f32 to vector<8x8xf32>
    %38 = arith.maximumf %36, %37 : vector<8x8xf32>
    %cst_12 = arith.constant 9.99999974E-6 : f32
    %39 = vector.broadcast %cst_12 : f32 to vector<8x8xf32>
    %40 = arith.addf %38, %39 : vector<8x8xf32>
    %41 = math.rsqrt %40 : vector<8x8xf32>
    %cst_13 = arith.constant 0.000000e+00 : f32
    %42 = vector.broadcast %cst_13 : f32 to vector<8x8xf32>
    %43 = arith.subf %42, %32 : vector<8x8xf32>
    %44 = arith.mulf %43, %41 : vector<8x8xf32>
    %45 = tpu.concatenate %41, %44 in 0 : vector<8x8xf32>, vector<8x8xf32> -> vector<16x8xf32>
    %cst_14 = arith.constant dense<0.000000e+00> : vector<16x2048xf32>
    %46 = tpu.matmul %45, %2, %cst_14 {dimension_numbers = #tpu.dot_dimension_numbers<[1], [0], [0], [1], [0, 0, 1, 1], [], []>} : vector<16x8xf32>, vector<8x2048xf32>, vector<16x2048xf32> -> vector<16x2048xf32>
    %47 = vector.extract_strided_slice %46 {offsets = [0, 0], sizes = [8, 2048], strides = [1, 1]} : vector<16x2048xf32> to vector<8x2048xf32>
    %48 = arith.mulf %31, %47 : vector<8x2048xf32>
    %49 = vector.extract_strided_slice %46 {offsets = [8, 0], sizes = [8, 2048], strides = [1, 1]} : vector<16x2048xf32> to vector<8x2048xf32>
    %50 = arith.addf %48, %49 : vector<8x2048xf32>
    %cst_15 = arith.constant 0.000000e+00 : f32
    %51 = vector.broadcast %cst_15 : f32 to vector<8x2048xf32>
    %52 = arith.maximumf %50, %51 : vector<8x2048xf32>
    %c0_16 = arith.constant 0 : index
    %c0_17 = arith.constant 0 : index
    %53 = vector.load %arg3[%c0_16, %c0_17] : memref<72x8xf32, #tpu.memory_space<vmem>>, vector<72x8xf32>
    %cst_18 = arith.constant dense<0.000000e+00> : vector<72x2048xf32>
    %54 = tpu.matmul %53, %52, %cst_18 {dimension_numbers = #tpu.dot_dimension_numbers<[1], [0], [0], [1], [0, 0, 1, 1], [], []>} : vector<72x8xf32>, vector<8x2048xf32>, vector<72x2048xf32> -> vector<72x2048xf32>
    %55 = arith.mulf %54, %0 : vector<72x2048xf32>
    %56 = vector.extract_strided_slice %55 {offsets = [0, 0], sizes = [8, 2048], strides = [1, 1]} : vector<72x2048xf32> to vector<8x2048xf32>
    %c17_i32_19 = arith.constant 17 : i32
    %57 = tpu.dynamic_rotate %56 by %c17_i32_19 dim 1 : vector<8x2048xf32>, i32 -> vector<8x2048xf32>
    %58 = vector.extract_strided_slice %55 {offsets = [8, 0], sizes = [8, 2048], strides = [1, 1]} : vector<72x2048xf32> to vector<8x2048xf32>
    %c16_i32_20 = arith.constant 16 : i32
    %59 = tpu.dynamic_rotate %58 by %c16_i32_20 dim 1 : vector<8x2048xf32>, i32 -> vector<8x2048xf32>
    %60 = vector.extract_strided_slice %55 {offsets = [16, 0], sizes = [8, 2048], strides = [1, 1]} : vector<72x2048xf32> to vector<8x2048xf32>
    %c15_i32_21 = arith.constant 15 : i32
    %61 = tpu.dynamic_rotate %60 by %c15_i32_21 dim 1 : vector<8x2048xf32>, i32 -> vector<8x2048xf32>
    %62 = vector.extract_strided_slice %55 {offsets = [24, 0], sizes = [8, 2048], strides = [1, 1]} : vector<72x2048xf32> to vector<8x2048xf32>
    %c1_i32_22 = arith.constant 1 : i32
    %63 = tpu.dynamic_rotate %62 by %c1_i32_22 dim 1 : vector<8x2048xf32>, i32 -> vector<8x2048xf32>
    %64 = vector.extract_strided_slice %55 {offsets = [32, 0], sizes = [8, 2048], strides = [1, 1]} : vector<72x2048xf32> to vector<8x2048xf32>
    %65 = vector.extract_strided_slice %55 {offsets = [40, 0], sizes = [8, 2048], strides = [1, 1]} : vector<72x2048xf32> to vector<8x2048xf32>
    %c2047_i32_23 = arith.constant 2047 : i32
    %66 = tpu.dynamic_rotate %65 by %c2047_i32_23 dim 1 : vector<8x2048xf32>, i32 -> vector<8x2048xf32>
    %67 = vector.extract_strided_slice %55 {offsets = [48, 0], sizes = [8, 2048], strides = [1, 1]} : vector<72x2048xf32> to vector<8x2048xf32>
    %c2033_i32_24 = arith.constant 2033 : i32
    %68 = tpu.dynamic_rotate %67 by %c2033_i32_24 dim 1 : vector<8x2048xf32>, i32 -> vector<8x2048xf32>
    %69 = vector.extract_strided_slice %55 {offsets = [56, 0], sizes = [8, 2048], strides = [1, 1]} : vector<72x2048xf32> to vector<8x2048xf32>
    %c2032_i32_25 = arith.constant 2032 : i32
    %70 = tpu.dynamic_rotate %69 by %c2032_i32_25 dim 1 : vector<8x2048xf32>, i32 -> vector<8x2048xf32>
    %71 = vector.extract_strided_slice %55 {offsets = [64, 0], sizes = [8, 2048], strides = [1, 1]} : vector<72x2048xf32> to vector<8x2048xf32>
    %c2031_i32_26 = arith.constant 2031 : i32
    %72 = tpu.dynamic_rotate %71 by %c2031_i32_26 dim 1 : vector<8x2048xf32>, i32 -> vector<8x2048xf32>
    %73 = arith.addf %57, %59 : vector<8x2048xf32>
    %74 = arith.addf %61, %63 : vector<8x2048xf32>
    %75 = arith.addf %64, %66 : vector<8x2048xf32>
    %76 = arith.addf %68, %70 : vector<8x2048xf32>
    %77 = arith.addf %73, %74 : vector<8x2048xf32>
    %78 = arith.addf %75, %76 : vector<8x2048xf32>
    %79 = arith.addf %77, %78 : vector<8x2048xf32>
    %80 = arith.addf %79, %72 : vector<8x2048xf32>
    %cst_27 = arith.constant dense<0.000000e+00> : vector<8x8xf32>
    %81 = tpu.matmul %80, %1, %cst_27 {dimension_numbers = #tpu.dot_dimension_numbers<[1], [0], [0], [1], [0, 0, 1, 1], [], []>} : vector<8x2048xf32>, vector<2048x8xf32>, vector<8x8xf32> -> vector<8x8xf32>
    %82 = arith.mulf %80, %80 : vector<8x2048xf32>
    %cst_28 = arith.constant dense<0.000000e+00> : vector<8x8xf32>
    %83 = tpu.matmul %82, %1, %cst_28 {dimension_numbers = #tpu.dot_dimension_numbers<[1], [0], [0], [1], [0, 0, 1, 1], [], []>} : vector<8x2048xf32>, vector<2048x8xf32>, vector<8x8xf32> -> vector<8x8xf32>
    %84 = arith.mulf %81, %81 : vector<8x8xf32>
    %85 = arith.subf %83, %84 : vector<8x8xf32>
    %cst_29 = arith.constant 0.000000e+00 : f32
    %86 = vector.broadcast %cst_29 : f32 to vector<8x8xf32>
    %87 = arith.maximumf %85, %86 : vector<8x8xf32>
    %cst_30 = arith.constant 9.99999974E-6 : f32
    %88 = vector.broadcast %cst_30 : f32 to vector<8x8xf32>
    %89 = arith.addf %87, %88 : vector<8x8xf32>
    %90 = math.rsqrt %89 : vector<8x8xf32>
    %cst_31 = arith.constant 0.000000e+00 : f32
    %91 = vector.broadcast %cst_31 : f32 to vector<8x8xf32>
    %92 = arith.subf %91, %81 : vector<8x8xf32>
    %93 = arith.mulf %92, %90 : vector<8x8xf32>
    %94 = tpu.concatenate %90, %93 in 0 : vector<8x8xf32>, vector<8x8xf32> -> vector<16x8xf32>
    %cst_32 = arith.constant dense<0.000000e+00> : vector<16x2048xf32>
    %95 = tpu.matmul %94, %2, %cst_32 {dimension_numbers = #tpu.dot_dimension_numbers<[1], [0], [0], [1], [0, 0, 1, 1], [], []>} : vector<16x8xf32>, vector<8x2048xf32>, vector<16x2048xf32> -> vector<16x2048xf32>
    %96 = vector.extract_strided_slice %95 {offsets = [0, 0], sizes = [8, 2048], strides = [1, 1]} : vector<16x2048xf32> to vector<8x2048xf32>
    %97 = arith.mulf %80, %96 : vector<8x2048xf32>
    %98 = vector.extract_strided_slice %95 {offsets = [8, 0], sizes = [8, 2048], strides = [1, 1]} : vector<16x2048xf32> to vector<8x2048xf32>
    %99 = arith.addf %97, %98 : vector<8x2048xf32>
    %cst_33 = arith.constant 0.000000e+00 : f32
    %100 = vector.broadcast %cst_33 : f32 to vector<8x2048xf32>
    %101 = arith.maximumf %99, %100 : vector<8x2048xf32>
    %c0_34 = arith.constant 0 : index
    %c0_35 = arith.constant 0 : index
    %102 = vector.load %arg4[%c0_34, %c0_35] : memref<4x8xf32, #tpu.memory_space<vmem>>, vector<4x8xf32>
    %cst_36 = arith.constant dense<0.000000e+00> : vector<4x2048xf32>
    %103 = tpu.matmul %102, %101, %cst_36 {dimension_numbers = #tpu.dot_dimension_numbers<[1], [0], [0], [1], [0, 0, 1, 1], [], []>} : vector<4x8xf32>, vector<8x2048xf32>, vector<4x2048xf32> -> vector<4x2048xf32>
    %c0_37 = arith.constant 0 : index
    %c0_38 = arith.constant 0 : index
    %104 = vector.load %arg8[%c0_37, %c0_38] : memref<4x2048xf32, #tpu.memory_space<vmem>>, vector<4x2048xf32>
    tpu.vector_store %arg8[%c0_37, %c0_38], %103 {strides = array<i32>} : memref<4x2048xf32, #tpu.memory_space<vmem>>, vector<4x2048xf32>,
    return
  }
  func.func @transform_0(%arg0: i32) -> (i32, i32) {
    %c0_i32 = arith.constant 0 : i32
    %c0_i32_0 = arith.constant 0 : i32
    return %c0_i32, %arg0 : i32, i32
  }
  func.func @transform_1(%arg0: i32) -> (i32, i32) {
    %c0_i32 = arith.constant 0 : i32
    %c0_i32_0 = arith.constant 0 : i32
    %c0_i32_1 = arith.constant 0 : i32
    return %c0_i32, %c0_i32_0 : i32, i32
  }
  func.func @transform_2(%arg0: i32) -> (i32, i32) {
    %c0_i32 = arith.constant 0 : i32
    %c0_i32_0 = arith.constant 0 : i32
    %c0_i32_1 = arith.constant 0 : i32
    return %c0_i32, %c0_i32_0 : i32, i32
  }
  func.func @transform_3(%arg0: i32) -> (i32, i32) {
    %c0_i32 = arith.constant 0 : i32
    %c0_i32_0 = arith.constant 0 : i32
    %c0_i32_1 = arith.constant 0 : i32
    return %c0_i32, %c0_i32_0 : i32, i32
  }
  func.func @transform_4(%arg0: i32) -> (i32, i32) {
    %c0_i32 = arith.constant 0 : i32
    %c0_i32_0 = arith.constant 0 : i32
    %c0_i32_1 = arith.constant 0 : i32
    return %c0_i32, %c0_i32_0 : i32, i32
  }
  func.func @transform_5(%arg0: i32) -> (i32, i32) {
    %c0_i32 = arith.constant 0 : i32
    %c0_i32_0 = arith.constant 0 : i32
    %c0_i32_1 = arith.constant 0 : i32
    return %c0_i32, %c0_i32_0 : i32, i32
  }
  func.func @transform_6(%arg0: i32) -> (i32, i32) {
    %c0_i32 = arith.constant 0 : i32
    %c0_i32_0 = arith.constant 0 : i32
    %c0_i32_1 = arith.constant 0 : i32
    return %c0_i32, %c0_i32_0 : i32, i32
  }
  func.func @transform_7(%arg0: i32) -> (i32, i32) {
    %c0_i32 = arith.constant 0 : i32
    %c0_i32_0 = arith.constant 0 : i32
    return %c0_i32, %arg0 : i32, i32
  }
}

</mosaic_0001>

<bundles_post_ra>
// kernel: dfilter_forward.1
= control target key start
LH: loop header
LB: loop body
LE: loop exit
PB: predicated region body
PF: predicated region fallthrough
CT: control target
= control target key end

     0   :  { %s10950_s24 = smov 0   ;;  %s16637_s0 = inlined_call_operand.vmem [shape: f32[4,4096], index: 0, kind: input, shape index: {}]   ;;  %s16638_s1 = inlined_call_operand.vmem [shape: f32[72,4], index: 1, kind: input, shape index: {}]   ;;  %s16639_s2 = inlined_call_operand.vmem [shape: f32[72,8], index: 2, kind: input, shape index: {}]   ;;  %s16640_s3 = inlined_call_operand.vmem [shape: f32[4,8], index: 3, kind: input, shape index: {}]   ;;  %s16641_s4 = inlined_call_operand.vmem [shape: f32[72,2048], index: 4, kind: input, shape index: {}]   ;;  %s16642_s5 = inlined_call_operand.vmem [shape: f32[2048,8], index: 5, kind: input, shape index: {}]   ;;  %s16643_s6 = inlined_call_operand.vmem [shape: f32[8,2048], index: 6, kind: input, shape index: {}]   ;;  %s16644_s7 = inlined_call_operand.vmem [shape: f32[4,4096], index: 7, kind: output, shape index: {}]  }
   0x1 LB: > { %s8349_s25 = sadd.s32 4294967295, %s10899_s24   ;;  %p8353_p0 = scmp.ge.s32.totalorder %s10899_s24, 1  ;;  %s10899_s24 = sphi %s10950_s24, %s17_s24  }
   0x2   : > { %p238_p1 = scmp.lt.s32.totalorder %s10899_s24, 3 }
   0x4   : > { %p239_p2 = pnand %p8353_p0, %p238_p1 }
   0x6   : > { %242 = sbr.rel (%p239_p2) target bundleno = 2609 (0xa31), region = 48 }
   0xd   : > { %s8354_s26 = sshll.u32 %s8349_s25, 4  ;;  %v16645_v0 = vmov 0.0   ;;  %vm759_vm0 = vcmask 1043456   ;;  %v10977_v7 = vld [vmem:[%s16638_s1] sm:$0xff]  ;;  %vm731_vm1 = vcmask 31744   ;;  %v10993_v12 = vld [vmem:[%s16638_s1 + $0x8] sm:$0xff] }
   0xe   : > { %p271_p3 = scmp.lt.s32.totalorder %s8354_s26, 31  ;;  %856 = vmatprep.mubr.f32.mxu0 %v16645_v0  ;;  %975 = vmatprep.mubr.f32.mxu1 %v16645_v0  ;;  %v11008_v15 = vld [vmem:[%s16638_s1 + $0x10] sm:$0xff]  ;;  %v11021_v16 = vld [vmem:[%s16638_s1 + $0x18] sm:$0xff]  ;;  %v11032_v17 = vld [vmem:[%s16638_s1 + $0x20] sm:$0xff]  ;;  %s10902_s14 = smov 17   ;;  %vm3553_vm10 = vcmask 64512  }
   0xf   : > { %v11043_v18 = vld [vmem:[%s16638_s1 + $0x28] sm:$0xff]  ;;  %v11054_v19 = vld [vmem:[%s16638_s1 + $0x30] sm:$0xff]  ;;  %v11065_v20 = vld [vmem:[%s16638_s1 + $0x38] sm:$0xff]  ;;  %s10903_s19 = smov 16   ;;  %s10904_s12 = smov 15  }
  0x10   : > { %s17685_s26 = smov (!%p271_p3, %s8354_s26), 31  ;;  %v11076_v21 = vld [vmem:[%s16638_s1 + $0x40] sm:$0xff]  ;;  %v284_v27 = vld [vmem:[%s16641_s4 + $0x10] sm:$0xff]  ;;  %v283_v34 = vld [vmem:[%s16641_s4 + $0x8] sm:$0xff]  ;;  %s10905_s23 = smov 1  }
  0x11   : > { %s8355_s27 = sshll.u32 %s17685_s26, 2  ;;  %v282_v26 = vld [vmem:[%s16641_s4] sm:$0xff]  ;;  %v300_v37 = vld [vmem:[%s16641_s4 + $0x90] sm:$0xff]  ;;  %v285_v43 = vld [vmem:[%s16641_s4 + $0x18] sm:$0xff]  ;;  %s10906_s13 = smov 127  }
  0x12   : > { %s10968_s30 = scalar_lea.vmem %s16637_s0, %s8355_s27  ;;  %v298_v35 = vld [vmem:[%s16641_s4 + $0x80] sm:$0xff]  ;;  %v299_v50 = vld [vmem:[%s16641_s4 + $0x88] sm:$0xff]  ;;  %v301_v51 = vld [vmem:[%s16641_s4 + $0x98] sm:$0xff]  ;;  %s10907_s28 = smov 113  }
  0x13   : > { %v698_v1 = vld [vmem:[%s10968_s30] sm:$0xff]  ;;  %v699_v2 = vld [vmem:[%s10968_s30 + $0x8] sm:$0xff]  ;;  %v700_v3 = vld [vmem:[%s10968_s30 + $0x10] sm:$0xff]  ;;  %s10908_s10 = smov 112   ;;  %s10909_s25 = smov 111  }
  0x14   : > { %v723_v4 = vcombine.high %v698_v1, %v698_v1  ;;  %v724_v5 = vcombine.high %v699_v2, %v699_v2  ;;  %v701_v6 = vld [vmem:[%s10968_s30 + $0x18] sm:$0xff]  ;;  %v725_v8 = vcombine.high %v700_v3, %v700_v3  ;;  %v703_v10 = vld [vmem:[%s10968_s30 + $0x28] sm:$0xff]  ;;  %v702_v11 = vld [vmem:[%s10968_s30 + $0x20] sm:$0xff] }
  0x15   : > { %v726_v9 = vcombine.high %v701_v6, %v701_v6  ;;  %v728_v13 = vcombine.high %v703_v10, %v703_v10  ;;  %v727_v14 = vcombine.high %v702_v11, %v702_v11  ;;  %v705_v22 = vld [vmem:[%s10968_s30 + $0x38] sm:$0xff]  ;;  %v704_v23 = vld [vmem:[%s10968_s30 + $0x30] sm:$0xff]  ;;  %v314_v52 = vld [vmem:[%s16641_s4 + $0x100] sm:$0xff] }
  0x16   : > { %8358 = vmatprep.subr.msk.mxu0 %vm759_vm0, %v723_v4  ;;  %8369 = vmatprep.subr.msk.mxu1 %vm759_vm0, %v724_v5  ;;  %v730_v24 = vcombine.high %v705_v22, %v705_v22  ;;  %v729_v25 = vcombine.high %v704_v23, %v704_v23  ;;  %v316_v53 = vld [vmem:[%s16641_s4 + $0x110] sm:$0xff]  ;;  %v317_v4 = vld [vmem:[%s16641_s4 + $0x118] sm:$0xff]  ;;  %v330_v5 = vld [vmem:[%s16641_s4 + $0x180] sm:$0xff] }
  0x17   : > { %8359 = vmatpush1.msk.msra.mxu0 %vm759_vm0, %v698_v1  ;;  %8370 = vmatpush1.msk.msra.mxu1 %vm759_vm0, %v699_v2 }
  0x18   : > { %8360 = vmatmul.mubr.msk.f32.vlgmr.msra.gmra.mrb[0].mxu0 %vm731_vm1, %v10977_v7  ;;  %8371 = vmatmul.mubr.msk.f32.vlgmr.msra.gmra.mrb[0].mxu1 %vm731_vm1, %v10977_v7 }
  0x19   : > { %862 = vmatprep.mubr.f32.mxu0 %v16645_v0  ;;  %981 = vmatprep.mubr.f32.mxu1 %v16645_v0 }
  0x1a   : > { %8380 = vmatprep.subr.msk.mxu0 %vm759_vm0, %v725_v8  ;;  %8391 = vmatprep.subr.msk.mxu1 %vm759_vm0, %v726_v9 }
  0x1b   : > { %8381 = vmatpush1.msk.msra.mxu0 %vm759_vm0, %v700_v3  ;;  %8392 = vmatpush1.msk.msra.mxu1 %vm759_vm0, %v701_v6  ;;  %v315_v3 = vld [vmem:[%s16641_s4 + $0x108] sm:$0xff]  ;;  %v332_v6 = vld [vmem:[%s16641_s4 + $0x190] sm:$0xff] }
  0x1c   : > { %8361 = vmatmul.mubr.msk.f32.gmra.mrb[2].mxu0 %vm731_vm1, %v10993_v12  ;;  %8372 = vmatmul.mubr.msk.f32.gmra.mrb[2].mxu1 %vm731_vm1, %v10993_v12 }
  0x1d   : > { %868 = vmatprep.mubr.f32.mxu0 %v16645_v0  ;;  %987 = vmatprep.mubr.f32.mxu1 %v16645_v0 }
  0x1e   : > { %8413 = vmatprep.subr.msk.mxu1 %vm759_vm0, %v728_v13  ;;  %8402 = vmatprep.subr.msk.mxu0 %vm759_vm0, %v727_v14 }
  0x20   : > { %8362 = vmatmul.mubr.msk.f32.gmra.mrb[4].mxu0 %vm731_vm1, %v11008_v15  ;;  %8373 = vmatmul.mubr.msk.f32.gmra.mrb[4].mxu1 %vm731_vm1, %v11008_v15 }
  0x21   : > { %874 = vmatprep.mubr.f32.mxu0 %v16645_v0  ;;  %993 = vmatprep.mubr.f32.mxu1 %v16645_v0 }
  0x24   : > { %8363 = vmatmul.mubr.msk.f32.gmra.mrb[6].mxu0 %vm731_vm1, %v11021_v16  ;;  %8374 = vmatmul.mubr.msk.f32.gmra.mrb[6].mxu1 %vm731_vm1, %v11021_v16 }
  0x25   : > { %880 = vmatprep.mubr.f32.mxu0 %v16645_v0  ;;  %999 = vmatprep.mubr.f32.mxu1 %v16645_v0 }
  0x28   : > { %8364 = vmatmul.mubr.msk.f32.gmra.mrb[8].mxu0 %vm731_vm1, %v11032_v17  ;;  %8375 = vmatmul.mubr.msk.f32.gmra.mrb[8].mxu1 %vm731_vm1, %v11032_v17 }
  0x29   : > { %886 = vmatprep.mubr.f32.mxu0 %v16645_v0  ;;  %1005 = vmatprep.mubr.f32.mxu1 %v16645_v0 }
  0x2c   : > { %8365 = vmatmul.mubr.msk.f32.gmra.mrb[10].mxu0 %vm731_vm1, %v11043_v18  ;;  %8376 = vmatmul.mubr.msk.f32.gmra.mrb[10].mxu1 %vm731_vm1, %v11043_v18 }
  0x2d   : > { %892 = vmatprep.mubr.f32.mxu0 %v16645_v0  ;;  %1011 = vmatprep.mubr.f32.mxu1 %v16645_v0 }
  0x30   : > { %8366 = vmatmul.mubr.msk.f32.gmra.mrb[12].mxu0 %vm731_vm1, %v11054_v19  ;;  %8377 = vmatmul.mubr.msk.f32.gmra.mrb[12].mxu1 %vm731_vm1, %v11054_v19 }
  0x31   : > { %898 = vmatprep.mubr.f32.mxu0 %v16645_v0  ;;  %1017 = vmatprep.mubr.f32.mxu1 %v16645_v0 }
  0x34   : > { %8367 = vmatmul.mubr.msk.f32.gmra.mrb[14].mxu0 %vm731_vm1, %v11065_v20  ;;  %8378 = vmatmul.mubr.msk.f32.gmra.mrb[14].mxu1 %vm731_vm1, %v11065_v20 }
  0x35   : > { %1023 = vmatprep.mubr.f32.mxu1 %v16645_v0  ;;  %904 = vmatprep.mubr.f32.mxu0 %v16645_v0 }
  0x38   : > { %8379 = vmatmul.mubr.msk.f32.gmra.mrb[16].mxu1 %vm731_vm1, %v11076_v21  ;;  %8368 = vmatmul.mubr.msk.f32.gmra.mrb[16].mxu0 %vm731_vm1, %v11076_v21 }
  0x39   : > { %1094 = vmatprep.mubr.f32.mxu0 %v16645_v0  ;;  %1213 = vmatprep.mubr.f32.mxu1 %v16645_v0 }
  0x3c   : > { %8382 = vmatmul.mubr.msk.f32.vlgmr.msra.gmra.mrb[18].mxu0 %vm731_vm1, %v10977_v7  ;;  %8393 = vmatmul.mubr.msk.f32.vlgmr.msra.gmra.mrb[18].mxu1 %vm731_vm1, %v10977_v7 }
  0x3d   : > { %1100 = vmatprep.mubr.f32.mxu0 %v16645_v0  ;;  %1219 = vmatprep.mubr.f32.mxu1 %v16645_v0 }
  0x3e   : > { %8414 = vmatpush1.msk.msra.mxu1 %vm759_vm0, %v703_v10  ;;  %8403 = vmatpush1.msk.msra.mxu0 %vm759_vm0, %v702_v11 }
  0x3f   : > { %8435 = vmatprep.subr.msk.mxu1 %vm759_vm0, %v730_v24  ;;  %8424 = vmatprep.subr.msk.mxu0 %vm759_vm0, %v729_v25 }
  0x40   : > { %8383 = vmatmul.mubr.msk.f32.gmra.mrb[20].mxu0 %vm731_vm1, %v10993_v12  ;;  %8394 = vmatmul.mubr.msk.f32.gmra.mrb[20].mxu1 %vm731_vm1, %v10993_v12 }
  0x41   : > { %1225 = vmatprep.mubr.f32.mxu1 %v16645_v0  ;;  %1106 = vmatprep.mubr.f32.mxu0 %v16645_v0 }
  0x44   : > { %8395 = vmatmul.mubr.msk.f32.gmra.mrb[22].mxu1 %vm731_vm1, %v11008_v15  ;;  %8384 = vmatmul.mubr.msk.f32.gmra.mrb[22].mxu0 %vm731_vm1, %v11008_v15 }
  0x45   : > { %1231 = vmatprep.mubr.f32.mxu1 %v16645_v0  ;;  %1112 = vmatprep.mubr.f32.mxu0 %v16645_v0 }
  0x48   : > { %8396 = vmatmul.mubr.msk.f32.gmra.mrb[24].mxu1 %vm731_vm1, %v11021_v16  ;;  %8385 = vmatmul.mubr.msk.f32.gmra.mrb[24].mxu0 %vm731_vm1, %v11021_v16 }
  0x49   : > { %1237 = vmatprep.mubr.f32.mxu1 %v16645_v0  ;;  %1118 = vmatprep.mubr.f32.mxu0 %v16645_v0 }
  0x4c   : > { %8397 = vmatmul.mubr.msk.f32.gmra.mrb[26].mxu1 %vm731_vm1, %v11032_v17  ;;  %8386 = vmatmul.mubr.msk.f32.gmra.mrb[26].mxu0 %vm731_vm1, %v11032_v17 }
  0x4d   : > { %1243 = vmatprep.mubr.f32.mxu1 %v16645_v0  ;;  %1124 = vmatprep.mubr.f32.mxu0 %v16645_v0 }
  0x50   : > { %8398 = vmatmul.mubr.msk.f32.gmra.mrb[28].mxu1 %vm731_vm1, %v11043_v18  ;;  %8387 = vmatmul.mubr.msk.f32.gmra.mrb[28].mxu0 %vm731_vm1, %v11043_v18 }
  0x51   : > { %1249 = vmatprep.mubr.f32.mxu1 %v16645_v0  ;;  %1130 = vmatprep.mubr.f32.mxu0 %v16645_v0 }
  0x54   : > { %8399 = vmatmul.mubr.msk.f32.gmra.mrb[30].mxu1 %vm731_vm1, %v11054_v19  ;;  %8388 = vmatmul.mubr.msk.f32.gmra.mrb[30].mxu0 %vm731_vm1, %v11054_v19 }
  0x55   : > { %1255 = vmatprep.mubr.f32.mxu1 %v16645_v0  ;;  %1136 = vmatprep.mubr.f32.mxu0 %v16645_v0 }
  0x58   : > { %8400 = vmatmul.mubr.msk.f32.gmra.mrb[32].mxu1 %vm731_vm1, %v11065_v20  ;;  %8389 = vmatmul.mubr.msk.f32.gmra.mrb[32].mxu0 %vm731_vm1, %v11065_v20 }
  0x59   : > { %1261 = vmatprep.mubr.f32.mxu1 %v16645_v0  ;;  %1142 = vmatprep.mubr.f32.mxu0 %v16645_v0 }
  0x5c   : > { %8401 = vmatmul.mubr.msk.f32.gmra.mrb[34].mxu1 %vm731_vm1, %v11076_v21  ;;  %8390 = vmatmul.mubr.msk.f32.gmra.mrb[34].mxu0 %vm731_vm1, %v11076_v21 }
  0x5d   : > { %1451 = vmatprep.mubr.f32.mxu1 %v16645_v0  ;;  %1332 = vmatprep.mubr.f32.mxu0 %v16645_v0 }
  0x60   : > { %8415 = vmatmul.mubr.msk.f32.vlgmr.msra.gmra.mrb[36].mxu1 %vm731_vm1, %v10977_v7  ;;  %8404 = vmatmul.mubr.msk.f32.vlgmr.msra.gmra.mrb[36].mxu0 %vm731_vm1, %v10977_v7 }
  0x61   : > { %1457 = vmatprep.mubr.f32.mxu1 %v16645_v0  ;;  %8436 = vmatpush1.msk.msra.mxu1 %vm759_vm0, %v705_v22  ;;  %v364_v22 = vld [vmem:[%s16641_s4 + $0x290] sm:$0xff] }
  0x62   : > { %1338 = vmatprep.mubr.f32.mxu0 %v16645_v0  ;;  %8425 = vmatpush1.msk.msra.mxu0 %vm759_vm0, %v704_v23 }
  0x64   : > { %8416 = vmatmul.mubr.msk.f32.gmra.mrb[38].mxu1 %vm731_vm1, %v10993_v12  ;;  %8405 = vmatmul.mubr.msk.f32.gmra.mrb[38].mxu0 %vm731_vm1, %v10993_v12 }
  0x65   : > { %1463 = vmatprep.mubr.f32.mxu1 %v16645_v0  ;;  %1344 = vmatprep.mubr.f32.mxu0 %v16645_v0 }
  0x68   : > { %8417 = vmatmul.mubr.msk.f32.gmra.mrb[40].mxu1 %vm731_vm1, %v11008_v15  ;;  %8406 = vmatmul.mubr.msk.f32.gmra.mrb[40].mxu0 %vm731_vm1, %v11008_v15 }
  0x69   : > { %1469 = vmatprep.mubr.f32.mxu1 %v16645_v0  ;;  %1350 = vmatprep.mubr.f32.mxu0 %v16645_v0 }
  0x6c   : > { %8418 = vmatmul.mubr.msk.f32.gmra.mrb[42].mxu1 %vm731_vm1, %v11021_v16  ;;  %8407 = vmatmul.mubr.msk.f32.gmra.mrb[42].mxu0 %vm731_vm1, %v11021_v16 }
  0x6d   : > { %1475 = vmatprep.mubr.f32.mxu1 %v16645_v0  ;;  %1356 = vmatprep.mubr.f32.mxu0 %v16645_v0 }
  0x70   : > { %8419 = vmatmul.mubr.msk.f32.gmra.mrb[44].mxu1 %vm731_vm1, %v11032_v17  ;;  %8408 = vmatmul.mubr.msk.f32.gmra.mrb[44].mxu0 %vm731_vm1, %v11032_v17 }
  0x71   : > { %1481 = vmatprep.mubr.f32.mxu1 %v16645_v0  ;;  %1362 = vmatprep.mubr.f32.mxu0 %v16645_v0 }
  0x74   : > { %8420 = vmatmul.mubr.msk.f32.gmra.mrb[46].mxu1 %vm731_vm1, %v11043_v18  ;;  %8409 = vmatmul.mubr.msk.f32.gmra.mrb[46].mxu0 %vm731_vm1, %v11043_v18 }
  0x75   : > { %1487 = vmatprep.mubr.f32.mxu1 %v16645_v0  ;;  %1368 = vmatprep.mubr.f32.mxu0 %v16645_v0 }
  0x78   : > { %8421 = vmatmul.mubr.msk.f32.gmra.mrb[48].mxu1 %vm731_vm1, %v11054_v19  ;;  %8410 = vmatmul.mubr.msk.f32.gmra.mrb[48].mxu0 %vm731_vm1, %v11054_v19 }
  0x79   : > { %1493 = vmatprep.mubr.f32.mxu1 %v16645_v0  ;;  %1374 = vmatprep.mubr.f32.mxu0 %v16645_v0 }
  0x7c   : > { %8422 = vmatmul.mubr.msk.f32.gmra.mrb[50].mxu1 %vm731_vm1, %v11065_v20  ;;  %8411 = vmatmul.mubr.msk.f32.gmra.mrb[50].mxu0 %vm731_vm1, %v11065_v20 }
  0x7d   : > { %1499 = vmatprep.mubr.f32.mxu1 %v16645_v0  ;;  %1380 = vmatprep.mubr.f32.mxu0 %v16645_v0 }
  0x80   : > { %8423 = vmatmul.mubr.msk.f32.gmra.mrb[52].mxu1 %vm731_vm1, %v11076_v21  ;;  %8412 = vmatmul.mubr.msk.f32.gmra.mrb[52].mxu0 %vm731_vm1, %v11076_v21 }
  0x81   : > { %1689 = vmatprep.mubr.f32.mxu1 %v16645_v0  ;;  %1570 = vmatprep.mubr.f32.mxu0 %v16645_v0 }
  0x84   : > { %8437 = vmatmul.mubr.msk.f32.vlgmr.msra.gmra.mrb[54].mxu1 %vm731_vm1, %v10977_v7  ;;  %8426 = vmatmul.mubr.msk.f32.vlgmr.msra.gmra.mrb[54].mxu0 %vm731_vm1, %v10977_v7 }
  0x85   : > { %1695 = vmatprep.mubr.f32.mxu1 %v16645_v0  ;;  %1576 = vmatprep.mubr.f32.mxu0 %v16645_v0 }
  0x88   : > { %8438 = vmatmul.mubr.msk.f32.gmra.mrb[56].mxu1 %vm731_vm1, %v10993_v12  ;;  %8427 = vmatmul.mubr.msk.f32.gmra.mrb[56].mxu0 %vm731_vm1, %v10993_v12 }
  0x89   : > { %1701 = vmatprep.mubr.f32.mxu1 %v16645_v0  ;;  %1582 = vmatprep.mubr.f32.mxu0 %v16645_v0 }
  0x8c   : > { %8439 = vmatmul.mubr.msk.f32.gmra.mrb[58].mxu1 %vm731_vm1, %v11008_v15  ;;  %8428 = vmatmul.mubr.msk.f32.gmra.mrb[58].mxu0 %vm731_vm1, %v11008_v15 }
  0x8d   : > { %1707 = vmatprep.mubr.f32.mxu1 %v16645_v0  ;;  %1588 = vmatprep.mubr.f32.mxu0 %v16645_v0 }
  0x90   : > { %8440 = vmatmul.mubr.msk.f32.gmra.mrb[60].mxu1 %vm731_vm1, %v11021_v16  ;;  %8429 = vmatmul.mubr.msk.f32.gmra.mrb[60].mxu0 %vm731_vm1, %v11021_v16 }
  0x91   : > { %1594 = vmatprep.mubr.f32.mxu0 %v16645_v0  ;;  %1713 = vmatprep.mubr.f32.mxu1 %v16645_v0 }
  0x94   : > { %8430 = vmatmul.mubr.msk.f32.gmra.mrb[62].mxu0 %vm731_vm1, %v11032_v17  ;;  %8441 = vmatmul.mubr.msk.f32.gmra.mrb[62].mxu1 %vm731_vm1, %v11032_v17 }
  0x95   : > { %1600 = vmatprep.mubr.f32.mxu0 %v16645_v0  ;;  %1719 = vmatprep.mubr.f32.mxu1 %v16645_v0 }
  0x98   : > { %8431 = vmatmul.mubr.msk.f32.gmra.mrb[64].mxu0 %vm731_vm1, %v11043_v18  ;;  %8442 = vmatmul.mubr.msk.f32.gmra.mrb[64].mxu1 %vm731_vm1, %v11043_v18 }
  0x99   : > { %1606 = vmatprep.mubr.f32.mxu0 %v16645_v0  ;;  %1725 = vmatprep.mubr.f32.mxu1 %v16645_v0 }
  0x9c   : > { %8432 = vmatmul.mubr.msk.f32.gmra.mrb[66].mxu0 %vm731_vm1, %v11054_v19  ;;  %8443 = vmatmul.mubr.msk.f32.gmra.mrb[66].mxu1 %vm731_vm1, %v11054_v19  ;;  %v331_v19 = vld [vmem:[%s16641_s4 + $0x188] sm:$0xff] }
  0x9d   : > { %1612 = vmatprep.mubr.f32.mxu0 %v16645_v0  ;;  %1731 = vmatprep.mubr.f32.mxu1 %v16645_v0 }
  0xa0   : > { %8433 = vmatmul.mubr.msk.f32.gmra.mrb[68].mxu0 %vm731_vm1, %v11065_v20  ;;  %8444 = vmatmul.mubr.msk.f32.gmra.mrb[68].mxu1 %vm731_vm1, %v11065_v20  ;;  %v333_v20 = vld [vmem:[%s16641_s4 + $0x198] sm:$0xff] }
  0xa1   : > { %1618 = vmatprep.mubr.f32.mxu0 %v16645_v0  ;;  %1737 = vmatprep.mubr.f32.mxu1 %v16645_v0 }
  0xa4   : > { %8434 = vmatmul.mubr.msk.f32.gmra.mrb[70].mxu0 %vm731_vm1, %v11076_v21  ;;  %8445 = vmatmul.mubr.msk.f32.gmra.mrb[70].mxu1 %vm731_vm1, %v11076_v21  ;;  %v362_v21 = vld [vmem:[%s16641_s4 + $0x280] sm:$0xff] }
  0xeb   : > { %v858_v28 = vpop.f32.mrb[0].mxu0  ;;  %v977_v29 = vpop.f32.mrb[0].mxu1 }
  0xec   : > { %v1744_v30 = vmul.f32 %v858_v28, %v282_v26  ;;  %v1746_v31 = vmul.f32 %v977_v29, %v284_v27  ;;  %v860_v32 = vpop.f32.mrb[1].mxu0  ;;  %v979_v33 = vpop.f32.mrb[1].mxu1 }
  0xed   : > { %v1745_v39 = vmul.f32 %v860_v32, %v283_v34  ;;  %v1747_v47 = vmul.f32 %v979_v33, %v285_v43 }
  0xee   : > { %1892 = vrot.lane.b32.xlu1 %v1746_v31, %s10902_s14  ;;  %1888 = vrot.lane.b32.xlu0 %v1744_v30, %s10902_s14 }
  0xef   : > { %v864_v36 = vpop.f32.mrb[2].mxu0  ;;  %v983_v38 = vpop.f32.mrb[2].mxu1 }
  0xf0   : > { %v1760_v40 = vmul.f32 %v864_v36, %v298_v35  ;;  %v866_v41 = vpop.f32.mrb[3].mxu0  ;;  %v985_v42 = vpop.f32.mrb[3].mxu1  ;;  %v1762_v44 = vmul.f32 %v983_v38, %v300_v37  ;;  %v363_v35 = vld [vmem:[%s16641_s4 + $0x288] sm:$0xff]  ;;  %v365_v36 = vld [vmem:[%s16641_s4 + $0x298] sm:$0xff]  ;;  %v380_v38 = vld [vmem:[%s16641_s4 + $0x310] sm:$0xff] }
  0xf1   : > { %v1761_v56 = vmul.f32 %v866_v41, %v299_v50  ;;  %v1763_v57 = vmul.f32 %v985_v42, %v301_v51  ;;  %v379_v37 = vld [vmem:[%s16641_s4 + $0x308] sm:$0xff] }
  0xf2   : > { %1890 = vrot.lane.b32.xlu0 %v1745_v39, %s10902_s14  ;;  %1939 = vrot.lane.b32.xlu1 %v1760_v40, %s10903_s19 }
  0xf3   : > { %v870_v45 = vpop.f32.mrb[4].mxu0  ;;  %v989_v46 = vpop.f32.mrb[4].mxu1 }
  0xf4   : > { %v872_v48 = vpop.f32.mrb[5].mxu0  ;;  %v991_v49 = vpop.f32.mrb[5].mxu1  ;;  %v1776_v60 = vmul.f32 %v870_v45, %v314_v52  ;;  %v1778_v61 = vmul.f32 %v989_v46, %v316_v53  ;;  %v378_v52 = vld [vmem:[%s16641_s4 + $0x300] sm:$0xff] }
  0xf5   : > { %v1777_v9 = vmul.f32 %v872_v48, %v315_v3  ;;  %v1779_v10 = vmul.f32 %v991_v49, %v317_v4 }
  0xf6   : > { %1894 = vrot.lane.b32.xlu0 %v1747_v47, %s10902_s14  ;;  %1943 = vrot.lane.b32.xlu1 %v1762_v44, %s10903_s19  ;;  %v394_v47 = vld [vmem:[%s16641_s4 + $0x380] sm:$0xff] }
  0xf7   : > { %v876_v54 = vpop.f32.mrb[6].mxu0  ;;  %v995_v55 = vpop.f32.mrb[6].mxu1 }
  0xf8   : > { %v878_v58 = vpop.f32.mrb[7].mxu0  ;;  %v997_v59 = vpop.f32.mrb[7].mxu1  ;;  %v1792_v13 = vmul.f32 %v876_v54, %v330_v5  ;;  %v1794_v14 = vmul.f32 %v995_v55, %v332_v6 }
  0xf9   : > { %v1793_v25 = vmul.f32 %v878_v58, %v331_v19  ;;  %v1795_v26 = vmul.f32 %v997_v59, %v333_v20  ;;  %v381_v59 = vld [vmem:[%s16641_s4 + $0x318] sm:$0xff] }
  0xfa   : > { %1945 = vrot.lane.b32.xlu0 %v1763_v57, %s10903_s19  ;;  %1941 = vrot.lane.b32.xlu1 %v1761_v56, %s10903_s19 }
  0xfb   : > { %v11291_v62 = vpop.f32.mrb[8].mxu0  ;;  %v11293_v63 = vpop.f32.mrb[8].mxu1 }
  0xfc   : > { %16998 = vst [vmem:[#allocation2_spill] sm:$0xff] %v11291_v62  ;;  %16999 = vst [vmem:[#allocation3_spill] sm:$0xff] %v11293_v63  ;;  %v11295_v1 = vpop.f32.mrb[9].mxu0  ;;  %v11297_v2 = vpop.f32.mrb[9].mxu1  ;;  %v416_v62 = vld [vmem:[%s16641_s4 + $0x430] sm:$0xff] }
  0xfd   : > { %17000 = vst [vmem:[#allocation4_spill] sm:$0xff] %v11297_v2 }
  0xfe   : > { %1992 = vrot.lane.b32.xlu1 %v1778_v61, %s10904_s12  ;;  %1988 = vrot.lane.b32.xlu0 %v1776_v60, %s10904_s12  ;;  %v395_v60 = vld [vmem:[%s16641_s4 + $0x388] sm:$0xff]  ;;  %v412_v61 = vld [vmem:[%s16641_s4 + $0x410] sm:$0xff] }
  0xff   : > { %v888_v7 = vpop.f32.mrb[10].mxu0  ;;  %v1007_v8 = vpop.f32.mrb[10].mxu1 }
 0x100   : > { %v890_v11 = vpop.f32.mrb[11].mxu0  ;;  %v1009_v12 = vpop.f32.mrb[11].mxu1  ;;  %v1824_v29 = vmul.f32 %v888_v7, %v362_v21  ;;  %v1826_v30 = vmul.f32 %v1007_v8, %v364_v22 }
 0x101   : > { %v1825_v41 = vmul.f32 %v890_v11, %v363_v35  ;;  %v1827_v42 = vmul.f32 %v1009_v12, %v365_v36  ;;  %v411_v35 = vld [vmem:[%s16641_s4 + $0x408] sm:$0xff] }
 0x102   : > { %1994 = vrot.lane.b32.xlu0 %v1779_v10, %s10904_s12  ;;  %1990 = vrot.lane.b32.xlu1 %v1777_v9, %s10904_s12  ;;  %v396_v9 = vld [vmem:[%s16641_s4 + $0x390] sm:$0xff] }
 0x103   : > { %v894_v15 = vpop.f32.mrb[12].mxu0  ;;  %v1013_v16 = vpop.f32.mrb[12].mxu1 }
 0x104   : > { %v896_v17 = vpop.f32.mrb[13].mxu0  ;;  %v1015_v18 = vpop.f32.mrb[13].mxu1  ;;  %v1842_v46 = vmul.f32 %v1013_v16, %v380_v38  ;;  %v1840_v56 = vmul.f32 %v894_v15, %v378_v52  ;;  %v397_v16 = vld [vmem:[%s16641_s4 + $0x398] sm:$0xff] }
 0x105   : > { %v1841_v45 = vmul.f32 %v896_v17, %v379_v37  ;;  %v1843_v5 = vmul.f32 %v1015_v18, %v381_v59  ;;  %v413_v17 = vld [vmem:[%s16641_s4 + $0x418] sm:$0xff]  ;;  %v286_v18 = vld [vmem:[%s16641_s4 + $0x20] sm:$0xff]  ;;  %v304_v59 = vld [vmem:[%s16641_s4 + $0xb0] sm:$0xff] }
 0x106   : > { %2041 = vrot.lane.b32.xlu1 %v1794_v14, %s10905_s23  ;;  %2037 = vrot.lane.b32.xlu0 %v1792_v13, %s10905_s23  ;;  %v302_v37 = vld [vmem:[%s16641_s4 + $0xa0] sm:$0xff] }
 0x107   : > { %v900_v23 = vpop.f32.mrb[14].mxu0  ;;  %v11329_v24 = vpop.f32.mrb[14].mxu1 }
 0x108   : > { %v902_v27 = vpop.f32.mrb[15].mxu0  ;;  %v11331_v28 = vpop.f32.mrb[15].mxu1  ;;  %v1856_v53 = vmul.f32 %v900_v23, %v394_v47  ;;  %v1858_v13 = vmul.f32 %v11329_v24, %v396_v9 }
 0x109   : > { %v1857_v6 = vmul.f32 %v902_v27, %v395_v60  ;;  %v1859_v21 = vmul.f32 %v11331_v28, %v397_v16  ;;  %v288_v27 = vld [vmem:[%s16641_s4 + $0x30] sm:$0xff] }
 0x10a   : > { %2043 = vrot.lane.b32.xlu0 %v1795_v26, %s10905_s23  ;;  %2039 = vrot.lane.b32.xlu1 %v1793_v25, %s10905_s23  ;;  %v410_v25 = vld [vmem:[%s16641_s4 + $0x400] sm:$0xff] }
 0x10b   : > { %v1025_v31 = vpop.f32.mrb[16].mxu1  ;;  %v11335_v32 = vpop.f32.mrb[16].mxu0 }
 0x10c   : > { %v11337_v33 = vpop.f32.mrb[17].mxu1  ;;  %v11339_v34 = vpop.f32.mrb[17].mxu0  ;;  %v1874_v10 = vmul.f32 %v1025_v31, %v412_v61 }
 0x10d   : > { %v1875_v22 = vmul.f32 %v11337_v33, %v413_v17 }
 0x10e   : > { %2090 = vrot.lane.b32.xlu1 %v1826_v30, %s10906_s13  ;;  %2086 = vrot.lane.b32.xlu0 %v1824_v29, %s10906_s13  ;;  %v1872_v30 = vmul.f32 %v11335_v32, %v410_v25 }
 0x10f   : > { %v1096_v39 = vpop.f32.mrb[18].mxu0  ;;  %v11355_v40 = vpop.f32.mrb[18].mxu1 }
 0x110   : > { %v11357_v43 = vpop.f32.mrb[19].mxu0  ;;  %v11359_v44 = vpop.f32.mrb[19].mxu1  ;;  %v1748_v26 = vmul.f32 %v1096_v39, %v286_v18  ;;  %v1750_v36 = vmul.f32 %v11355_v40, %v288_v27  ;;  %v1873_v39 = vmul.f32 %v11339_v34, %v411_v35  ;;  %v287_v40 = vld [vmem:[%s16641_s4 + $0x28] sm:$0xff] }
 0x111   : > { %v1749_v34 = vmul.f32 %v11357_v43, %v287_v40  ;;  %v318_v43 = vld [vmem:[%s16641_s4 + $0x120] sm:$0xff]  ;;  %v475_v27 = vld [vmem:[%s16642_s5 + $0x188] sm:$0xff] }
 0x112   : > { %2092 = vrot.lane.b32.xlu1 %v1827_v42, %s10906_s13  ;;  %2088 = vrot.lane.b32.xlu0 %v1825_v41, %s10906_s13  ;;  %v458_v40 = vld [vmem:[%s16642_s5 + $0x100] sm:$0xff] }
 0x113   : > { %v11366_v48 = vpop.f32.mrb[20].mxu0  ;;  %v11368_v49 = vpop.f32.mrb[20].mxu1 }
 0x114   : > { %v11370_v50 = vpop.f32.mrb[21].mxu0  ;;  %v11372_v51 = vpop.f32.mrb[21].mxu1 }
 0x116   : > { %2139 = vrot.lane.b32.xlu1 %v1842_v46, %s10907_s28  ;;  %2137 = vrot.lane.b32.xlu0 %v1841_v45, %s10907_s28  ;;  %v1764_v45 = vmul.f32 %v11366_v48, %v302_v37 }
 0x117   : > { %v11379_v54 = vpop.f32.mrb[22].mxu1  ;;  %v11381_v55 = vpop.f32.mrb[22].mxu0 }
 0x118   : > { %v11383_v57 = vpop.f32.mrb[23].mxu1  ;;  %v11385_v58 = vpop.f32.mrb[23].mxu0 }
 0x11a   : > { %2135 = vrot.lane.b32.xlu1 %v1840_v56, %s10907_s28  ;;  %2184 = vrot.lane.b32.xlu0 %v1856_v53, %s10908_s10  ;;  %v289_v56 = vld [vmem:[%s16641_s4 + $0x38] sm:$0xff] }
 0x11b   : > { %v11398_v3 = vpop.f32.mrb[24].mxu1  ;;  %v11400_v4 = vpop.f32.mrb[24].mxu0  ;;  %v1751_v61 = vmul.f32 %v11359_v44, %v289_v56 }
 0x11c   : > { %v11402_v7 = vpop.f32.mrb[25].mxu1  ;;  %v11404_v8 = vpop.f32.mrb[25].mxu0 }
 0x11e   : > { %2141 = vrot.lane.b32.xlu1 %v1843_v5, %s10907_s28  ;;  %2186 = vrot.lane.b32.xlu0 %v1857_v6, %s10908_s10  ;;  %v1766_v5 = vmul.f32 %v11368_v49, %v304_v59 }
 0x11f   : > { %v11411_v11 = vpop.f32.mrb[26].mxu1  ;;  %v11413_v12 = vpop.f32.mrb[26].mxu0 }
 0x120   : > { %17001 = vst [vmem:[#allocation5_spill] sm:$0xff] %v11411_v11  ;;  %17002 = vst [vmem:[#allocation6_spill] sm:$0xff] %v11413_v12  ;;  %v11416_v14 = vpop.f32.mrb[27].mxu1  ;;  %v11418_v15 = vpop.f32.mrb[27].mxu0 }
 0x121   : > { %17003 = vst [vmem:[#allocation7_spill] sm:$0xff] %v11416_v14  ;;  %17004 = vst [vmem:[#allocation8_spill] sm:$0xff] %v11418_v15  ;;  %v446_v14 = vld [vmem:[%s16642_s5 + $0xa0] sm:$0xff] }
 0x122   : > { %2188 = vrot.lane.b32.xlu1 %v1858_v13, %s10908_s10  ;;  %2237 = vrot.lane.b32.xlu0 %v1874_v10, %s10909_s25  ;;  %v303_v10 = vld [vmem:[%s16641_s4 + $0xa8] sm:$0xff]  ;;  %v1780_v13 = vmul.f32 %v11381_v55, %v318_v43  ;;  %v476_v43 = vld [vmem:[%s16642_s5 + $0x190] sm:$0xff] }
 0x123   : > { %v11431_v19 = vpop.f32.mrb[28].mxu1  ;;  %v11433_v20 = vpop.f32.mrb[28].mxu0  ;;  %v1765_v44 = vmul.f32 %v11370_v50, %v303_v10  ;;  %v334_v50 = vld [vmem:[%s16641_s4 + $0x1a0] sm:$0xff] }
 0x124   : > { %v11437_v23 = vpop.f32.mrb[29].mxu1  ;;  %v11439_v24 = vpop.f32.mrb[29].mxu0 }
 0x126   : > { %2190 = vrot.lane.b32.xlu1 %v1859_v21, %s10908_s10  ;;  %2239 = vrot.lane.b32.xlu0 %v1875_v22, %s10909_s25  ;;  %v305_v21 = vld [vmem:[%s16641_s4 + $0xb8] sm:$0xff]  ;;  %v320_v22 = vld [vmem:[%s16641_s4 + $0x130] sm:$0xff] }
 0x127   : > { %v11449_v28 = vpop.f32.mrb[30].mxu1  ;;  %v11451_v29 = vpop.f32.mrb[30].mxu0  ;;  %v1782_v35 = vmul.f32 %v11379_v54, %v320_v22  ;;  %v1796_v54 = vmul.f32 %v11400_v4, %v334_v50  ;;  %v336_v22 = vld [vmem:[%s16641_s4 + $0x1b0] sm:$0xff] }
 0x128   : > { %v11454_v31 = vpop.f32.mrb[31].mxu1  ;;  %v11456_v33 = vpop.f32.mrb[31].mxu0 }
 0x12a   : > { %2233 = vrot.lane.b32.xlu1 %v1872_v30, %s10909_s25  ;;  %1896 = vrot.lane.b32.xlu0 %v1748_v26, %s10902_s14  ;;  %v474_v26 = vld [vmem:[%s16642_s5 + $0x180] sm:$0xff]  ;;  %v1767_v30 = vmul.f32 %v11372_v51, %v305_v21  ;;  %v319_v51 = vld [vmem:[%s16641_s4 + $0x128] sm:$0xff] }
 0x12b   : > { %v11467_v38 = vpop.f32.mrb[32].mxu1  ;;  %v11469_v32 = vpop.f32.mrb[32].mxu0  ;;  %v461_v21 = vld [vmem:[%s16642_s5 + $0x118] sm:$0xff] }
 0x12c   : > { %v11472_v41 = vpop.f32.mrb[33].mxu1  ;;  %v11474_v42 = vpop.f32.mrb[33].mxu0 }
 0x12e   : > { %2235 = vrot.lane.b32.xlu1 %v1873_v39, %s10909_s25  ;;  %1900 = vrot.lane.b32.xlu0 %v1750_v36, %s10902_s14  ;;  %v11554_v39 = vpack.c.bf16 %v475_v27, %v474_v26  ;;  %v366_v26 = vld [vmem:[%s16641_s4 + $0x2a0] sm:$0xff] }
 0x12f   : > { %v11482_v46 = vpop.f32.mrb[34].mxu1  ;;  %v11484_v47 = vpop.f32.mrb[34].mxu0 }
 0x130   : > { %v11487_v52 = vpop.f32.mrb[35].mxu1  ;;  %v11489_v53 = vpop.f32.mrb[35].mxu0  ;;  %17005 = vst [vmem:[#allocation9_spill] sm:$0xff] %v11554_v39  ;;  %9713 = vmatprep.subr.bf16.mxu1 %v11554_v39  ;;  %v469_v39 = vld [vmem:[%s16642_s5 + $0x158] sm:$0xff] }
 0x132   : > { %1898 = vrot.lane.b32.xlu1 %v1749_v34, %s10902_s14  ;;  %1947 = vrot.lane.b32.xlu0 %v1764_v45, %s10903_s19  ;;  %v459_v45 = vld [vmem:[%s16642_s5 + $0x108] sm:$0xff] }
 0x133   : > { %v11502_v48 = vpop.f32.mrb[36].mxu1  ;;  %v11504_v60 = vpop.f32.mrb[36].mxu0  ;;  %v11565_v34 = vpack.c.bf16 %v459_v45, %v458_v40  ;;  %v479_v40 = vld [vmem:[%s16642_s5 + $0x1a8] sm:$0xff] }
 0x134   : > { %v11508_v6 = vpop.f32.mrb[37].mxu1  ;;  %v11510_v9 = vpop.f32.mrb[37].mxu0 }
 0x135   : > { %17006 = vst [vmem:[#allocation10_spill] sm:$0xff] %v11565_v34  ;;  %9715 = vmatpush3.bf16.msra.mxu1 %v11565_v34 }
 0x136   : > { %1902 = vrot.lane.b32.xlu1 %v1751_v61, %s10902_s14  ;;  %1951 = vrot.lane.b32.xlu0 %v1766_v5, %s10903_s19  ;;  %v477_v61 = vld [vmem:[%s16642_s5 + $0x198] sm:$0xff]  ;;  %v1781_v5 = vmul.f32 %v11385_v58, %v319_v51  ;;  %v1798_v51 = vmul.f32 %v11398_v3, %v336_v22 }
 0x137   : > { %v11518_v16 = vpop.f32.mrb[38].mxu1  ;;  %v11520_v17 = vpop.f32.mrb[38].mxu0  ;;  %v11587_v4 = vpack.c.bf16 %v477_v61, %v476_v43  ;;  %v321_v58 = vld [vmem:[%s16641_s4 + $0x138] sm:$0xff] }
 0x138   : > { %v11523_v49 = vpop.f32.mrb[39].mxu1  ;;  %v11525_v18 = vpop.f32.mrb[39].mxu0  ;;  %v1783_v45 = vmul.f32 %v11383_v57, %v321_v58  ;;  %v335_v57 = vld [vmem:[%s16641_s4 + $0x1a8] sm:$0xff] }
 0x139   : > { %17007 = vst [vmem:[#allocation11_spill] sm:$0xff] %v11587_v4  ;;  %9717 = vmatprep.subr.bf16.mxu1 %v11587_v4  ;;  %v467_v4 = vld [vmem:[%s16642_s5 + $0x148] sm:$0xff] }
 0x13a   : > { %1949 = vrot.lane.b32.xlu1 %v1765_v44, %s10903_s19  ;;  %1996 = vrot.lane.b32.xlu0 %v1780_v13, %s10904_s12  ;;  %v460_v44 = vld [vmem:[%s16642_s5 + $0x110] sm:$0xff] }
 0x13b   : > { %v11538_v55 = vpop.f32.mrb[40].mxu1  ;;  %v11540_v25 = vpop.f32.mrb[40].mxu0  ;;  %v11601_v50 = vpack.c.bf16 %v461_v21, %v460_v44  ;;  %v463_v44 = vld [vmem:[%s16642_s5 + $0x128] sm:$0xff]  ;;  %v1828_v21 = vmul.f32 %v11433_v20, %v366_v26  ;;  %v464_v26 = vld [vmem:[%s16642_s5 + $0x130] sm:$0xff] }
 0x13c   : > { %v11550_v36 = vpop.f32.mrb[41].mxu1  ;;  %v11552_v37 = vpop.f32.mrb[41].mxu0 }
 0x13d   : > { %17008 = vst [vmem:[#allocation12_spill] sm:$0xff] %v11601_v50  ;;  %9719 = vmatpush3.bf16.msra.mxu1 %v11601_v50 }
 0x13e   : > { %1953 = vrot.lane.b32.xlu1 %v1767_v30, %s10903_s19  ;;  %2000 = vrot.lane.b32.xlu0 %v1782_v35, %s10904_s12  ;;  %v478_v35 = vld [vmem:[%s16642_s5 + $0x1a0] sm:$0xff] }
 0x13f   : > { %v11570_v56 = vpop.f32.mrb[42].mxu1  ;;  %v11572_v59 = vpop.f32.mrb[42].mxu0  ;;  %v11626_v61 = vpack.c.bf16 %v479_v40, %v478_v35  ;;  %v480_v35 = vld [vmem:[%s16642_s5 + $0x1b0] sm:$0xff]  ;;  %v481_v40 = vld [vmem:[%s16642_s5 + $0x1b8] sm:$0xff] }
 0x140   : > { %v11582_v10 = vpop.f32.mrb[43].mxu1  ;;  %v11584_v13 = vpop.f32.mrb[43].mxu0  ;;  %v11659_v20 = vpack.c.bf16 %v481_v40, %v480_v35 }
 0x141   : > { %17013 = vst [vmem:[#allocation17_spill] sm:$0xff] %v11626_v61  ;;  %9721 = vmatprep.subr.bf16.mxu1 %v11626_v61  ;;  %v483_v61 = vld [vmem:[%s16642_s5 + $0x1c8] sm:$0xff] }
 0x142   : > { %1998 = vrot.lane.b32.xlu1 %v1781_v5, %s10904_s12  ;;  %2045 = vrot.lane.b32.xlu0 %v1796_v54, %s10905_s23  ;;  %v462_v5 = vld [vmem:[%s16642_s5 + $0x120] sm:$0xff]  ;;  %17015 = vst [vmem:[#allocation19_spill] sm:$0xff] %v11659_v20 }
 0x143   : > { %v11608_v27 = vpop.f32.mrb[44].mxu1  ;;  %v11610_v30 = vpop.f32.mrb[44].mxu0  ;;  %v11637_v3 = vpack.c.bf16 %v463_v44, %v462_v5  ;;  %v465_v44 = vld [vmem:[%s16642_s5 + $0x138] sm:$0xff] }
 0x144   : > { %17009 = vst [vmem:[#allocation13_spill] sm:$0xff] %v11608_v27  ;;  %17010 = vst [vmem:[#allocation14_spill] sm:$0xff] %v11610_v30  ;;  %v11621_v54 = vpop.f32.mrb[45].mxu1  ;;  %v11623_v43 = vpop.f32.mrb[45].mxu0  ;;  %v11673_v0 = vpack.c.bf16 %v465_v44, %v464_v26  ;;  %v471_v27 = vld [vmem:[%s16642_s5 + $0x168] sm:$0xff] }
 0x145   : > { %17011 = vst [vmem:[#allocation15_spill] sm:$0xff] %v11621_v54  ;;  %17012 = vst [vmem:[#allocation16_spill] sm:$0xff] %v11623_v43  ;;  %9723 = vmatpush3.bf16.msra.mxu1 %v11637_v3  ;;  %v473_v43 = vld [vmem:[%s16642_s5 + $0x178] sm:$0xff] }
 0x146   : > { %17014 = vst [vmem:[#allocation18_spill] sm:$0xff] %v11637_v3  ;;  %2002 = vrot.lane.b32.xlu1 %v1783_v45, %s10904_s12  ;;  %2049 = vrot.lane.b32.xlu0 %v1798_v51, %s10905_s23  ;;  %v1797_v45 = vmul.f32 %v11404_v8, %v335_v57  ;;  %v337_v8 = vld [vmem:[%s16641_s4 + $0x1b8] sm:$0xff]  ;;  %v367_v57 = vld [vmem:[%s16641_s4 + $0x2a8] sm:$0xff]  ;;  %17016 = vst [vmem:[#allocation20_spill] sm:$0xff] %v11673_v0 }
 0x147   : > { %v11642_v58 = vpop.f32.mrb[46].mxu1  ;;  %v11644_v22 = vpop.f32.mrb[46].mxu0  ;;  %9725 = vmatprep.subr.bf16.mxu1 %v11659_v20  ;;  %v482_v3 = vld [vmem:[%s16642_s5 + $0x1c0] sm:$0xff]  ;;  %v1799_v26 = vmul.f32 %v11402_v7, %v337_v8  ;;  %v368_v7 = vld [vmem:[%s16641_s4 + $0x2b0] sm:$0xff] }
 0x148   : > { %v11654_v5 = vpop.f32.mrb[47].mxu1  ;;  %v11656_v51 = vpop.f32.mrb[47].mxu0  ;;  %v11695_v50 = vpack.c.bf16 %v483_v61, %v482_v3  ;;  %v466_v20 = vld [vmem:[%s16642_s5 + $0x140] sm:$0xff] }
 0x149   : > { %9727 = vmatpush3.bf16.msra.mxu1 %v11673_v0  ;;  %v11709_v8 = vpack.c.bf16 %v467_v4, %v466_v20  ;;  %v485_v0 = vld [vmem:[%s16642_s5 + $0x1d8] sm:$0xff]  ;;  %v1830_v4 = vmul.f32 %v11431_v19, %v368_v7  ;;  %v384_v19 = vld [vmem:[%s16641_s4 + $0x330] sm:$0xff] }
 0x14a   : > { %2047 = vrot.lane.b32.xlu1 %v1797_v45, %s10905_s23  ;;  %2094 = vrot.lane.b32.xlu0 %v1828_v21, %s10906_s13  ;;  %v1829_v45 = vmul.f32 %v11439_v24, %v367_v57  ;;  %17017 = vst [vmem:[#allocation21_spill] sm:$0xff] %v11695_v50  ;;  %v369_v24 = vld [vmem:[%s16641_s4 + $0x2b8] sm:$0xff]  ;;  %v484_v57 = vld [vmem:[%s16642_s5 + $0x1d0] sm:$0xff] }
 0x14b   : > { %v11677_v35 = vpop.f32.mrb[48].mxu1  ;;  %v11679_v40 = vpop.f32.mrb[48].mxu0  ;;  %17018 = vst [vmem:[#allocation22_spill] sm:$0xff] %v11709_v8  ;;  %9729 = vmatprep.subr.bf16.mxu1 %v11695_v50  ;;  %v1831_v20 = vmul.f32 %v11437_v23, %v369_v24  ;;  %v11731_v34 = vpack.c.bf16 %v485_v0, %v484_v57  ;;  %v468_v50 = vld [vmem:[%s16642_s5 + $0x150] sm:$0xff]  ;;  %v382_v23 = vld [vmem:[%s16641_s4 + $0x320] sm:$0xff] }
 0x14c   : > { %v11690_v44 = vpop.f32.mrb[49].mxu1  ;;  %v11692_v21 = vpop.f32.mrb[49].mxu0  ;;  %v11745_v7 = vpack.c.bf16 %v469_v39, %v468_v50  ;;  %v486_v57 = vld [vmem:[%s16642_s5 + $0x1e0] sm:$0xff]  ;;  %v1846_v39 = vmul.f32 %v11449_v28, %v384_v19  ;;  %v1844_v50 = vmul.f32 %v11451_v29, %v382_v23  ;;  %v400_v28 = vld [vmem:[%s16641_s4 + $0x3b0] sm:$0xff]  ;;  %v383_v29 = vld [vmem:[%s16641_s4 + $0x328] sm:$0xff] }
 0x14d   : > { %9731 = vmatpush3.bf16.msra.mxu1 %v11709_v8  ;;  %17019 = vst [vmem:[#allocation23_spill] sm:$0xff] %v11731_v34  ;;  %v487_v8 = vld [vmem:[%s16642_s5 + $0x1e8] sm:$0xff] }
 0x14e   : > { %2051 = vrot.lane.b32.xlu1 %v1799_v26, %s10905_s23  ;;  %2096 = vrot.lane.b32.xlu0 %v1829_v45, %s10906_s13  ;;  %17020 = vst [vmem:[#allocation24_spill] sm:$0xff] %v11745_v7  ;;  %v11767_v54 = vpack.c.bf16 %v487_v8, %v486_v57  ;;  %v488_v57 = vld [vmem:[%s16642_s5 + $0x1f0] sm:$0xff] }
 0x14f   : > { %v11713_v61 = vpop.f32.mrb[50].mxu1  ;;  %v11715_v3 = vpop.f32.mrb[50].mxu0  ;;  %9733 = vmatprep.subr.bf16.mxu1 %v11731_v34  ;;  %v470_v34 = vld [vmem:[%s16642_s5 + $0x160] sm:$0xff] }
 0x150   : > { %v11726_v26 = vpop.f32.mrb[51].mxu1  ;;  %v11728_v45 = vpop.f32.mrb[51].mxu0  ;;  %17021 = vst [vmem:[#allocation25_spill] sm:$0xff] %v11767_v54  ;;  %v11781_v19 = vpack.c.bf16 %v471_v27, %v470_v34  ;;  %v1862_v34 = vmul.f32 %v11467_v38, %v400_v28  ;;  %v1845_v27 = vmul.f32 %v11456_v33, %v383_v29  ;;  %v385_v33 = vld [vmem:[%s16641_s4 + $0x338] sm:$0xff]  ;;  %v414_v38 = vld [vmem:[%s16641_s4 + $0x420] sm:$0xff]  ;;  %v443_v29 = vld [vmem:[%s16642_s5 + $0x88] sm:$0xff] }
 0x151   : > { %9735 = vmatpush3.bf16.msra.mxu1 %v11745_v7  ;;  %v489_v7 = vld [vmem:[%s16642_s5 + $0x1f8] sm:$0xff]  ;;  %v1847_v12 = vmul.f32 %v11454_v31, %v385_v33  ;;  %v1876_v15 = vmul.f32 %v11484_v47, %v414_v38  ;;  %v398_v31 = vld [vmem:[%s16641_s4 + $0x3a0] sm:$0xff] }
 0x152   : > { %2098 = vrot.lane.b32.xlu1 %v1830_v4, %s10906_s13  ;;  %2100 = vrot.lane.b32.xlu0 %v1831_v20, %s10906_s13  ;;  %17022 = vst [vmem:[#allocation26_spill] sm:$0xff] %v11781_v19  ;;  %v11803_v30 = vpack.c.bf16 %v489_v7, %v488_v57  ;;  %v442_v7 = vld [vmem:[%s16642_s5 + $0x80] sm:$0xff] }
 0x153   : > { %v11749_v0 = vpop.f32.mrb[52].mxu1  ;;  %v11751_v24 = vpop.f32.mrb[52].mxu0  ;;  %9737 = vmatprep.subr.bf16.mxu1 %v11767_v54  ;;  %v472_v54 = vld [vmem:[%s16642_s5 + $0x170] sm:$0xff] }
 0x154   : > { %v11762_v4 = vpop.f32.mrb[53].mxu1  ;;  %v11764_v20 = vpop.f32.mrb[53].mxu0  ;;  %17024 = vst [vmem:[#allocation28_spill] sm:$0xff] %v11803_v30  ;;  %v11817_v28 = vpack.c.bf16 %v473_v43, %v472_v54  ;;  %v11832_v54 = vpack.c.bf16 %v443_v29, %v442_v7  ;;  %v426_v43 = vld [vmem:[%s16642_s5] sm:$0xff] }
 0x155   : > { %9739 = vmatpush3.bf16.msra.mxu1 %v11781_v19 }
 0x156   : > { %2147 = vrot.lane.b32.xlu1 %v1846_v39, %s10907_s28  ;;  %2143 = vrot.lane.b32.xlu0 %v1844_v50, %s10907_s28  ;;  %17025 = vst [vmem:[#allocation29_spill] sm:$0xff] %v11817_v28  ;;  %17027 = vst [vmem:[#allocation31_spill] sm:$0xff] %v11832_v54 }
 0x157   : > { %v11785_v8 = vpop.f32.mrb[54].mxu1  ;;  %v11787_v23 = vpop.f32.mrb[54].mxu0  ;;  %9741 = vmatprep.subr.bf16.mxu1 %v11803_v30  ;;  %v539_v30 = vld [vmem:[%s16642_s5 + $0x388] sm:$0xff]  ;;  %9681 = vmatprep.subr.bf16.mxu0 %v11832_v54 }
 0x158   : > { %17023 = vst [vmem:[#allocation27_spill] sm:$0xff] %v11785_v8  ;;  %v11798_v39 = vpop.f32.mrb[55].mxu1  ;;  %v11800_v50 = vpop.f32.mrb[55].mxu0 }
 0x159   : > { %9743 = vmatpush3.bf16.msra.mxu1 %v11817_v28 }
 0x15a   : > { %2196 = vrot.lane.b32.xlu1 %v1862_v34, %s10908_s10  ;;  %2145 = vrot.lane.b32.xlu0 %v1845_v27, %s10907_s28  ;;  %v427_v34 = vld [vmem:[%s16642_s5 + $0x8] sm:$0xff]  ;;  %v538_v27 = vld [vmem:[%s16642_s5 + $0x380] sm:$0xff] }
 0x15b   : > { %v11827_v57 = vpop.f32.mrb[56].mxu1  ;;  %v11829_v19 = vpop.f32.mrb[56].mxu0  ;;  %v11850_v29 = vpack.c.bf16 %v427_v34, %v426_v43  ;;  %v11862_v47 = vpack.c.bf16 %v539_v30, %v538_v27  ;;  %v444_v43 = vld [vmem:[%s16642_s5 + $0x90] sm:$0xff]  ;;  %v445_v30 = vld [vmem:[%s16642_s5 + $0x98] sm:$0xff] }
 0x15c   : > { %17026 = vst [vmem:[#allocation30_spill] sm:$0xff] %v11827_v57  ;;  %v11845_v11 = vpop.f32.mrb[57].mxu1  ;;  %v11847_v7 = vpop.f32.mrb[57].mxu0  ;;  %v11884_v28 = vpack.c.bf16 %v445_v30, %v444_v43  ;;  %v431_v57 = vld [vmem:[%s16642_s5 + $0x28] sm:$0xff] }
 0x15d   : > { %17028 = vst [vmem:[#allocation32_spill] sm:$0xff] %v11850_v29  ;;  %17029 = vst [vmem:[#allocation33_spill] sm:$0xff] %v11862_v47  ;;  %9683 = vmatpush3.bf16.msra.mxu0 %v11850_v29  ;;  %9777 = vmatprep.subr.bf16.mxu1 %v11862_v47  ;;  %v428_v47 = vld [vmem:[%s16642_s5 + $0x10] sm:$0xff]  ;;  %v429_v29 = vld [vmem:[%s16642_s5 + $0x18] sm:$0xff] }
 0x15e   : > { %2149 = vrot.lane.b32.xlu0 %v1847_v12, %s10907_s28  ;;  %2241 = vrot.lane.b32.xlu1 %v1876_v15, %s10909_s25  ;;  %v1878_v12 = vmul.f32 %v11482_v46, %v416_v62  ;;  %v1860_v15 = vmul.f32 %v11469_v32, %v398_v31  ;;  %17032 = vst [vmem:[#allocation36_spill] sm:$0xff] %v11884_v28  ;;  %v399_v62 = vld [vmem:[%s16641_s4 + $0x3a8] sm:$0xff] }
 0x15f   : > { %v11866_v33 = vpop.f32.mrb[58].mxu1  ;;  %v11868_v38 = vpop.f32.mrb[58].mxu0  ;;  %v291_v32 = vld [vmem:[%s16641_s4 + $0x48] sm:$0xff]  ;;  %v11902_v43 = vpack.c.bf16 %v429_v29, %v428_v47  ;;  %9685 = vmatprep.subr.bf16.mxu0 %v11884_v28  ;;  %v1861_v29 = vmul.f32 %v11474_v42, %v399_v62  ;;  %v430_v28 = vld [vmem:[%s16642_s5 + $0x20] sm:$0xff]  ;;  %v401_v42 = vld [vmem:[%s16641_s4 + $0x3b8] sm:$0xff] }
 0x160   : > { %17030 = vst [vmem:[#allocation34_spill] sm:$0xff] %v11866_v33  ;;  %v11880_v34 = vpop.permute.xlu1 %1892  ;;  %v11882_v27 = vpop.permute.xlu0 %1888  ;;  %v447_v33 = vld [vmem:[%s16642_s5 + $0xa8] sm:$0xff]  ;;  %v1753_v47 = vmul.f32 %v11510_v9, %v291_v32  ;;  %v370_v32 = vld [vmem:[%s16641_s4 + $0x2c0] sm:$0xff] }
 0x161   : > { %17031 = vst [vmem:[#allocation35_spill] sm:$0xff] %v11880_v34  ;;  %v11898_v46 = vpop.f32.mrb[59].mxu1  ;;  %v11900_v31 = vpop.f32.mrb[59].mxu0  ;;  %17033 = vst [vmem:[#allocation37_spill] sm:$0xff] %v11902_v43  ;;  %9687 = vmatpush3.bf16.msra.mxu0 %v11902_v43  ;;  %v307_v9 = vld [vmem:[%s16641_s4 + $0xc8] sm:$0xff]  ;;  %v448_v34 = vld [vmem:[%s16642_s5 + $0xb0] sm:$0xff] }
 0x162   : > { %2192 = vrot.lane.b32.xlu0 %v1860_v15, %s10908_s10  ;;  %2245 = vrot.lane.b32.xlu1 %v1878_v12, %s10909_s25 }
 0x163   : > { %v11906_v30 = vpop.f32.mrb[60].mxu1  ;;  %v11908_v54 = vpop.f32.mrb[60].mxu0 }
 0x164   : > { %17034 = vst [vmem:[#allocation38_spill] sm:$0xff] %v11906_v30  ;;  %v11919_v15 = vpop.permute.xlu0 %1890  ;;  %v11921_v12 = vpop.permute.xlu1 %1939  ;;  %v11924_v30 = vpack.c.bf16 %v447_v33, %v446_v14  ;;  %v11942_v33 = vpack.c.bf16 %v431_v57, %v430_v28  ;;  %v449_v28 = vld [vmem:[%s16642_s5 + $0xb8] sm:$0xff]  ;;  %v1863_v57 = vmul.f32 %v11472_v41, %v401_v42  ;;  %v415_v41 = vld [vmem:[%s16641_s4 + $0x428] sm:$0xff] }
 0x165   : > { %17035 = vst [vmem:[#allocation39_spill] sm:$0xff] %v11921_v12  ;;  %v11938_v62 = vpop.f32.mrb[61].mxu1  ;;  %v11940_v14 = vpop.f32.mrb[61].mxu0 }
 0x166   : > { %17036 = vst [vmem:[#allocation40_spill] sm:$0xff] %v11924_v30  ;;  %17037 = vst [vmem:[#allocation41_spill] sm:$0xff] %v11942_v33  ;;  %2194 = vrot.lane.b32.xlu0 %v1861_v29, %s10908_s10  ;;  %1906 = vrot.lane.b32.xlu1 %v1753_v47, %s10902_s14  ;;  %v1769_v29 = vmul.f32 %v11525_v18, %v307_v9 }
 0x167   : > { %v11949_v43 = vpop.f32.mrb[62].mxu0  ;;  %v11951_v8 = vpop.f32.mrb[62].mxu1  ;;  %9689 = vmatprep.subr.bf16.mxu0 %v11924_v30  ;;  %v432_v30 = vld [vmem:[%s16642_s5 + $0x30] sm:$0xff] }
 0x168   : > { %17038 = vst [vmem:[#allocation42_spill] sm:$0xff] %v11949_v43  ;;  %17039 = vst [vmem:[#allocation43_spill] sm:$0xff] %v11951_v8  ;;  %v11962_v47 = vpop.permute.xlu0 %1894  ;;  %v11964_v2 = vpop.permute.xlu1 %1943  ;;  %9691 = vmatpush3.bf16.msra.mxu0 %v11942_v33  ;;  %v11967_v8 = vpack.c.bf16 %v449_v28, %v448_v34  ;;  %v433_v43 = vld [vmem:[%s16642_s5 + $0x38] sm:$0xff]  ;;  %v1832_v34 = vmul.f32 %v11644_v22, %v370_v32  ;;  %v386_v28 = vld [vmem:[%s16641_s4 + $0x340] sm:$0xff]  ;;  %v1877_v22 = vmul.f32 %v11489_v53, %v415_v41 }
 0x169   : > { %17040 = vst [vmem:[#allocation44_spill] sm:$0xff] %v11962_v47  ;;  %17041 = vst [vmem:[#allocation45_spill] sm:$0xff] %v11964_v2  ;;  %v11978_v18 = vpop.f32.mrb[63].mxu0  ;;  %v11980_v42 = vpop.f32.mrb[63].mxu1  ;;  %v11982_v9 = vpack.c.bf16 %v433_v43, %v432_v30  ;;  %v450_v43 = vld [vmem:[%s16642_s5 + $0xc0] sm:$0xff]  ;;  %v451_v30 = vld [vmem:[%s16642_s5 + $0xc8] sm:$0xff] }
 0x16a   : > { %17042 = vst [vmem:[#allocation46_spill] sm:$0xff] %v11967_v8  ;;  %17043 = vst [vmem:[#allocation47_spill] sm:$0xff] %v11978_v18  ;;  %2198 = vrot.lane.b32.xlu0 %v1863_v57, %s10908_s10  ;;  %1957 = vrot.lane.b32.xlu1 %v1769_v29, %s10903_s19  ;;  %v12007_v29 = vpack.c.bf16 %v451_v30, %v450_v43  ;;  %v417_v53 = vld [vmem:[%s16641_s4 + $0x438] sm:$0xff]  ;;  %v1848_v43 = vmul.f32 %v11679_v40, %v386_v28  ;;  %v402_v30 = vld [vmem:[%s16641_s4 + $0x3c0] sm:$0xff] }
 0x16b   : > { %17044 = vst [vmem:[#allocation48_spill] sm:$0xff] %v11980_v42  ;;  %17045 = vst [vmem:[#allocation49_spill] sm:$0xff] %v11982_v9  ;;  %v11990_v33 = vpop.f32.mrb[64].mxu0  ;;  %v11992_v47 = vpop.f32.mrb[64].mxu1  ;;  %9693 = vmatprep.subr.bf16.mxu0 %v11967_v8  ;;  %v434_v8 = vld [vmem:[%s16642_s5 + $0x40] sm:$0xff]  ;;  %v435_v42 = vld [vmem:[%s16642_s5 + $0x48] sm:$0xff]  ;;  %v1879_v40 = vmul.f32 %v11487_v52, %v417_v53 }
 0x16c   : > { %v12002_v32 = vpop.permute.xlu0 %1945  ;;  %v12004_v57 = vpop.permute.xlu1 %1941  ;;  %9695 = vmatpush3.bf16.msra.mxu0 %v11982_v9  ;;  %17047 = vst [vmem:[#allocation51_spill] sm:$0xff] %v12007_v29  ;;  %v12022_v2 = vpack.c.bf16 %v435_v42, %v434_v8  ;;  %v452_v8 = vld [vmem:[%s16642_s5 + $0xd0] sm:$0xff]  ;;  %v453_v42 = vld [vmem:[%s16642_s5 + $0xd8] sm:$0xff]  ;;  %v290_v52 = vld [vmem:[%s16641_s4 + $0x40] sm:$0xff] }
 0x16d   : > { %17046 = vst [vmem:[#allocation50_spill] sm:$0xff] %v12002_v32  ;;  %v12018_v41 = vpop.f32.mrb[65].mxu0  ;;  %v12020_v18 = vpop.f32.mrb[65].mxu1  ;;  %9697 = vmatprep.subr.bf16.mxu0 %v12007_v29  ;;  %v436_v29 = vld [vmem:[%s16642_s5 + $0x50] sm:$0xff] }
 0x16e   : > { %17048 = vst [vmem:[#allocation52_spill] sm:$0xff] %v12020_v18  ;;  %17049 = vst [vmem:[#allocation53_spill] sm:$0xff] %v12022_v2  ;;  %2243 = vrot.lane.b32.xlu0 %v1877_v22, %s10909_s25  ;;  %2102 = vrot.lane.b32.xlu1 %v1832_v34, %s10906_s13  ;;  %v12047_v22 = vpack.c.bf16 %v453_v42, %v452_v8  ;;  %v437_v18 = vld [vmem:[%s16642_s5 + $0x58] sm:$0xff]  ;;  %v1864_v8 = vmul.f32 %v11715_v3, %v402_v30  ;;  %v418_v42 = vld [vmem:[%s16641_s4 + $0x440] sm:$0xff] }
 0x16f   : > { %v12030_v9 = vpop.f32.mrb[66].mxu0  ;;  %v12032_v32 = vpop.f32.mrb[66].mxu1  ;;  %v12062_v63 = vpack.c.bf16 %v437_v18, %v436_v29  ;;  %v454_v18 = vld [vmem:[%s16642_s5 + $0xe0] sm:$0xff]  ;;  %v455_v29 = vld [vmem:[%s16642_s5 + $0xe8] sm:$0xff]  ;;  %v1752_v3 = vmul.f32 %v11504_v60, %v290_v52 }
 0x170   : > { %17050 = vst [vmem:[#allocation54_spill] sm:$0xff] %v12032_v32  ;;  %v12042_v34 = vpop.permute.xlu1 %1992  ;;  %v12044_v28 = vpop.permute.xlu0 %1988  ;;  %9699 = vmatpush3.bf16.msra.mxu0 %v12022_v2  ;;  %17053 = vst [vmem:[#allocation57_spill] sm:$0xff] %v12047_v22  ;;  %v306_v60 = vld [vmem:[%s16641_s4 + $0xc0] sm:$0xff] }
 0x171   : > { %17051 = vst [vmem:[#allocation55_spill] sm:$0xff] %v12042_v34  ;;  %17052 = vst [vmem:[#allocation56_spill] sm:$0xff] %v12044_v28  ;;  %v12058_v53 = vpop.f32.mrb[67].mxu0  ;;  %v12060_v34 = vpop.f32.mrb[67].mxu1  ;;  %9701 = vmatprep.subr.bf16.mxu0 %v12047_v22  ;;  %v438_v22 = vld [vmem:[%s16642_s5 + $0x60] sm:$0xff] }
 0x172   : > { %17054 = vst [vmem:[#allocation58_spill] sm:$0xff] %v12060_v34  ;;  %17055 = vst [vmem:[#allocation59_spill] sm:$0xff] %v12062_v63  ;;  %2247 = vrot.lane.b32.xlu0 %v1879_v40, %s10909_s25  ;;  %2151 = vrot.lane.b32.xlu1 %v1848_v43, %s10907_s28  ;;  %v12087_v40 = vpack.c.bf16 %v455_v29, %v454_v18  ;;  %v439_v34 = vld [vmem:[%s16642_s5 + $0x68] sm:$0xff]  ;;  %v1880_v18 = vmul.f32 %v11751_v24, %v418_v42  ;;  %v440_v42 = vld [vmem:[%s16642_s5 + $0x70] sm:$0xff] }
 0x173   : > { %v12070_v2 = vpop.f32.mrb[68].mxu0  ;;  %v12072_v32 = vpop.f32.mrb[68].mxu1 }
 0x174   : > { %17056 = vst [vmem:[#allocation60_spill] sm:$0xff] %v12072_v32  ;;  %v12082_v43 = vpop.permute.xlu0 %1994  ;;  %v12084_v30 = vpop.permute.xlu1 %1990  ;;  %9703 = vmatpush3.bf16.msra.mxu0 %v12062_v63  ;;  %17058 = vst [vmem:[#allocation62_spill] sm:$0xff] %v12087_v40  ;;  %v12102_v32 = vpack.c.bf16 %v439_v34, %v438_v22  ;;  %v457_v34 = vld [vmem:[%s16642_s5 + $0xf8] sm:$0xff]  ;;  %v1768_v22 = vmul.f32 %v11520_v17, %v306_v60 }
 0x175   : > { %17057 = vst [vmem:[#allocation61_spill] sm:$0xff] %v12082_v43  ;;  %v12098_v52 = vpop.f32.mrb[69].mxu0  ;;  %v12100_v43 = vpop.f32.mrb[69].mxu1  ;;  %9705 = vmatprep.subr.bf16.mxu0 %v12087_v40  ;;  %v441_v40 = vld [vmem:[%s16642_s5 + $0x78] sm:$0xff] }
 0x176   : > { %17059 = vst [vmem:[#allocation63_spill] sm:$0xff] %v12098_v52  ;;  %17060 = vst [vmem:[#allocation64_spill] sm:$0xff] %v12100_v43  ;;  %1904 = vrot.lane.b32.xlu0 %v1752_v3, %s10902_s14  ;;  %2200 = vrot.lane.b32.xlu1 %v1864_v8, %s10908_s10  ;;  %v456_v52 = vld [vmem:[%s16642_s5 + $0xf0] sm:$0xff]  ;;  %v297_v17 = vld [vmem:[%s16641_s4 + $0x78] sm:$0xff] }
 0x177   : > { %17061 = vst [vmem:[#allocation65_spill] sm:$0xff] %v12102_v32  ;;  %v12107_v29 = vpop.f32.mrb[70].mxu0  ;;  %v12109_v63 = vpop.f32.mrb[70].mxu1  ;;  %v12124_v24 = vpack.c.bf16 %v457_v34, %v456_v52  ;;  %v313_v60 = vld [vmem:[%s16641_s4 + $0xf8] sm:$0xff]  ;;  %v12142_v34 = vpack.c.bf16 %v441_v40, %v440_v42  ;;  %v506_v43 = vld [vmem:[%s16642_s5 + $0x280] sm:$0xff]  ;;  %v1759_v40 = vmul.f32 %v11798_v39, %v297_v17 }
 0x178   : > { %17062 = vst [vmem:[#allocation66_spill] sm:$0xff] %v12109_v63  ;;  %v12119_v3 = vpop.permute.xlu1 %2041  ;;  %v12121_v8 = vpop.permute.xlu0 %2037  ;;  %9707 = vmatpush3.bf16.msra.mxu0 %v12102_v32  ;;  %v345_v32 = vld [vmem:[%s16641_s4 + $0x1f8] sm:$0xff] }
 0x179   : > { %17063 = vst [vmem:[#allocation67_spill] sm:$0xff] %v12121_v8  ;;  %17064 = vst [vmem:[#allocation68_spill] sm:$0xff] %v12124_v24  ;;  %v12138_v63 = vpop.f32.mrb[71].mxu0  ;;  %v12140_v52 = vpop.f32.mrb[71].mxu1  ;;  %9709 = vmatprep.subr.bf16.mxu0 %v12124_v24  ;;  %v329_v24 = vld [vmem:[%s16641_s4 + $0x178] sm:$0xff]  ;;  %v1807_v39 = vmul.f32 %v11938_v62, %v345_v32 }
 0x17a   : > { %17065 = vst [vmem:[#allocation69_spill] sm:$0xff] %v12138_v63  ;;  %17066 = vst [vmem:[#allocation70_spill] sm:$0xff] %v12140_v52  ;;  %1955 = vrot.lane.b32.xlu0 %v1768_v22, %s10903_s19  ;;  %2249 = vrot.lane.b32.xlu1 %v1880_v18, %s10909_s25  ;;  %v507_v52 = vld [vmem:[%s16642_s5 + $0x288] sm:$0xff]  ;;  %v1775_v22 = vmul.f32 %v11845_v11, %v313_v60  ;;  %v1791_v11 = vmul.f32 %v11898_v46, %v329_v24 }
 0x17b   : > { %17067 = vst [vmem:[#allocation71_spill] sm:$0xff] %v12142_v34  ;;  %v12163_v63 = vpack.c.bf16 %v507_v52, %v506_v43  ;;  %v322_v43 = vld [vmem:[%s16641_s4 + $0x140] sm:$0xff]  ;;  %v323_v52 = vld [vmem:[%s16641_s4 + $0x148] sm:$0xff] }
 0x17c   : > { %v12158_v42 = vpop.permute.xlu0 %2043  ;;  %v12160_v18 = vpop.permute.xlu1 %2039  ;;  %9711 = vmatpush3.bf16.msra.mxu0 %v12142_v34  ;;  %v1784_v62 = vmul.f32 %v11540_v25, %v322_v43  ;;  %v1785_v46 = vmul.f32 %v11552_v37, %v323_v52  ;;  %v372_v43 = vld [vmem:[%s16641_s4 + $0x2d0] sm:$0xff]  ;;  %v371_v52 = vld [vmem:[%s16641_s4 + $0x2c8] sm:$0xff] }
 0x17d   : > { %17068 = vst [vmem:[#allocation72_spill] sm:$0xff] %v12163_v63  ;;  %9745 = vmatprep.subr.bf16.mxu0 %v12163_v63  ;;  %v387_v63 = vld [vmem:[%s16641_s4 + $0x348] sm:$0xff] }
 0x17e   : > { %1918 = vrot.lane.b32.xlu0 %v1759_v40, %s10902_s14  ;;  %1969 = vrot.lane.b32.xlu1 %v1775_v22, %s10903_s19  ;;  %v338_v40 = vld [vmem:[%s16641_s4 + $0x1c0] sm:$0xff]  ;;  %v339_v22 = vld [vmem:[%s16641_s4 + $0x1c8] sm:$0xff] }
 0x17f   : > { %v1800_v25 = vmul.f32 %v11572_v59, %v338_v40  ;;  %v1801_v37 = vmul.f32 %v11584_v13, %v339_v22  ;;  %v1834_v59 = vmul.f32 %v11642_v58, %v372_v43  ;;  %v1833_v13 = vmul.f32 %v11656_v51, %v371_v52  ;;  %v388_v22 = vld [vmem:[%s16641_s4 + $0x350] sm:$0xff] }
 0x180   : > { %v12173_v17 = vpop.permute.xlu1 %2090  ;;  %v12175_v60 = vpop.permute.xlu0 %2086  ;;  %v1920_v40 = vlaneseq  ;;  %v1850_v58 = vmul.f32 %v11677_v35, %v388_v22  ;;  %v1849_v51 = vmul.f32 %v11692_v21, %v387_v63  ;;  %v404_v52 = vld [vmem:[%s16641_s4 + $0x3d0] sm:$0xff] }
 0x181   : > { %17069 = vst [vmem:[#allocation73_spill] sm:$0xff] %v12175_v60  ;;  %v1866_v63 = vmul.f32 %v11713_v61, %v404_v52  ;;  %v292_v22 = vld [vmem:[%s16641_s4 + $0x50] sm:$0xff]  ;;  %v293_v61 = vld [vmem:[%s16641_s4 + $0x58] sm:$0xff] }
 0x182   : > { %2018 = vrot.lane.b32.xlu0 %v1791_v11, %s10904_s12  ;;  %2067 = vrot.lane.b32.xlu1 %v1807_v39, %s10905_s23  ;;  %v12233_v43 = vand.u32 127, %v1920_v40  ;;  %v347_v40 = vld [vmem:[%s16641_s4 + $0x208] sm:$0xff] }
 0x184   : > { %v12187_v32 = vpop.permute.xlu1 %2092  ;;  %v12189_v24 = vpop.permute.xlu0 %2088  ;;  %17074 = vst [vmem:[#allocation78_spill] sm:$0xff] %v12233_v43  ;;  %vm2069_vm2 = vcmp.lt.s32.totalorder %v12233_v43, 1  ;;  %vm2118_vm3 = vcmp.lt.s32.totalorder %v12233_v43, 127  ;;  %vm2167_vm4 = vcmp.lt.s32.totalorder %v12233_v43, 113  ;;  %vm2216_vm5 = vcmp.lt.s32.totalorder %v12233_v43, 112 }
 0x185   : > { %vm1971_vm6 = vcmp.lt.s32.totalorder %v12233_v43, 16  ;;  %vm2020_vm7 = vcmp.lt.s32.totalorder %v12233_v43, 15  ;;  %vm1922_vm8 = vcmp.lt.s32.totalorder %v12233_v43, 17  ;;  %vm2265_vm9 = vcmp.lt.s32.totalorder %v12233_v43, 111  ;;  %v17303_v43 = vld [vmem:[#allocation33_spill] sm:$0xff] }
 0x186   : > { %2004 = vrot.lane.b32.xlu0 %v1784_v62, %s10904_s12  ;;  %2006 = vrot.lane.b32.xlu1 %v1785_v46, %s10904_s12 }
 0x188   : > { %v12201_v39 = vpop.permute.xlu1 %2139  ;;  %v12203_v11 = vpop.permute.xlu0 %2137 }
 0x189   : > { %17070 = vst [vmem:[#allocation74_spill] sm:$0xff] %v12203_v11  ;;  %v2181_v52 = vsel %vm2167_vm4, %v12203_v11, %v12201_v39 }
 0x18a   : > { %2053 = vrot.lane.b32.xlu0 %v1800_v25, %s10905_s23  ;;  %2055 = vrot.lane.b32.xlu1 %v1801_v37, %s10905_s23 }
 0x18c   : > { %v12215_v62 = vpop.permute.xlu1 %2135  ;;  %v12217_v46 = vpop.permute.xlu0 %2184 }
 0x18d   : > { %17071 = vst [vmem:[#allocation75_spill] sm:$0xff] %v12215_v62  ;;  %17072 = vst [vmem:[#allocation76_spill] sm:$0xff] %v12217_v46  ;;  %v308_v46 = vld [vmem:[%s16641_s4 + $0xd0] sm:$0xff] }
 0x18e   : > { %2104 = vrot.lane.b32.xlu0 %v1833_v13, %s10906_s13  ;;  %2106 = vrot.lane.b32.xlu1 %v1834_v59, %s10906_s13  ;;  %v403_v13 = vld [vmem:[%s16641_s4 + $0x3c8] sm:$0xff] }
 0x18f   : > { %v1865_v35 = vmul.f32 %v11728_v45, %v403_v13  ;;  %v1809_v13 = vmul.f32 %v11295_v1, %v347_v40  ;;  %v1986_v1 = vsel %vm1971_vm6, %v11921_v12, %v12004_v57 }
 0x190   : > { %v12229_v25 = vpop.permute.xlu1 %2141  ;;  %v12231_v37 = vpop.permute.xlu0 %2186 }
 0x191   : > { %17073 = vst [vmem:[#allocation77_spill] sm:$0xff] %v12231_v37 }
 0x192   : > { %2153 = vrot.lane.b32.xlu0 %v1849_v51, %s10907_s28  ;;  %2155 = vrot.lane.b32.xlu1 %v1850_v58, %s10907_s28  ;;  %v2084_v58 = vsel %vm2069_vm2, %v12121_v8, %v12160_v18  ;;  %v2132_v51 = vsel %vm2118_vm3, %v12189_v24, %v12173_v17 }
 0x193   : > { %v2315_v40 = vadd.f32 %v2132_v51, %v1809_v13  ;;  %v325_v51 = vld [vmem:[%s16641_s4 + $0x158] sm:$0xff] }
 0x194   : > { %v12249_v21 = vpop.permute.xlu1 %2188  ;;  %v12251_v59 = vpop.permute.xlu0 %2237 }
 0x195   : > { %v2230_v45 = vsel %vm2216_vm5, %v12231_v37, %v12249_v21  ;;  %v309_v37 = vld [vmem:[%s16641_s4 + $0xd8] sm:$0xff] }
 0x196   : > { %2202 = vrot.lane.b32.xlu0 %v1865_v35, %s10908_s10  ;;  %2204 = vrot.lane.b32.xlu1 %v1866_v63, %s10908_s10  ;;  %v1754_v63 = vmul.f32 %v11502_v48, %v292_v22  ;;  %v1755_v35 = vmul.f32 %v11508_v6, %v293_v61  ;;  %v2331_v34 = vadd.f32 %v2230_v45, %v2181_v52 }
 0x197   : > { %v2035_v48 = vsel %vm2020_vm7, %v12044_v28, %v12084_v30  ;;  %v1937_v22 = vsel %vm1922_vm8, %v11882_v27, %v11919_v15  ;;  %v1770_v61 = vmul.f32 %v11518_v16, %v308_v46  ;;  %v1771_v45 = vmul.f32 %v11523_v49, %v309_v37 }
 0x198   : > { %v12286_v62 = vpop.permute.xlu1 %2190  ;;  %v12288_v8 = vpop.permute.xlu0 %2239  ;;  %v2299_v6 = vadd.f32 %v2084_v58, %v2035_v48  ;;  %v2283_v52 = vadd.f32 %v1986_v1, %v1937_v22  ;;  %v2363_v12 = vadd.f32 %v2331_v34, %v2315_v40  ;;  %v324_v58 = vld [vmem:[%s16641_s4 + $0x150] sm:$0xff]  ;;  %v1787_v49 = vmul.f32 %v11550_v36, %v325_v51  ;;  %v373_v40 = vld [vmem:[%s16641_s4 + $0x2d8] sm:$0xff] }
 0x199   : > { %v1786_v16 = vmul.f32 %v11538_v55, %v324_v58  ;;  %v420_v22 = vld [vmem:[%s16641_s4 + $0x450] sm:$0xff]  ;;  %v295_v58 = vld [vmem:[%s16641_s4 + $0x68] sm:$0xff] }
 0x19a   : > { %1908 = vrot.lane.b32.xlu0 %v1754_v63, %s10902_s14  ;;  %1910 = vrot.lane.b32.xlu1 %v1755_v35, %s10902_s14  ;;  %v2347_v13 = vadd.f32 %v2299_v6, %v2283_v52  ;;  %v340_v63 = vld [vmem:[%s16641_s4 + $0x1d0] sm:$0xff]  ;;  %v341_v35 = vld [vmem:[%s16641_s4 + $0x1d8] sm:$0xff] }
 0x19b   : > { %v1803_v1 = vmul.f32 %v11582_v10, %v341_v35  ;;  %v1882_v10 = vmul.f32 %v11749_v0, %v420_v22  ;;  %v389_v52 = vld [vmem:[%s16641_s4 + $0x358] sm:$0xff]  ;;  %v1757_v0 = vmul.f32 %v11800_v50, %v295_v58  ;;  %v419_v35 = vld [vmem:[%s16641_s4 + $0x448] sm:$0xff]  ;;  %v294_v58 = vld [vmem:[%s16641_s4 + $0x60] sm:$0xff] }
 0x19c   : > { %v12312_v11 = vpop.permute.xlu1 %2233  ;;  %v12314_v28 = vpop.permute.xlu0 %1896  ;;  %v2379_v37 = vadd.f32 %v2363_v12, %v2347_v13  ;;  %v1802_v12 = vmul.f32 %v11570_v56, %v340_v63  ;;  %v1835_v56 = vmul.f32 %v11654_v5, %v373_v40  ;;  %v1851_v5 = vmul.f32 %v11690_v44, %v389_v52  ;;  %v421_v22 = vld [vmem:[%s16641_s4 + $0x458] sm:$0xff] }
 0x19d   : > { %17075 = vst [vmem:[#allocation79_spill] sm:$0xff] %v12312_v11 }
 0x19e   : > { %1959 = vrot.lane.b32.xlu0 %v1770_v61, %s10903_s19  ;;  %1961 = vrot.lane.b32.xlu1 %v1771_v45, %s10903_s19 }
 0x1a0   : > { %v12327_v34 = vpop.permute.xlu1 %2235  ;;  %v12329_v46 = vpop.permute.xlu0 %1900 }
 0x1a1   : > { %v2279_v55 = vsel %vm2265_vm9, %v12327_v34, %v12251_v59 }
 0x1a2   : > { %2008 = vrot.lane.b32.xlu0 %v1786_v16, %s10904_s12  ;;  %2010 = vrot.lane.b32.xlu1 %v1787_v49, %s10904_s12  ;;  %v12343_v36 = vadd.f32 %v2379_v37, %v2279_v55  ;;  %v405_v16 = vld [vmem:[%s16641_s4 + $0x3d8] sm:$0xff]  ;;  %v311_v49 = vld [vmem:[%s16641_s4 + $0xe8] sm:$0xff] }
 0x1a3   : > { %v1867_v44 = vmul.f32 %v11726_v26, %v405_v16  ;;  %v1773_v50 = vmul.f32 %v11847_v7, %v311_v49  ;;  %v327_v55 = vld [vmem:[%s16641_s4 + $0x168] sm:$0xff]  ;;  %v374_v26 = vld [vmem:[%s16641_s4 + $0x2e0] sm:$0xff]  ;;  %v1881_v7 = vmul.f32 %v11764_v20, %v419_v35 }
 0x1a4   : > { %17076 = vst [vmem:[#allocation80_spill] sm:$0xff] %v12343_v36  ;;  %2474 = vmatprep.mubr.f32.mxu0 %v12343_v36  ;;  %v12348_v48 = vpop.permute.xlu1 %1898  ;;  %v12350_v6 = vpop.permute.xlu0 %1947  ;;  %v390_v20 = vld [vmem:[%s16641_s4 + $0x360] sm:$0xff] }
 0x1a5   : > { %v310_v49 = vld [vmem:[%s16641_s4 + $0xe0] sm:$0xff] }
 0x1a6   : > { %2057 = vrot.lane.b32.xlu0 %v1802_v12, %s10905_s23  ;;  %2059 = vrot.lane.b32.xlu1 %v1803_v1, %s10905_s23  ;;  %v1789_v12 = vmul.f32 %v11900_v31, %v327_v55  ;;  %v1883_v31 = vmul.f32 %v11762_v4, %v421_v22  ;;  %v1756_v4 = vmul.f32 %v11787_v23, %v294_v58  ;;  %v326_v23 = vld [vmem:[%s16641_s4 + $0x160] sm:$0xff]  ;;  %v343_v55 = vld [vmem:[%s16641_s4 + $0x1e8] sm:$0xff] }
 0x1a7   : > { %v342_v22 = vld [vmem:[%s16641_s4 + $0x1e0] sm:$0xff]  ;;  %v375_v58 = vld [vmem:[%s16641_s4 + $0x2e8] sm:$0xff] }
 0x1a8   : > { %v12362_v61 = vpop.permute.xlu1 %1902  ;;  %v12364_v45 = vpop.permute.xlu0 %1951 }
 0x1a9   : > { %17077 = vst [vmem:[#allocation81_spill] sm:$0xff] %v12362_v61 }
 0x1aa   : > { %2108 = vrot.lane.b32.xlu0 %v1835_v56, %s10906_s13  ;;  %2253 = vrot.lane.b32.xlu1 %v1882_v10, %s10909_s25  ;;  %v1836_v56 = vmul.f32 %v11990_v33, %v374_v26  ;;  %v1852_v33 = vmul.f32 %v12030_v9, %v390_v20  ;;  %v1805_v26 = vmul.f32 %v11940_v14, %v343_v55  ;;  %v17082_v55 = vld [vmem:[#allocation3_spill] sm:$0xff] }
 0x1ab   : > { %v1804_v14 = vmul.f32 %v11908_v54, %v342_v22  ;;  %v348_v54 = vld [vmem:[%s16641_s4 + $0x210] sm:$0xff]  ;;  %v2180_v22 = vsel %vm2167_vm4, %v12201_v39, %v12229_v25 }
 0x1ac   : > { %v12376_v51 = vpop.permute.xlu1 %1949  ;;  %v12378_v13 = vpop.permute.xlu0 %1996 }
 0x1ae   : > { %2157 = vrot.lane.b32.xlu0 %v1851_v5, %s10907_s28  ;;  %1914 = vrot.lane.b32.xlu1 %v1757_v0, %s10902_s14  ;;  %v406_v5 = vld [vmem:[%s16641_s4 + $0x3e0] sm:$0xff] }
 0x1af   : > { %v1868_v9 = vmul.f32 %v12070_v2, %v406_v5  ;;  %v422_v2 = vld [vmem:[%s16641_s4 + $0x460] sm:$0xff]  ;;  %v1837_v5 = vmul.f32 %v12018_v41, %v375_v58  ;;  %v17084_v58 = vld [vmem:[#allocation4_spill] sm:$0xff] }
 0x1b0   : > { %v12390_v37 = vpop.permute.xlu1 %1953  ;;  %v12392_v63 = vpop.permute.xlu0 %2000  ;;  %v17081_v41 = vld [vmem:[#allocation54_spill] sm:$0xff] }
 0x1b1   : > { %17078 = vst [vmem:[#allocation82_spill] sm:$0xff] %v12390_v37 }
 0x1b2   : > { %2206 = vrot.lane.b32.xlu0 %v1867_v44, %s10908_s10  ;;  %1965 = vrot.lane.b32.xlu1 %v1773_v50, %s10903_s19  ;;  %v1772_v44 = vmul.f32 %v11829_v19, %v310_v49  ;;  %v1788_v19 = vmul.f32 %v11868_v38, %v326_v23  ;;  %v376_v38 = vld [vmem:[%s16641_s4 + $0x2f0] sm:$0xff] }
 0x1b4   : > { %v12407_v1 = vpop.permute.xlu1 %1998  ;;  %v12409_v40 = vpop.permute.xlu0 %2045 }
 0x1b6   : > { %2251 = vrot.lane.b32.xlu0 %v1881_v7, %s10909_s25  ;;  %2014 = vrot.lane.b32.xlu1 %v1789_v12, %s10904_s12 }
 0x1b8   : > { %v12421_v10 = vpop.permute.xlu1 %2002  ;;  %v12423_v52 = vpop.permute.xlu0 %2049 }
 0x1b9   : > { %17079 = vst [vmem:[#allocation83_spill] sm:$0xff] %v12421_v10 }
 0x1ba   : > { %2255 = vrot.lane.b32.xlu0 %v1883_v31, %s10909_s25  ;;  %2110 = vrot.lane.b32.xlu1 %v1836_v56, %s10906_s13  ;;  %v1884_v56 = vmul.f32 %v12107_v29, %v422_v2  ;;  %v1838_v29 = vmul.f32 %v11992_v47, %v376_v38  ;;  %v349_v47 = vld [vmem:[%s16641_s4 + $0x218] sm:$0xff]  ;;  %v1810_v2 = vmul.f32 %v17082_v55, %v348_v54 }
 0x1bc   : > { %v12435_v0 = vpop.permute.xlu1 %2047  ;;  %v12437_v16 = vpop.permute.xlu0 %2094 }
 0x1be   : > { %1912 = vrot.lane.b32.xlu0 %v1756_v4, %s10902_s14  ;;  %2159 = vrot.lane.b32.xlu1 %v1852_v33, %s10907_s28  ;;  %v392_v33 = vld [vmem:[%s16641_s4 + $0x370] sm:$0xff] }
 0x1bf   : > { %v1854_v23 = vmul.f32 %v17081_v41, %v392_v33  ;;  %v17085_v33 = vld [vmem:[#allocation50_spill] sm:$0xff]  ;;  %v17089_v41 = vld [vmem:[#allocation61_spill] sm:$0xff] }
 0x1c0   : > { %v12446_v50 = vpop.permute.xlu1 %2051  ;;  %v12448_v35 = vpop.permute.xlu0 %2096 }
 0x1c1   : > { %17080 = vst [vmem:[#allocation84_spill] sm:$0xff] %v12446_v50 }
 0x1c2   : > { %1963 = vrot.lane.b32.xlu0 %v1772_v44, %s10903_s19  ;;  %2208 = vrot.lane.b32.xlu1 %v1868_v9, %s10908_s10  ;;  %v391_v9 = vld [vmem:[%s16641_s4 + $0x368] sm:$0xff]  ;;  %v2229_v44 = vsel %vm2216_vm5, %v12249_v21, %v12286_v62  ;;  %v2131_v21 = vsel %vm2118_vm3, %v12173_v17, %v12187_v32  ;;  %v2082_v17 = vsel %vm2069_vm2, %v12119_v3, %v12158_v42 }
 0x1c4   : > { %v12463_v7 = vpop.permute.xlu1 %2098  ;;  %v12465_v12 = vpop.permute.xlu0 %2100 }
 0x1c6   : > { %2012 = vrot.lane.b32.xlu0 %v1788_v19, %s10904_s12  ;;  %2063 = vrot.lane.b32.xlu1 %v1805_v26, %s10905_s23  ;;  %v408_v19 = vld [vmem:[%s16641_s4 + $0x3f0] sm:$0xff]  ;;  %v2083_v26 = vsel %vm2069_vm2, %v12160_v18, %v12119_v3  ;;  %v17086_v18 = vld [vmem:[#allocation45_spill] sm:$0xff] }
 0x1c7   : > { %v1984_v54 = vsel %vm1971_vm6, %v17086_v18, %v17085_v33  ;;  %v1985_v39 = vsel %vm1971_vm6, %v12004_v57, %v17086_v18  ;;  %v17088_v3 = vld [vmem:[#allocation60_spill] sm:$0xff]  ;;  %v2130_v57 = vsel %vm2118_vm3, %v12187_v32, %v12437_v16  ;;  %v17090_v18 = vld [vmem:[#allocation35_spill] sm:$0xff] }
 0x1c8   : > { %v12477_v20 = vpop.permute.xlu1 %2147  ;;  %v12479_v31 = vpop.permute.xlu0 %2143  ;;  %v296_v32 = vld [vmem:[%s16641_s4 + $0x70] sm:$0xff] }
 0x1ca   : > { %2061 = vrot.lane.b32.xlu0 %v1804_v14, %s10905_s23  ;;  %2257 = vrot.lane.b32.xlu1 %v1884_v56, %s10909_s25  ;;  %v1853_v56 = vmul.f32 %v12058_v53, %v391_v9  ;;  %v407_v53 = vld [vmem:[%s16641_s4 + $0x3e8] sm:$0xff] }
 0x1cb   : > { %v17087_v9 = vld [vmem:[#allocation55_spill] sm:$0xff] }
 0x1cc   : > { %v12494_v4 = vpop.permute.xlu1 %2196  ;;  %v12496_v49 = vpop.permute.xlu0 %2145  ;;  %v2033_v55 = vsel %vm2020_vm7, %v17087_v9, %v17089_v41 }
 0x1ce   : > { %2112 = vrot.lane.b32.xlu0 %v1837_v5, %s10906_s13  ;;  %2114 = vrot.lane.b32.xlu1 %v1838_v29, %s10906_s13  ;;  %v1811_v29 = vmul.f32 %v17084_v58, %v349_v47  ;;  %v2332_v5 = vadd.f32 %v2229_v44, %v2180_v22  ;;  %v2034_v47 = vsel %vm2020_vm7, %v12084_v30, %v17087_v9 }
 0x1cf   : > { %v1870_v44 = vmul.f32 %v17088_v3, %v408_v19  ;;  %v2300_v22 = vadd.f32 %v2083_v26, %v2034_v47  ;;  %v2316_v58 = vadd.f32 %v2131_v21, %v1810_v2  ;;  %v1936_v30 = vsel %vm1922_vm8, %v11919_v15, %v17090_v18  ;;  %v17092_v3 = vld [vmem:[#allocation63_spill] sm:$0xff]  ;;  %v312_v15 = vld [vmem:[%s16641_s4 + $0xf0] sm:$0xff] }
 0x1d0   : > { %v12528_v38 = vpop.permute.xlu0 %2149  ;;  %v12530_v14 = vpop.permute.xlu1 %2241  ;;  %v1869_v9 = vmul.f32 %v17092_v3, %v407_v53  ;;  %v2284_v21 = vadd.f32 %v1985_v39, %v1936_v30  ;;  %v17093_v3 = vld [vmem:[#allocation27_spill] sm:$0xff] }
 0x1d1   : > { %17083 = vst [vmem:[#allocation54_spill] sm:$0xff] %v12530_v14  ;;  %v2364_v47 = vadd.f32 %v2332_v5, %v2316_v58  ;;  %v1758_v5 = vmul.f32 %v17093_v3, %v296_v32  ;;  %v17094_v58 = vld [vmem:[#allocation30_spill] sm:$0xff] }
 0x1d2   : > { %2161 = vrot.lane.b32.xlu0 %v1853_v56, %s10907_s28  ;;  %2163 = vrot.lane.b32.xlu1 %v1854_v23, %s10907_s28  ;;  %v17091_v23 = vld [vmem:[#allocation44_spill] sm:$0xff]  ;;  %v2301_v56 = vadd.f32 %v2082_v17, %v2033_v55  ;;  %v2179_v17 = vsel %vm2167_vm4, %v12229_v25, %v12479_v31  ;;  %v2317_v55 = vadd.f32 %v2130_v57, %v1811_v29  ;;  %v542_v3 = vld [vmem:[%s16642_s5 + $0x3a0] sm:$0xff] }
 0x1d3   : > { %v1935_v19 = vsel %vm1922_vm8, %v17090_v18, %v17091_v23  ;;  %v2348_v30 = vadd.f32 %v2300_v22, %v2284_v21  ;;  %v1774_v36 = vmul.f32 %v17094_v58, %v312_v15  ;;  %v328_v25 = vld [vmem:[%s16641_s4 + $0x170] sm:$0xff]  ;;  %v523_v22 = vld [vmem:[%s16642_s5 + $0x308] sm:$0xff]  ;;  %v17096_v21 = vld [vmem:[#allocation34_spill] sm:$0xff] }
 0x1d4   : > { %v12572_v26 = vpop.permute.xlu0 %2192  ;;  %v12574_v2 = vpop.permute.xlu1 %2245  ;;  %v2285_v39 = vadd.f32 %v1984_v54, %v1935_v19  ;;  %v344_v29 = vld [vmem:[%s16641_s4 + $0x1f0] sm:$0xff]  ;;  %v1790_v32 = vmul.f32 %v17096_v21, %v328_v25  ;;  %v527_v21 = vld [vmem:[%s16642_s5 + $0x328] sm:$0xff] }
 0x1d5   : > { %v2228_v53 = vsel %vm2216_vm5, %v12286_v62, %v12572_v26  ;;  %v2380_v54 = vadd.f32 %v2364_v47, %v2348_v30  ;;  %v540_v19 = vld [vmem:[%s16642_s5 + $0x390] sm:$0xff]  ;;  %v393_v30 = vld [vmem:[%s16641_s4 + $0x378] sm:$0xff] }
 0x1d6   : > { %v2333_v18 = vadd.f32 %v2228_v53, %v2179_v17  ;;  %2210 = vrot.lane.b32.xlu0 %v1869_v9, %s10908_s10  ;;  %2212 = vrot.lane.b32.xlu1 %v1870_v44, %s10908_s10  ;;  %v2349_v23 = vadd.f32 %v2301_v56, %v2285_v39  ;;  %v522_v44 = vld [vmem:[%s16642_s5 + $0x300] sm:$0xff]  ;;  %v541_v56 = vld [vmem:[%s16642_s5 + $0x398] sm:$0xff]  ;;  %v2277_v9 = vsel %vm2265_vm9, %v12288_v8, %v12530_v14  ;;  %v17103_v58 = vld [vmem:[#allocation52_spill] sm:$0xff] }
 0x1d7   : > { %v12633_v47 = vpack.c.bf16 %v523_v22, %v522_v44  ;;  %v17100_v17 = vld [vmem:[#allocation38_spill] sm:$0xff]  ;;  %v17131_v14 = vld [vmem:[#allocation75_spill] sm:$0xff] }
 0x1d8   : > { %v2365_v41 = vadd.f32 %v2333_v18, %v2317_v55  ;;  %v12597_v33 = vpop.permute.xlu0 %2194  ;;  %v12599_v62 = vpop.permute.xlu1 %1906  ;;  %v1806_v53 = vmul.f32 %v17100_v17, %v344_v29  ;;  %v377_v55 = vld [vmem:[%s16641_s4 + $0x2f8] sm:$0xff]  ;;  %v12641_v18 = vpack.c.bf16 %v541_v56, %v540_v19  ;;  %v17106_v22 = vld [vmem:[#allocation58_spill] sm:$0xff] }
 0x1d9   : > { %17095 = vst [vmem:[#allocation3_spill] sm:$0xff] %v12599_v62  ;;  %17099 = vst [vmem:[#allocation55_spill] sm:$0xff] %v12633_v47  ;;  %v1839_v25 = vmul.f32 %v17103_v58, %v377_v55  ;;  %v409_v19 = vld [vmem:[%s16641_s4 + $0x3f8] sm:$0xff]  ;;  %v17108_v55 = vld [vmem:[#allocation64_spill] sm:$0xff] }
 0x1da   : > { %1916 = vrot.lane.b32.xlu0 %v1758_v5, %s10902_s14  ;;  %1967 = vrot.lane.b32.xlu1 %v1774_v36, %s10903_s19  ;;  %v2381_v57 = vadd.f32 %v2365_v41, %v2349_v23  ;;  %v2278_v36 = vsel %vm2265_vm9, %v12251_v59, %v12288_v8  ;;  %17102 = vst [vmem:[#allocation35_spill] sm:$0xff] %v12641_v18  ;;  %v524_v8 = vld [vmem:[%s16642_s5 + $0x310] sm:$0xff]  ;;  %v525_v59 = vld [vmem:[%s16642_s5 + $0x318] sm:$0xff] }
 0x1db   : > { %v12636_v39 = vadd.f32 %v2380_v54, %v2278_v36  ;;  %v543_v5 = vld [vmem:[%s16642_s5 + $0x3a8] sm:$0xff]  ;;  %v12668_v44 = vpack.c.bf16 %v525_v59, %v524_v8  ;;  %v544_v36 = vld [vmem:[%s16642_s5 + $0x3b0] sm:$0xff]  ;;  %v545_v17 = vld [vmem:[%s16642_s5 + $0x3b8] sm:$0xff]  ;;  %v1871_v8 = vmul.f32 %v17108_v55, %v409_v19 }
 0x1dc   : > { %v12627_v41 = vpop.permute.xlu0 %2198  ;;  %v12629_v23 = vpop.permute.xlu1 %1957  ;;  %v12631_v15 = vadd.f32 %v2381_v57, %v2277_v9  ;;  %v1855_v57 = vmul.f32 %v17106_v22, %v393_v30  ;;  %v12675_v56 = vpack.c.bf16 %v543_v5, %v542_v3  ;;  %v526_v9 = vld [vmem:[%s16642_s5 + $0x320] sm:$0xff]  ;;  %v425_v3 = vld [vmem:[%s16641_s4 + $0x478] sm:$0xff]  ;;  %v12717_v19 = vpack.c.bf16 %v545_v17, %v544_v36  ;;  %v547_v36 = vld [vmem:[%s16642_s5 + $0x3c8] sm:$0xff] }
 0x1dd   : > { %17097 = vst [vmem:[#allocation4_spill] sm:$0xff] %v12629_v23  ;;  %17101 = vst [vmem:[#allocation60_spill] sm:$0xff] %v12636_v39  ;;  %v12706_v5 = vpack.c.bf16 %v527_v21, %v526_v9  ;;  %v353_v58 = vld [vmem:[%s16641_s4 + $0x238] sm:$0xff]  ;;  %v528_v9 = vld [vmem:[%s16642_s5 + $0x330] sm:$0xff]  ;;  %v1980_v17 = vsel %vm1971_vm6, %v12364_v45, %v12390_v37 }
 0x1de   : > { %17098 = vst [vmem:[#allocation45_spill] sm:$0xff] %v12631_v15  ;;  %2544 = vmatprep.mubr.f32.mxu1 %v12631_v15  ;;  %2016 = vrot.lane.b32.xlu0 %v1790_v32, %s10904_s12  ;;  %17105 = vst [vmem:[#allocation27_spill] sm:$0xff] %v12668_v44  ;;  %v423_v32 = vld [vmem:[%s16641_s4 + $0x468] sm:$0xff]  ;;  %v17111_v22 = vld [vmem:[#allocation69_spill] sm:$0xff] }
 0x1df   : > { %2065 = vrot.lane.b32.xlu1 %v1806_v53, %s10905_s23  ;;  %2545 = vmatmul.mubr.f32.vlgmr.msra.gmra.mrb[72].mxu1 %v12636_v39  ;;  %17107 = vst [vmem:[#allocation30_spill] sm:$0xff] %v12675_v56  ;;  %v424_v53 = vld [vmem:[%s16641_s4 + $0x470] sm:$0xff]  ;;  %17110 = vst [vmem:[#allocation38_spill] sm:$0xff] %v12706_v5  ;;  %v529_v21 = vld [vmem:[%s16642_s5 + $0x338] sm:$0xff] }
 0x1e0   : > { %9779 = vmatpush3.bf16.msra.mxu1 %v12633_v47  ;;  %v12664_v29 = vpop.permute.xlu0 %2243  ;;  %v12666_v54 = vpop.permute.xlu1 %2102  ;;  %17112 = vst [vmem:[#allocation52_spill] sm:$0xff] %v12717_v19  ;;  %v17113_v55 = vld [vmem:[#allocation66_spill] sm:$0xff]  ;;  %v17115_v47 = vld [vmem:[#allocation7_spill] sm:$0xff] }
 0x1e1   : > { %17104 = vst [vmem:[#allocation63_spill] sm:$0xff] %v12666_v54  ;;  %9781 = vmatprep.subr.bf16.mxu1 %v12641_v18  ;;  %v352_v18 = vld [vmem:[%s16641_s4 + $0x230] sm:$0xff]  ;;  %v1815_v39 = vmul.f32 %v17115_v47, %v353_v58 }
 0x1e2   : > { %2116 = vrot.lane.b32.xlu0 %v1839_v25, %s10906_s13  ;;  %v2078_v25 = vsel %vm2069_vm2, %v12423_v52, %v12446_v50 }
 0x1e3   : > { %2165 = vrot.lane.b32.xlu1 %v1855_v57, %s10907_s28  ;;  %v1885_v57 = vmul.f32 %v17111_v22, %v423_v32  ;;  %v546_v32 = vld [vmem:[%s16642_s5 + $0x3c0] sm:$0xff] }
 0x1e4   : > { %9783 = vmatpush3.bf16.msra.mxu1 %v12668_v44  ;;  %v12699_v59 = vpop.permute.xlu0 %2247  ;;  %v12701_v30 = vpop.permute.xlu1 %2151  ;;  %v1886_v44 = vmul.f32 %v17113_v55, %v424_v53  ;;  %v2029_v53 = vsel %vm2020_vm7, %v12392_v63, %v12421_v10  ;;  %v17114_v22 = vld [vmem:[#allocation70_spill] sm:$0xff] }
 0x1e5   : > { %17109 = vst [vmem:[#allocation34_spill] sm:$0xff] %v12701_v30  ;;  %9785 = vmatprep.subr.bf16.mxu1 %v12675_v56  ;;  %v1887_v55 = vmul.f32 %v17114_v22, %v425_v3  ;;  %v346_v56 = vld [vmem:[%s16641_s4 + $0x200] sm:$0xff]  ;;  %v2305_v15 = vadd.f32 %v2078_v25, %v2029_v53  ;;  %v351_v3 = vld [vmem:[%s16641_s4 + $0x228] sm:$0xff]  ;;  %v1931_v22 = vsel %vm1922_vm8, %v12329_v46, %v12362_v61  ;;  %v548_v53 = vld [vmem:[%s16642_s5 + $0x3d0] sm:$0xff] }
 0x1e6   : > { %2214 = vrot.lane.b32.xlu0 %v1871_v8, %s10908_s10  ;;  %v2126_v8 = vsel %vm2118_vm3, %v12465_v12, %v12666_v54  ;;  %v2175_v47 = vsel %vm2167_vm4, %v12528_v38, %v12701_v30  ;;  %v12777_v25 = vpack.c.bf16 %v547_v36, %v546_v32  ;;  %v549_v32 = vld [vmem:[%s16642_s5 + $0x3d8] sm:$0xff]  ;;  %v532_v36 = vld [vmem:[%s16642_s5 + $0x350] sm:$0xff] }
 0x1e7   : > { %2259 = vrot.lane.b32.xlu1 %v1885_v57, %s10909_s25  ;;  %v12759_v57 = vpack.c.bf16 %v529_v21, %v528_v9  ;;  %v530_v9 = vld [vmem:[%s16642_s5 + $0x340] sm:$0xff]  ;;  %v531_v21 = vld [vmem:[%s16642_s5 + $0x348] sm:$0xff]  ;;  %v2321_v61 = vadd.f32 %v2126_v8, %v1815_v39 }
 0x1e8   : > { %9787 = vmatpush3.bf16.msra.mxu1 %v12706_v5  ;;  %v12755_v10 = vpop.permute.xlu0 %1904  ;;  %v12757_v50 = vpop.permute.xlu1 %2200  ;;  %17119 = vst [vmem:[#allocation66_spill] sm:$0xff] %v12777_v25  ;;  %v2289_v5 = vadd.f32 %v1980_v17, %v1931_v22  ;;  %v550_v39 = vld [vmem:[%s16642_s5 + $0x3e0] sm:$0xff]  ;;  %v12814_v54 = vpack.c.bf16 %v531_v21, %v530_v9  ;;  %v17125_v9 = vld [vmem:[#allocation76_spill] sm:$0xff] }
 0x1e9   : > { %17116 = vst [vmem:[#allocation58_spill] sm:$0xff] %v12755_v10  ;;  %17117 = vst [vmem:[#allocation64_spill] sm:$0xff] %v12757_v50  ;;  %v2224_v58 = vsel %vm2216_vm5, %v12627_v41, %v12757_v50  ;;  %9789 = vmatprep.subr.bf16.mxu1 %v12717_v19  ;;  %v533_v19 = vld [vmem:[%s16642_s5 + $0x358] sm:$0xff]  ;;  %v534_v17 = vld [vmem:[%s16642_s5 + $0x360] sm:$0xff] }
 0x1ea   : > { %17118 = vst [vmem:[#allocation69_spill] sm:$0xff] %v12759_v57  ;;  %v2337_v37 = vadd.f32 %v2224_v58, %v2175_v47  ;;  %2261 = vrot.lane.b32.xlu0 %v1886_v44, %s10909_s25  ;;  %v551_v44 = vld [vmem:[%s16642_s5 + $0x3e8] sm:$0xff]  ;;  %v17120_v8 = vld [vmem:[#allocation2_spill] sm:$0xff]  ;;  %v2353_v47 = vadd.f32 %v2305_v15, %v2289_v5  ;;  %17122 = vst [vmem:[#allocation7_spill] sm:$0xff] %v12814_v54  ;;  %v12838_v23 = vpack.c.bf16 %v533_v19, %v532_v36 }
 0x1eb   : > { %2263 = vrot.lane.b32.xlu1 %v1887_v55, %s10909_s25  ;;  %v1808_v22 = vmul.f32 %v17120_v8, %v346_v56  ;;  %v535_v50 = vld [vmem:[%s16642_s5 + $0x368] sm:$0xff]  ;;  %v552_v10 = vld [vmem:[%s16642_s5 + $0x3f0] sm:$0xff]  ;;  %v2133_v56 = vsel %vm2118_vm3, %v12175_v60, %v12189_v24  ;;  %v17124_v5 = vld [vmem:[#allocation77_spill] sm:$0xff]  ;;  %v12835_v8 = vpack.c.bf16 %v549_v32, %v548_v53  ;;  %v2225_v19 = vsel %vm2216_vm5, %v12494_v4, %v12627_v41 }
 0x1ec   : > { %v2369_v58 = vadd.f32 %v2337_v37, %v2321_v61  ;;  %9791 = vmatpush3.bf16.msra.mxu1 %v12759_v57  ;;  %v12810_v30 = vpop.permute.xlu0 %1955  ;;  %v12812_v55 = vpop.permute.xlu1 %2249  ;;  %v553_v61 = vld [vmem:[%s16642_s5 + $0x3f8] sm:$0xff]  ;;  %v2231_v21 = vsel %vm2216_vm5, %v17125_v9, %v17124_v5  ;;  %v17127_v57 = vld [vmem:[#allocation8_spill] sm:$0xff]  ;;  %v2079_v41 = vsel %vm2069_vm2, %v12435_v0, %v12423_v52  ;;  %v2127_v52 = vsel %vm2118_vm3, %v12463_v7, %v12465_v12  ;;  %v17237_v60 = vld [vmem:[#allocation47_spill] sm:$0xff] }
 0x1ed   : > { %17121 = vst [vmem:[#allocation70_spill] sm:$0xff] %v12810_v30  ;;  %v17123_v37 = vld [vmem:[#allocation5_spill] sm:$0xff]  ;;  %9793 = vmatprep.subr.bf16.mxu1 %v12777_v25  ;;  %17126 = vst [vmem:[#allocation2_spill] sm:$0xff] %v12835_v8  ;;  %v1813_v62 = vmul.f32 %v17127_v57, %v351_v3  ;;  %v2273_v5 = vsel %vm2265_vm9, %v12699_v59, %v12812_v55  ;;  %v12850_v25 = vpack.c.bf16 %v535_v50, %v534_v17 }
 0x1ee   : > { %v1814_v15 = vmul.f32 %v17123_v37, %v352_v18  ;;  %v2385_v30 = vadd.f32 %v2369_v58, %v2353_v47  ;;  %17128 = vst [vmem:[#allocation5_spill] sm:$0xff] %v12838_v23  ;;  %v12840_v18 = vpack.c.bf16 %v551_v44, %v550_v39  ;;  %v17130_v37 = vld [vmem:[#allocation74_spill] sm:$0xff]  ;;  %v12852_v53 = vpack.c.bf16 %v553_v61, %v552_v10 }
 0x1ef   : > { %v2182_v24 = vsel %vm2167_vm4, %v17131_v14, %v17130_v37  ;;  %17132 = vst [vmem:[#allocation8_spill] sm:$0xff] %v12850_v25  ;;  %v2314_v57 = vadd.f32 %v2133_v56, %v1808_v22  ;;  %v1932_v10 = vsel %vm1922_vm8, %v12348_v48, %v12329_v46  ;;  %v1981_v50 = vsel %vm1971_vm6, %v12376_v51, %v12364_v45  ;;  %v17137_v22 = vld [vmem:[#allocation39_spill] sm:$0xff]  ;;  %v648_v14 = vld [vmem:[%s16642_s5 + $0x6f0] sm:$0xff] }
 0x1f0   : > { %17129 = vst [vmem:[#allocation77_spill] sm:$0xff] %v12840_v18  ;;  %17133 = vst [vmem:[#allocation74_spill] sm:$0xff] %v12852_v53  ;;  %v2330_v3 = vadd.f32 %v2231_v21, %v2182_v24  ;;  %9795 = vmatpush3.bf16.msra.mxu1 %v12814_v54  ;;  %v12859_v32 = vpop.permute.xlu0 %1918  ;;  %v12861_v36 = vpop.permute.xlu1 %1969  ;;  %v12863_v39 = vadd.f32 %v2385_v30, %v2273_v5  ;;  %v2226_v30 = vsel %vm2216_vm5, %v12597_v33, %v12494_v4  ;;  %v17139_v21 = vld [vmem:[#allocation56_spill] sm:$0xff]  ;;  %v17140_v37 = vld [vmem:[#allocation67_spill] sm:$0xff] }
 0x1f1   : > { %17134 = vst [vmem:[#allocation85_spill] sm:$0xff] %v12859_v32  ;;  %17135 = vst [vmem:[#allocation86_spill] sm:$0xff] %v12861_v36  ;;  %9797 = vmatprep.subr.bf16.mxu1 %v12835_v8  ;;  %v2080_v46 = vsel %vm2069_vm2, %v12409_v40, %v12435_v0  ;;  %v2128_v45 = vsel %vm2118_vm3, %v12448_v35, %v12463_v7  ;;  %v2176_v4 = vsel %vm2167_vm4, %v12477_v20, %v12528_v38  ;;  %v521_v54 = vld [vmem:[%s16642_s5 + $0x2f8] sm:$0xff] }
 0x1f2   : > { %17136 = vst [vmem:[#allocation87_spill] sm:$0xff] %v12863_v39  ;;  %2684 = vmatprep.mubr.f32.mxu1 %v12863_v39  ;;  %v2177_v0 = vsel %vm2167_vm4, %v12496_v49, %v12477_v20  ;;  %v2336_v44 = vadd.f32 %v2225_v19, %v2176_v4  ;;  %v1938_v17 = vsel %vm1922_vm8, %v12859_v32, %v11882_v27  ;;  %v585_v39 = vld [vmem:[%s16642_s5 + $0x4f8] sm:$0xff] }
 0x1f3   : > { %v1987_v7 = vsel %vm1971_vm6, %v12861_v36, %v17137_v22  ;;  %v1982_v12 = vsel %vm1971_vm6, %v12350_v6, %v12376_v51  ;;  %v2030_v20 = vsel %vm2020_vm7, %v12407_v1, %v12392_v63  ;;  %v2031_v27 = vsel %vm2020_vm7, %v12378_v13, %v12407_v1  ;;  %v536_v51 = vld [vmem:[%s16642_s5 + $0x370] sm:$0xff]  ;;  %v537_v63 = vld [vmem:[%s16642_s5 + $0x378] sm:$0xff] }
 0x1f4   : > { %v2335_v38 = vadd.f32 %v2226_v30, %v2177_v0  ;;  %9799 = vmatpush3.bf16.msra.mxu1 %v12838_v23  ;;  %v12924_v47 = vpop.permute.xlu0 %2018  ;;  %v12926_v58 = vpop.permute.xlu1 %2067  ;;  %v2304_v61 = vadd.f32 %v2079_v41, %v2030_v20  ;;  %v2320_v56 = vadd.f32 %v2127_v52, %v1814_v15  ;;  %v2303_v5 = vadd.f32 %v2080_v46, %v2031_v27  ;;  %v602_v15 = vld [vmem:[%s16642_s5 + $0x580] sm:$0xff]  ;;  %v603_v41 = vld [vmem:[%s16642_s5 + $0x588] sm:$0xff]  ;;  %v649_v36 = vld [vmem:[%s16642_s5 + $0x6f8] sm:$0xff] }
 0x1f5   : > { %17138 = vst [vmem:[#allocation39_spill] sm:$0xff] %v12926_v58  ;;  %v2036_v1 = vsel %vm2020_vm7, %v12924_v47, %v17139_v21  ;;  %v2085_v24 = vsel %vm2069_vm2, %v12926_v58, %v17140_v37  ;;  %9801 = vmatprep.subr.bf16.mxu1 %v12840_v18  ;;  %v2319_v19 = vadd.f32 %v2128_v45, %v1813_v62  ;;  %v490_v21 = vld [vmem:[%s16642_s5 + $0x200] sm:$0xff]  ;;  %v604_v37 = vld [vmem:[%s16642_s5 + $0x590] sm:$0xff]  ;;  %v597_v18 = vld [vmem:[%s16642_s5 + $0x558] sm:$0xff] }
 0x1f6   : > { %v2282_v30 = vadd.f32 %v1987_v7, %v1938_v17  ;;  %v2298_v4 = vadd.f32 %v2085_v24, %v2036_v1  ;;  %v1933_v52 = vsel %vm1922_vm8, %v12314_v28, %v12348_v48  ;;  %v2288_v0 = vadd.f32 %v1981_v50, %v1932_v10  ;;  %v491_v48 = vld [vmem:[%s16642_s5 + $0x208] sm:$0xff]  ;;  %v605_v24 = vld [vmem:[%s16642_s5 + $0x598] sm:$0xff]  ;;  %v350_v23 = vld [vmem:[%s16641_s4 + $0x220] sm:$0xff] }
 0x1f7   : > { %v2368_v22 = vadd.f32 %v2336_v44, %v2320_v56  ;;  %v12953_v20 = vpack.c.bf16 %v537_v63, %v536_v51  ;;  %v2362_v62 = vadd.f32 %v2330_v3, %v2314_v57  ;;  %v2287_v46 = vadd.f32 %v1982_v12, %v1933_v52  ;;  %v508_v57 = vld [vmem:[%s16642_s5 + $0x290] sm:$0xff]  ;;  %v509_v3 = vld [vmem:[%s16642_s5 + $0x298] sm:$0xff]  ;;  %v586_v51 = vld [vmem:[%s16642_s5 + $0x500] sm:$0xff] }
 0x1f8   : > { %v2367_v45 = vadd.f32 %v2335_v38, %v2319_v19  ;;  %v2346_v17 = vadd.f32 %v2298_v4, %v2282_v30  ;;  %9803 = vmatpush3.bf16.msra.mxu1 %v12850_v25  ;;  %v12956_v7 = vpop.permute.xlu0 %2004  ;;  %v12958_v27 = vpop.permute.xlu1 %2006  ;;  %v2352_v10 = vadd.f32 %v2304_v61, %v2288_v0  ;;  %v12973_v50 = vpack.c.bf16 %v603_v41, %v602_v15  ;;  %v587_v63 = vld [vmem:[%s16642_s5 + $0x508] sm:$0xff]  ;;  %v492_v4 = vld [vmem:[%s16642_s5 + $0x210] sm:$0xff]  ;;  %v493_v15 = vld [vmem:[%s16642_s5 + $0x218] sm:$0xff] }
 0x1f9   : > { %17141 = vst [vmem:[#allocation56_spill] sm:$0xff] %v12953_v20  ;;  %9805 = vmatprep.subr.bf16.mxu1 %v12852_v53  ;;  %v2351_v44 = vadd.f32 %v2303_v5, %v2287_v46  ;;  %v2274_v12 = vsel %vm2265_vm9, %v12574_v2, %v12699_v59  ;;  %v2280_v61 = vsel %vm2265_vm9, %v12312_v11, %v12327_v34  ;;  %v510_v52 = vld [vmem:[%s16642_s5 + $0x2a0] sm:$0xff]  ;;  %v511_v0 = vld [vmem:[%s16642_s5 + $0x2a8] sm:$0xff]  ;;  %v596_v25 = vld [vmem:[%s16642_s5 + $0x550] sm:$0xff] }
 0x1fa   : > { %17142 = vst [vmem:[#allocation67_spill] sm:$0xff] %v12973_v50  ;;  %v2378_v38 = vadd.f32 %v2362_v62, %v2346_v17  ;;  %v2275_v56 = vsel %vm2265_vm9, %v12664_v29, %v12574_v2  ;;  %v2384_v59 = vadd.f32 %v2368_v22, %v2352_v10  ;;  %v12993_v1 = vpack.c.bf16 %v491_v48, %v490_v21  ;;  %v589_v17 = vld [vmem:[%s16642_s5 + $0x518] sm:$0xff]  ;;  %v606_v48 = vld [vmem:[%s16642_s5 + $0x5a0] sm:$0xff]  ;;  %v607_v10 = vld [vmem:[%s16642_s5 + $0x5a8] sm:$0xff] }
 0x1fb   : > { %v2383_v2 = vadd.f32 %v2367_v45, %v2351_v44  ;;  %v13008_v30 = vpack.c.bf16 %v509_v3, %v508_v57  ;;  %v13025_v22 = vpack.c.bf16 %v587_v63, %v586_v51  ;;  %v13030_v46 = vpack.c.bf16 %v605_v24, %v604_v37  ;;  %v588_v45 = vld [vmem:[%s16642_s5 + $0x510] sm:$0xff]  ;;  %v513_v63 = vld [vmem:[%s16642_s5 + $0x2b8] sm:$0xff]  ;;  %v591_v37 = vld [vmem:[%s16642_s5 + $0x528] sm:$0xff] }
 0x1fc   : > { %17143 = vst [vmem:[#allocation88_spill] sm:$0xff] %v12993_v1  ;;  %v13001_v5 = vadd.f32 %v2378_v38, %v2280_v61  ;;  %9807 = vmatpush3.bf16.msra.mxu1 %v12953_v20  ;;  %v13004_v34 = vpop.permute.xlu0 %2053  ;;  %v13006_v19 = vpop.permute.xlu1 %2055  ;;  %v13016_v41 = vadd.f32 %v2384_v59, %v2274_v12  ;;  %v13040_v21 = vpack.c.bf16 %v493_v15, %v492_v4  ;;  %v494_v12 = vld [vmem:[%s16642_s5 + $0x220] sm:$0xff]  ;;  %v495_v38 = vld [vmem:[%s16642_s5 + $0x228] sm:$0xff]  ;;  %v512_v51 = vld [vmem:[%s16642_s5 + $0x2b0] sm:$0xff] }
 0x1fd   : > { %17145 = vst [vmem:[#allocation90_spill] sm:$0xff] %v13008_v30  ;;  %9841 = vmatprep.subr.bf16.mxu1 %v12973_v50  ;;  %17147 = vst [vmem:[#allocation92_spill] sm:$0xff] %v13025_v22  ;;  %v13028_v62 = vadd.f32 %v2383_v2, %v2275_v56  ;;  %v13054_v44 = vpack.c.bf16 %v511_v0, %v510_v52  ;;  %v13069_v61 = vpack.c.bf16 %v589_v17, %v588_v45  ;;  %v590_v59 = vld [vmem:[%s16642_s5 + $0x520] sm:$0xff]  ;;  %v608_v2 = vld [vmem:[%s16642_s5 + $0x5b0] sm:$0xff] }
 0x1fe   : > { %17144 = vst [vmem:[#allocation89_spill] sm:$0xff] %v13001_v5  ;;  %17146 = vst [vmem:[#allocation91_spill] sm:$0xff] %v13016_v41  ;;  %2475 = vmatmul.mubr.f32.vlgmr.msra.gmra.mrb[72].mxu0 %v13001_v5  ;;  %v13072_v56 = vpack.c.bf16 %v607_v10, %v606_v48  ;;  %v13081_v24 = vpack.c.bf16 %v495_v38, %v494_v12  ;;  %v609_v4 = vld [vmem:[%s16642_s5 + $0x5b8] sm:$0xff]  ;;  %v13094_v0 = vpack.c.bf16 %v513_v63, %v512_v51  ;;  %v496_v45 = vld [vmem:[%s16642_s5 + $0x230] sm:$0xff] }
 0x1ff   : > { %17148 = vst [vmem:[#allocation93_spill] sm:$0xff] %v13028_v62  ;;  %17149 = vst [vmem:[#allocation94_spill] sm:$0xff] %v13030_v46  ;;  %9747 = vmatpush3.bf16.msra.mxu0 %v12993_v1  ;;  %2685 = vmatmul.mubr.f32.vlgmr.msra.gmra.mrb[74].mxu1 %v13016_v41  ;;  %v497_v17 = vld [vmem:[%s16642_s5 + $0x238] sm:$0xff]  ;;  %v514_v48 = vld [vmem:[%s16642_s5 + $0x2c0] sm:$0xff]  ;;  %v13109_v12 = vpack.c.bf16 %v591_v37, %v590_v59  ;;  %v13112_v38 = vpack.c.bf16 %v609_v4, %v608_v2 }
 0x200   : > { %17150 = vst [vmem:[#allocation95_spill] sm:$0xff] %v13040_v21  ;;  %2614 = vmatprep.mubr.f32.mxu0 %v13028_v62  ;;  %v13049_v57 = vpop.permute.xlu0 %2104  ;;  %v13051_v3 = vpop.permute.xlu1 %2106  ;;  %9749 = vmatprep.subr.bf16.mxu0 %v13008_v30  ;;  %17151 = vst [vmem:[#allocation96_spill] sm:$0xff] %v13054_v44  ;;  %v515_v10 = vld [vmem:[%s16642_s5 + $0x2c8] sm:$0xff]  ;;  %v592_v51 = vld [vmem:[%s16642_s5 + $0x530] sm:$0xff] }
 0x201   : > { %9843 = vmatpush3.bf16.msra.mxu1 %v13025_v22  ;;  %17152 = vst [vmem:[#allocation97_spill] sm:$0xff] %v13069_v61  ;;  %17153 = vst [vmem:[#allocation98_spill] sm:$0xff] %v13072_v56  ;;  %v593_v63 = vld [vmem:[%s16642_s5 + $0x538] sm:$0xff]  ;;  %v610_v59 = vld [vmem:[%s16642_s5 + $0x5c0] sm:$0xff] }
 0x202   : > { %9845 = vmatprep.subr.bf16.mxu1 %v13030_v46  ;;  %17154 = vst [vmem:[#allocation99_spill] sm:$0xff] %v13081_v24  ;;  %17155 = vst [vmem:[#allocation100_spill] sm:$0xff] %v13094_v0  ;;  %v13121_v46 = vpack.c.bf16 %v497_v17, %v496_v45  ;;  %v611_v37 = vld [vmem:[%s16642_s5 + $0x5c8] sm:$0xff]  ;;  %v498_v45 = vld [vmem:[%s16642_s5 + $0x240] sm:$0xff] }
 0x203   : > { %9751 = vmatpush3.bf16.msra.mxu0 %v13040_v21  ;;  %17156 = vst [vmem:[#allocation101_spill] sm:$0xff] %v13109_v12  ;;  %17157 = vst [vmem:[#allocation102_spill] sm:$0xff] %v13112_v38  ;;  %v499_v17 = vld [vmem:[%s16642_s5 + $0x248] sm:$0xff]  ;;  %v517_v22 = vld [vmem:[%s16642_s5 + $0x2d8] sm:$0xff] }
 0x204   : > { %v13089_v15 = vpop.permute.xlu0 %2153  ;;  %v13091_v52 = vpop.permute.xlu1 %2155  ;;  %9753 = vmatprep.subr.bf16.mxu0 %v13054_v44  ;;  %17158 = vst [vmem:[#allocation103_spill] sm:$0xff] %v13121_v46  ;;  %v594_v50 = vld [vmem:[%s16642_s5 + $0x540] sm:$0xff]  ;;  %v595_v41 = vld [vmem:[%s16642_s5 + $0x548] sm:$0xff]  ;;  %v13161_v20 = vpack.c.bf16 %v499_v17, %v498_v45  ;;  %v500_v45 = vld [vmem:[%s16642_s5 + $0x250] sm:$0xff] }
 0x205   : > { %9847 = vmatpush3.bf16.msra.mxu1 %v13069_v61  ;;  %v516_v61 = vld [vmem:[%s16642_s5 + $0x2d0] sm:$0xff]  ;;  %v501_v17 = vld [vmem:[%s16642_s5 + $0x258] sm:$0xff]  ;;  %v519_v53 = vld [vmem:[%s16642_s5 + $0x2e8] sm:$0xff] }
 0x206   : > { %9849 = vmatprep.subr.bf16.mxu1 %v13072_v56  ;;  %v13134_v56 = vpack.c.bf16 %v515_v10, %v514_v48  ;;  %v13149_v48 = vpack.c.bf16 %v593_v63, %v592_v51  ;;  %v13152_v10 = vpack.c.bf16 %v611_v37, %v610_v59  ;;  %17162 = vst [vmem:[#allocation107_spill] sm:$0xff] %v13161_v20  ;;  %v612_v51 = vld [vmem:[%s16642_s5 + $0x5d0] sm:$0xff]  ;;  %v613_v63 = vld [vmem:[%s16642_s5 + $0x5d8] sm:$0xff]  ;;  %v17203_v44 = vld [vmem:[#allocation34_spill] sm:$0xff] }
 0x207   : > { %9755 = vmatpush3.bf16.msra.mxu0 %v13081_v24  ;;  %v2174_v21 = vsel %vm2167_vm4, %v17203_v44, %v13089_v15  ;;  %v584_v30 = vld [vmem:[%s16642_s5 + $0x4f0] sm:$0xff]  ;;  %v569_v62 = vld [vmem:[%s16642_s5 + $0x478] sm:$0xff] }
 0x208   : > { %v13129_v2 = vpop.permute.xlu0 %2202  ;;  %v13131_v4 = vpop.permute.xlu1 %2204  ;;  %9757 = vmatprep.subr.bf16.mxu0 %v13094_v0  ;;  %17159 = vst [vmem:[#allocation104_spill] sm:$0xff] %v13134_v56  ;;  %17160 = vst [vmem:[#allocation105_spill] sm:$0xff] %v13149_v48  ;;  %v17207_v5 = vld [vmem:[#allocation13_spill] sm:$0xff]  ;;  %v17238_v58 = vld [vmem:[#allocation48_spill] sm:$0xff] }
 0x209   : > { %9851 = vmatpush3.bf16.msra.mxu1 %v13109_v12  ;;  %17161 = vst [vmem:[#allocation106_spill] sm:$0xff] %v13152_v10  ;;  %v518_v12 = vld [vmem:[%s16642_s5 + $0x2e0] sm:$0xff] }
 0x20a   : > { %9853 = vmatprep.subr.bf16.mxu1 %v13112_v38  ;;  %v13174_v38 = vpack.c.bf16 %v517_v22, %v516_v61  ;;  %v13189_v22 = vpack.c.bf16 %v595_v41, %v594_v50  ;;  %v13192_v61 = vpack.c.bf16 %v613_v63, %v612_v51  ;;  %v2227_v50 = vsel %vm2216_vm5, %v12572_v26, %v12597_v33  ;;  %v614_v51 = vld [vmem:[%s16642_s5 + $0x5e0] sm:$0xff]  ;;  %v615_v63 = vld [vmem:[%s16642_s5 + $0x5e8] sm:$0xff] }
 0x20b   : > { %9759 = vmatpush3.bf16.msra.mxu0 %v13121_v46  ;;  %v13208_v41 = vpack.c.bf16 %v501_v17, %v500_v45  ;;  %v13221_v8 = vpack.c.bf16 %v519_v53, %v518_v12  ;;  %v502_v33 = vld [vmem:[%s16642_s5 + $0x260] sm:$0xff]  ;;  %v503_v26 = vld [vmem:[%s16642_s5 + $0x268] sm:$0xff]  ;;  %v2081_v45 = vsel %vm2069_vm2, %v12158_v42, %v12409_v40  ;;  %v2129_v17 = vsel %vm2118_vm3, %v12437_v16, %v12448_v35  ;;  %v520_v12 = vld [vmem:[%s16642_s5 + $0x2f0] sm:$0xff] }
 0x20c   : > { %v13169_v59 = vpop.permute.xlu0 %1908  ;;  %v13171_v37 = vpop.permute.xlu1 %1910  ;;  %9761 = vmatprep.subr.bf16.mxu0 %v13134_v56  ;;  %17163 = vst [vmem:[#allocation108_spill] sm:$0xff] %v13174_v38  ;;  %17164 = vst [vmem:[#allocation109_spill] sm:$0xff] %v13189_v22  ;;  %v2178_v53 = vsel %vm2167_vm4, %v12479_v31, %v12496_v49  ;;  %v13248_v42 = vpack.c.bf16 %v597_v18, %v596_v25  ;;  %v17169_v40 = vld [vmem:[#allocation6_spill] sm:$0xff]  ;;  %v13252_v35 = vpack.c.bf16 %v615_v63, %v614_v51  ;;  %v599_v49 = vld [vmem:[%s16642_s5 + $0x568] sm:$0xff] }
 0x20d   : > { %9855 = vmatpush3.bf16.msra.mxu1 %v13149_v48  ;;  %17165 = vst [vmem:[#allocation110_spill] sm:$0xff] %v13192_v61  ;;  %17166 = vst [vmem:[#allocation111_spill] sm:$0xff] %v13208_v41  ;;  %v2334_v16 = vadd.f32 %v2227_v50, %v2178_v53  ;;  %v598_v31 = vld [vmem:[%s16642_s5 + $0x560] sm:$0xff]  ;;  %v13269_v50 = vpack.c.bf16 %v503_v26, %v502_v33  ;;  %v616_v51 = vld [vmem:[%s16642_s5 + $0x5f0] sm:$0xff] }
 0x20e   : > { %9857 = vmatprep.subr.bf16.mxu1 %v13152_v10  ;;  %17167 = vst [vmem:[#allocation112_spill] sm:$0xff] %v13221_v8  ;;  %17168 = vst [vmem:[#allocation113_spill] sm:$0xff] %v13248_v42  ;;  %v617_v63 = vld [vmem:[%s16642_s5 + $0x5f8] sm:$0xff]  ;;  %v504_v33 = vld [vmem:[%s16642_s5 + $0x270] sm:$0xff] }
 0x20f   : > { %9763 = vmatpush3.bf16.msra.mxu0 %v13161_v20  ;;  %17170 = vst [vmem:[#allocation6_spill] sm:$0xff] %v13252_v35  ;;  %v17171_v20 = vld [vmem:[#allocation50_spill] sm:$0xff]  ;;  %v505_v26 = vld [vmem:[%s16642_s5 + $0x278] sm:$0xff] }
 0x210   : > { %v13216_v10 = vpop.permute.xlu0 %1959  ;;  %v13218_v48 = vpop.permute.xlu1 %1961  ;;  %9765 = vmatprep.subr.bf16.mxu0 %v13174_v38  ;;  %v1812_v38 = vmul.f32 %v17169_v40, %v350_v23  ;;  %v1983_v25 = vsel %vm1971_vm6, %v17171_v20, %v12350_v6  ;;  %v17172_v23 = vld [vmem:[#allocation61_spill] sm:$0xff]  ;;  %17173 = vst [vmem:[#allocation50_spill] sm:$0xff] %v13269_v50 }
 0x211   : > { %9859 = vmatpush3.bf16.msra.mxu1 %v13189_v22  ;;  %v2032_v18 = vsel %vm2020_vm7, %v17172_v23, %v12378_v13  ;;  %v13282_v13 = vpack.c.bf16 %v521_v54, %v520_v12  ;;  %v17175_v23 = vld [vmem:[#allocation44_spill] sm:$0xff]  ;;  %v571_v54 = vld [vmem:[%s16642_s5 + $0x488] sm:$0xff]  ;;  %v13313_v22 = vpack.c.bf16 %v505_v26, %v504_v33  ;;  %v17180_v26 = vld [vmem:[#allocation54_spill] sm:$0xff] }
 0x212   : > { %9861 = vmatprep.subr.bf16.mxu1 %v13192_v61  ;;  %v2302_v53 = vadd.f32 %v2081_v45, %v2032_v18  ;;  %v2318_v40 = vadd.f32 %v2129_v17, %v1812_v38  ;;  %v1934_v38 = vsel %vm1922_vm8, %v17175_v23, %v12314_v28  ;;  %v570_v45 = vld [vmem:[%s16642_s5 + $0x480] sm:$0xff]  ;;  %v13301_v17 = vpack.c.bf16 %v599_v49, %v598_v31  ;;  %v600_v28 = vld [vmem:[%s16642_s5 + $0x570] sm:$0xff]  ;;  %v601_v23 = vld [vmem:[%s16642_s5 + $0x578] sm:$0xff] }
 0x213   : > { %9767 = vmatpush3.bf16.msra.mxu0 %v13208_v41  ;;  %17174 = vst [vmem:[#allocation61_spill] sm:$0xff] %v13282_v13  ;;  %v2286_v12 = vadd.f32 %v1983_v25, %v1934_v38  ;;  %v13304_v61 = vpack.c.bf16 %v617_v63, %v616_v51  ;;  %17178 = vst [vmem:[#allocation115_spill] sm:$0xff] %v13313_v22  ;;  %v667_v31 = vld [vmem:[%s16642_s5 + $0x788] sm:$0xff]  ;;  %v13326_v63 = vpack.c.bf16 %v571_v54, %v570_v45  ;;  %v572_v38 = vld [vmem:[%s16642_s5 + $0x490] sm:$0xff] }
 0x214   : > { %v13277_v6 = vpop.permute.xlu0 %2008  ;;  %v13279_v20 = vpop.permute.xlu1 %2010  ;;  %9769 = vmatprep.subr.bf16.mxu0 %v13221_v8  ;;  %17176 = vst [vmem:[#allocation44_spill] sm:$0xff] %v13301_v17  ;;  %v2366_v18 = vadd.f32 %v2334_v16, %v2318_v40  ;;  %v666_v16 = vld [vmem:[%s16642_s5 + $0x780] sm:$0xff]  ;;  %v555_v33 = vld [vmem:[%s16642_s5 + $0x408] sm:$0xff]  ;;  %v573_v45 = vld [vmem:[%s16642_s5 + $0x498] sm:$0xff]  ;;  %v13345_v54 = vpack.c.bf16 %v601_v23, %v600_v28 }
 0x215   : > { %9863 = vmatpush3.bf16.msra.mxu1 %v13248_v42  ;;  %17177 = vst [vmem:[#allocation114_spill] sm:$0xff] %v13304_v61  ;;  %v2350_v49 = vadd.f32 %v2302_v53, %v2286_v12  ;;  %17179 = vst [vmem:[#allocation116_spill] sm:$0xff] %v13326_v63  ;;  %v554_v40 = vld [vmem:[%s16642_s5 + $0x400] sm:$0xff]  ;;  %v2276_v53 = vsel %vm2265_vm9, %v17180_v26, %v12664_v29  ;;  %v557_v28 = vld [vmem:[%s16642_s5 + $0x418] sm:$0xff] }
 0x216   : > { %9865 = vmatprep.subr.bf16.mxu1 %v13252_v35  ;;  %17181 = vst [vmem:[#allocation54_spill] sm:$0xff] %v13345_v54  ;;  %v13348_v35 = vpack.c.bf16 %v667_v31, %v666_v16  ;;  %v13351_v29 = vpack.c.bf16 %v555_v33, %v554_v40  ;;  %v355_v23 = vld [vmem:[%s16641_s4 + $0x248] sm:$0xff]  ;;  %v2222_v16 = vsel %vm2216_vm5, %v13129_v2, %v13131_v4  ;;  %v574_v31 = vld [vmem:[%s16642_s5 + $0x4a0] sm:$0xff] }
 0x217   : > { %9771 = vmatpush3.bf16.msra.mxu0 %v13269_v50  ;;  %v2382_v12 = vadd.f32 %v2366_v18, %v2350_v49  ;;  %v556_v18 = vld [vmem:[%s16642_s5 + $0x410] sm:$0xff]  ;;  %v575_v49 = vld [vmem:[%s16642_s5 + $0x4a8] sm:$0xff]  ;;  %v2076_v40 = vsel %vm2069_vm2, %v13004_v34, %v13006_v19  ;;  %v2124_v33 = vsel %vm2118_vm3, %v13049_v57, %v13051_v3 }
 0x218   : > { %v13321_v25 = vpop.permute.xlu0 %2057  ;;  %v13323_v51 = vpop.permute.xlu1 %2059  ;;  %9773 = vmatprep.subr.bf16.mxu0 %v13282_v13  ;;  %17182 = vst [vmem:[#allocation117_spill] sm:$0xff] %v13348_v35  ;;  %17183 = vst [vmem:[#allocation118_spill] sm:$0xff] %v13351_v29 }
 0x219   : > { %9867 = vmatpush3.bf16.msra.mxu1 %v13301_v17  ;;  %v13353_v26 = vadd.f32 %v2382_v12, %v2276_v53  ;;  %v13360_v17 = vpack.c.bf16 %v573_v45, %v572_v38  ;;  %v2173_v53 = vsel %vm2167_vm4, %v13089_v15, %v13091_v52  ;;  %v13397_v38 = vpack.c.bf16 %v557_v28, %v556_v18  ;;  %v17187_v45 = vld [vmem:[#allocation16_spill] sm:$0xff]  ;;  %v559_v18 = vld [vmem:[%s16642_s5 + $0x428] sm:$0xff] }
 0x21a   : > { %9869 = vmatprep.subr.bf16.mxu1 %v13304_v61  ;;  %v1817_v12 = vmul.f32 %v17187_v45, %v355_v23  ;;  %v17189_v28 = vld [vmem:[#allocation4_spill] sm:$0xff] }
 0x21b   : > { %9775 = vmatpush3.bf16.msra.mxu0 %v13313_v22  ;;  %17184 = vst [vmem:[#allocation119_spill] sm:$0xff] %v13353_v26  ;;  %17185 = vst [vmem:[#allocation120_spill] sm:$0xff] %v13360_v17  ;;  %v17192_v22 = vld [vmem:[#allocation58_spill] sm:$0xff]  ;;  %v568_v15 = vld [vmem:[%s16642_s5 + $0x470] sm:$0xff] }
 0x21c   : > { %v13355_v42 = vpop.permute.xlu0 %2108  ;;  %v13357_v13 = vpop.permute.xlu1 %2253  ;;  %9809 = vmatprep.subr.bf16.mxu0 %v13326_v63  ;;  %17186 = vst [vmem:[#allocation121_spill] sm:$0xff] %v13397_v38  ;;  %v13405_v63 = vpack.c.bf16 %v575_v49, %v574_v31  ;;  %v576_v31 = vld [vmem:[%s16642_s5 + $0x4b0] sm:$0xff]  ;;  %v577_v49 = vld [vmem:[%s16642_s5 + $0x4b8] sm:$0xff]  ;;  %v2323_v45 = vadd.f32 %v2124_v33, %v1817_v12 }
 0x21d   : > { %9871 = vmatpush3.bf16.msra.mxu1 %v13345_v54  ;;  %v13439_v24 = vpack.c.bf16 %v577_v49, %v576_v31  ;;  %v561_v33 = vld [vmem:[%s16642_s5 + $0x438] sm:$0xff]  ;;  %v562_v49 = vld [vmem:[%s16642_s5 + $0x440] sm:$0xff] }
 0x21e   : > { %2615 = vmatmul.mubr.f32.vlgmr.msra.gmra.mrb[74].mxu0 %v13353_v26  ;;  %9905 = vmatprep.subr.bf16.mxu1 %v13348_v35  ;;  %v2339_v35 = vadd.f32 %v2222_v16, %v2173_v53  ;;  %17188 = vst [vmem:[#allocation16_spill] sm:$0xff] %v13405_v63  ;;  %v558_v26 = vld [vmem:[%s16642_s5 + $0x420] sm:$0xff]  ;;  %v2027_v16 = vsel %vm2020_vm7, %v12956_v7, %v12958_v27 }
 0x21f   : > { %9811 = vmatpush3.bf16.msra.mxu0 %v13351_v29  ;;  %v17190_v29 = vld [vmem:[#allocation70_spill] sm:$0xff]  ;;  %v2307_v53 = vadd.f32 %v2076_v40, %v2027_v16  ;;  %v13432_v8 = vpack.c.bf16 %v559_v18, %v558_v26  ;;  %v560_v40 = vld [vmem:[%s16642_s5 + $0x430] sm:$0xff] }
 0x220   : > { %v13400_v54 = vpop.permute.xlu0 %2157  ;;  %v13402_v61 = vpop.permute.xlu1 %1914  ;;  %9813 = vmatprep.subr.bf16.mxu0 %v13360_v17  ;;  %v1978_v23 = vsel %vm1971_vm6, %v17190_v29, %v17189_v28  ;;  %v17191_v17 = vld [vmem:[#allocation3_spill] sm:$0xff]  ;;  %v2371_v56 = vadd.f32 %v2339_v35, %v2323_v45  ;;  %17194 = vst [vmem:[#allocation70_spill] sm:$0xff] %v13439_v24  ;;  %v578_v35 = vld [vmem:[%s16642_s5 + $0x4c0] sm:$0xff]  ;;  %v13454_v12 = vpack.c.bf16 %v561_v33, %v560_v40  ;;  %v580_v45 = vld [vmem:[%s16642_s5 + $0x4d0] sm:$0xff] }
 0x221   : > { %v1929_v50 = vsel %vm1922_vm8, %v17192_v22, %v17191_v17  ;;  %17193 = vst [vmem:[#allocation4_spill] sm:$0xff] %v13432_v8  ;;  %v356_v33 = vld [vmem:[%s16641_s4 + $0x250] sm:$0xff] }
 0x222   : > { %v2291_v41 = vadd.f32 %v1978_v23, %v1929_v50  ;;  %v579_v50 = vld [vmem:[%s16642_s5 + $0x4c8] sm:$0xff]  ;;  %17195 = vst [vmem:[#allocation3_spill] sm:$0xff] %v13454_v12 }
 0x223   : > { %9815 = vmatpush3.bf16.msra.mxu0 %v13397_v38  ;;  %v13461_v31 = vpack.c.bf16 %v579_v50, %v578_v35  ;;  %v357_v35 = vld [vmem:[%s16641_s4 + $0x258] sm:$0xff]  ;;  %v354_v50 = vld [vmem:[%s16641_s4 + $0x240] sm:$0xff]  ;;  %v17202_v38 = vld [vmem:[#allocation63_spill] sm:$0xff] }
 0x224   : > { %v13434_v46 = vpop.permute.xlu0 %2206  ;;  %v13436_v0 = vpop.permute.xlu1 %1965  ;;  %9817 = vmatprep.subr.bf16.mxu0 %v13405_v63  ;;  %v2355_v26 = vadd.f32 %v2307_v53, %v2291_v41  ;;  %v563_v41 = vld [vmem:[%s16642_s5 + $0x448] sm:$0xff] }
 0x225   : > { %17196 = vst [vmem:[#allocation58_spill] sm:$0xff] %v13461_v31 }
 0x226   : > { %v2387_v16 = vadd.f32 %v2371_v56, %v2355_v26  ;;  %v581_v56 = vld [vmem:[%s16642_s5 + $0x4d8] sm:$0xff]  ;;  %v13491_v26 = vpack.c.bf16 %v563_v41, %v562_v49  ;;  %v564_v49 = vld [vmem:[%s16642_s5 + $0x450] sm:$0xff] }
 0x227   : > { %9819 = vmatpush3.bf16.msra.mxu0 %v13432_v8  ;;  %v13503_v63 = vpack.c.bf16 %v581_v56, %v580_v45  ;;  %v565_v41 = vld [vmem:[%s16642_s5 + $0x458] sm:$0xff]  ;;  %v566_v45 = vld [vmem:[%s16642_s5 + $0x460] sm:$0xff]  ;;  %v567_v56 = vld [vmem:[%s16642_s5 + $0x468] sm:$0xff] }
 0x228   : > { %v13456_v18 = vpop.permute.xlu0 %2251  ;;  %v13458_v23 = vpop.permute.xlu1 %2014  ;;  %9821 = vmatprep.subr.bf16.mxu0 %v13439_v24  ;;  %17198 = vst [vmem:[#allocation123_spill] sm:$0xff] %v13491_v26  ;;  %v17199_v24 = vld [vmem:[#allocation64_spill] sm:$0xff]  ;;  %v13547_v44 = vpack.c.bf16 %v565_v41, %v564_v49  ;;  %v17211_v49 = vld [vmem:[#allocation81_spill] sm:$0xff] }
 0x229   : > { %v2271_v53 = vsel %vm2265_vm9, %v13456_v18, %v13357_v13  ;;  %17200 = vst [vmem:[#allocation64_spill] sm:$0xff] %v13503_v63  ;;  %v1930_v41 = vsel %vm1922_vm8, %v17211_v49, %v17192_v22  ;;  %v1977_v22 = vsel %vm1971_vm6, %v17189_v28, %v13216_v10 }
 0x22a   : > { %v13479_v40 = vadd.f32 %v2387_v16, %v2271_v53  ;;  %v2223_v16 = vsel %vm2216_vm5, %v17199_v24, %v13129_v2  ;;  %v582_v24 = vld [vmem:[%s16642_s5 + $0x4e0] sm:$0xff]  ;;  %v583_v2 = vld [vmem:[%s16642_s5 + $0x4e8] sm:$0xff] }
 0x22b   : > { %9823 = vmatpush3.bf16.msra.mxu0 %v13454_v12  ;;  %v2338_v1 = vadd.f32 %v2223_v16, %v2174_v21  ;;  %v13562_v21 = vpack.c.bf16 %v583_v2, %v582_v24  ;;  %v13564_v16 = vpack.c.bf16 %v567_v56, %v566_v45  ;;  %v2221_v24 = vsel %vm2216_vm5, %v13131_v4, %v13434_v46 }
 0x22c   : > { %17197 = vst [vmem:[#allocation122_spill] sm:$0xff] %v13479_v40  ;;  %2754 = vmatprep.mubr.f32.mxu0 %v13479_v40  ;;  %v13498_v53 = vpop.permute.xlu0 %2255  ;;  %v13500_v8 = vpop.permute.xlu1 %2110  ;;  %9825 = vmatprep.subr.bf16.mxu0 %v13461_v31  ;;  %v17201_v31 = vld [vmem:[#allocation14_spill] sm:$0xff]  ;;  %v2125_v40 = vsel %vm2118_vm3, %v17202_v38, %v13049_v57  ;;  %v17205_v57 = vld [vmem:[#allocation84_spill] sm:$0xff]  ;;  %v13580_v2 = vpack.c.bf16 %v569_v62, %v568_v15 }
 0x22d   : > { %v1816_v12 = vmul.f32 %v17201_v31, %v354_v50  ;;  %v17204_v31 = vld [vmem:[#allocation82_spill] sm:$0xff]  ;;  %v2077_v38 = vsel %vm2069_vm2, %v17205_v57, %v13004_v34  ;;  %17206 = vst [vmem:[#allocation14_spill] sm:$0xff] %v13547_v44  ;;  %17209 = vst [vmem:[#allocation63_spill] sm:$0xff] %v13562_v21  ;;  %v17212_v57 = vld [vmem:[#allocation83_spill] sm:$0xff]  ;;  %v2123_v62 = vsel %vm2118_vm3, %v13051_v3, %v13355_v42 }
 0x22e   : > { %v1979_v50 = vsel %vm1971_vm6, %v17204_v31, %v17190_v29  ;;  %v1818_v29 = vmul.f32 %v17207_v5, %v356_v33  ;;  %v17208_v31 = vld [vmem:[#allocation15_spill] sm:$0xff]  ;;  %17210 = vst [vmem:[#allocation34_spill] sm:$0xff] %v13564_v16  ;;  %v2028_v5 = vsel %vm2020_vm7, %v17212_v57, %v12956_v7  ;;  %17214 = vst [vmem:[#allocation84_spill] sm:$0xff] %v13580_v2 }
 0x22f   : > { %9827 = vmatpush3.bf16.msra.mxu0 %v13491_v26  ;;  %v1819_v11 = vmul.f32 %v17208_v31, %v357_v35  ;;  %v2322_v33 = vadd.f32 %v2125_v40, %v1816_v12  ;;  %v13574_v35 = vpack.c.bf16 %v585_v39, %v584_v30  ;;  %v2290_v31 = vadd.f32 %v1979_v50, %v1930_v41 }
 0x230   : > { %v13557_v9 = vpop.permute.xlu0 %1912  ;;  %v13559_v34 = vpop.permute.xlu1 %2159  ;;  %9829 = vmatprep.subr.bf16.mxu0 %v13503_v63  ;;  %v2306_v26 = vadd.f32 %v2077_v38, %v2028_v5  ;;  %v2074_v39 = vsel %vm2069_vm2, %v13321_v25, %v13323_v51  ;;  %v2122_v7 = vsel %vm2118_vm3, %v13355_v42, %v13500_v8  ;;  %v2075_v30 = vsel %vm2069_vm2, %v13006_v19, %v13321_v25  ;;  %v634_v19 = vld [vmem:[%s16642_s5 + $0x680] sm:$0xff]  ;;  %v17235_v63 = vld [vmem:[#allocation43_spill] sm:$0xff] }
 0x231   : > { %17213 = vst [vmem:[#allocation82_spill] sm:$0xff] %v13574_v35  ;;  %v2370_v45 = vadd.f32 %v2338_v1, %v2322_v33  ;;  %v1976_v1 = vsel %vm1971_vm6, %v13216_v10, %v13218_v48  ;;  %v2172_v4 = vsel %vm2167_vm4, %v13091_v52, %v13400_v54  ;;  %v635_v10 = vld [vmem:[%s16642_s5 + $0x688] sm:$0xff]  ;;  %v2025_v3 = vsel %vm2020_vm7, %v13277_v6, %v13279_v20 }
 0x232   : > { %v2340_v52 = vadd.f32 %v2221_v24, %v2172_v4  ;;  %v2171_v42 = vsel %vm2167_vm4, %v13400_v54, %v13559_v34  ;;  %v2026_v40 = vsel %vm2020_vm7, %v12958_v27, %v13277_v6  ;;  %v2309_v56 = vadd.f32 %v2074_v39, %v2025_v3  ;;  %v637_v24 = vld [vmem:[%s16642_s5 + $0x698] sm:$0xff] }
 0x233   : > { %9831 = vmatpush3.bf16.msra.mxu0 %v13547_v44  ;;  %v2325_v50 = vadd.f32 %v2122_v7, %v1819_v11  ;;  %v1927_v15 = vsel %vm1922_vm8, %v13169_v59, %v13171_v37  ;;  %v2308_v49 = vadd.f32 %v2075_v30, %v2026_v40  ;;  %v2324_v54 = vadd.f32 %v2123_v62, %v1818_v29  ;;  %v618_v29 = vld [vmem:[%s16642_s5 + $0x600] sm:$0xff]  ;;  %v679_v44 = vld [vmem:[%s16642_s5 + $0x7e8] sm:$0xff] }
 0x234   : > { %v13611_v28 = vpop.permute.xlu0 %1963  ;;  %v13613_v12 = vpop.permute.xlu1 %2208  ;;  %9833 = vmatprep.subr.bf16.mxu0 %v13562_v21  ;;  %v13643_v41 = vpack.c.bf16 %v635_v10, %v634_v19  ;;  %v1928_v27 = vsel %vm1922_vm8, %v17191_v17, %v13169_v59  ;;  %v2293_v6 = vadd.f32 %v1976_v1, %v1927_v15  ;;  %v2272_v59 = vsel %vm2265_vm9, %v12812_v55, %v13456_v18  ;;  %v636_v17 = vld [vmem:[%s16642_s5 + $0x690] sm:$0xff]  ;;  %v650_v30 = vld [vmem:[%s16642_s5 + $0x700] sm:$0xff]  ;;  %v651_v55 = vld [vmem:[%s16642_s5 + $0x708] sm:$0xff] }
 0x235   : > { %v2220_v25 = vsel %vm2216_vm5, %v13434_v46, %v13613_v12  ;;  %v2354_v46 = vadd.f32 %v2306_v26, %v2290_v31  ;;  %v619_v26 = vld [vmem:[%s16642_s5 + $0x608] sm:$0xff]  ;;  %v2292_v33 = vadd.f32 %v1977_v22, %v1928_v27  ;;  %v2372_v31 = vadd.f32 %v2340_v52, %v2324_v54  ;;  %v620_v18 = vld [vmem:[%s16642_s5 + $0x610] sm:$0xff]  ;;  %v621_v52 = vld [vmem:[%s16642_s5 + $0x618] sm:$0xff] }
 0x236   : > { %v2341_v38 = vadd.f32 %v2220_v25, %v2171_v42  ;;  %17215 = vst [vmem:[#allocation13_spill] sm:$0xff] %v13643_v41  ;;  %v2357_v39 = vadd.f32 %v2309_v56, %v2293_v6  ;;  %v13671_v22 = vpack.c.bf16 %v619_v26, %v618_v29  ;;  %v13693_v3 = vpack.c.bf16 %v637_v24, %v636_v17  ;;  %v668_v42 = vld [vmem:[%s16642_s5 + $0x790] sm:$0xff]  ;;  %v638_v56 = vld [vmem:[%s16642_s5 + $0x6a0] sm:$0xff]  ;;  %v653_v27 = vld [vmem:[%s16642_s5 + $0x718] sm:$0xff] }
 0x237   : > { %9835 = vmatpush3.bf16.msra.mxu0 %v13564_v16  ;;  %v2386_v7 = vadd.f32 %v2370_v45, %v2354_v46  ;;  %v2356_v1 = vadd.f32 %v2308_v49, %v2292_v33  ;;  %v2270_v45 = vsel %vm2265_vm9, %v13357_v13, %v13498_v53  ;;  %v669_v13 = vld [vmem:[%s16642_s5 + $0x798] sm:$0xff]  ;;  %v13717_v15 = vpack.c.bf16 %v651_v55, %v650_v30  ;;  %v652_v46 = vld [vmem:[%s16642_s5 + $0x710] sm:$0xff]  ;;  %v622_v6 = vld [vmem:[%s16642_s5 + $0x620] sm:$0xff] }
 0x238   : > { %v2373_v11 = vadd.f32 %v2341_v38, %v2325_v50  ;;  %v13649_v57 = vpop.permute.xlu0 %2012  ;;  %v13651_v5 = vpop.permute.xlu1 %2063  ;;  %9837 = vmatprep.subr.bf16.mxu0 %v13574_v35  ;;  %17216 = vst [vmem:[#allocation15_spill] sm:$0xff] %v13671_v22  ;;  %17219 = vst [vmem:[#allocation124_spill] sm:$0xff] %v13693_v3  ;;  %v639_v50 = vld [vmem:[%s16642_s5 + $0x6a8] sm:$0xff]  ;;  %v13722_v54 = vpack.c.bf16 %v621_v52, %v620_v18  ;;  %v640_v17 = vld [vmem:[%s16642_s5 + $0x6b0] sm:$0xff] }
 0x239   : > { %v13682_v62 = vadd.f32 %v2386_v7, %v2272_v59  ;;  %v2388_v25 = vadd.f32 %v2372_v31, %v2356_v1  ;;  %17221 = vst [vmem:[#allocation126_spill] sm:$0xff] %v13717_v15  ;;  %v13741_v26 = vpack.c.bf16 %v639_v50, %v638_v56  ;;  %v623_v33 = vld [vmem:[%s16642_s5 + $0x628] sm:$0xff]  ;;  %v670_v31 = vld [vmem:[%s16642_s5 + $0x7a0] sm:$0xff]  ;;  %v641_v24 = vld [vmem:[%s16642_s5 + $0x6b8] sm:$0xff] }
 0x23a   : > { %v2389_v10 = vadd.f32 %v2373_v11, %v2357_v39  ;;  %17223 = vst [vmem:[#allocation128_spill] sm:$0xff] %v13722_v54  ;;  %v671_v59 = vld [vmem:[%s16642_s5 + $0x7a8] sm:$0xff]  ;;  %v13760_v39 = vpack.c.bf16 %v653_v27, %v652_v46  ;;  %v654_v7 = vld [vmem:[%s16642_s5 + $0x720] sm:$0xff]  ;;  %v13767_v1 = vpack.c.bf16 %v623_v33, %v622_v6  ;;  %v624_v18 = vld [vmem:[%s16642_s5 + $0x630] sm:$0xff] }
 0x23b   : > { %9839 = vmatpush3.bf16.msra.mxu0 %v13580_v2  ;;  %17217 = vst [vmem:[#allocation81_spill] sm:$0xff] %v13682_v62  ;;  %v13719_v49 = vadd.f32 %v2388_v25, %v2270_v45  ;;  %17225 = vst [vmem:[#allocation130_spill] sm:$0xff] %v13741_v26  ;;  %v13769_v30 = vpack.c.bf16 %v671_v59, %v670_v31  ;;  %v655_v55 = vld [vmem:[%s16642_s5 + $0x728] sm:$0xff]  ;;  %v625_v45 = vld [vmem:[%s16642_s5 + $0x638] sm:$0xff]  ;;  %v13791_v25 = vpack.c.bf16 %v641_v24, %v640_v17 }
 0x23c   : > { %v13688_v4 = vpop.permute.xlu0 %2061  ;;  %v13690_v19 = vpop.permute.xlu1 %2257  ;;  %9873 = vmatprep.subr.bf16.mxu0 %v13643_v41  ;;  %17226 = vst [vmem:[#allocation131_spill] sm:$0xff] %v13760_v39  ;;  %17227 = vst [vmem:[#allocation132_spill] sm:$0xff] %v13767_v1  ;;  %v360_v52 = vld [vmem:[%s16641_s4 + $0x270] sm:$0xff]  ;;  %v673_v56 = vld [vmem:[%s16642_s5 + $0x7b8] sm:$0xff]  ;;  %v13824_v24 = vpack.c.bf16 %v655_v55, %v654_v7 }
 0x23d   : > { %17218 = vst [vmem:[#allocation83_spill] sm:$0xff] %v13690_v19  ;;  %v2269_v40 = vsel %vm2265_vm9, %v13498_v53, %v13690_v19  ;;  %17222 = vst [vmem:[#allocation127_spill] sm:$0xff] %v13719_v49  ;;  %v13724_v53 = vpack.c.bf16 %v669_v13, %v668_v42  ;;  %v642_v50 = vld [vmem:[%s16642_s5 + $0x6c0] sm:$0xff]  ;;  %v359_v46 = vld [vmem:[%s16641_s4 + $0x268] sm:$0xff] }
 0x23e   : > { %2755 = vmatmul.mubr.f32.vlgmr.msra.gmra.mrb[76].mxu0 %v13682_v62  ;;  %v13715_v38 = vadd.f32 %v2389_v10, %v2269_v40  ;;  %17228 = vst [vmem:[#allocation133_spill] sm:$0xff] %v13769_v30  ;;  %v358_v10 = vld [vmem:[%s16641_s4 + $0x260] sm:$0xff]  ;;  %17229 = vst [vmem:[#allocation134_spill] sm:$0xff] %v13791_v25  ;;  %v672_v40 = vld [vmem:[%s16642_s5 + $0x7b0] sm:$0xff]  ;;  %v1821_v32 = vmul.f32 %v17237_v60, %v359_v46 }
 0x23f   : > { %9875 = vmatpush3.bf16.msra.mxu0 %v13671_v22  ;;  %17224 = vst [vmem:[#allocation129_spill] sm:$0xff] %v13724_v53  ;;  %v361_v27 = vld [vmem:[%s16641_s4 + $0x278] sm:$0xff]  ;;  %v656_v6 = vld [vmem:[%s16642_s5 + $0x730] sm:$0xff]  ;;  %v643_v31 = vld [vmem:[%s16642_s5 + $0x6c8] sm:$0xff] }
 0x240   : > { %17220 = vst [vmem:[#allocation125_spill] sm:$0xff] %v13715_v38  ;;  %v13735_v11 = vpop.permute.xlu0 %2112  ;;  %2824 = vmatprep.mubr.f32.mxu1 %v13715_v38  ;;  %v13738_v29 = vpop.permute.xlu1 %2114  ;;  %9877 = vmatprep.subr.bf16.mxu0 %v13693_v3  ;;  %v657_v33 = vld [vmem:[%s16642_s5 + $0x738] sm:$0xff]  ;;  %v626_v59 = vld [vmem:[%s16642_s5 + $0x640] sm:$0xff]  ;;  %v627_v17 = vld [vmem:[%s16642_s5 + $0x648] sm:$0xff]  ;;  %v13848_v3 = vpack.c.bf16 %v673_v56, %v672_v40  ;;  %v13877_v2 = vpack.c.bf16 %v643_v31, %v642_v50 }
 0x241   : > { %2825 = vmatmul.mubr.f32.vlgmr.msra.gmra.mrb[76].mxu1 %v13719_v49  ;;  %17230 = vst [vmem:[#allocation135_spill] sm:$0xff] %v13824_v24  ;;  %v644_v7 = vld [vmem:[%s16642_s5 + $0x6d0] sm:$0xff]  ;;  %v645_v55 = vld [vmem:[%s16642_s5 + $0x6d8] sm:$0xff]  ;;  %v646_v40 = vld [vmem:[%s16642_s5 + $0x6e0] sm:$0xff]  ;;  %v13898_v38 = vmul.f32 %v17235_v63, %v360_v52  ;;  %v13914_v63 = vpack.c.bf16 %v657_v33, %v656_v6  ;;  %v13916_v52 = vpack.c.bf16 %v627_v17, %v626_v59 }
 0x242   : > { %9907 = vmatpush3.bf16.msra.mxu1 %v13717_v15  ;;  %v659_v15 = vld [vmem:[%s16642_s5 + $0x748] sm:$0xff]  ;;  %17232 = vst [vmem:[#allocation137_spill] sm:$0xff] %v13848_v3  ;;  %v628_v49 = vld [vmem:[%s16642_s5 + $0x650] sm:$0xff]  ;;  %v629_v22 = vld [vmem:[%s16642_s5 + $0x658] sm:$0xff] }
 0x243   : > { %9879 = vmatpush3.bf16.msra.mxu0 %v13722_v54  ;;  %9909 = vmatprep.subr.bf16.mxu1 %v13724_v53  ;;  %v675_v53 = vld [vmem:[%s16642_s5 + $0x7c8] sm:$0xff]  ;;  %v658_v54 = vld [vmem:[%s16642_s5 + $0x740] sm:$0xff]  ;;  %v676_v41 = vld [vmem:[%s16642_s5 + $0x7d0] sm:$0xff]  ;;  %17233 = vst [vmem:[#allocation138_spill] sm:$0xff] %v13877_v2 }
 0x244   : > { %v13786_v42 = vpop.permute.xlu0 %2161  ;;  %v13788_v13 = vpop.permute.xlu1 %2163  ;;  %9881 = vmatprep.subr.bf16.mxu0 %v13741_v26  ;;  %v674_v26 = vld [vmem:[%s16642_s5 + $0x7c0] sm:$0xff]  ;;  %v647_v56 = vld [vmem:[%s16642_s5 + $0x6e8] sm:$0xff]  ;;  %17239 = vst [vmem:[#allocation43_spill] sm:$0xff] %v13914_v63  ;;  %17240 = vst [vmem:[#allocation47_spill] sm:$0xff] %v13916_v52  ;;  %v13931_v46 = vpack.c.bf16 %v659_v15, %v658_v54  ;;  %v13947_v15 = vpack.c.bf16 %v629_v22, %v628_v49  ;;  %v1975_v22 = vsel %vm1971_vm6, %v13218_v48, %v13611_v28 }
 0x245   : > { %v630_v35 = vld [vmem:[%s16642_s5 + $0x660] sm:$0xff]  ;;  %v631_v16 = vld [vmem:[%s16642_s5 + $0x668] sm:$0xff]  ;;  %v680_v60 = vld [vmem:[%s16642_s5 + $0x7f0] sm:$0xff]  ;;  %v1925_v48 = vsel %vm1922_vm8, %v13557_v9, %v13402_v61 }
 0x246   : > { %9911 = vmatpush3.bf16.msra.mxu1 %v13760_v39  ;;  %v13846_v39 = vpack.c.bf16 %v625_v45, %v624_v18  ;;  %v660_v18 = vld [vmem:[%s16642_s5 + $0x750] sm:$0xff]  ;;  %v661_v45 = vld [vmem:[%s16642_s5 + $0x758] sm:$0xff]  ;;  %v678_v21 = vld [vmem:[%s16642_s5 + $0x7e0] sm:$0xff]  ;;  %17242 = vst [vmem:[#allocation139_spill] sm:$0xff] %v13931_v46 }
 0x247   : > { %9883 = vmatpush3.bf16.msra.mxu0 %v13767_v1  ;;  %9913 = vmatprep.subr.bf16.mxu1 %v13769_v30  ;;  %v677_v30 = vld [vmem:[%s16642_s5 + $0x7d8] sm:$0xff]  ;;  %v662_v50 = vld [vmem:[%s16642_s5 + $0x760] sm:$0xff]  ;;  %v663_v19 = vld [vmem:[%s16642_s5 + $0x768] sm:$0xff]  ;;  %17244 = vst [vmem:[#allocation141_spill] sm:$0xff] %v13947_v15 }
 0x248   : > { %17231 = vst [vmem:[#allocation136_spill] sm:$0xff] %v13846_v39  ;;  %v2211_v1 = vpop.permute.xlu0 %2210  ;;  %v13874_v62 = vpop.permute.xlu1 %2212  ;;  %9885 = vmatprep.subr.bf16.mxu0 %v13791_v25  ;;  %v17234_v31 = vld [vmem:[#allocation42_spill] sm:$0xff]  ;;  %v681_v6 = vld [vmem:[%s16642_s5 + $0x7f8] sm:$0xff]  ;;  %v664_v33 = vld [vmem:[%s16642_s5 + $0x770] sm:$0xff]  ;;  %v13949_v54 = vpack.c.bf16 %v677_v30, %v676_v41 }
 0x249   : > { %v13895_v25 = vmul.f32 %v17234_v31, %v358_v10  ;;  %17236 = vst [vmem:[#allocation42_spill] sm:$0xff] %v13898_v38  ;;  %v13911_v10 = vmul.f32 %v17238_v58, %v361_v27  ;;  %v632_v31 = vld [vmem:[%s16642_s5 + $0x670] sm:$0xff]  ;;  %v633_v38 = vld [vmem:[%s16642_s5 + $0x678] sm:$0xff]  ;;  %v13929_v58 = vpack.c.bf16 %v675_v53, %v674_v26  ;;  %v13933_v27 = vpack.c.bf16 %v645_v55, %v644_v7 }
 0x24a   : > { %9915 = vmatpush3.bf16.msra.mxu1 %v13824_v24  ;;  %v665_v59 = vld [vmem:[%s16642_s5 + $0x778] sm:$0xff]  ;;  %17245 = vst [vmem:[#allocation142_spill] sm:$0xff] %v13949_v54  ;;  %v13951_v53 = vpack.c.bf16 %v661_v45, %v660_v18  ;;  %v13953_v26 = vpack.c.bf16 %v647_v56, %v646_v40  ;;  %v13955_v7 = vpack.c.bf16 %v631_v16, %v630_v35 }
 0x24b   : > { %9887 = vmatpush3.bf16.msra.mxu0 %v13846_v39  ;;  %9917 = vmatprep.subr.bf16.mxu1 %v13848_v3  ;;  %17241 = vst [vmem:[#allocation48_spill] sm:$0xff] %v13929_v58  ;;  %17243 = vst [vmem:[#allocation140_spill] sm:$0xff] %v13933_v27  ;;  %v13957_v55 = vpack.c.bf16 %v679_v44, %v678_v21  ;;  %v13959_v39 = vpack.c.bf16 %v663_v19, %v662_v50 }
 0x24c   : > { %v1917_v17 = vpop.permute.xlu0 %1916  ;;  %v13944_v3 = vpop.permute.xlu1 %1967  ;;  %9889 = vmatprep.subr.bf16.mxu0 %v13877_v2  ;;  %17246 = vst [vmem:[#allocation143_spill] sm:$0xff] %v13951_v53  ;;  %17247 = vst [vmem:[#allocation144_spill] sm:$0xff] %v13953_v26  ;;  %v13961_v24 = vpack.c.bf16 %v649_v36, %v648_v14  ;;  %v13968_v41 = vpack.c.bf16 %v633_v38, %v632_v31  ;;  %v13970_v49 = vpack.c.bf16 %v681_v6, %v680_v60 }
 0x24d   : > { %17248 = vst [vmem:[#allocation145_spill] sm:$0xff] %v13955_v7  ;;  %17249 = vst [vmem:[#allocation146_spill] sm:$0xff] %v13957_v55  ;;  %v13972_v30 = vpack.c.bf16 %v665_v59, %v664_v33  ;;  %v2072_v44 = vsel %vm2069_vm2, %v13688_v4, %v13651_v5  ;;  %v2219_v14 = vsel %vm2216_vm5, %v13613_v12, %v2211_v1 }
 0x24e   : > { %17250 = vst [vmem:[#allocation147_spill] sm:$0xff] %v13959_v39  ;;  %17251 = vst [vmem:[#allocation148_spill] sm:$0xff] %v13961_v24  ;;  %9919 = vmatpush3.bf16.msra.mxu1 %v13914_v63  ;;  %v2218_v36 = vsel %vm2216_vm5, %v2211_v1, %v13874_v62  ;;  %v1926_v21 = vsel %vm1922_vm8, %v13171_v37, %v13557_v9  ;;  %v1974_v16 = vsel %vm1971_vm6, %v13611_v28, %v13436_v0 }
 0x24f   : > { %17252 = vst [vmem:[#allocation149_spill] sm:$0xff] %v13968_v41  ;;  %17253 = vst [vmem:[#allocation150_spill] sm:$0xff] %v13970_v49  ;;  %9891 = vmatpush3.bf16.msra.mxu0 %v13916_v52  ;;  %9921 = vmatprep.subr.bf16.mxu1 %v13929_v58  ;;  %v2023_v35 = vsel %vm2020_vm7, %v13649_v57, %v13458_v23  ;;  %v2121_v19 = vsel %vm2118_vm3, %v13500_v8, %v13735_v11 }
 0x250   : > { %17254 = vst [vmem:[#allocation151_spill] sm:$0xff] %v13972_v30  ;;  %v2017_v12 = vpop.permute.xlu0 %2016  ;;  %9893 = vmatprep.subr.bf16.mxu0 %v13933_v27  ;;  %v2120_v9 = vsel %vm2118_vm3, %v13735_v11, %v13738_v29  ;;  %v2170_v37 = vsel %vm2167_vm4, %v13559_v34, %v13786_v42  ;;  %v2169_v28 = vsel %vm2167_vm4, %v13786_v42, %v13788_v13 }
 0x251   : > { %v2066_v38 = vpop.permute.xlu1 %2065  ;;  %v2294_v1 = vadd.f32 %v1975_v22, %v1926_v21  ;;  %v2311_v18 = vadd.f32 %v2072_v44, %v2023_v35  ;;  %v2342_v45 = vadd.f32 %v2219_v14, %v2170_v37  ;;  %v2343_v8 = vadd.f32 %v2218_v36, %v2169_v28  ;;  %v17257_v22 = vld [vmem:[#allocation73_spill] sm:$0xff]  ;;  %v17261_v37 = vld [vmem:[#allocation42_spill] sm:$0xff] }
 0x252   : > { %9923 = vmatpush3.bf16.msra.mxu1 %v13931_v46  ;;  %v2295_v40 = vadd.f32 %v1974_v16, %v1925_v48  ;;  %v2024_v11 = vsel %vm2020_vm7, %v13279_v20, %v13649_v57  ;;  %v2073_v34 = vsel %vm2069_vm2, %v13323_v51, %v13688_v4  ;;  %v2326_v42 = vadd.f32 %v2121_v19, %v13895_v25  ;;  %v17255_v4 = vld [vmem:[#allocation39_spill] sm:$0xff]  ;;  %v17260_v19 = vld [vmem:[#allocation76_spill] sm:$0xff] }
 0x253   : > { %9895 = vmatpush3.bf16.msra.mxu0 %v13947_v15  ;;  %9925 = vmatprep.subr.bf16.mxu1 %v13949_v54  ;;  %v2327_v56 = vadd.f32 %v2120_v9, %v1821_v32  ;;  %v1924_v50 = vsel %vm1922_vm8, %v13402_v61, %v1917_v17  ;;  %v1973_v20 = vsel %vm1971_vm6, %v13436_v0, %v13944_v3  ;;  %v17259_v16 = vld [vmem:[#allocation75_spill] sm:$0xff] }
 0x254   : > { %v2117_v57 = vpop.permute.xlu0 %2116  ;;  %9897 = vmatprep.subr.bf16.mxu0 %v13953_v26  ;;  %v2021_v51 = vsel %vm2020_vm7, %v2017_v12, %v12924_v47  ;;  %v2022_v32 = vsel %vm2020_vm7, %v13458_v23, %v2017_v12  ;;  %v2070_v61 = vsel %vm2069_vm2, %v2066_v38, %v17255_v4  ;;  %v2071_v25 = vsel %vm2069_vm2, %v13651_v5, %v2066_v38  ;;  %v17256_v47 = vld [vmem:[#allocation85_spill] sm:$0xff]  ;;  %v17258_v5 = vld [vmem:[#allocation86_spill] sm:$0xff] }
 0x255   : > { %v2166_v0 = vpop.permute.xlu1 %2165  ;;  %v2310_v31 = vadd.f32 %v2073_v34, %v2024_v11  ;;  %v2359_v60 = vadd.f32 %v2311_v18, %v2295_v40  ;;  %v2374_v6 = vadd.f32 %v2342_v45, %v2326_v42  ;;  %v2375_v33 = vadd.f32 %v2343_v8, %v2327_v56  ;;  %v17262_v42 = vld [vmem:[#allocation83_spill] sm:$0xff] }
 0x256   : > { %9927 = vmatpush3.bf16.msra.mxu1 %v13951_v53  ;;  %v1923_v59 = vsel %vm1922_vm8, %v1917_v17, %v17256_v47  ;;  %v2119_v23 = vsel %vm2118_vm3, %v13738_v29, %v2117_v57  ;;  %v2134_v44 = vsel %vm2118_vm3, %v2117_v57, %v17257_v22  ;;  %v1972_v14 = vsel %vm1971_vm6, %v13944_v3, %v17258_v5  ;;  %v17266_v47 = vld [vmem:[#allocation80_spill] sm:$0xff]  ;;  %v17269_v5 = vld [vmem:[#allocation45_spill] sm:$0xff] }
 0x257   : > { %9899 = vmatpush3.bf16.msra.mxu0 %v13955_v7  ;;  %9929 = vmatprep.subr.bf16.mxu1 %v13957_v55  ;;  %v2296_v36 = vadd.f32 %v1973_v20, %v1924_v50  ;;  %v2312_v48 = vadd.f32 %v2071_v25, %v2022_v32  ;;  %v2313_v17 = vadd.f32 %v2070_v61, %v2021_v51  ;;  %v17267_v22 = vld [vmem:[#allocation32_spill] sm:$0xff] }
 0x258   : > { %v2215_v21 = vpop.permute.xlu0 %2214  ;;  %9901 = vmatprep.subr.bf16.mxu0 %v13961_v24  ;;  %v2168_v29 = vsel %vm2167_vm4, %v13788_v13, %v2166_v0  ;;  %v2183_v35 = vsel %vm2167_vm4, %v2166_v0, %v17259_v16  ;;  %v2328_v28 = vadd.f32 %v2119_v23, %v17261_v37  ;;  %v2329_v38 = vadd.f32 %v2134_v44, %v13911_v10  ;;  %v17263_v10 = vld [vmem:[#allocation31_spill] sm:$0xff]  ;;  %v17268_v44 = vld [vmem:[#allocation36_spill] sm:$0xff]  ;;  %v17275_v16 = vld [vmem:[#allocation41_spill] sm:$0xff] }
 0x259   : > { %v2217_v12 = vsel %vm2216_vm5, %v13874_v62, %v2215_v21  ;;  %v2232_v3 = vsel %vm2216_vm5, %v2215_v21, %v17260_v19  ;;  %v2260_v9 = vpop.permute.xlu1 %2259  ;;  %v2358_v13 = vadd.f32 %v2310_v31, %v2294_v1  ;;  %v2297_v8 = vadd.f32 %v1972_v14, %v1923_v59  ;;  %v17264_v31 = vld [vmem:[#allocation9_spill] sm:$0xff]  ;;  %v17273_v21 = vld [vmem:[#allocation40_spill] sm:$0xff]  ;;  %v17278_v19 = vld [vmem:[#allocation18_spill] sm:$0xff] }
 0x25a   : > { %v2344_v18 = vadd.f32 %v2217_v12, %v2168_v29  ;;  %v2345_v45 = vadd.f32 %v2232_v3, %v2183_v35  ;;  %9931 = vmatpush3.bf16.msra.mxu1 %v13959_v39  ;;  %v2391_v62 = vadd.f32 %v2375_v33, %v2359_v60  ;;  %v2360_v40 = vadd.f32 %v2312_v48, %v2296_v36  ;;  %v17265_v60 = vld [vmem:[#allocation79_spill] sm:$0xff]  ;;  %v17270_v36 = vld [vmem:[#allocation10_spill] sm:$0xff]  ;;  %v17271_v48 = vld [vmem:[#allocation37_spill] sm:$0xff] }
 0x25b   : > { %9903 = vmatpush3.bf16.msra.mxu0 %v13968_v41  ;;  %9933 = vmatprep.subr.bf16.mxu1 %v13970_v49  ;;  %v2268_v56 = vsel %vm2265_vm9, %v17262_v42, %v2260_v9  ;;  %v2361_v20 = vadd.f32 %v2313_v17, %v2297_v8  ;;  %v2390_v57 = vadd.f32 %v2374_v6, %v2358_v13  ;;  %v17272_v17 = vld [vmem:[#allocation11_spill] sm:$0xff]  ;;  %v17274_v29 = vld [vmem:[#allocation12_spill] sm:$0xff]  ;;  %v17276_v35 = vld [vmem:[#allocation17_spill] sm:$0xff] }
 0x25c   : > { %v2376_v11 = vadd.f32 %v2344_v18, %v2328_v28  ;;  %v2377_v34 = vadd.f32 %v2345_v45, %v2329_v38  ;;  %v2262_v50 = vpop.permute.xlu0 %2261  ;;  %9937 = vmatprep.subr.bf16.mxu0 %v17263_v10  ;;  %v2971_v59 = vmul.f32 %v17266_v47, %v17266_v47  ;;  %v2973_v14 = vmul.f32 %v17269_v5, %v17269_v5  ;;  %v17277_v12 = vld [vmem:[#allocation46_spill] sm:$0xff]  ;;  %v17279_v3 = vld [vmem:[#allocation49_spill] sm:$0xff]  ;;  %v17281_v37 = vld [vmem:[#allocation51_spill] sm:$0xff] }
 0x25d   : > { %v2267_v1 = vsel %vm2265_vm9, %v2260_v9, %v2262_v50  ;;  %v2264_v51 = vpop.permute.xlu1 %2263  ;;  %v14094_v61 = vadd.f32 %v2390_v57, %v2268_v56  ;;  %v17280_v9 = vld [vmem:[#allocation19_spill] sm:$0xff]  ;;  %v17282_v28 = vld [vmem:[#allocation20_spill] sm:$0xff]  ;;  %v17283_v38 = vld [vmem:[#allocation53_spill] sm:$0xff] }
 0x25e   : > { %v2392_v32 = vadd.f32 %v2376_v11, %v2360_v40  ;;  %9935 = vmatpush3.bf16.msra.mxu1 %v13972_v30  ;;  %v14092_v4 = vadd.f32 %v2391_v62, %v2267_v1  ;;  %v2266_v25 = vsel %vm2265_vm9, %v2262_v50, %v2264_v51  ;;  %v2393_v0 = vadd.f32 %v2377_v34, %v2361_v20  ;;  %v17284_v18 = vld [vmem:[#allocation21_spill] sm:$0xff]  ;;  %v17286_v13 = vld [vmem:[#allocation22_spill] sm:$0xff]  ;;  %v17287_v8 = vld [vmem:[#allocation59_spill] sm:$0xff] }
 0x25f   : > { %9969 = vmatprep.subr.bf16.mxu1 %v17264_v31  ;;  %v2281_v6 = vsel %vm2265_vm9, %v2264_v51, %v17265_v60  ;;  %v17285_v45 = vld [vmem:[#allocation57_spill] sm:$0xff]  ;;  %v17288_v62 = vld [vmem:[#allocation23_spill] sm:$0xff]  ;;  %v17289_v40 = vld [vmem:[#allocation62_spill] sm:$0xff] }
 0x260   : > { %v14102_v33 = vadd.f32 %v2392_v32, %v2266_v25  ;;  %2894 = vmatprep.mubr.f32.mxu0 %v14092_v4  ;;  %v14108_v23 = vadd.f32 %v2393_v0, %v2281_v6  ;;  %v17290_v11 = vld [vmem:[#allocation24_spill] sm:$0xff]  ;;  %v17291_v34 = vld [vmem:[#allocation65_spill] sm:$0xff]  ;;  %v17294_v50 = vld [vmem:[#allocation26_spill] sm:$0xff] }
 0x261   : > { %2895 = vmatmul.mubr.f32.vlgmr.msra.gmra.mrb[78].mxu0 %v14094_v61  ;;  %v17292_v42 = vld [vmem:[#allocation25_spill] sm:$0xff]  ;;  %v17293_v56 = vld [vmem:[#allocation68_spill] sm:$0xff]  ;;  %v17295_v20 = vld [vmem:[#allocation71_spill] sm:$0xff] }
 0x262   : > { %9939 = vmatpush3.bf16.msra.mxu0 %v17267_v22  ;;  %3050 = vmatprep.mubr.f32.mxu0 %v2971_v59  ;;  %v17296_v57 = vld [vmem:[#allocation28_spill] sm:$0xff]  ;;  %v17297_v1 = vld [vmem:[#allocation89_spill] sm:$0xff] }
 0x263   : > { %2964 = vmatprep.mubr.f32.mxu1 %v14108_v23  ;;  %9941 = vmatprep.subr.bf16.mxu0 %v17268_v44  ;;  %v2970_v51 = vmul.f32 %v17297_v1, %v17297_v1  ;;  %v17298_v32 = vld [vmem:[#allocation72_spill] sm:$0xff]  ;;  %v17299_v25 = vld [vmem:[#allocation93_spill] sm:$0xff] }
 0x264   : > { %2965 = vmatmul.mubr.f32.vlgmr.msra.gmra.mrb[78].mxu1 %v14102_v33  ;;  %v2975_v0 = vmul.f32 %v17299_v25, %v17299_v25  ;;  %v17300_v60 = vld [vmem:[#allocation29_spill] sm:$0xff]  ;;  %v17301_v6 = vld [vmem:[#allocation88_spill] sm:$0xff] }
 0x265   : > { %9971 = vmatpush3.bf16.msra.mxu1 %v17270_v36  ;;  %3120 = vmatprep.mubr.f32.mxu1 %v2973_v14  ;;  %v17302_v59 = vld [vmem:[#allocation60_spill] sm:$0xff] }
 0x266   : > { %9943 = vmatpush3.bf16.msra.mxu0 %v17271_v48  ;;  %9973 = vmatprep.subr.bf16.mxu1 %v17272_v17  ;;  %v2972_v14 = vmul.f32 %v17302_v59, %v17302_v59 }
 0x267   : > { %9945 = vmatprep.subr.bf16.mxu0 %v17273_v21 }
 0x269   : > { %9975 = vmatpush3.bf16.msra.mxu1 %v17274_v29 }
 0x26a   : > { %9947 = vmatpush3.bf16.msra.mxu0 %v17275_v16  ;;  %9977 = vmatprep.subr.bf16.mxu1 %v17276_v35 }
 0x26b   : > { %9949 = vmatprep.subr.bf16.mxu0 %v17277_v12 }
 0x26d   : > { %9979 = vmatpush3.bf16.msra.mxu1 %v17278_v19 }
 0x26e   : > { %9951 = vmatpush3.bf16.msra.mxu0 %v17279_v3  ;;  %9981 = vmatprep.subr.bf16.mxu1 %v17280_v9 }
 0x26f   : > { %9953 = vmatprep.subr.bf16.mxu0 %v17281_v37 }
 0x271   : > { %9983 = vmatpush3.bf16.msra.mxu1 %v17282_v28 }
 0x272   : > { %9955 = vmatpush3.bf16.msra.mxu0 %v17283_v38  ;;  %9985 = vmatprep.subr.bf16.mxu1 %v17284_v18  ;;  %v17383_v38 = vld [vmem:[#allocation134_spill] sm:$0xff] }
 0x273   : > { %9957 = vmatprep.subr.bf16.mxu0 %v17285_v45  ;;  %v17350_v45 = vld [vmem:[#allocation101_spill] sm:$0xff] }
 0x275   : > { %9987 = vmatpush3.bf16.msra.mxu1 %v17286_v13  ;;  %v17384_v13 = vld [vmem:[#allocation135_spill] sm:$0xff] }
 0x276   : > { %9959 = vmatpush3.bf16.msra.mxu0 %v17287_v8  ;;  %9989 = vmatprep.subr.bf16.mxu1 %v17288_v62  ;;  %v17343_v8 = vld [vmem:[#allocation121_spill] sm:$0xff]  ;;  %v17365_v62 = vld [vmem:[#allocation82_spill] sm:$0xff] }
 0x277   : > { %9961 = vmatprep.subr.bf16.mxu0 %v17289_v40  ;;  %v17314_v40 = vld [vmem:[#allocation38_spill] sm:$0xff] }
 0x279   : > { %9991 = vmatpush3.bf16.msra.mxu1 %v17290_v11  ;;  %v17349_v11 = vld [vmem:[#allocation70_spill] sm:$0xff] }
 0x27a   : > { %9963 = vmatpush3.bf16.msra.mxu0 %v17291_v34  ;;  %9993 = vmatprep.subr.bf16.mxu1 %v17292_v42  ;;  %v17307_v34 = vld [vmem:[#allocation95_spill] sm:$0xff]  ;;  %v17341_v42 = vld [vmem:[#allocation120_spill] sm:$0xff] }
 0x27b   : > { %9965 = vmatprep.subr.bf16.mxu0 %v17293_v56 }
 0x27d   : > { %9995 = vmatpush3.bf16.msra.mxu1 %v17294_v50  ;;  %v17313_v50 = vld [vmem:[#allocation100_spill] sm:$0xff] }
 0x27e   : > { %9967 = vmatpush3.bf16.msra.mxu0 %v17295_v20  ;;  %9997 = vmatprep.subr.bf16.mxu1 %v17296_v57  ;;  %v17304_v20 = vld [vmem:[#allocation87_spill] sm:$0xff]  ;;  %v17305_v57 = vld [vmem:[#allocation90_spill] sm:$0xff] }
 0x27f   : > { %10001 = vmatprep.subr.bf16.mxu0 %v17298_v32  ;;  %v2977_v56 = vmul.f32 %v17304_v20, %v17304_v20  ;;  %v17306_v32 = vld [vmem:[#allocation55_spill] sm:$0xff] }
 0x281   : > { %9999 = vmatpush3.bf16.msra.mxu1 %v17300_v60  ;;  %3051 = vmatmul.mubr.f32.vlgmr.msra.gmra.mrb[80].mxu0 %v2970_v51  ;;  %v17308_v51 = vld [vmem:[#allocation35_spill] sm:$0xff] }
 0x282   : > { %10003 = vmatpush3.bf16.msra.mxu0 %v17301_v6  ;;  %3190 = vmatprep.mubr.f32.mxu0 %v2975_v0  ;;  %v17309_v6 = vld [vmem:[#allocation96_spill] sm:$0xff]  ;;  %v17310_v0 = vld [vmem:[#allocation27_spill] sm:$0xff] }
 0x283   : > { %10033 = vmatprep.subr.bf16.mxu1 %v17303_v43  ;;  %10005 = vmatprep.subr.bf16.mxu0 %v17305_v57  ;;  %v17311_v60 = vld [vmem:[#allocation99_spill] sm:$0xff]  ;;  %v17312_v43 = vld [vmem:[#allocation30_spill] sm:$0xff]  ;;  %v17316_v57 = vld [vmem:[#allocation52_spill] sm:$0xff] }
 0x284   : > { %3121 = vmatmul.mubr.f32.vlgmr.msra.gmra.mrb[80].mxu1 %v2972_v14  ;;  %v17315_v14 = vld [vmem:[#allocation103_spill] sm:$0xff] }
 0x285   : > { %10035 = vmatpush3.bf16.msra.mxu1 %v17306_v32  ;;  %3260 = vmatprep.mubr.f32.mxu1 %v2977_v56  ;;  %v17317_v56 = vld [vmem:[#allocation104_spill] sm:$0xff] }
 0x286   : > { %10007 = vmatpush3.bf16.msra.mxu0 %v17307_v34  ;;  %10037 = vmatprep.subr.bf16.mxu1 %v17308_v51  ;;  %v17318_v34 = vld [vmem:[#allocation69_spill] sm:$0xff]  ;;  %v17319_v51 = vld [vmem:[#allocation107_spill] sm:$0xff]  ;;  %v17336_v32 = vld [vmem:[#allocation56_spill] sm:$0xff] }
 0x287   : > { %10009 = vmatprep.subr.bf16.mxu0 %v17309_v6  ;;  %v17320_v6 = vld [vmem:[#allocation66_spill] sm:$0xff] }
 0x289   : > { %10039 = vmatpush3.bf16.msra.mxu1 %v17310_v0  ;;  %v17321_v0 = vld [vmem:[#allocation108_spill] sm:$0xff] }
 0x28a   : > { %10011 = vmatpush3.bf16.msra.mxu0 %v17311_v60  ;;  %10041 = vmatprep.subr.bf16.mxu1 %v17312_v43  ;;  %v17322_v60 = vld [vmem:[#allocation7_spill] sm:$0xff] }
 0x28b   : > { %10013 = vmatprep.subr.bf16.mxu0 %v17313_v50  ;;  %v17323_v43 = vld [vmem:[#allocation111_spill] sm:$0xff]  ;;  %v17324_v50 = vld [vmem:[#allocation2_spill] sm:$0xff] }
 0x28d   : > { %10043 = vmatpush3.bf16.msra.mxu1 %v17314_v40  ;;  %v17325_v40 = vld [vmem:[#allocation112_spill] sm:$0xff] }
 0x28e   : > { %10015 = vmatpush3.bf16.msra.mxu0 %v17315_v14  ;;  %10045 = vmatprep.subr.bf16.mxu1 %v17316_v57  ;;  %v17326_v14 = vld [vmem:[#allocation5_spill] sm:$0xff]  ;;  %v17327_v57 = vld [vmem:[#allocation50_spill] sm:$0xff] }
 0x28f   : > { %10017 = vmatprep.subr.bf16.mxu0 %v17317_v56  ;;  %v17328_v56 = vld [vmem:[#allocation77_spill] sm:$0xff] }
 0x291   : > { %10047 = vmatpush3.bf16.msra.mxu1 %v17318_v34  ;;  %v17329_v34 = vld [vmem:[#allocation61_spill] sm:$0xff] }
 0x292   : > { %10019 = vmatpush3.bf16.msra.mxu0 %v17319_v51  ;;  %10049 = vmatprep.subr.bf16.mxu1 %v17320_v6  ;;  %v17330_v51 = vld [vmem:[#allocation8_spill] sm:$0xff]  ;;  %v17331_v6 = vld [vmem:[#allocation115_spill] sm:$0xff] }
 0x293   : > { %10021 = vmatprep.subr.bf16.mxu0 %v17321_v0  ;;  %v17332_v0 = vld [vmem:[#allocation74_spill] sm:$0xff] }
 0x295   : > { %10051 = vmatpush3.bf16.msra.mxu1 %v17322_v60  ;;  %v17333_v60 = vld [vmem:[#allocation119_spill] sm:$0xff] }
 0x296   : > { %10023 = vmatpush3.bf16.msra.mxu0 %v17323_v43  ;;  %10053 = vmatprep.subr.bf16.mxu1 %v17324_v50  ;;  %v2974_v43 = vmul.f32 %v17333_v60, %v17333_v60  ;;  %v17334_v50 = vld [vmem:[#allocation116_spill] sm:$0xff] }
 0x297   : > { %10025 = vmatprep.subr.bf16.mxu0 %v17325_v40  ;;  %v17335_v40 = vld [vmem:[#allocation122_spill] sm:$0xff] }
 0x299   : > { %10055 = vmatpush3.bf16.msra.mxu1 %v17326_v14  ;;  %v2979_v14 = vmul.f32 %v17335_v40, %v17335_v40 }
 0x29a   : > { %10027 = vmatpush3.bf16.msra.mxu0 %v17327_v57  ;;  %10057 = vmatprep.subr.bf16.mxu1 %v17328_v56  ;;  %v17337_v57 = vld [vmem:[#allocation118_spill] sm:$0xff] }
 0x29b   : > { %10029 = vmatprep.subr.bf16.mxu0 %v17329_v34  ;;  %v17338_v34 = vld [vmem:[#allocation91_spill] sm:$0xff] }
 0x29d   : > { %10059 = vmatpush3.bf16.msra.mxu1 %v17330_v51  ;;  %v2976_v51 = vmul.f32 %v17338_v34, %v17338_v34 }
 0x29e   : > { %10031 = vmatpush3.bf16.msra.mxu0 %v17331_v6  ;;  %10061 = vmatprep.subr.bf16.mxu1 %v17332_v0  ;;  %v17339_v6 = vld [vmem:[#allocation67_spill] sm:$0xff]  ;;  %v17340_v0 = vld [vmem:[#allocation125_spill] sm:$0xff] }
 0x29f   : > { %10065 = vmatprep.subr.bf16.mxu0 %v17334_v50  ;;  %v2981_v56 = vmul.f32 %v17340_v0, %v17340_v0  ;;  %v17342_v50 = vld [vmem:[#allocation92_spill] sm:$0xff] }
 0x2a1   : > { %10063 = vmatpush3.bf16.msra.mxu1 %v17336_v32  ;;  %3191 = vmatmul.mubr.f32.vlgmr.msra.gmra.mrb[82].mxu0 %v2974_v43  ;;  %v17344_v43 = vld [vmem:[#allocation94_spill] sm:$0xff]  ;;  %v17347_v32 = vld [vmem:[#allocation4_spill] sm:$0xff] }
 0x2a2   : > { %10067 = vmatpush3.bf16.msra.mxu0 %v17337_v57  ;;  %3330 = vmatprep.mubr.f32.mxu0 %v2979_v14  ;;  %v17345_v57 = vld [vmem:[#allocation16_spill] sm:$0xff]  ;;  %v17346_v14 = vld [vmem:[#allocation97_spill] sm:$0xff] }
 0x2a3   : > { %10097 = vmatprep.subr.bf16.mxu1 %v17339_v6  ;;  %10069 = vmatprep.subr.bf16.mxu0 %v17341_v42  ;;  %v17348_v6 = vld [vmem:[#allocation98_spill] sm:$0xff] }
 0x2a4   : > { %3261 = vmatmul.mubr.f32.vlgmr.msra.gmra.mrb[82].mxu1 %v2976_v51  ;;  %v17351_v51 = vld [vmem:[#allocation3_spill] sm:$0xff]  ;;  %v17352_v42 = vld [vmem:[#allocation102_spill] sm:$0xff] }
 0x2a5   : > { %10099 = vmatpush3.bf16.msra.mxu1 %v17342_v50  ;;  %3400 = vmatprep.mubr.f32.mxu1 %v2981_v56  ;;  %v17353_v56 = vld [vmem:[#allocation58_spill] sm:$0xff]  ;;  %v17357_v50 = vld [vmem:[#allocation64_spill] sm:$0xff] }
 0x2a6   : > { %10071 = vmatpush3.bf16.msra.mxu0 %v17343_v8  ;;  %10101 = vmatprep.subr.bf16.mxu1 %v17344_v43  ;;  %v17354_v8 = vld [vmem:[#allocation105_spill] sm:$0xff]  ;;  %v17355_v43 = vld [vmem:[#allocation123_spill] sm:$0xff] }
 0x2a7   : > { %10073 = vmatprep.subr.bf16.mxu0 %v17345_v57 }
 0x2a9   : > { %10103 = vmatpush3.bf16.msra.mxu1 %v17346_v14  ;;  %v17356_v14 = vld [vmem:[#allocation106_spill] sm:$0xff] }
 0x2aa   : > { %10075 = vmatpush3.bf16.msra.mxu0 %v17347_v32  ;;  %10105 = vmatprep.subr.bf16.mxu1 %v17348_v6 }
 0x2ab   : > { %10077 = vmatprep.subr.bf16.mxu0 %v17349_v11  ;;  %v17358_v11 = vld [vmem:[#allocation109_spill] sm:$0xff] }
 0x2ad   : > { %10107 = vmatpush3.bf16.msra.mxu1 %v17350_v45  ;;  %v17359_v45 = vld [vmem:[#allocation14_spill] sm:$0xff] }
 0x2ae   : > { %10079 = vmatpush3.bf16.msra.mxu0 %v17351_v51  ;;  %10109 = vmatprep.subr.bf16.mxu1 %v17352_v42  ;;  %v17360_v51 = vld [vmem:[#allocation110_spill] sm:$0xff]  ;;  %v17361_v42 = vld [vmem:[#allocation63_spill] sm:$0xff] }
 0x2af   : > { %10081 = vmatprep.subr.bf16.mxu0 %v17353_v56  ;;  %v17362_v56 = vld [vmem:[#allocation113_spill] sm:$0xff] }
 0x2b1   : > { %10111 = vmatpush3.bf16.msra.mxu1 %v17354_v8  ;;  %v17363_v8 = vld [vmem:[#allocation34_spill] sm:$0xff] }
 0x2b2   : > { %10083 = vmatpush3.bf16.msra.mxu0 %v17355_v43  ;;  %v8627_v57 = vpop.f32.mrb[72].mxu1  ;;  %10113 = vmatprep.subr.bf16.mxu1 %v17356_v14  ;;  %v17364_v43 = vld [vmem:[#allocation6_spill] sm:$0xff]  ;;  %v17366_v14 = vld [vmem:[#allocation44_spill] sm:$0xff] }
 0x2b3   : > { %v8628_v32 = vpop.f32.mrb[73].mxu1  ;;  %10085 = vmatprep.subr.bf16.mxu0 %v17357_v50  ;;  %v17367_v50 = vld [vmem:[#allocation84_spill] sm:$0xff] }
 0x2b4   : > { %v8629_v6 = vadd.f32 %v8628_v32, %v8627_v57  ;;  %v17368_v57 = vld [vmem:[#allocation114_spill] sm:$0xff]  ;;  %v17369_v32 = vld [vmem:[#allocation81_spill] sm:$0xff] }
 0x2b5   : > { %10115 = vmatpush3.bf16.msra.mxu1 %v17358_v11  ;;  %v17377_v11 = vld [vmem:[#allocation128_spill] sm:$0xff] }
 0x2b6   : > { %10087 = vmatpush3.bf16.msra.mxu0 %v17359_v45  ;;  %10117 = vmatprep.subr.bf16.mxu1 %v17360_v51  ;;  %v2978_v45 = vmul.f32 %v17369_v32, %v17369_v32  ;;  %v17370_v51 = vld [vmem:[#allocation13_spill] sm:$0xff] }
 0x2b7   : > { %10089 = vmatprep.subr.bf16.mxu0 %v17361_v42  ;;  %v2983_v42 = vmul.f32 %v14092_v4, %v14092_v4 }
 0x2b9   : > { %10119 = vmatpush3.bf16.msra.mxu1 %v17362_v56  ;;  %v17371_v56 = vld [vmem:[#allocation54_spill] sm:$0xff] }
 0x2ba   : > { %10091 = vmatpush3.bf16.msra.mxu0 %v17363_v8  ;;  %10121 = vmatprep.subr.bf16.mxu1 %v17364_v43  ;;  %v17372_v8 = vld [vmem:[#allocation15_spill] sm:$0xff]  ;;  %v17375_v43 = vld [vmem:[#allocation124_spill] sm:$0xff] }
 0x2bb   : > { %10093 = vmatprep.subr.bf16.mxu0 %v17365_v62  ;;  %v17373_v62 = vld [vmem:[#allocation127_spill] sm:$0xff] }
 0x2bd   : > { %10123 = vmatpush3.bf16.msra.mxu1 %v17366_v14  ;;  %v2980_v14 = vmul.f32 %v17373_v62, %v17373_v62 }
 0x2be   : > { %10095 = vmatpush3.bf16.msra.mxu0 %v17367_v50  ;;  %10125 = vmatprep.subr.bf16.mxu1 %v17368_v57  ;;  %v17374_v50 = vld [vmem:[#allocation117_spill] sm:$0xff]  ;;  %v2985_v57 = vmul.f32 %v14108_v23, %v14108_v23 }
 0x2bf   : > { %10129 = vmatprep.subr.bf16.mxu0 %v17370_v51  ;;  %v17376_v51 = vld [vmem:[#allocation126_spill] sm:$0xff] }
 0x2c1   : > { %10127 = vmatpush3.bf16.msra.mxu1 %v17371_v56  ;;  %3331 = vmatmul.mubr.f32.vlgmr.msra.gmra.mrb[84].mxu0 %v2978_v45  ;;  %v17378_v45 = vld [vmem:[#allocation129_spill] sm:$0xff]  ;;  %v17381_v56 = vld [vmem:[#allocation132_spill] sm:$0xff] }
 0x2c2   : > { %10131 = vmatpush3.bf16.msra.mxu0 %v17372_v8  ;;  %3470 = vmatprep.mubr.f32.mxu0 %v2983_v42  ;;  %v17379_v8 = vld [vmem:[#allocation130_spill] sm:$0xff]  ;;  %v17380_v42 = vld [vmem:[#allocation131_spill] sm:$0xff] }
 0x2c3   : > { %10161 = vmatprep.subr.bf16.mxu1 %v17374_v50  ;;  %10133 = vmatprep.subr.bf16.mxu0 %v17375_v43  ;;  %v17382_v50 = vld [vmem:[#allocation133_spill] sm:$0xff] }
 0x2c4   : > { %3401 = vmatmul.mubr.f32.vlgmr.msra.gmra.mrb[84].mxu1 %v2980_v14  ;;  %v17385_v14 = vld [vmem:[#allocation136_spill] sm:$0xff] }
 0x2c5   : > { %10163 = vmatpush3.bf16.msra.mxu1 %v17376_v51  ;;  %3540 = vmatprep.mubr.f32.mxu1 %v2985_v57  ;;  %v17386_v51 = vld [vmem:[#allocation137_spill] sm:$0xff] }
 0x2c6   : > { %10135 = vmatpush3.bf16.msra.mxu0 %v17377_v11  ;;  %10165 = vmatprep.subr.bf16.mxu1 %v17378_v45 }
 0x2c7   : > { %10137 = vmatprep.subr.bf16.mxu0 %v17379_v8 }
 0x2c9   : > { %10167 = vmatpush3.bf16.msra.mxu1 %v17380_v42 }
 0x2ca   : > { %10139 = vmatpush3.bf16.msra.mxu0 %v17381_v56  ;;  %10169 = vmatprep.subr.bf16.mxu1 %v17382_v50 }
 0x2cb   : > { %10141 = vmatprep.subr.bf16.mxu0 %v17383_v38 }
 0x2cd   : > { %10171 = vmatpush3.bf16.msra.mxu1 %v17384_v13 }
 0x2ce   : > { %10143 = vmatpush3.bf16.msra.mxu0 %v17385_v14  ;;  %10173 = vmatprep.subr.bf16.mxu1 %v17386_v51 }
 0x2cf   : > { %10145 = vmatprep.subr.bf16.mxu0 %v13877_v2 }
 0x2d1   : > { %10175 = vmatpush3.bf16.msra.mxu1 %v13914_v63  ;;  %v8592_v57 = vpop.f32.mrb[72].mxu0 }
 0x2d2   : > { %v8697_v8 = vpop.f32.mrb[74].mxu1  ;;  %10147 = vmatpush3.bf16.msra.mxu0 %v13916_v52  ;;  %v8593_v42 = vpop.f32.mrb[73].mxu0  ;;  %10177 = vmatprep.subr.bf16.mxu1 %v13929_v58 }
 0x2d3   : > { %v8594_v50 = vadd.f32 %v8593_v42, %v8592_v57  ;;  %v8698_v56 = vpop.f32.mrb[75].mxu1  ;;  %10149 = vmatprep.subr.bf16.mxu0 %v13933_v27 }
 0x2d4   : > { %v8699_v13 = vadd.f32 %v8698_v56, %v8697_v8  ;;  %v2982_v8 = vmul.f32 %v14094_v61, %v14094_v61 }
 0x2d5   : > { %v2547_v38 = vadd.f32 %v8629_v6, %v8594_v50  ;;  %10179 = vmatpush3.bf16.msra.mxu1 %v13931_v46  ;;  %v2984_v50 = vmul.f32 %v14102_v33, %v14102_v33  ;;  %v17387_v6 = vmov 0.0  }
 0x2d6   : > { %10151 = vmatpush3.bf16.msra.mxu0 %v13947_v15  ;;  %10181 = vmatprep.subr.bf16.mxu1 %v13949_v54 }
 0x2d7   : > { %10153 = vmatprep.subr.bf16.mxu0 %v13953_v26 }
 0x2d9   : > { %10183 = vmatpush3.bf16.msra.mxu1 %v13951_v53 }
 0x2da   : > { %10155 = vmatpush3.bf16.msra.mxu0 %v13955_v7  ;;  %10185 = vmatprep.subr.bf16.mxu1 %v13957_v55 }
 0x2db   : > { %10157 = vmatprep.subr.bf16.mxu0 %v13961_v24 }
 0x2dd   : > { %10187 = vmatpush3.bf16.msra.mxu1 %v13959_v39 }
 0x2de   : > { %10159 = vmatpush3.bf16.msra.mxu0 %v13968_v41  ;;  %10189 = vmatprep.subr.bf16.mxu1 %v13970_v49 }
 0x2e1   : > { %10191 = vmatpush3.bf16.msra.mxu1 %v13972_v30  ;;  %3471 = vmatmul.mubr.f32.vlgmr.msra.gmra.mrb[86].mxu0 %v2982_v8 }
 0x2e2   : > { %3624 = vmatprep.mubr.f32.mxu0 %v17387_v6 }
 0x2e4   : > { %3541 = vmatmul.mubr.f32.vlgmr.msra.gmra.mrb[86].mxu1 %v2984_v50 }
 0x2e5   : > { %3701 = vmatprep.mubr.f32.mxu1 %v17387_v6 }
 0x2f1   : > { %v8662_v56 = vpop.f32.mrb[74].mxu0 }
 0x2f2   : > { %v8663_v42 = vpop.f32.mrb[75].mxu0 }
 0x2f3   : > { %v8664_v57 = vadd.f32 %v8663_v42, %v8662_v56 }
 0x2f5   : > { %v2617_v41 = vadd.f32 %v8664_v57, %v2547_v38 }
 0x2f7   : > { %v2687_v39 = vadd.f32 %v8699_v13, %v2617_v41  ;;  %v683_v41 = vld [vmem:[%s16643_s6 + $0x8] sm:$0xff] }
 0x2f8   : > { %3560 = vmatprep.subr.mxu0 %v683_v41 }
 0x311   : > { %v8732_v49 = vpop.f32.mrb[76].mxu0 }
 0x312   : > { %v8733_v24 = vpop.f32.mrb[77].mxu0 }
 0x313   : > { %v8734_v55 = vadd.f32 %v8733_v24, %v8732_v49  ;;  %v685_v24 = vld [vmem:[%s16643_s6 + $0x18] sm:$0xff] }
 0x314   : > { %v8767_v7 = vpop.f32.mrb[76].mxu1  ;;  %3637 = vmatprep.subr.mxu1 %v685_v24 }
 0x315   : > { %v2757_v53 = vadd.f32 %v8734_v55, %v2687_v39  ;;  %v8768_v30 = vpop.f32.mrb[77].mxu1  ;;  %v682_v39 = vld [vmem:[%s16643_s6] sm:$0xff] }
 0x316   : > { %v8769_v8 = vadd.f32 %v8768_v30, %v8767_v7  ;;  %3561 = vmatpush1.msra.mxu0 %v682_v39 }
 0x318   : > { %v2827_v26 = vadd.f32 %v8769_v8, %v2757_v53 }
 0x334   : > { %v8802_v54 = vpop.f32.mrb[78].mxu0 }
 0x335   : > { %v8803_v15 = vpop.f32.mrb[79].mxu0 }
 0x336   : > { %v8804_v46 = vadd.f32 %v8803_v15, %v8802_v54 }
 0x337   : > { %v8837_v27 = vpop.f32.mrb[78].mxu1 }
 0x338   : > { %v2897_v50 = vadd.f32 %v8804_v46, %v2827_v26  ;;  %v8838_v58 = vpop.f32.mrb[79].mxu1  ;;  %v684_v46 = vld [vmem:[%s16643_s6 + $0x10] sm:$0xff] }
 0x339   : > { %v8839_v52 = vadd.f32 %v8838_v58, %v8837_v27  ;;  %3638 = vmatpush1.msra.mxu1 %v684_v46  ;;  %v689_v58 = vld [vmem:[%s16643_s6 + $0x38] sm:$0xff] }
 0x33a   : > { %3791 = vmatprep.subr.mxu1 %v689_v58 }
 0x33b   : > { %v2967_v63 = vadd.f32 %v8839_v52, %v2897_v50  ;;  %v687_v52 = vld [vmem:[%s16643_s6 + $0x28] sm:$0xff] }
 0x33c   : > { %3714 = vmatprep.subr.mxu0 %v687_v52 }
 0x354   : > { %v8872_v27 = vpop.f32.mrb[80].mxu0 }
 0x355   : > { %v8873_v15 = vpop.f32.mrb[81].mxu0 }
 0x356   : > { %v8874_v54 = vadd.f32 %v8873_v15, %v8872_v27 }
 0x357   : > { %v8907_v53 = vpop.f32.mrb[80].mxu1 }
 0x358   : > { %v8908_v26 = vpop.f32.mrb[81].mxu1 }
 0x359   : > { %v8909_v7 = vadd.f32 %v8908_v26, %v8907_v53 }
 0x35b   : > { %v3123_v55 = vadd.f32 %v8909_v7, %v8874_v54 }
 0x374   : > { %v8942_v49 = vpop.f32.mrb[82].mxu0 }
 0x375   : > { %v8943_v30 = vpop.f32.mrb[83].mxu0 }
 0x376   : > { %v8944_v38 = vadd.f32 %v8943_v30, %v8942_v49  ;;  %v3546_v30 = vmul.f32 %v2967_v63, %v2967_v63 }
 0x377   : > { %v8977_v13 = vpop.f32.mrb[82].mxu1 }
 0x378   : > { %v3193_v56 = vadd.f32 %v8944_v38, %v3123_v55  ;;  %v8978_v42 = vpop.f32.mrb[83].mxu1 }
 0x379   : > { %v8979_v57 = vadd.f32 %v8978_v42, %v8977_v13  ;;  %v3551_v42 = vsub.f32 0.0, %v2967_v63  ;;  %v693_v63 = vld [vmem:[%s16643_s6 + $0x58] sm:$0xff] }
 0x37b   : > { %v3263_v8 = vadd.f32 %v8979_v57, %v3193_v56 }
 0x394   : > { %v9012_v50 = vpop.f32.mrb[84].mxu0 }
 0x395   : > { %v9013_v41 = vpop.f32.mrb[85].mxu0 }
 0x396   : > { %v9014_v24 = vadd.f32 %v9013_v41, %v9012_v50  ;;  %v691_v41 = vld [vmem:[%s16643_s6 + $0x48] sm:$0xff] }
 0x397   : > { %v9047_v39 = vpop.f32.mrb[84].mxu1 }
 0x398   : > { %v3333_v46 = vadd.f32 %v9014_v24, %v3263_v8  ;;  %v9048_v52 = vpop.f32.mrb[85].mxu1  ;;  %v686_v8 = vld [vmem:[%s16643_s6 + $0x20] sm:$0xff] }
 0x399   : > { %v9049_v58 = vadd.f32 %v9048_v52, %v9047_v39  ;;  %v690_v24 = vld [vmem:[%s16643_s6 + $0x40] sm:$0xff]  ;;  %v692_v39 = vld [vmem:[%s16643_s6 + $0x50] sm:$0xff]  ;;  %v697_v52 = vld [vmem:[%s16643_s6 + $0x78] sm:$0xff] }
 0x39b   : > { %v3403_v27 = vadd.f32 %v9049_v58, %v3333_v46  ;;  %v695_v46 = vld [vmem:[%s16643_s6 + $0x68] sm:$0xff]  ;;  %v694_v58 = vld [vmem:[%s16643_s6 + $0x60] sm:$0xff] }
 0x3b4   : > { %v9082_v15 = vpop.f32.mrb[86].mxu0 }
 0x3b5   : > { %v9083_v2 = vpop.f32.mrb[87].mxu0 }
 0x3b6   : > { %v9084_v53 = vadd.f32 %v9083_v2, %v9082_v15  ;;  %v688_v2 = vld [vmem:[%s16643_s6 + $0x30] sm:$0xff] }
 0x3b7   : > { %v9117_v54 = vpop.f32.mrb[86].mxu1 }
 0x3b8   : > { %v3473_v26 = vadd.f32 %v9084_v53, %v3403_v27  ;;  %v9118_v7 = vpop.f32.mrb[87].mxu1  ;;  %v696_v27 = vld [vmem:[%s16643_s6 + $0x70] sm:$0xff] }
 0x3b9   : > { %v9119_v49 = vadd.f32 %v9118_v7, %v9117_v54 }
 0x3bb   : > { %v3543_v55 = vadd.f32 %v9119_v49, %v3473_v26 }
 0x3bd   : > { %v3547_v38 = vsub.f32 %v3543_v55, %v3546_v30 }
 0x3bf   : > { %v3548_v13 = vmax.f32 %v3547_v38, 0.0 }
 0x3c1   : > { %v3549_v56 = vadd.f32 1e-05, %v3548_v13 }
 0x3c3   : > { %10729 = vrsqrt.f32 %v3549_v56 }
 0x3cd   : > { %v10730_v57 = vpop.eup %10729 }
 0x3ce   : > { %8446 = vmatmul.mubr.msk.f32.vlgmr.msra.gmra.mrb[88].mxu0 %vm3553_vm10, %v10730_v57  ;;  %8448 = vmatmul.mubr.msk.f32.vlgmr.msra.gmra.mrb[88].mxu1 %vm3553_vm10, %v10730_v57  ;;  %v3552_v50 = vmul.f32 %v10730_v57, %v3551_v42 }
 0x3cf   : > { %3630 = vmatprep.mubr.f32.mxu0 %v17387_v6  ;;  %3707 = vmatprep.mubr.f32.mxu1 %v17387_v6 }
 0x3d0   : > { %3715 = vmatpush1.msra.mxu0 %v686_v8  ;;  %3792 = vmatpush1.msra.mxu1 %v688_v2 }
 0x3d1   : > { %3868 = vmatprep.subr.mxu0 %v691_v41  ;;  %3945 = vmatprep.subr.mxu1 %v693_v63 }
 0x3d2   : > { %8447 = vmatmul.mubr.msk.f32.gmra.mrb[90].mxu0 %vm3553_vm10, %v3552_v50  ;;  %8449 = vmatmul.mubr.msk.f32.gmra.mrb[90].mxu1 %vm3553_vm10, %v3552_v50 }
 0x3d3   : > { %3778 = vmatprep.mubr.f32.mxu0 %v17387_v6  ;;  %3855 = vmatprep.mubr.f32.mxu1 %v17387_v6 }
 0x3d6   : > { %8450 = vmatmul.mubr.msk.f32.vlgmr.msra.gmra.mrb[92].mxu0 %vm3553_vm10, %v10730_v57  ;;  %8452 = vmatmul.mubr.msk.f32.vlgmr.msra.gmra.mrb[92].mxu1 %vm3553_vm10, %v10730_v57 }
 0x3d7   : > { %3784 = vmatprep.mubr.f32.mxu0 %v17387_v6  ;;  %3861 = vmatprep.mubr.f32.mxu1 %v17387_v6 }
 0x3d8   : > { %3869 = vmatpush1.msra.mxu0 %v690_v24  ;;  %3946 = vmatpush1.msra.mxu1 %v692_v39 }
 0x3d9   : > { %4022 = vmatprep.subr.mxu0 %v695_v46  ;;  %4099 = vmatprep.subr.mxu1 %v697_v52 }
 0x3da   : > { %8451 = vmatmul.mubr.msk.f32.gmra.mrb[94].mxu0 %vm3553_vm10, %v3552_v50  ;;  %8453 = vmatmul.mubr.msk.f32.gmra.mrb[94].mxu1 %vm3553_vm10, %v3552_v50 }
 0x3db   : > { %3932 = vmatprep.mubr.f32.mxu0 %v17387_v6  ;;  %4009 = vmatprep.mubr.f32.mxu1 %v17387_v6 }
 0x3de   : > { %8454 = vmatmul.mubr.msk.f32.vlgmr.msra.gmra.mrb[96].mxu0 %vm3553_vm10, %v10730_v57  ;;  %8456 = vmatmul.mubr.msk.f32.vlgmr.msra.gmra.mrb[96].mxu1 %vm3553_vm10, %v10730_v57 }
 0x3df   : > { %3938 = vmatprep.mubr.f32.mxu0 %v17387_v6  ;;  %4015 = vmatprep.mubr.f32.mxu1 %v17387_v6 }
 0x3e0   : > { %4023 = vmatpush1.msra.mxu0 %v694_v58  ;;  %4100 = vmatpush1.msra.mxu1 %v696_v27 }
 0x3e2   : > { %8455 = vmatmul.mubr.msk.f32.gmra.mrb[98].mxu0 %vm3553_vm10, %v3552_v50  ;;  %8457 = vmatmul.mubr.msk.f32.gmra.mrb[98].mxu1 %vm3553_vm10, %v3552_v50 }
 0x3e3   : > { %4086 = vmatprep.mubr.f32.mxu0 %v17387_v6  ;;  %4163 = vmatprep.mubr.f32.mxu1 %v17387_v6 }
 0x3e6   : > { %8458 = vmatmul.mubr.msk.f32.vlgmr.msra.gmra.mrb[100].mxu0 %vm3553_vm10, %v10730_v57  ;;  %8460 = vmatmul.mubr.msk.f32.vlgmr.msra.gmra.mrb[100].mxu1 %vm3553_vm10, %v10730_v57 }
 0x3e7   : > { %4092 = vmatprep.mubr.f32.mxu0 %v17387_v6  ;;  %4169 = vmatprep.mubr.f32.mxu1 %v17387_v6 }
 0x3ea   : > { %8459 = vmatmul.mubr.msk.f32.gmra.mrb[102].mxu0 %vm3553_vm10, %v3552_v50  ;;  %8461 = vmatmul.mubr.msk.f32.gmra.mrb[102].mxu1 %vm3553_vm10, %v3552_v50 }
 0x3eb   : > { %4324 = vmatprep.mubr.f32.mxu0 %v17387_v6  ;;  %4443 = vmatprep.mubr.f32.mxu1 %v17387_v6 }
 0x4a1   : > { %v3626_v15 = vpop.f32.mrb[88].mxu0  ;;  %v3703_v53 = vpop.f32.mrb[88].mxu1 }
 0x4a2   : > { %v3628_v54 = vpop.f32.mrb[89].mxu0  ;;  %v3705_v26 = vpop.f32.mrb[89].mxu1  ;;  %v4176_v7 = vmul.f32 %v3626_v15, %v17297_v1  ;;  %v4178_v49 = vmul.f32 %v3703_v53, %v17302_v59 }
 0x4a3   : > { %v4177_v30 = vmul.f32 %v3628_v54, %v17266_v47  ;;  %v4179_v55 = vmul.f32 %v3705_v26, %v17269_v5  ;;  %v14357_v47 = vld [vmem:[%s16639_s2] sm:$0xff] }
 0x4a5   : > { %v3632_v38 = vpop.f32.mrb[90].mxu0  ;;  %v3709_v13 = vpop.f32.mrb[90].mxu1 }
 0x4a6   : > { %v4192_v56 = vadd.f32 %v4176_v7, %v3632_v38  ;;  %v4194_v42 = vadd.f32 %v4178_v49, %v3709_v13  ;;  %v3634_v57 = vpop.f32.mrb[91].mxu0  ;;  %v3711_v8 = vpop.f32.mrb[91].mxu1 }
 0x4a7   : > { %v4193_v2 = vadd.f32 %v4177_v30, %v3634_v57  ;;  %v4195_v50 = vadd.f32 %v4179_v55, %v3711_v8 }
 0x4a8   : > { %v4208_v46 = vmax.f32 %v4192_v56, 0.0  ;;  %v4210_v1 = vmax.f32 %v4194_v42, 0.0 }
 0x4a9   : > { %v4209_v41 = vmax.f32 %v4193_v2, 0.0  ;;  %v4211_v63 = vmax.f32 %v4195_v50, 0.0  ;;  %v3780_v24 = vpop.f32.mrb[92].mxu0  ;;  %v3857_v39 = vpop.f32.mrb[92].mxu1  ;;  %v14383_v2 = vld [vmem:[%s16639_s2 + $0x10] sm:$0xff] }
 0x4aa   : > { %v3782_v52 = vpop.f32.mrb[93].mxu0  ;;  %v3859_v59 = vpop.f32.mrb[93].mxu1  ;;  %v4180_v5 = vmul.f32 %v3780_v24, %v17333_v60  ;;  %v4182_v58 = vmul.f32 %v3857_v39, %v17338_v34  ;;  %v14372_v34 = vld [vmem:[%s16639_s2 + $0x8] sm:$0xff] }
 0x4ab   : > { %4260 = vmatprep.subr.mxu0 %v4209_v41  ;;  %4379 = vmatprep.subr.mxu1 %v4211_v63  ;;  %v4181_v27 = vmul.f32 %v3782_v52, %v17299_v25  ;;  %v4183_v15 = vmul.f32 %v3859_v59, %v17304_v20 }
 0x4ac   : > { %4261 = vmatpush1.msra.mxu0 %v4208_v46  ;;  %4380 = vmatpush1.msra.mxu1 %v4210_v1 }
 0x4ad   : > { %v3786_v53 = vpop.f32.mrb[94].mxu0  ;;  %v3863_v54 = vpop.f32.mrb[94].mxu1  ;;  %8462 = vmatmul.mubr.msk.f32.vlgmr.msra.gmra.mrb[104].mxu0 %vm3553_vm10, %v14357_v47  ;;  %8471 = vmatmul.mubr.msk.f32.vlgmr.msra.gmra.mrb[104].mxu1 %vm3553_vm10, %v14357_v47 }
 0x4ae   : > { %v4196_v26 = vadd.f32 %v4180_v5, %v3786_v53  ;;  %v4198_v7 = vadd.f32 %v4182_v58, %v3863_v54  ;;  %v3788_v49 = vpop.f32.mrb[95].mxu0  ;;  %v3865_v60 = vpop.f32.mrb[95].mxu1  ;;  %4330 = vmatprep.mubr.f32.mxu0 %v17387_v6  ;;  %4449 = vmatprep.mubr.f32.mxu1 %v17387_v6 }
 0x4af   : > { %v4197_v20 = vadd.f32 %v4181_v27, %v3788_v49  ;;  %v4199_v25 = vadd.f32 %v4183_v15, %v3865_v60 }
 0x4b0   : > { %v4212_v56 = vmax.f32 %v4196_v26, 0.0  ;;  %v4214_v42 = vmax.f32 %v4198_v7, 0.0  ;;  %v14413_v26 = vld [vmem:[%s16639_s2 + $0x20] sm:$0xff] }
 0x4b1   : > { %v4213_v30 = vmax.f32 %v4197_v20, 0.0  ;;  %v4215_v55 = vmax.f32 %v4199_v25, 0.0  ;;  %v3934_v38 = vpop.f32.mrb[96].mxu0  ;;  %v4011_v13 = vpop.f32.mrb[96].mxu1  ;;  %8463 = vmatmul.mubr.msk.f32.gmra.mrb[106].mxu0 %vm3553_vm10, %v14372_v34  ;;  %8472 = vmatmul.mubr.msk.f32.gmra.mrb[106].mxu1 %vm3553_vm10, %v14372_v34 }
 0x4b2   : > { %v3936_v57 = vpop.f32.mrb[97].mxu0  ;;  %v4013_v8 = vpop.f32.mrb[97].mxu1  ;;  %4336 = vmatprep.mubr.f32.mxu0 %v17387_v6  ;;  %4455 = vmatprep.mubr.f32.mxu1 %v17387_v6  ;;  %v4184_v50 = vmul.f32 %v3934_v38, %v17369_v32  ;;  %v4186_v41 = vmul.f32 %v4011_v13, %v17373_v62 }
 0x4b3   : > { %4498 = vmatprep.subr.mxu0 %v4213_v30  ;;  %4617 = vmatprep.subr.mxu1 %v4215_v55  ;;  %v4185_v63 = vmul.f32 %v3936_v57, %v17335_v40  ;;  %v4187_v24 = vmul.f32 %v4013_v8, %v17340_v0  ;;  %v14402_v40 = vld [vmem:[%s16639_s2 + $0x18] sm:$0xff]  ;;  %v14465_v57 = vld [vmem:[%s16639_s2 + $0x40] sm:$0xff] }
 0x4b4   : > { %4499 = vmatpush1.msra.mxu0 %v4212_v56  ;;  %4618 = vmatpush1.msra.mxu1 %v4214_v42  ;;  %v14443_v56 = vld [vmem:[%s16639_s2 + $0x30] sm:$0xff]  ;;  %v14454_v42 = vld [vmem:[%s16639_s2 + $0x38] sm:$0xff] }
 0x4b5   : > { %v3940_v39 = vpop.f32.mrb[98].mxu0  ;;  %v4017_v46 = vpop.f32.mrb[98].mxu1  ;;  %8464 = vmatmul.mubr.msk.f32.gmra.mrb[108].mxu0 %vm3553_vm10, %v14383_v2  ;;  %8473 = vmatmul.mubr.msk.f32.gmra.mrb[108].mxu1 %vm3553_vm10, %v14383_v2 }
 0x4b6   : > { %v14393_v1 = vadd.f32 %v4184_v50, %v3940_v39  ;;  %v14395_v52 = vadd.f32 %v4186_v41, %v4017_v46  ;;  %v3942_v32 = vpop.f32.mrb[99].mxu0  ;;  %v4019_v62 = vpop.f32.mrb[99].mxu1  ;;  %4342 = vmatprep.mubr.f32.mxu0 %v17387_v6  ;;  %4461 = vmatprep.mubr.f32.mxu1 %v17387_v6  ;;  %v17391_v46 = vld [vmem:[#allocation57_spill] sm:$0xff] }
 0x4b7   : > { %v4201_v0 = vadd.f32 %v4185_v63, %v3942_v32  ;;  %v4203_v59 = vadd.f32 %v4187_v24, %v4019_v62  ;;  %v17394_v32 = vld [vmem:[#allocation25_spill] sm:$0xff]  ;;  %v17395_v62 = vld [vmem:[#allocation62_spill] sm:$0xff] }
 0x4b8   : > { %v4216_v8 = vmax.f32 %v14393_v1, 0.0  ;;  %v4218_v50 = vmax.f32 %v14395_v52, 0.0  ;;  %v17392_v1 = vld [vmem:[#allocation24_spill] sm:$0xff]  ;;  %v17393_v52 = vld [vmem:[#allocation59_spill] sm:$0xff] }
 0x4b9   : > { %v4217_v5 = vmax.f32 %v4201_v0, 0.0  ;;  %v4219_v58 = vmax.f32 %v4203_v59, 0.0  ;;  %v4088_v27 = vpop.f32.mrb[100].mxu0  ;;  %v4165_v15 = vpop.f32.mrb[100].mxu1  ;;  %8465 = vmatmul.mubr.msk.f32.gmra.mrb[110].mxu0 %vm3553_vm10, %v14402_v40  ;;  %8474 = vmatmul.mubr.msk.f32.gmra.mrb[110].mxu1 %vm3553_vm10, %v14402_v40  ;;  %v17397_v0 = vld [vmem:[#allocation65_spill] sm:$0xff]  ;;  %v17398_v59 = vld [vmem:[#allocation28_spill] sm:$0xff] }
 0x4ba   : > { %v4090_v53 = vpop.f32.mrb[101].mxu0  ;;  %v4167_v54 = vpop.f32.mrb[101].mxu1  ;;  %4348 = vmatprep.mubr.f32.mxu0 %v17387_v6  ;;  %4467 = vmatprep.mubr.f32.mxu1 %v17387_v6  ;;  %v4188_v7 = vmul.f32 %v4088_v27, %v14094_v61  ;;  %v4190_v49 = vmul.f32 %v4165_v15, %v14102_v33  ;;  %v17401_v27 = vld [vmem:[#allocation71_spill] sm:$0xff]  ;;  %v17402_v15 = vld [vmem:[#allocation33_spill] sm:$0xff] }
 0x4bb   : > { %4736 = vmatprep.subr.mxu0 %v4217_v5  ;;  %4855 = vmatprep.subr.mxu1 %v4219_v58  ;;  %v4189_v60 = vmul.f32 %v4090_v53, %v14092_v4  ;;  %v4191_v20 = vmul.f32 %v4167_v54, %v14108_v23  ;;  %v14432_v4 = vld [vmem:[%s16639_s2 + $0x28] sm:$0xff]  ;;  %v17399_v5 = vld [vmem:[#allocation68_spill] sm:$0xff]  ;;  %v17400_v58 = vld [vmem:[#allocation29_spill] sm:$0xff] }
 0x4bc   : > { %v17403_v53 = vld [vmem:[#allocation72_spill] sm:$0xff] }
 0x4bd   : > { %v4094_v25 = vpop.f32.mrb[102].mxu0  ;;  %v4171_v30 = vpop.f32.mrb[102].mxu1  ;;  %8466 = vmatmul.mubr.msk.f32.gmra.mrb[112].mxu0 %vm3553_vm10, %v14413_v26  ;;  %8475 = vmatmul.mubr.msk.f32.gmra.mrb[112].mxu1 %vm3553_vm10, %v14413_v26 }
 0x4be   : > { %v14423_v55 = vadd.f32 %v4188_v7, %v4094_v25  ;;  %v14425_v38 = vadd.f32 %v4190_v49, %v4171_v30  ;;  %v4096_v13 = vpop.f32.mrb[103].mxu0  ;;  %v4173_v61 = vpop.f32.mrb[103].mxu1  ;;  %4354 = vmatprep.mubr.f32.mxu0 %v17387_v6  ;;  %4473 = vmatprep.mubr.f32.mxu1 %v17387_v6  ;;  %v10733_v7 = vld [vmem:[%s16641_s4] sm:$0xff] }
 0x4bf   : > { %v4205_v33 = vadd.f32 %v4189_v60, %v4096_v13  ;;  %v4207_v23 = vadd.f32 %v4191_v20, %v4173_v61  ;;  %v10734_v60 = vld [vmem:[%s16641_s4 + $0x10] sm:$0xff]  ;;  %v10735_v13 = vld [vmem:[%s16641_s4 + $0x8] sm:$0xff] }
 0x4c0   : > { %v4220_v24 = vmax.f32 %v14423_v55, 0.0  ;;  %v4222_v39 = vmax.f32 %v14425_v38, 0.0 }
 0x4c1   : > { %8467 = vmatmul.mubr.msk.f32.gmra.mrb[114].mxu0 %vm3553_vm10, %v14432_v4  ;;  %8476 = vmatmul.mubr.msk.f32.gmra.mrb[114].mxu1 %vm3553_vm10, %v14432_v4  ;;  %v4221_v41 = vmax.f32 %v4205_v33, 0.0  ;;  %v4223_v63 = vmax.f32 %v4207_v23, 0.0 }
 0x4c2   : > { %4360 = vmatprep.mubr.f32.mxu0 %v17387_v6  ;;  %4479 = vmatprep.mubr.f32.mxu1 %v17387_v6 }
 0x4c5   : > { %8468 = vmatmul.mubr.msk.f32.gmra.mrb[116].mxu0 %vm3553_vm10, %v14443_v56  ;;  %8477 = vmatmul.mubr.msk.f32.gmra.mrb[116].mxu1 %vm3553_vm10, %v14443_v56 }
 0x4c6   : > { %4366 = vmatprep.mubr.f32.mxu0 %v17387_v6  ;;  %4485 = vmatprep.mubr.f32.mxu1 %v17387_v6 }
 0x4c9   : > { %8469 = vmatmul.mubr.msk.f32.gmra.mrb[118].mxu0 %vm3553_vm10, %v14454_v42  ;;  %8478 = vmatmul.mubr.msk.f32.gmra.mrb[118].mxu1 %vm3553_vm10, %v14454_v42 }
 0x4ca   : > { %4372 = vmatprep.mubr.f32.mxu0 %v17387_v6  ;;  %4491 = vmatprep.mubr.f32.mxu1 %v17387_v6 }
 0x4cd   : > { %8470 = vmatmul.mubr.msk.f32.gmra.mrb[120].mxu0 %vm3553_vm10, %v14465_v57  ;;  %8479 = vmatmul.mubr.msk.f32.gmra.mrb[120].mxu1 %vm3553_vm10, %v14465_v57 }
 0x4ce   : > { %4562 = vmatprep.mubr.f32.mxu0 %v17387_v6  ;;  %4681 = vmatprep.mubr.f32.mxu1 %v17387_v6 }
 0x4d1   : > { %8480 = vmatmul.mubr.msk.f32.vlgmr.msra.gmra.mrb[122].mxu0 %vm3553_vm10, %v14357_v47  ;;  %8489 = vmatmul.mubr.msk.f32.vlgmr.msra.gmra.mrb[122].mxu1 %vm3553_vm10, %v14357_v47 }
 0x4d2   : > { %4737 = vmatpush1.msra.mxu0 %v4216_v8  ;;  %4856 = vmatpush1.msra.mxu1 %v4218_v50  ;;  %v10738_v8 = vld [vmem:[%s16641_s4 + $0x90] sm:$0xff] }
 0x4d3   : > { %4974 = vmatprep.subr.mxu0 %v4221_v41  ;;  %5093 = vmatprep.subr.mxu1 %v4223_v63 }
 0x4d4   : > { %4568 = vmatprep.mubr.f32.mxu0 %v17387_v6  ;;  %4687 = vmatprep.mubr.f32.mxu1 %v17387_v6 }
 0x4d5   : > { %8481 = vmatmul.mubr.msk.f32.gmra.mrb[124].mxu0 %vm3553_vm10, %v14372_v34  ;;  %8490 = vmatmul.mubr.msk.f32.gmra.mrb[124].mxu1 %vm3553_vm10, %v14372_v34 }
 0x4d6   : > { %4574 = vmatprep.mubr.f32.mxu0 %v17387_v6  ;;  %4693 = vmatprep.mubr.f32.mxu1 %v17387_v6 }
 0x4d9   : > { %8482 = vmatmul.mubr.msk.f32.gmra.mrb[126].mxu0 %vm3553_vm10, %v14383_v2  ;;  %8491 = vmatmul.mubr.msk.f32.gmra.mrb[126].mxu1 %vm3553_vm10, %v14383_v2 }
 0x4da   : > { %4580 = vmatprep.mubr.f32.mxu0 %v17387_v6  ;;  %4699 = vmatprep.mubr.f32.mxu1 %v17387_v6 }
 0x4dd   : > { %8483 = vmatmul.mubr.msk.f32.gmra.mrb[128].mxu0 %vm3553_vm10, %v14402_v40  ;;  %8492 = vmatmul.mubr.msk.f32.gmra.mrb[128].mxu1 %vm3553_vm10, %v14402_v40 }
 0x4de   : > { %4586 = vmatprep.mubr.f32.mxu0 %v17387_v6  ;;  %4705 = vmatprep.mubr.f32.mxu1 %v17387_v6 }
 0x4e1   : > { %8484 = vmatmul.mubr.msk.f32.gmra.mrb[130].mxu0 %vm3553_vm10, %v14413_v26  ;;  %8493 = vmatmul.mubr.msk.f32.gmra.mrb[130].mxu1 %vm3553_vm10, %v14413_v26 }
 0x4e2   : > { %4592 = vmatprep.mubr.f32.mxu0 %v17387_v6  ;;  %4711 = vmatprep.mubr.f32.mxu1 %v17387_v6 }
 0x4e5   : > { %8485 = vmatmul.mubr.msk.f32.gmra.mrb[132].mxu0 %vm3553_vm10, %v14432_v4  ;;  %8494 = vmatmul.mubr.msk.f32.gmra.mrb[132].mxu1 %vm3553_vm10, %v14432_v4 }
 0x4e6   : > { %4598 = vmatprep.mubr.f32.mxu0 %v17387_v6  ;;  %4717 = vmatprep.mubr.f32.mxu1 %v17387_v6 }
 0x4e9   : > { %8486 = vmatmul.mubr.msk.f32.gmra.mrb[134].mxu0 %vm3553_vm10, %v14443_v56  ;;  %8495 = vmatmul.mubr.msk.f32.gmra.mrb[134].mxu1 %vm3553_vm10, %v14443_v56 }
 0x4ea   : > { %4604 = vmatprep.mubr.f32.mxu0 %v17387_v6  ;;  %4723 = vmatprep.mubr.f32.mxu1 %v17387_v6 }
 0x4ed   : > { %8487 = vmatmul.mubr.msk.f32.gmra.mrb[136].mxu0 %vm3553_vm10, %v14454_v42  ;;  %8496 = vmatmul.mubr.msk.f32.gmra.mrb[136].mxu1 %vm3553_vm10, %v14454_v42 }
 0x4ee   : > { %4610 = vmatprep.mubr.f32.mxu0 %v17387_v6  ;;  %4729 = vmatprep.mubr.f32.mxu1 %v17387_v6 }
 0x4f1   : > { %8488 = vmatmul.mubr.msk.f32.gmra.mrb[138].mxu0 %vm3553_vm10, %v14465_v57  ;;  %8497 = vmatmul.mubr.msk.f32.gmra.mrb[138].mxu1 %vm3553_vm10, %v14465_v57 }
 0x4f2   : > { %4800 = vmatprep.mubr.f32.mxu0 %v17387_v6  ;;  %4919 = vmatprep.mubr.f32.mxu1 %v17387_v6 }
 0x4f5   : > { %8498 = vmatmul.mubr.msk.f32.vlgmr.msra.gmra.mrb[140].mxu0 %vm3553_vm10, %v14357_v47  ;;  %8507 = vmatmul.mubr.msk.f32.vlgmr.msra.gmra.mrb[140].mxu1 %vm3553_vm10, %v14357_v47 }
 0x4f6   : > { %4975 = vmatpush1.msra.mxu0 %v4220_v24  ;;  %5094 = vmatpush1.msra.mxu1 %v4222_v39 }
 0x4f7   : > { %4925 = vmatprep.mubr.f32.mxu1 %v17387_v6  ;;  %4806 = vmatprep.mubr.f32.mxu0 %v17387_v6 }
 0x4f8   : > { %10225 = vmatprep.subr.bf16.mxu1 %v17264_v31  ;;  %10193 = vmatprep.subr.bf16.mxu0 %v17263_v10 }
 0x4f9   : > { %8508 = vmatmul.mubr.msk.f32.gmra.mrb[142].mxu1 %vm3553_vm10, %v14372_v34  ;;  %8499 = vmatmul.mubr.msk.f32.gmra.mrb[142].mxu0 %vm3553_vm10, %v14372_v34 }
 0x4fa   : > { %4931 = vmatprep.mubr.f32.mxu1 %v17387_v6  ;;  %4812 = vmatprep.mubr.f32.mxu0 %v17387_v6 }
 0x4fd   : > { %8509 = vmatmul.mubr.msk.f32.gmra.mrb[144].mxu1 %vm3553_vm10, %v14383_v2  ;;  %8500 = vmatmul.mubr.msk.f32.gmra.mrb[144].mxu0 %vm3553_vm10, %v14383_v2 }
 0x4fe   : > { %4937 = vmatprep.mubr.f32.mxu1 %v17387_v6  ;;  %4818 = vmatprep.mubr.f32.mxu0 %v17387_v6 }
 0x501   : > { %8510 = vmatmul.mubr.msk.f32.gmra.mrb[146].mxu1 %vm3553_vm10, %v14402_v40  ;;  %8501 = vmatmul.mubr.msk.f32.gmra.mrb[146].mxu0 %vm3553_vm10, %v14402_v40 }
 0x502   : > { %4943 = vmatprep.mubr.f32.mxu1 %v17387_v6  ;;  %4824 = vmatprep.mubr.f32.mxu0 %v17387_v6 }
 0x505   : > { %8511 = vmatmul.mubr.msk.f32.gmra.mrb[148].mxu1 %vm3553_vm10, %v14413_v26  ;;  %8502 = vmatmul.mubr.msk.f32.gmra.mrb[148].mxu0 %vm3553_vm10, %v14413_v26 }
 0x506   : > { %4949 = vmatprep.mubr.f32.mxu1 %v17387_v6  ;;  %4830 = vmatprep.mubr.f32.mxu0 %v17387_v6 }
 0x509   : > { %8512 = vmatmul.mubr.msk.f32.gmra.mrb[150].mxu1 %vm3553_vm10, %v14432_v4  ;;  %8503 = vmatmul.mubr.msk.f32.gmra.mrb[150].mxu0 %vm3553_vm10, %v14432_v4 }
 0x50a   : > { %4955 = vmatprep.mubr.f32.mxu1 %v17387_v6  ;;  %4836 = vmatprep.mubr.f32.mxu0 %v17387_v6 }
 0x50d   : > { %8513 = vmatmul.mubr.msk.f32.gmra.mrb[152].mxu1 %vm3553_vm10, %v14443_v56  ;;  %8504 = vmatmul.mubr.msk.f32.gmra.mrb[152].mxu0 %vm3553_vm10, %v14443_v56 }
 0x50e   : > { %4961 = vmatprep.mubr.f32.mxu1 %v17387_v6  ;;  %4842 = vmatprep.mubr.f32.mxu0 %v17387_v6 }
 0x511   : > { %8514 = vmatmul.mubr.msk.f32.gmra.mrb[154].mxu1 %vm3553_vm10, %v14454_v42  ;;  %8505 = vmatmul.mubr.msk.f32.gmra.mrb[154].mxu0 %vm3553_vm10, %v14454_v42 }
 0x512   : > { %4967 = vmatprep.mubr.f32.mxu1 %v17387_v6  ;;  %4848 = vmatprep.mubr.f32.mxu0 %v17387_v6 }
 0x515   : > { %8515 = vmatmul.mubr.msk.f32.gmra.mrb[156].mxu1 %vm3553_vm10, %v14465_v57  ;;  %8506 = vmatmul.mubr.msk.f32.gmra.mrb[156].mxu0 %vm3553_vm10, %v14465_v57 }
 0x516   : > { %5157 = vmatprep.mubr.f32.mxu1 %v17387_v6  ;;  %5038 = vmatprep.mubr.f32.mxu0 %v17387_v6 }
 0x519   : > { %8525 = vmatmul.mubr.msk.f32.vlgmr.msra.gmra.mrb[158].mxu1 %vm3553_vm10, %v14357_v47  ;;  %8516 = vmatmul.mubr.msk.f32.vlgmr.msra.gmra.mrb[158].mxu0 %vm3553_vm10, %v14357_v47  ;;  %v17388_v47 = vld [vmem:[#allocation22_spill] sm:$0xff] }
 0x51a   : > { %5163 = vmatprep.mubr.f32.mxu1 %v17387_v6  ;;  %5044 = vmatprep.mubr.f32.mxu0 %v17387_v6 }
 0x51b   : > { %10227 = vmatpush3.bf16.msra.mxu1 %v17270_v36  ;;  %10195 = vmatpush3.bf16.msra.mxu0 %v17267_v22 }
 0x51c   : > { %10229 = vmatprep.subr.bf16.mxu1 %v17272_v17  ;;  %10197 = vmatprep.subr.bf16.mxu0 %v17268_v44 }
 0x51d   : > { %8526 = vmatmul.mubr.msk.f32.gmra.mrb[160].mxu1 %vm3553_vm10, %v14372_v34  ;;  %8517 = vmatmul.mubr.msk.f32.gmra.mrb[160].mxu0 %vm3553_vm10, %v14372_v34  ;;  %v17389_v34 = vld [vmem:[#allocation53_spill] sm:$0xff] }
 0x51e   : > { %5169 = vmatprep.mubr.f32.mxu1 %v17387_v6  ;;  %5050 = vmatprep.mubr.f32.mxu0 %v17387_v6 }
 0x51f   : > { %10231 = vmatpush3.bf16.msra.mxu1 %v17274_v29  ;;  %10199 = vmatpush3.bf16.msra.mxu0 %v17271_v48 }
 0x520   : > { %10233 = vmatprep.subr.bf16.mxu1 %v17276_v35  ;;  %10201 = vmatprep.subr.bf16.mxu0 %v17273_v21 }
 0x521   : > { %8527 = vmatmul.mubr.msk.f32.gmra.mrb[162].mxu1 %vm3553_vm10, %v14383_v2  ;;  %8518 = vmatmul.mubr.msk.f32.gmra.mrb[162].mxu0 %vm3553_vm10, %v14383_v2  ;;  %v17390_v2 = vld [vmem:[#allocation23_spill] sm:$0xff] }
 0x522   : > { %5175 = vmatprep.mubr.f32.mxu1 %v17387_v6  ;;  %5056 = vmatprep.mubr.f32.mxu0 %v17387_v6 }
 0x523   : > { %10235 = vmatpush3.bf16.msra.mxu1 %v17278_v19  ;;  %10203 = vmatpush3.bf16.msra.mxu0 %v17275_v16 }
 0x524   : > { %10237 = vmatprep.subr.bf16.mxu1 %v17280_v9  ;;  %10205 = vmatprep.subr.bf16.mxu0 %v17277_v12 }
 0x525   : > { %8528 = vmatmul.mubr.msk.f32.gmra.mrb[164].mxu1 %vm3553_vm10, %v14402_v40  ;;  %8519 = vmatmul.mubr.msk.f32.gmra.mrb[164].mxu0 %vm3553_vm10, %v14402_v40  ;;  %v17396_v40 = vld [vmem:[#allocation26_spill] sm:$0xff] }
 0x526   : > { %5062 = vmatprep.mubr.f32.mxu0 %v17387_v6  ;;  %5181 = vmatprep.mubr.f32.mxu1 %v17387_v6 }
 0x527   : > { %10239 = vmatpush3.bf16.msra.mxu1 %v17282_v28  ;;  %10207 = vmatpush3.bf16.msra.mxu0 %v17279_v3 }
 0x528   : > { %10241 = vmatprep.subr.bf16.mxu1 %v17284_v18  ;;  %10209 = vmatprep.subr.bf16.mxu0 %v17281_v37 }
 0x529   : > { %8520 = vmatmul.mubr.msk.f32.gmra.mrb[166].mxu0 %vm3553_vm10, %v14413_v26  ;;  %8529 = vmatmul.mubr.msk.f32.gmra.mrb[166].mxu1 %vm3553_vm10, %v14413_v26 }
 0x52a   : > { %5068 = vmatprep.mubr.f32.mxu0 %v17387_v6  ;;  %5187 = vmatprep.mubr.f32.mxu1 %v17387_v6 }
 0x52b   : > { %10243 = vmatpush3.bf16.msra.mxu1 %v17388_v47  ;;  %10211 = vmatpush3.bf16.msra.mxu0 %v17389_v34 }
 0x52c   : > { %10245 = vmatprep.subr.bf16.mxu1 %v17390_v2  ;;  %10213 = vmatprep.subr.bf16.mxu0 %v17391_v46 }
 0x52d   : > { %8521 = vmatmul.mubr.msk.f32.gmra.mrb[168].mxu0 %vm3553_vm10, %v14432_v4  ;;  %8530 = vmatmul.mubr.msk.f32.gmra.mrb[168].mxu1 %vm3553_vm10, %v14432_v4  ;;  %v10736_v4 = vld [vmem:[%s16641_s4 + $0x18] sm:$0xff] }
 0x52e   : > { %5074 = vmatprep.mubr.f32.mxu0 %v17387_v6  ;;  %5193 = vmatprep.mubr.f32.mxu1 %v17387_v6 }
 0x52f   : > { %10247 = vmatpush3.bf16.msra.mxu1 %v17392_v1  ;;  %10215 = vmatpush3.bf16.msra.mxu0 %v17393_v52 }
 0x530   : > { %10249 = vmatprep.subr.bf16.mxu1 %v17394_v32  ;;  %10217 = vmatprep.subr.bf16.mxu0 %v17395_v62 }
 0x531   : > { %8522 = vmatmul.mubr.msk.f32.gmra.mrb[170].mxu0 %vm3553_vm10, %v14443_v56  ;;  %8531 = vmatmul.mubr.msk.f32.gmra.mrb[170].mxu1 %vm3553_vm10, %v14443_v56 }
 0x532   : > { %5080 = vmatprep.mubr.f32.mxu0 %v17387_v6  ;;  %5199 = vmatprep.mubr.f32.mxu1 %v17387_v6 }
 0x533   : > { %10251 = vmatpush3.bf16.msra.mxu1 %v17396_v40  ;;  %10219 = vmatpush3.bf16.msra.mxu0 %v17397_v0 }
 0x534   : > { %10253 = vmatprep.subr.bf16.mxu1 %v17398_v59  ;;  %10221 = vmatprep.subr.bf16.mxu0 %v17399_v5 }
 0x535   : > { %8523 = vmatmul.mubr.msk.f32.gmra.mrb[172].mxu0 %vm3553_vm10, %v14454_v42  ;;  %8532 = vmatmul.mubr.msk.f32.gmra.mrb[172].mxu1 %vm3553_vm10, %v14454_v42  ;;  %v10737_v42 = vld [vmem:[%s16641_s4 + $0x80] sm:$0xff] }
 0x536   : > { %5086 = vmatprep.mubr.f32.mxu0 %v17387_v6  ;;  %5205 = vmatprep.mubr.f32.mxu1 %v17387_v6 }
 0x537   : > { %10255 = vmatpush3.bf16.msra.mxu1 %v17400_v58  ;;  %10223 = vmatpush3.bf16.msra.mxu0 %v17401_v27 }
 0x538   : > { %10289 = vmatprep.subr.bf16.mxu1 %v17402_v15  ;;  %10257 = vmatprep.subr.bf16.mxu0 %v17403_v53 }
 0x539   : > { %8524 = vmatmul.mubr.msk.f32.gmra.mrb[174].mxu0 %vm3553_vm10, %v14465_v57  ;;  %8533 = vmatmul.mubr.msk.f32.gmra.mrb[174].mxu1 %vm3553_vm10, %v14465_v57 }
 0x580   : > { %v4326_v54 = vpop.f32.mrb[104].mxu0  ;;  %v4445_v26 = vpop.f32.mrb[104].mxu1 }
 0x581   : > { %v5212_v49 = vmul.f32 %v10733_v7, %v4326_v54  ;;  %v5214_v20 = vmul.f32 %v10734_v60, %v4445_v26  ;;  %v4328_v25 = vpop.f32.mrb[105].mxu0  ;;  %v4447_v30 = vpop.f32.mrb[105].mxu1  ;;  %v10739_v7 = vld [vmem:[%s16641_s4 + $0x88] sm:$0xff]  ;;  %v10740_v60 = vld [vmem:[%s16641_s4 + $0x98] sm:$0xff] }
 0x582   : > { %v5213_v61 = vmul.f32 %v10735_v13, %v4328_v25  ;;  %v5215_v33 = vmul.f32 %v10736_v4, %v4447_v30  ;;  %v10742_v13 = vld [vmem:[%s16641_s4 + $0x110] sm:$0xff] }
 0x583   : > { %5360 = vrot.lane.b32.xlu1 %v5214_v20, %s10902_s14  ;;  %5356 = vrot.lane.b32.xlu0 %v5212_v49, %s10902_s14 }
 0x584   : > { %v4332_v55 = vpop.f32.mrb[106].mxu0  ;;  %v4451_v38 = vpop.f32.mrb[106].mxu1 }
 0x585   : > { %v4334_v23 = vpop.f32.mrb[107].mxu0  ;;  %v4453_v56 = vpop.f32.mrb[107].mxu1  ;;  %v5228_v57 = vmul.f32 %v10737_v42, %v4332_v55  ;;  %v5230_v50 = vmul.f32 %v10738_v8, %v4451_v38  ;;  %v10741_v55 = vld [vmem:[%s16641_s4 + $0x100] sm:$0xff]  ;;  %v10743_v8 = vld [vmem:[%s16641_s4 + $0x108] sm:$0xff] }
 0x586   : > { %v5229_v49 = vmul.f32 %v10739_v7, %v4334_v23  ;;  %v5231_v20 = vmul.f32 %v10740_v60, %v4453_v56  ;;  %v10745_v60 = vld [vmem:[%s16641_s4 + $0x180] sm:$0xff] }
 0x587   : > { %5362 = vrot.lane.b32.xlu0 %v5215_v33, %s10902_s14  ;;  %5358 = vrot.lane.b32.xlu1 %v5213_v61, %s10902_s14 }
 0x588   : > { %v4338_v41 = vpop.f32.mrb[108].mxu0  ;;  %v4457_v63 = vpop.f32.mrb[108].mxu1 }
 0x589   : > { %v4340_v24 = vpop.f32.mrb[109].mxu0  ;;  %v4459_v39 = vpop.f32.mrb[109].mxu1  ;;  %v5244_v38 = vmul.f32 %v10741_v55, %v4338_v41  ;;  %v5246_v61 = vmul.f32 %v10742_v13, %v4457_v63  ;;  %v10744_v41 = vld [vmem:[%s16641_s4 + $0x118] sm:$0xff] }
 0x58a   : > { %v5247_v63 = vmul.f32 %v10744_v41, %v4459_v39 }
 0x58b   : > { %5408 = vrot.lane.b32.xlu1 %v5230_v50, %s10903_s19  ;;  %5404 = vrot.lane.b32.xlu0 %v5228_v57, %s10903_s19  ;;  %v5245_v50 = vmul.f32 %v10743_v8, %v4340_v24  ;;  %v10746_v24 = vld [vmem:[%s16641_s4 + $0x190] sm:$0xff] }
 0x58c   : > { %v4344_v54 = vpop.f32.mrb[110].mxu0  ;;  %v4463_v26 = vpop.f32.mrb[110].mxu1 }
 0x58d   : > { %v4346_v25 = vpop.f32.mrb[111].mxu0  ;;  %v4465_v30 = vpop.f32.mrb[111].mxu1  ;;  %v5262_v55 = vmul.f32 %v10746_v24, %v4463_v26  ;;  %v10748_v26 = vld [vmem:[%s16641_s4 + $0x198] sm:$0xff] }
 0x58f   : > { %5410 = vrot.lane.b32.xlu0 %v5231_v20, %s10903_s19  ;;  %5406 = vrot.lane.b32.xlu1 %v5229_v49, %s10903_s19  ;;  %v5260_v20 = vmul.f32 %v10745_v60, %v4344_v54  ;;  %v10747_v54 = vld [vmem:[%s16641_s4 + $0x188] sm:$0xff] }
 0x590   : > { %v14709_v4 = vpop.f32.mrb[112].mxu0  ;;  %v14711_v33 = vpop.f32.mrb[112].mxu1  ;;  %v5261_v41 = vmul.f32 %v10747_v54, %v4346_v25  ;;  %v10750_v25 = vld [vmem:[%s16641_s4 + $0x290] sm:$0xff] }
 0x591   : > { %17404 = vst [vmem:[#allocation39_spill] sm:$0xff] %v14709_v4  ;;  %17405 = vst [vmem:[#allocation85_spill] sm:$0xff] %v14711_v33  ;;  %v14713_v23 = vpop.f32.mrb[113].mxu1  ;;  %v14715_v56 = vpop.f32.mrb[113].mxu0 }
 0x592   : > { %17406 = vst [vmem:[#allocation73_spill] sm:$0xff] %v14713_v23 }
 0x593   : > { %5456 = vrot.lane.b32.xlu1 %v5246_v61, %s10904_s12  ;;  %5452 = vrot.lane.b32.xlu0 %v5244_v38, %s10904_s12 }
 0x594   : > { %v4356_v42 = vpop.f32.mrb[114].mxu0  ;;  %v4475_v57 = vpop.f32.mrb[114].mxu1 }
 0x595   : > { %v4358_v7 = vpop.f32.mrb[115].mxu0  ;;  %v4477_v49 = vpop.f32.mrb[115].mxu1  ;;  %v5294_v54 = vmul.f32 %v10750_v25, %v4475_v57  ;;  %v10752_v57 = vld [vmem:[%s16641_s4 + $0x298] sm:$0xff] }
 0x596   : > { %v5295_v25 = vmul.f32 %v10752_v57, %v4477_v49 }
 0x597   : > { %5458 = vrot.lane.b32.xlu0 %v5247_v63, %s10904_s12  ;;  %5454 = vrot.lane.b32.xlu1 %v5245_v50, %s10904_s12  ;;  %v5263_v63 = vmul.f32 %v10748_v26, %v4465_v30 }
 0x598   : > { %v4362_v38 = vpop.f32.mrb[116].mxu0  ;;  %v4481_v13 = vpop.f32.mrb[116].mxu1 }
 0x599   : > { %v4364_v61 = vpop.f32.mrb[117].mxu0  ;;  %v4483_v39 = vpop.f32.mrb[117].mxu1 }
 0x59b   : > { %5504 = vrot.lane.b32.xlu1 %v5262_v55, %s10905_s23  ;;  %5500 = vrot.lane.b32.xlu0 %v5260_v20, %s10905_s23  ;;  %v10749_v20 = vld [vmem:[%s16641_s4 + $0x280] sm:$0xff] }
 0x59c   : > { %v4368_v8 = vpop.f32.mrb[118].mxu0  ;;  %v14735_v50 = vpop.f32.mrb[118].mxu1  ;;  %v5292_v55 = vmul.f32 %v10749_v20, %v4356_v42  ;;  %v10751_v42 = vld [vmem:[%s16641_s4 + $0x288] sm:$0xff] }
 0x59d   : > { %v4370_v60 = vpop.f32.mrb[119].mxu0  ;;  %v14743_v24 = vpop.f32.mrb[119].mxu1  ;;  %v5293_v20 = vmul.f32 %v10751_v42, %v4358_v7  ;;  %v10754_v7 = vld [vmem:[%s16641_s4 + $0x310] sm:$0xff] }
 0x59e   : > { %v5310_v42 = vmul.f32 %v10754_v7, %v4481_v13 }
 0x59f   : > { %5506 = vrot.lane.b32.xlu0 %v5263_v63, %s10905_s23  ;;  %5502 = vrot.lane.b32.xlu1 %v5261_v41, %s10905_s23 }
 0x5a0   : > { %v4493_v6 = vpop.f32.mrb[120].mxu1  ;;  %v14753_v15 = vpop.f32.mrb[120].mxu0 }
 0x5a1   : > { %v4495_v30 = vpop.f32.mrb[121].mxu1  ;;  %v14755_v26 = vpop.f32.mrb[121].mxu0 }
 0x5a3   : > { %5552 = vrot.lane.b32.xlu1 %v5294_v54, %s10906_s13  ;;  %5548 = vrot.lane.b32.xlu0 %v5292_v55, %s10906_s13  ;;  %v10753_v55 = vld [vmem:[%s16641_s4 + $0x308] sm:$0xff] }
 0x5a4   : > { %v4564_v41 = vpop.f32.mrb[122].mxu0  ;;  %v14759_v63 = vpop.f32.mrb[122].mxu1  ;;  %v5309_v54 = vmul.f32 %v10753_v55, %v4364_v61  ;;  %v10755_v61 = vld [vmem:[%s16641_s4 + $0x380] sm:$0xff] }
 0x5a5   : > { %v14767_v58 = vpop.f32.mrb[123].mxu0  ;;  %v14769_v53 = vpop.f32.mrb[123].mxu1  ;;  %v10756_v55 = vld [vmem:[%s16641_s4 + $0x300] sm:$0xff] }
 0x5a6   : > { %v5308_v7 = vmul.f32 %v10756_v55, %v4362_v38  ;;  %v10758_v38 = vld [vmem:[%s16641_s4 + $0x388] sm:$0xff] }
 0x5a7   : > { %5554 = vrot.lane.b32.xlu1 %v5295_v25, %s10906_s13  ;;  %5550 = vrot.lane.b32.xlu0 %v5293_v20, %s10906_s13  ;;  %v5324_v20 = vmul.f32 %v10755_v61, %v4368_v8  ;;  %v5325_v55 = vmul.f32 %v10758_v38, %v4370_v60  ;;  %v10760_v60 = vld [vmem:[%s16641_s4 + $0x390] sm:$0xff] }
 0x5a8   : > { %v14779_v27 = vpop.f32.mrb[124].mxu0  ;;  %v14781_v49 = vpop.f32.mrb[124].mxu1 }
 0x5a9   : > { %v14783_v57 = vpop.f32.mrb[125].mxu0  ;;  %v14785_v59 = vpop.f32.mrb[125].mxu1 }
 0x5ab   : > { %5600 = vrot.lane.b32.xlu1 %v5310_v42, %s10907_s28  ;;  %5598 = vrot.lane.b32.xlu0 %v5309_v54, %s10907_s28  ;;  %v10757_v42 = vld [vmem:[%s16641_s4 + $0x318] sm:$0xff] }
 0x5ac   : > { %v14792_v25 = vpop.f32.mrb[126].mxu0  ;;  %v14794_v13 = vpop.f32.mrb[126].mxu1  ;;  %v5311_v61 = vmul.f32 %v10757_v42, %v4483_v39  ;;  %v5326_v42 = vmul.f32 %v10760_v60, %v14735_v50  ;;  %v10762_v50 = vld [vmem:[%s16641_s4 + $0x418] sm:$0xff] }
 0x5ad   : > { %v14799_v40 = vpop.f32.mrb[127].mxu1  ;;  %v14801_v5 = vpop.f32.mrb[127].mxu0  ;;  %v5343_v60 = vmul.f32 %v10762_v50, %v4495_v30  ;;  %v10764_v30 = vld [vmem:[%s16641_s4 + $0x400] sm:$0xff] }
 0x5af   : > { %5596 = vrot.lane.b32.xlu1 %v5308_v7, %s10907_s28  ;;  %5644 = vrot.lane.b32.xlu0 %v5324_v20, %s10908_s10  ;;  %v10759_v20 = vld [vmem:[%s16641_s4 + $0x410] sm:$0xff] }
 0x5b0   : > { %v14805_v54 = vpop.f32.mrb[128].mxu1  ;;  %v14807_v8 = vpop.f32.mrb[128].mxu0  ;;  %v5342_v7 = vmul.f32 %v10759_v20, %v4493_v6  ;;  %v10761_v20 = vld [vmem:[%s16641_s4 + $0x398] sm:$0xff] }
 0x5b1   : > { %v14815_v0 = vpop.f32.mrb[129].mxu1  ;;  %v14817_v32 = vpop.f32.mrb[129].mxu0  ;;  %v5327_v62 = vmul.f32 %v10761_v20, %v14743_v24  ;;  %v5340_v20 = vmul.f32 %v10764_v30, %v14753_v15  ;;  %v10766_v15 = vld [vmem:[%s16641_s4 + $0x408] sm:$0xff] }
 0x5b2   : > { %v5341_v30 = vmul.f32 %v10766_v15, %v14755_v26  ;;  %v10768_v26 = vld [vmem:[%s16641_s4 + $0x28] sm:$0xff] }
 0x5b3   : > { %5602 = vrot.lane.b32.xlu1 %v5311_v61, %s10907_s28  ;;  %5646 = vrot.lane.b32.xlu0 %v5325_v55, %s10908_s10  ;;  %v5217_v15 = vmul.f32 %v10768_v26, %v14767_v58  ;;  %v10770_v58 = vld [vmem:[%s16641_s4 + $0xb0] sm:$0xff] }
 0x5b4   : > { %v14824_v1 = vpop.f32.mrb[130].mxu1  ;;  %v14826_v39 = vpop.f32.mrb[130].mxu0  ;;  %v5234_v26 = vmul.f32 %v10770_v58, %v14781_v49  ;;  %v10772_v49 = vld [vmem:[%s16641_s4 + $0xa8] sm:$0xff] }
 0x5b5   : > { %17407 = vst [vmem:[#allocation86_spill] sm:$0xff] %v14824_v1  ;;  %v14832_v38 = vpop.f32.mrb[131].mxu1  ;;  %v14834_v61 = vpop.f32.mrb[131].mxu0  ;;  %v5233_v58 = vmul.f32 %v10772_v49, %v14783_v57  ;;  %v10774_v57 = vld [vmem:[%s16641_s4 + $0x130] sm:$0xff] }
 0x5b6   : > { %17408 = vst [vmem:[#allocation75_spill] sm:$0xff] %v14832_v38  ;;  %17409 = vst [vmem:[#allocation76_spill] sm:$0xff] %v14834_v61  ;;  %v5250_v49 = vmul.f32 %v10774_v57, %v14794_v13  ;;  %v10776_v13 = vld [vmem:[%s16641_s4 + $0x128] sm:$0xff] }
 0x5b7   : > { %5648 = vrot.lane.b32.xlu1 %v5326_v42, %s10908_s10  ;;  %5696 = vrot.lane.b32.xlu0 %v5342_v7, %s10909_s25  ;;  %v10763_v7 = vld [vmem:[%s16641_s4 + $0x20] sm:$0xff]  ;;  %v5249_v57 = vmul.f32 %v10776_v13, %v14801_v5  ;;  %v10778_v5 = vld [vmem:[%s16641_s4 + $0x1b0] sm:$0xff] }
 0x5b8   : > { %v14838_v55 = vpop.f32.mrb[132].mxu1  ;;  %v14840_v6 = vpop.f32.mrb[132].mxu0  ;;  %v5216_v2 = vmul.f32 %v10763_v7, %v4564_v41  ;;  %v10765_v41 = vld [vmem:[%s16641_s4 + $0x30] sm:$0xff]  ;;  %v5266_v13 = vmul.f32 %v10778_v5, %v14805_v54  ;;  %v10780_v54 = vld [vmem:[%s16641_s4 + $0x1a8] sm:$0xff] }
 0x5b9   : > { %v14849_v52 = vpop.f32.mrb[133].mxu1  ;;  %v14851_v42 = vpop.f32.mrb[133].mxu0  ;;  %v5265_v5 = vmul.f32 %v10780_v54, %v14817_v32  ;;  %v10782_v32 = vld [vmem:[%s16641_s4 + $0x2a8] sm:$0xff] }
 0x5ba   : > { %v5297_v54 = vmul.f32 %v10782_v32, %v14851_v42  ;;  %v10784_v42 = vld [vmem:[%s16641_s4 + $0x2b8] sm:$0xff] }
 0x5bb   : > { %5650 = vrot.lane.b32.xlu1 %v5327_v62, %s10908_s10  ;;  %5698 = vrot.lane.b32.xlu0 %v5343_v60, %s10909_s25  ;;  %v5218_v60 = vmul.f32 %v10765_v41, %v14759_v63  ;;  %v5299_v32 = vmul.f32 %v10784_v42, %v14849_v52  ;;  %v10786_v52 = vld [vmem:[%s16641_s4 + $0x320] sm:$0xff] }
 0x5bc   : > { %v14858_v47 = vpop.f32.mrb[134].mxu1  ;;  %v14860_v24 = vpop.f32.mrb[134].mxu0 }
 0x5bd   : > { %v14866_v50 = vpop.f32.mrb[135].mxu1  ;;  %v14868_v62 = vpop.f32.mrb[135].mxu0  ;;  %v5312_v42 = vmul.f32 %v10786_v52, %v14860_v24  ;;  %v10788_v24 = vld [vmem:[%s16641_s4 + $0x328] sm:$0xff] }
 0x5be   : > { %v5313_v52 = vmul.f32 %v10788_v24, %v14868_v62  ;;  %v10790_v62 = vld [vmem:[%s16641_s4 + $0x420] sm:$0xff] }
 0x5bf   : > { %5692 = vrot.lane.b32.xlu1 %v5340_v20, %s10909_s25  ;;  %5364 = vrot.lane.b32.xlu0 %v5216_v2, %s10902_s14  ;;  %v10767_v2 = vld [vmem:[%s16641_s4 + $0xa0] sm:$0xff] }
 0x5c0   : > { %v14876_v7 = vpop.f32.mrb[136].mxu1  ;;  %v14878_v46 = vpop.f32.mrb[136].mxu0  ;;  %v5232_v63 = vmul.f32 %v10767_v2, %v14779_v27  ;;  %v10769_v2 = vld [vmem:[%s16641_s4 + $0x38] sm:$0xff] }
 0x5c1   : > { %v14884_v34 = vpop.f32.mrb[137].mxu1  ;;  %v14886_v20 = vpop.f32.mrb[137].mxu0  ;;  %v5219_v37 = vmul.f32 %v10769_v2, %v14769_v53 }
 0x5c3   : > { %5694 = vrot.lane.b32.xlu1 %v5341_v30, %s10909_s25  ;;  %5368 = vrot.lane.b32.xlu0 %v5218_v60, %s10902_s14 }
 0x5c4   : > { %v14894_v41 = vpop.f32.mrb[138].mxu1  ;;  %v14896_v18 = vpop.f32.mrb[138].mxu0 }
 0x5c5   : > { %v14902_v28 = vpop.f32.mrb[139].mxu1  ;;  %v14904_v30 = vpop.f32.mrb[139].mxu0  ;;  %v5344_v24 = vmul.f32 %v10790_v62, %v14896_v18  ;;  %v10792_v18 = vld [vmem:[%s16641_s4 + $0x3a0] sm:$0xff] }
 0x5c6   : > { %v5328_v62 = vmul.f32 %v10792_v18, %v14878_v46  ;;  %v10793_v46 = vld [vmem:[%s16641_s4 + $0x3a8] sm:$0xff] }
 0x5c7   : > { %5366 = vrot.lane.b32.xlu1 %v5217_v15, %s10902_s14  ;;  %5412 = vrot.lane.b32.xlu0 %v5232_v63, %s10903_s19  ;;  %v10771_v63 = vld [vmem:[%s16641_s4 + $0x120] sm:$0xff]  ;;  %v10794_v18 = vld [vmem:[%s16641_s4 + $0x48] sm:$0xff] }
 0x5c8   : > { %v14908_v60 = vpop.f32.mrb[140].mxu1  ;;  %v14910_v27 = vpop.f32.mrb[140].mxu0  ;;  %v5248_v53 = vmul.f32 %v10771_v63, %v14792_v25  ;;  %v10773_v63 = vld [vmem:[%s16641_s4 + $0xb8] sm:$0xff] }
 0x5c9   : > { %v14920_v3 = vpop.f32.mrb[141].mxu1  ;;  %v14922_v15 = vpop.f32.mrb[141].mxu0  ;;  %v5235_v12 = vmul.f32 %v10773_v63, %v14785_v59 }
 0x5ca   : > { %v5221_v38 = vmul.f32 %v10794_v18, %v14922_v15  ;;  %v10795_v15 = vld [vmem:[%s16641_s4 + $0x3b8] sm:$0xff]  ;;  %v10796_v18 = vld [vmem:[%s16641_s4 + $0xc8] sm:$0xff] }
 0x5cb   : > { %5370 = vrot.lane.b32.xlu1 %v5219_v37, %s10902_s14  ;;  %5416 = vrot.lane.b32.xlu0 %v5234_v26, %s10903_s19 }
 0x5cc   : > { %v14930_v2 = vpop.f32.mrb[142].mxu1  ;;  %v14932_v9 = vpop.f32.mrb[142].mxu0 }
 0x5cd   : > { %v14938_v19 = vpop.f32.mrb[143].mxu1  ;;  %v14940_v37 = vpop.f32.mrb[143].mxu0 }
 0x5cf   : > { %5414 = vrot.lane.b32.xlu1 %v5233_v58, %s10903_s19  ;;  %5460 = vrot.lane.b32.xlu0 %v5248_v53, %s10904_s12  ;;  %v10775_v53 = vld [vmem:[%s16641_s4 + $0x1a0] sm:$0xff] }
 0x5d0   : > { %v14944_v26 = vpop.f32.mrb[144].mxu1  ;;  %v14946_v25 = vpop.f32.mrb[144].mxu0  ;;  %v5264_v59 = vmul.f32 %v10775_v53, %v14807_v8  ;;  %v10777_v53 = vld [vmem:[%s16641_s4 + $0x138] sm:$0xff] }
 0x5d1   : > { %v14956_v16 = vpop.f32.mrb[145].mxu1  ;;  %v14958_v58 = vpop.f32.mrb[145].mxu0  ;;  %v5251_v21 = vmul.f32 %v10777_v53, %v14799_v40 }
 0x5d3   : > { %5418 = vrot.lane.b32.xlu1 %v5235_v12, %s10903_s19  ;;  %5464 = vrot.lane.b32.xlu0 %v5250_v49, %s10904_s12 }
 0x5d4   : > { %v14966_v63 = vpop.f32.mrb[146].mxu1  ;;  %v14968_v35 = vpop.f32.mrb[146].mxu0 }
 0x5d5   : > { %v14974_v29 = vpop.f32.mrb[147].mxu1  ;;  %v14976_v12 = vpop.f32.mrb[147].mxu0 }
 0x5d7   : > { %5462 = vrot.lane.b32.xlu1 %v5249_v57, %s10904_s12  ;;  %5508 = vrot.lane.b32.xlu0 %v5264_v59, %s10905_s23  ;;  %v10779_v59 = vld [vmem:[%s16641_s4 + $0x2a0] sm:$0xff] }
 0x5d8   : > { %v14980_v49 = vpop.f32.mrb[148].mxu1  ;;  %v14982_v8 = vpop.f32.mrb[148].mxu0  ;;  %v5296_v40 = vmul.f32 %v10779_v59, %v14840_v6  ;;  %v10781_v59 = vld [vmem:[%s16641_s4 + $0x1b8] sm:$0xff] }
 0x5d9   : > { %17410 = vst [vmem:[#allocation42_spill] sm:$0xff] %v14980_v49  ;;  %17411 = vst [vmem:[#allocation83_spill] sm:$0xff] %v14982_v8  ;;  %v14992_v48 = vpop.f32.mrb[149].mxu1  ;;  %v14994_v57 = vpop.f32.mrb[149].mxu0  ;;  %v5267_v36 = vmul.f32 %v10781_v59, %v14815_v0  ;;  %v10783_v0 = vld [vmem:[%s16641_s4 + $0x2b0] sm:$0xff] }
 0x5da   : > { %17412 = vst [vmem:[#allocation79_spill] sm:$0xff] %v14992_v48  ;;  %17413 = vst [vmem:[#allocation80_spill] sm:$0xff] %v14994_v57  ;;  %v5298_v59 = vmul.f32 %v10783_v0, %v14838_v55  ;;  %v10785_v55 = vld [vmem:[%s16641_s4 + $0x330] sm:$0xff] }
 0x5db   : > { %5466 = vrot.lane.b32.xlu1 %v5251_v21, %s10904_s12  ;;  %5512 = vrot.lane.b32.xlu0 %v5266_v13, %s10905_s23  ;;  %v5314_v0 = vmul.f32 %v10785_v55, %v14858_v47  ;;  %v10787_v47 = vld [vmem:[%s16641_s4 + $0x3b0] sm:$0xff] }
 0x5dc   : > { %v15002_v53 = vpop.f32.mrb[150].mxu1  ;;  %v15004_v17 = vpop.f32.mrb[150].mxu0  ;;  %v5330_v55 = vmul.f32 %v10787_v47, %v14876_v7  ;;  %v10789_v7 = vld [vmem:[%s16641_s4 + $0x338] sm:$0xff] }
 0x5dd   : > { %v15010_v44 = vpop.f32.mrb[151].mxu1  ;;  %v15012_v21 = vpop.f32.mrb[151].mxu0  ;;  %v5315_v47 = vmul.f32 %v10789_v7, %v14866_v50  ;;  %v10791_v50 = vld [vmem:[%s16641_s4 + $0x430] sm:$0xff] }
 0x5de   : > { %v5346_v7 = vmul.f32 %v10791_v50, %v14894_v41  ;;  %v5329_v50 = vmul.f32 %v10793_v46, %v14886_v20  ;;  %v5331_v46 = vmul.f32 %v10795_v15, %v14884_v34  ;;  %v10797_v34 = vld [vmem:[%s16641_s4 + $0x2c0] sm:$0xff] }
 0x5df   : > { %5510 = vrot.lane.b32.xlu1 %v5265_v5, %s10905_s23  ;;  %5556 = vrot.lane.b32.xlu0 %v5296_v40, %s10906_s13  ;;  %v5300_v15 = vmul.f32 %v10797_v34, %v15004_v17  ;;  %v10799_v17 = vld [vmem:[%s16641_s4 + $0x340] sm:$0xff] }
 0x5e0   : > { %v15016_v13 = vpop.f32.mrb[152].mxu1  ;;  %v15018_v6 = vpop.f32.mrb[152].mxu0 }
 0x5e1   : > { %v15028_v22 = vpop.f32.mrb[153].mxu1  ;;  %v15030_v5 = vpop.f32.mrb[153].mxu0  ;;  %v5316_v34 = vmul.f32 %v10799_v17, %v15018_v6  ;;  %v10801_v6 = vld [vmem:[%s16641_s4 + $0x3c0] sm:$0xff] }
 0x5e3   : > { %5514 = vrot.lane.b32.xlu1 %v5267_v36, %s10905_s23  ;;  %5558 = vrot.lane.b32.xlu0 %v5297_v54, %s10906_s13 }
 0x5e4   : > { %v15034_v40 = vpop.f32.mrb[154].mxu1  ;;  %v15036_v31 = vpop.f32.mrb[154].mxu0 }
 0x5e5   : > { %v15046_v10 = vpop.f32.mrb[155].mxu1  ;;  %v15048_v36 = vpop.f32.mrb[155].mxu0  ;;  %v5332_v17 = vmul.f32 %v10801_v6, %v15036_v31  ;;  %v10803_v31 = vld [vmem:[%s16641_s4 + $0x440] sm:$0xff] }
 0x5e7   : > { %5560 = vrot.lane.b32.xlu1 %v5298_v59, %s10906_s13  ;;  %5562 = vrot.lane.b32.xlu0 %v5299_v32, %s10906_s13 }
 0x5e8   : > { %v15052_v54 = vpop.f32.mrb[156].mxu1  ;;  %v15054_v51 = vpop.f32.mrb[156].mxu0 }
 0x5e9   : > { %v15064_v14 = vpop.f32.mrb[157].mxu1  ;;  %v15066_v59 = vpop.f32.mrb[157].mxu0  ;;  %v5348_v6 = vmul.f32 %v10803_v31, %v15054_v51  ;;  %v10805_v51 = vld [vmem:[%s16641_s4 + $0x78] sm:$0xff] }
 0x5eb   : > { %5608 = vrot.lane.b32.xlu1 %v5314_v0, %s10907_s28  ;;  %5604 = vrot.lane.b32.xlu0 %v5312_v42, %s10907_s28 }
 0x5ec   : > { %v15070_v32 = vpop.f32.mrb[158].mxu1  ;;  %v15072_v45 = vpop.f32.mrb[158].mxu0 }
 0x5ed   : > { %17414 = vst [vmem:[#allocation45_spill] sm:$0xff] %v15070_v32  ;;  %v15082_v11 = vpop.f32.mrb[159].mxu1  ;;  %v15084_v0 = vpop.f32.mrb[159].mxu0 }
 0x5ee   : > { %v5227_v31 = vmul.f32 %v10805_v51, %v15082_v11 }
 0x5ef   : > { %5656 = vrot.lane.b32.xlu1 %v5330_v55, %s10908_s10  ;;  %5606 = vrot.lane.b32.xlu0 %v5313_v52, %s10907_s28 }
 0x5f0   : > { %v15088_v42 = vpop.f32.mrb[160].mxu1  ;;  %v15090_v43 = vpop.f32.mrb[160].mxu0 }
 0x5f1   : > { %17415 = vst [vmem:[#allocation89_spill] sm:$0xff] %v15088_v42  ;;  %v15100_v48 = vpop.f32.mrb[161].mxu1  ;;  %v15102_v55 = vpop.f32.mrb[161].mxu0  ;;  %v5237_v42 = vmul.f32 %v10796_v18, %v14940_v37  ;;  %v10798_v18 = vld [vmem:[%s16641_s4 + $0x428] sm:$0xff] }
 0x5f3   : > { %5610 = vrot.lane.b32.xlu0 %v5315_v47, %s10907_s28  ;;  %5700 = vrot.lane.b32.xlu1 %v5344_v24, %s10909_s25 }
 0x5f4   : > { %v15106_v52 = vpop.f32.mrb[162].mxu1  ;;  %v15108_v49 = vpop.f32.mrb[162].mxu0 }
 0x5f5   : > { %17416 = vst [vmem:[#allocation93_spill] sm:$0xff] %v15106_v52  ;;  %v15118_v57 = vpop.permute.xlu1 %5360  ;;  %v15120_v47 = vpop.permute.xlu0 %5356 }
 0x5f6   : > { %17417 = vst [vmem:[#allocation60_spill] sm:$0xff] %v15118_v57  ;;  %v15122_v24 = vpop.f32.mrb[163].mxu1  ;;  %v15124_v8 = vpop.f32.mrb[163].mxu0 }
 0x5f7   : > { %5652 = vrot.lane.b32.xlu0 %v5328_v62, %s10908_s10  ;;  %5704 = vrot.lane.b32.xlu1 %v5346_v7, %s10909_s25 }
 0x5f8   : > { %v15128_v4 = vpop.f32.mrb[164].mxu1  ;;  %v15130_v41 = vpop.f32.mrb[164].mxu0 }
 0x5f9   : > { %17418 = vst [vmem:[#allocation87_spill] sm:$0xff] %v15128_v4  ;;  %v15140_v52 = vpop.permute.xlu0 %5362  ;;  %v15142_v62 = vpop.permute.xlu1 %5358 }
 0x5fa   : > { %v15144_v7 = vpop.f32.mrb[165].mxu1  ;;  %v15146_v4 = vpop.f32.mrb[165].mxu0 }
 0x5fb   : > { %5654 = vrot.lane.b32.xlu0 %v5329_v50, %s10908_s10  ;;  %5374 = vrot.lane.b32.xlu1 %v5221_v38, %s10902_s14 }
 0x5fc   : > { %v15150_v1 = vpop.f32.mrb[166].mxu0  ;;  %v15152_v20 = vpop.f32.mrb[166].mxu1 }
 0x5fd   : > { %17419 = vst [vmem:[#allocation119_spill] sm:$0xff] %v15150_v1  ;;  %17420 = vst [vmem:[#allocation122_spill] sm:$0xff] %v15152_v20  ;;  %v15162_v32 = vpop.permute.xlu1 %5408  ;;  %v15164_v50 = vpop.permute.xlu0 %5404 }
 0x5fe   : > { %17421 = vst [vmem:[#allocation91_spill] sm:$0xff] %v15162_v32  ;;  %v15166_v38 = vpop.f32.mrb[167].mxu0  ;;  %v15168_v1 = vpop.f32.mrb[167].mxu1 }
 0x5ff   : > { %17422 = vst [vmem:[#allocation125_spill] sm:$0xff] %v15166_v38  ;;  %17423 = vst [vmem:[#allocation81_spill] sm:$0xff] %v15168_v1  ;;  %5658 = vrot.lane.b32.xlu0 %v5331_v46, %s10908_s10  ;;  %5422 = vrot.lane.b32.xlu1 %v5237_v42, %s10903_s19  ;;  %v5345_v1 = vmul.f32 %v10798_v18, %v14904_v30  ;;  %v10800_v18 = vld [vmem:[%s16641_s4 + $0x438] sm:$0xff] }
 0x600   : > { %v15176_v20 = vpop.f32.mrb[168].mxu0  ;;  %v15178_v37 = vpop.f32.mrb[168].mxu1 }
 0x601   : > { %v15184_v38 = vpop.permute.xlu0 %5410  ;;  %v15186_v46 = vpop.permute.xlu1 %5406 }
 0x602   : > { %v15188_v42 = vpop.f32.mrb[169].mxu0  ;;  %v15190_v61 = vpop.f32.mrb[169].mxu1 }
 0x603   : > { %17424 = vst [vmem:[#allocation127_spill] sm:$0xff] %v15190_v61  ;;  %5702 = vrot.lane.b32.xlu0 %v5345_v1, %s10909_s25  ;;  %5564 = vrot.lane.b32.xlu1 %v5300_v15, %s10906_s13  ;;  %v5347_v61 = vmul.f32 %v10800_v18, %v14902_v28  ;;  %v10802_v18 = vld [vmem:[%s16641_s4 + $0x40] sm:$0xff] }
 0x604   : > { %v15198_v23 = vpop.f32.mrb[170].mxu0  ;;  %v15200_v30 = vpop.f32.mrb[170].mxu1 }
 0x605   : > { %17425 = vst [vmem:[#allocation152_spill] sm:$0xff] %v15200_v30  ;;  %v15206_v57 = vpop.permute.xlu1 %5456  ;;  %v15208_v1 = vpop.permute.xlu0 %5452 }
 0x606   : > { %17426 = vst [vmem:[#allocation153_spill] sm:$0xff] %v15206_v57  ;;  %v15210_v15 = vpop.f32.mrb[171].mxu0  ;;  %v15212_v32 = vpop.f32.mrb[171].mxu1 }
 0x607   : > { %17427 = vst [vmem:[#allocation154_spill] sm:$0xff] %v15210_v15  ;;  %17428 = vst [vmem:[#allocation155_spill] sm:$0xff] %v15212_v32  ;;  %5706 = vrot.lane.b32.xlu0 %v5347_v61, %s10909_s25  ;;  %5612 = vrot.lane.b32.xlu1 %v5316_v34, %s10907_s28  ;;  %v5220_v32 = vmul.f32 %v10802_v18, %v14910_v27  ;;  %v10804_v18 = vld [vmem:[%s16641_s4 + $0xc0] sm:$0xff] }
 0x608   : > { %v15220_v33 = vpop.f32.mrb[172].mxu0  ;;  %v15222_v28 = vpop.f32.mrb[172].mxu1 }
 0x609   : > { %17429 = vst [vmem:[#allocation156_spill] sm:$0xff] %v15222_v28  ;;  %v15228_v15 = vpop.permute.xlu0 %5458  ;;  %v15230_v61 = vpop.permute.xlu1 %5454 }
 0x60a   : > { %v15232_v34 = vpop.f32.mrb[173].mxu0  ;;  %v15234_v57 = vpop.f32.mrb[173].mxu1 }
 0x60b   : > { %17430 = vst [vmem:[#allocation157_spill] sm:$0xff] %v15232_v34  ;;  %17431 = vst [vmem:[#allocation158_spill] sm:$0xff] %v15234_v57  ;;  %5372 = vrot.lane.b32.xlu0 %v5220_v32, %s10902_s14  ;;  %5660 = vrot.lane.b32.xlu1 %v5332_v17, %s10908_s10  ;;  %v5236_v57 = vmul.f32 %v10804_v18, %v14932_v9  ;;  %v10806_v9 = vld [vmem:[%s16641_s4 + $0xf8] sm:$0xff] }
 0x60c   : > { %v15242_v28 = vpop.f32.mrb[174].mxu0  ;;  %v15244_v27 = vpop.f32.mrb[174].mxu1  ;;  %v5243_v18 = vmul.f32 %v10806_v9, %v15100_v48 }
 0x60d   : > { %17432 = vst [vmem:[#allocation159_spill] sm:$0xff] %v15244_v27  ;;  %v15250_v34 = vpop.permute.xlu1 %5504  ;;  %v15252_v32 = vpop.permute.xlu0 %5500 }
 0x60e   : > { %17433 = vst [vmem:[#allocation160_spill] sm:$0xff] %v15252_v32  ;;  %v15254_v17 = vpop.f32.mrb[175].mxu0  ;;  %v15256_v30 = vpop.f32.mrb[175].mxu1 }
 0x60f   : > { %17434 = vst [vmem:[#allocation161_spill] sm:$0xff] %v15254_v17  ;;  %5420 = vrot.lane.b32.xlu0 %v5236_v57, %s10903_s19  ;;  %5708 = vrot.lane.b32.xlu1 %v5348_v6, %s10909_s25  ;;  %v10807_v57 = vld [vmem:[%s16641_s4 + $0x1f8] sm:$0xff] }
 0x610   : > { %v5275_v11 = vmul.f32 %v10807_v57, %v15144_v7  ;;  %v10808_v6 = vld [vmem:[%s16641_s4 + $0x178] sm:$0xff] }
 0x611   : > { %v15268_v27 = vpop.permute.xlu0 %5506  ;;  %v15270_v17 = vpop.permute.xlu1 %5502  ;;  %v5259_v48 = vmul.f32 %v10808_v6, %v15122_v24 }
 0x613   : > { %5386 = vrot.lane.b32.xlu0 %v5227_v31, %s10902_s14  ;;  %5434 = vrot.lane.b32.xlu1 %v5243_v18, %s10903_s19  ;;  %v10809_v31 = vld [vmem:[%s16641_s4 + $0x140] sm:$0xff]  ;;  %v10810_v18 = vld [vmem:[%s16641_s4 + $0x148] sm:$0xff] }
 0x614   : > { %v5252_v7 = vmul.f32 %v10809_v31, %v14946_v25  ;;  %v5253_v24 = vmul.f32 %v10810_v18, %v14958_v58 }
 0x615   : > { %v15282_v51 = vpop.permute.xlu1 %5552  ;;  %v15284_v9 = vpop.permute.xlu0 %5548 }
 0x616   : > { %17435 = vst [vmem:[#allocation162_spill] sm:$0xff] %v15284_v9 }
 0x617   : > { %5482 = vrot.lane.b32.xlu0 %v5259_v48, %s10904_s12  ;;  %5530 = vrot.lane.b32.xlu1 %v5275_v11, %s10905_s23  ;;  %v10811_v11 = vld [vmem:[%s16641_s4 + $0x1c0] sm:$0xff]  ;;  %v10812_v48 = vld [vmem:[%s16641_s4 + $0x1c8] sm:$0xff] }
 0x618   : > { %v5268_v25 = vmul.f32 %v10811_v11, %v14968_v35  ;;  %v5269_v58 = vmul.f32 %v10812_v48, %v14976_v12 }
 0x619   : > { %v15296_v57 = vpop.permute.xlu1 %5554  ;;  %v15298_v6 = vpop.permute.xlu0 %5550 }
 0x61a   : > { %17436 = vst [vmem:[#allocation163_spill] sm:$0xff] %v15298_v6 }
 0x61b   : > { %5468 = vrot.lane.b32.xlu0 %v5252_v7, %s10904_s12  ;;  %5470 = vrot.lane.b32.xlu1 %v5253_v24, %s10904_s12  ;;  %v10813_v7 = vld [vmem:[%s16641_s4 + $0x2d0] sm:$0xff]  ;;  %v10814_v24 = vld [vmem:[%s16641_s4 + $0x2c8] sm:$0xff] }
 0x61c   : > { %v5302_v35 = vmul.f32 %v10813_v7, %v15002_v53  ;;  %v5301_v12 = vmul.f32 %v10814_v24, %v15012_v21 }
 0x61d   : > { %v15310_v31 = vpop.permute.xlu1 %5600  ;;  %v15312_v18 = vpop.permute.xlu0 %5598 }
 0x61e   : > { %17437 = vst [vmem:[#allocation164_spill] sm:$0xff] %v15312_v18 }
 0x61f   : > { %5516 = vrot.lane.b32.xlu0 %v5268_v25, %s10905_s23  ;;  %5518 = vrot.lane.b32.xlu1 %v5269_v58, %s10905_s23  ;;  %v10815_v25 = vld [vmem:[%s16641_s4 + $0x350] sm:$0xff]  ;;  %v10816_v58 = vld [vmem:[%s16641_s4 + $0x348] sm:$0xff] }
 0x620   : > { %v5318_v53 = vmul.f32 %v10815_v25, %v15016_v13  ;;  %v5317_v21 = vmul.f32 %v10816_v58, %v15030_v5 }
 0x621   : > { %v15324_v11 = vpop.permute.xlu1 %5596  ;;  %v15326_v48 = vpop.permute.xlu0 %5644 }
 0x622   : > { %17438 = vst [vmem:[#allocation165_spill] sm:$0xff] %v15324_v11  ;;  %17439 = vst [vmem:[#allocation166_spill] sm:$0xff] %v15326_v48  ;;  %v10821_v11 = vld [vmem:[%s16641_s4 + $0x58] sm:$0xff] }
 0x623   : > { %5566 = vrot.lane.b32.xlu0 %v5301_v12, %s10906_s13  ;;  %5568 = vrot.lane.b32.xlu1 %v5302_v35, %s10906_s13  ;;  %v10817_v35 = vld [vmem:[%s16641_s4 + $0x3d0] sm:$0xff]  ;;  %v10818_v12 = vld [vmem:[%s16641_s4 + $0x3c8] sm:$0xff]  ;;  %v5223_v9 = vmul.f32 %v10821_v11, %v14920_v3  ;;  %v5402_v3 = vsel %vm1922_vm8, %v15120_v47, %v15142_v62 }
 0x624   : > { %v5334_v13 = vmul.f32 %v10817_v35, %v15034_v40  ;;  %v5333_v5 = vmul.f32 %v10818_v12, %v15048_v36  ;;  %v5546_v40 = vsel %vm2069_vm2, %v15252_v32, %v15270_v17  ;;  %v5593_v36 = vsel %vm2118_vm3, %v15298_v6, %v15282_v51  ;;  %v10819_v12 = vld [vmem:[%s16641_s4 + $0x208] sm:$0xff]  ;;  %v10822_v11 = vld [vmem:[%s16641_s4 + $0xd0] sm:$0xff] }
 0x625   : > { %v15338_v7 = vpop.permute.xlu1 %5602  ;;  %v15340_v24 = vpop.permute.xlu0 %5646  ;;  %v5641_v35 = vsel %vm2167_vm4, %v15312_v18, %v15310_v31 }
 0x627   : > { %5614 = vrot.lane.b32.xlu0 %v5317_v21, %s10907_s28  ;;  %5616 = vrot.lane.b32.xlu1 %v5318_v53, %s10907_s28 }
 0x629   : > { %v15352_v25 = vpop.permute.xlu1 %5648  ;;  %v15354_v58 = vpop.permute.xlu0 %5696 }
 0x62a   : > { %v5689_v53 = vsel %vm2216_vm5, %v15340_v24, %v15352_v25 }
 0x62b   : > { %5662 = vrot.lane.b32.xlu0 %v5333_v5, %s10908_s10  ;;  %5664 = vrot.lane.b32.xlu1 %v5334_v13, %s10908_s10  ;;  %v5277_v13 = vmul.f32 %v10819_v12, %v14715_v56  ;;  %v10820_v5 = vld [vmem:[%s16641_s4 + $0x50] sm:$0xff]  ;;  %v5789_v6 = vadd.f32 %v5689_v53, %v5641_v35  ;;  %v5450_v56 = vsel %vm1971_vm6, %v15164_v50, %v15186_v46 }
 0x62c   : > { %v5222_v32 = vmul.f32 %v10820_v5, %v14908_v60  ;;  %v5498_v60 = vsel %vm2020_vm7, %v15208_v1, %v15230_v61  ;;  %v5238_v53 = vmul.f32 %v10822_v11, %v14930_v2  ;;  %v10824_v2 = vld [vmem:[%s16641_s4 + $0x150] sm:$0xff] }
 0x62d   : > { %v15386_v18 = vpop.permute.xlu1 %5650  ;;  %v15388_v48 = vpop.permute.xlu0 %5698  ;;  %v5757_v12 = vadd.f32 %v5546_v40, %v5498_v60  ;;  %v5773_v5 = vadd.f32 %v5593_v36, %v5277_v13  ;;  %v10823_v40 = vld [vmem:[%s16641_s4 + $0xd8] sm:$0xff]  ;;  %v5254_v11 = vmul.f32 %v10824_v2, %v14944_v26  ;;  %v10826_v26 = vld [vmem:[%s16641_s4 + $0x1d0] sm:$0xff] }
 0x62e   : > { %v5239_v36 = vmul.f32 %v10823_v40, %v14938_v19  ;;  %v10825_v19 = vld [vmem:[%s16641_s4 + $0x158] sm:$0xff] }
 0x62f   : > { %5376 = vrot.lane.b32.xlu0 %v5222_v32, %s10902_s14  ;;  %5378 = vrot.lane.b32.xlu1 %v5223_v9, %s10902_s14  ;;  %v5741_v32 = vadd.f32 %v5450_v56, %v5402_v3  ;;  %v5821_v35 = vadd.f32 %v5789_v6, %v5773_v5  ;;  %v5255_v6 = vmul.f32 %v10825_v19, %v14956_v16  ;;  %v10827_v40 = vld [vmem:[%s16641_s4 + $0x1d8] sm:$0xff] }
 0x630   : > { %v5270_v16 = vmul.f32 %v10826_v26, %v14966_v63 }
 0x631   : > { %v15412_v9 = vpop.permute.xlu1 %5692  ;;  %v5365_v13 = vpop.permute.xlu0 %5364  ;;  %v5805_v60 = vadd.f32 %v5757_v12, %v5741_v32 }
 0x633   : > { %5424 = vrot.lane.b32.xlu0 %v5238_v53, %s10903_s19  ;;  %5426 = vrot.lane.b32.xlu1 %v5239_v36, %s10903_s19  ;;  %v5837_v56 = vadd.f32 %v5821_v35, %v5805_v60  ;;  %v5271_v36 = vmul.f32 %v10827_v40, %v14974_v29  ;;  %v5399_v60 = vsel %vm1922_vm8, %v15140_v52, %v5365_v13  ;;  %v10828_v29 = vld [vmem:[%s16641_s4 + $0x2d8] sm:$0xff] }
 0x635   : > { %v15424_v5 = vpop.permute.xlu1 %5694  ;;  %v5369_v12 = vpop.permute.xlu0 %5368 }
 0x636   : > { %v5737_v3 = vsel %vm2265_vm9, %v15424_v5, %v15354_v58 }
 0x637   : > { %v15430_v53 = vadd.f32 %v5837_v56, %v5737_v3  ;;  %5472 = vrot.lane.b32.xlu0 %v5254_v11, %s10904_s12  ;;  %5474 = vrot.lane.b32.xlu1 %v5255_v6, %s10904_s12  ;;  %v5303_v6 = vmul.f32 %v10828_v29, %v15010_v44  ;;  %v10829_v56 = vld [vmem:[%s16641_s4 + $0x450] sm:$0xff]  ;;  %v10830_v44 = vld [vmem:[%s16641_s4 + $0x358] sm:$0xff] }
 0x638   : > { %v5319_v40 = vmul.f32 %v10830_v44, %v15028_v22  ;;  %v10832_v22 = vld [vmem:[%s16641_s4 + $0x3d8] sm:$0xff] }
 0x639   : > { %v5367_v32 = vpop.permute.xlu1 %5366  ;;  %v5413_v35 = vpop.permute.xlu0 %5412  ;;  %5932 = vmatprep.mubr.f32.mxu0 %v15430_v53 }
 0x63a   : > { %v5397_v2 = vsel %vm1922_vm8, %v5367_v32, %v5369_v12  ;;  %v5398_v63 = vsel %vm1922_vm8, %v5365_v13, %v5367_v32  ;;  %v5447_v11 = vsel %vm1971_vm6, %v15184_v38, %v5413_v35  ;;  %v5350_v13 = vmul.f32 %v10829_v56, %v15052_v54  ;;  %v10831_v54 = vld [vmem:[%s16641_s4 + $0x68] sm:$0xff] }
 0x63b   : > { %v5744_v19 = vadd.f32 %v5447_v11, %v5399_v60  ;;  %5520 = vrot.lane.b32.xlu0 %v5270_v16, %s10905_s23  ;;  %5522 = vrot.lane.b32.xlu1 %v5271_v36, %s10905_s23  ;;  %v5225_v36 = vmul.f32 %v10831_v54, %v15084_v0  ;;  %v5335_v0 = vmul.f32 %v10832_v22, %v15046_v10  ;;  %v10833_v56 = vld [vmem:[%s16641_s4 + $0xe8] sm:$0xff] }
 0x63c   : > { %v10834_v10 = vld [vmem:[%s16641_s4 + $0x448] sm:$0xff] }
 0x63d   : > { %v15463_v3 = vpop.permute.xlu1 %5370  ;;  %v5417_v26 = vpop.permute.xlu0 %5416 }
 0x63e   : > { %v5396_v16 = vsel %vm1922_vm8, %v5369_v12, %v15463_v3 }
 0x63f   : > { %5570 = vrot.lane.b32.xlu0 %v5303_v6, %s10906_s13  ;;  %5712 = vrot.lane.b32.xlu1 %v5350_v13, %s10909_s25  ;;  %v5241_v13 = vmul.f32 %v10833_v56, %v15102_v55  ;;  %v5349_v55 = vmul.f32 %v10834_v10, %v15066_v59 }
 0x641   : > { %v5415_v32 = vpop.permute.xlu1 %5414  ;;  %v5461_v60 = vpop.permute.xlu0 %5460 }
 0x642   : > { %v5445_v12 = vsel %vm1971_vm6, %v5415_v32, %v5417_v26  ;;  %v5446_v11 = vsel %vm1971_vm6, %v5413_v35, %v5415_v32 }
 0x643   : > { %v5745_v29 = vadd.f32 %v5446_v11, %v5398_v63  ;;  %v5746_v6 = vadd.f32 %v5445_v12, %v5397_v2  ;;  %5618 = vrot.lane.b32.xlu0 %v5319_v40, %s10907_s28  ;;  %5382 = vrot.lane.b32.xlu1 %v5225_v36, %s10902_s14  ;;  %v10835_v40 = vld [vmem:[%s16641_s4 + $0x168] sm:$0xff] }
 0x644   : > { %v5257_v54 = vmul.f32 %v10835_v40, %v15124_v8  ;;  %v10836_v8 = vld [vmem:[%s16641_s4 + $0x2e0] sm:$0xff] }
 0x645   : > { %v15492_v44 = vpop.permute.xlu1 %5418  ;;  %v15494_v35 = vpop.permute.xlu0 %5464  ;;  %v5304_v22 = vmul.f32 %v10836_v8, %v15176_v20  ;;  %v10838_v20 = vld [vmem:[%s16641_s4 + $0x360] sm:$0xff] }
 0x646   : > { %v5444_v2 = vsel %vm1971_vm6, %v5417_v26, %v15492_v44  ;;  %v5320_v10 = vmul.f32 %v10838_v20, %v15198_v23 }
 0x647   : > { %v15499_v63 = vadd.f32 %v5444_v2, %v5396_v16  ;;  %5666 = vrot.lane.b32.xlu0 %v5335_v0, %s10908_s10  ;;  %5430 = vrot.lane.b32.xlu1 %v5241_v13, %s10903_s19  ;;  %v5495_v16 = vsel %vm2020_vm7, %v15228_v15, %v5461_v60  ;;  %v10837_v0 = vld [vmem:[%s16641_s4 + $0x458] sm:$0xff] }
 0x649   : > { %v5463_v36 = vpop.permute.xlu1 %5462  ;;  %v5509_v26 = vpop.permute.xlu0 %5508 }
 0x64a   : > { %v5493_v32 = vsel %vm2020_vm7, %v5463_v36, %v15494_v35  ;;  %v5494_v12 = vsel %vm2020_vm7, %v5461_v60, %v5463_v36  ;;  %v5543_v59 = vsel %vm2069_vm2, %v15268_v27, %v5509_v26  ;;  %v5351_v60 = vmul.f32 %v10837_v0, %v15064_v14  ;;  %v10839_v14 = vld [vmem:[%s16641_s4 + $0x60] sm:$0xff] }
 0x64b   : > { %v5760_v11 = vadd.f32 %v5543_v59, %v5495_v16  ;;  %5710 = vrot.lane.b32.xlu0 %v5349_v55, %s10909_s25  ;;  %5478 = vrot.lane.b32.xlu1 %v5257_v54, %s10904_s12 }
 0x64d   : > { %v15532_v56 = vadd.f32 %v5760_v11, %v5744_v19  ;;  %v15534_v13 = vpop.permute.xlu1 %5466  ;;  %v15536_v2 = vpop.permute.xlu0 %5512  ;;  %v5224_v19 = vmul.f32 %v10839_v14, %v15072_v45  ;;  %v10840_v45 = vld [vmem:[%s16641_s4 + $0x3e0] sm:$0xff] }
 0x64e   : > { %v5336_v23 = vmul.f32 %v10840_v45, %v15220_v33  ;;  %v10841_v11 = vld [vmem:[%s16641_s4 + $0x220] sm:$0xff] }
 0x64f   : > { %5714 = vrot.lane.b32.xlu0 %v5351_v60, %s10909_s25  ;;  %5572 = vrot.lane.b32.xlu1 %v5304_v22, %s10906_s13  ;;  %v5280_v8 = vmul.f32 %v10841_v11, %v14826_v39  ;;  %v5688_v11 = vsel %vm2216_vm5, %v15352_v25, %v15386_v18 }
 0x651   : > { %v5511_v55 = vpop.permute.xlu1 %5510  ;;  %v15548_v40 = vpop.permute.xlu0 %5556 }
 0x652   : > { %v5541_v54 = vsel %vm2069_vm2, %v5511_v55, %v15536_v2  ;;  %v5542_v36 = vsel %vm2069_vm2, %v5509_v26, %v5511_v55  ;;  %v10842_v26 = vld [vmem:[%s16641_s4 + $0xe0] sm:$0xff] }
 0x653   : > { %v5761_v16 = vadd.f32 %v5542_v36, %v5494_v12  ;;  %v5762_v59 = vadd.f32 %v5541_v54, %v5493_v32  ;;  %5380 = vrot.lane.b32.xlu0 %v5224_v19, %s10902_s14  ;;  %5620 = vrot.lane.b32.xlu1 %v5320_v10, %s10907_s28  ;;  %v5240_v32 = vmul.f32 %v10842_v26, %v15090_v43  ;;  %v10843_v43 = vld [vmem:[%s16641_s4 + $0x160] sm:$0xff]  ;;  %v17441_v26 = vld [vmem:[#allocation152_spill] sm:$0xff] }
 0x654   : > { %v10845_v19 = vld [vmem:[%s16641_s4 + $0x460] sm:$0xff] }
 0x655   : > { %v15569_v12 = vadd.f32 %v5761_v16, %v5745_v29  ;;  %v15571_v22 = vadd.f32 %v5762_v59, %v5746_v6  ;;  %v15573_v0 = vpop.permute.xlu1 %5514  ;;  %v15575_v60 = vpop.permute.xlu0 %5558  ;;  %v5256_v29 = vmul.f32 %v10843_v43, %v15108_v49  ;;  %v10844_v6 = vld [vmem:[%s16641_s4 + $0x1e8] sm:$0xff]  ;;  %v5352_v49 = vmul.f32 %v10845_v19, %v15242_v28  ;;  %v10846_v55 = vld [vmem:[%s16641_s4 + $0x1e0] sm:$0xff]  ;;  %v10847_v16 = vld [vmem:[%s16641_s4 + $0x2f0] sm:$0xff] }
 0x656   : > { %v5590_v33 = vsel %vm2118_vm3, %v15548_v40, %v15575_v60  ;;  %v5273_v20 = vmul.f32 %v10844_v6, %v15146_v4  ;;  %v5272_v4 = vmul.f32 %v10846_v55, %v15130_v41  ;;  %v5306_v59 = vmul.f32 %v10847_v16, %v15178_v37  ;;  %v10848_v28 = vld [vmem:[%s16641_s4 + $0x2e8] sm:$0xff]  ;;  %v17444_v19 = vld [vmem:[#allocation153_spill] sm:$0xff] }
 0x657   : > { %v15581_v39 = vadd.f32 %v5590_v33, %v5280_v8  ;;  %5428 = vrot.lane.b32.xlu0 %v5240_v32, %s10903_s19  ;;  %5668 = vrot.lane.b32.xlu1 %v5336_v23, %s10908_s10  ;;  %v5305_v45 = vmul.f32 %v10848_v28, %v15188_v42  ;;  %v5545_v37 = vsel %vm2069_vm2, %v15270_v17, %v15250_v34  ;;  %v10849_v42 = vld [vmem:[%s16641_s4 + $0x370] sm:$0xff]  ;;  %v17442_v33 = vld [vmem:[#allocation85_spill] sm:$0xff]  ;;  %v17443_v6 = vld [vmem:[#allocation91_spill] sm:$0xff] }
 0x658   : > { %v5322_v25 = vmul.f32 %v10849_v42, %v17441_v26  ;;  %v10850_v32 = vld [vmem:[%s16641_s4 + $0x210] sm:$0xff]  ;;  %v5592_v17 = vsel %vm2118_vm3, %v15282_v51, %v15296_v57  ;;  %v10851_v51 = vld [vmem:[%s16641_s4 + $0x368] sm:$0xff] }
 0x659   : > { %v15593_v10 = vpop.permute.xlu1 %5560  ;;  %v15595_v14 = vpop.permute.xlu0 %5562  ;;  %v5278_v43 = vmul.f32 %v10850_v32, %v17442_v33  ;;  %v17446_v28 = vld [vmem:[#allocation60_spill] sm:$0xff] }
 0x65a   : > { %v17447_v26 = vld [vmem:[#allocation156_spill] sm:$0xff] }
 0x65b   : > { %5476 = vrot.lane.b32.xlu0 %v5256_v29, %s10904_s12  ;;  %5526 = vrot.lane.b32.xlu1 %v5273_v20, %s10905_s23  ;;  %v5640_v29 = vsel %vm2167_vm4, %v15310_v31, %v15338_v7  ;;  %v5449_v20 = vsel %vm1971_vm6, %v15186_v46, %v17443_v6  ;;  %v5401_v46 = vsel %vm1922_vm8, %v15142_v62, %v17446_v28  ;;  %v10852_v62 = vld [vmem:[%s16641_s4 + $0x3f0] sm:$0xff] }
 0x65c   : > { %v5790_v55 = vadd.f32 %v5688_v11, %v5640_v29  ;;  %v5448_v11 = vsel %vm1971_vm6, %v17443_v6, %v15184_v38  ;;  %v5774_v42 = vadd.f32 %v5592_v17, %v5278_v43  ;;  %v5338_v32 = vmul.f32 %v10852_v62, %v17447_v26  ;;  %v10854_v6 = vld [vmem:[%s16641_s4 + $0x3e8] sm:$0xff] }
 0x65d   : > { %v15607_v54 = vpop.permute.xlu1 %5608  ;;  %v5605_v36 = vpop.permute.xlu0 %5604  ;;  %v5742_v33 = vadd.f32 %v5449_v20, %v5401_v46  ;;  %v5496_v38 = vsel %vm2020_vm7, %v17444_v19, %v15228_v15  ;;  %v5400_v43 = vsel %vm1922_vm8, %v17446_v28, %v15140_v52  ;;  %v17449_v20 = vld [vmem:[#allocation157_spill] sm:$0xff]  ;;  %v10855_v28 = vld [vmem:[%s16641_s4 + $0x228] sm:$0xff]  ;;  %v5588_v26 = vsel %vm2118_vm3, %v15593_v10, %v15595_v14 }
 0x65e   : > { %v5822_v29 = vadd.f32 %v5790_v55, %v5774_v42  ;;  %v5589_v55 = vsel %vm2118_vm3, %v15575_v60, %v15593_v10  ;;  %v17451_v46 = vld [vmem:[#allocation45_spill] sm:$0xff]  ;;  %v10857_v60 = vld [vmem:[%s16641_s4 + $0xf0] sm:$0xff] }
 0x65f   : > { %5524 = vrot.lane.b32.xlu0 %v5272_v4, %s10905_s23  ;;  %5716 = vrot.lane.b32.xlu1 %v5352_v49, %s10909_s25  ;;  %v5497_v49 = vsel %vm2020_vm7, %v15230_v61, %v17444_v19  ;;  %v17445_v4 = vld [vmem:[#allocation154_spill] sm:$0xff]  ;;  %v5544_v61 = vsel %vm2069_vm2, %v15250_v34, %v15268_v27  ;;  %v10853_v34 = vld [vmem:[%s16641_s4 + $0x218] sm:$0xff]  ;;  %v5743_v19 = vadd.f32 %v5448_v11, %v5400_v43 }
 0x660   : > { %v5321_v16 = vmul.f32 %v10851_v51, %v17445_v4  ;;  %v17448_v27 = vld [vmem:[#allocation73_spill] sm:$0xff]  ;;  %v5759_v17 = vadd.f32 %v5544_v61, %v5496_v38 }
 0x661   : > { %v15619_v41 = vpop.permute.xlu1 %5656  ;;  %v15621_v23 = vpop.permute.xlu0 %5606 }
 0x662   : > { %v15630_v8 = vsel %vm2167_vm4, %v5605_v36, %v15621_v23  ;;  %v5807_v42 = vadd.f32 %v5759_v17, %v5743_v19  ;;  %v17455_v19 = vld [vmem:[#allocation87_spill] sm:$0xff] }
 0x663   : > { %5574 = vrot.lane.b32.xlu0 %v5305_v45, %s10906_s13  ;;  %5576 = vrot.lane.b32.xlu1 %v5306_v59, %s10906_s13  ;;  %v5758_v45 = vadd.f32 %v5545_v37, %v5497_v49  ;;  %v5279_v37 = vmul.f32 %v10853_v34, %v17448_v27  ;;  %v5337_v49 = vmul.f32 %v10854_v6, %v17449_v20  ;;  %v10859_v20 = vld [vmem:[%s16641_s4 + $0x170] sm:$0xff] }
 0x665   : > { %v15666_v59 = vpop.permute.xlu0 %5610  ;;  %v15668_v31 = vpop.permute.xlu1 %5700  ;;  %v5806_v4 = vadd.f32 %v5758_v45, %v5742_v33  ;;  %v17452_v45 = vld [vmem:[#allocation89_spill] sm:$0xff]  ;;  %v5637_v33 = vsel %vm2167_vm4, %v15621_v23, %v15607_v54  ;;  %v17453_v23 = vld [vmem:[#allocation86_spill] sm:$0xff] }
 0x666   : > { %v5242_v11 = vmul.f32 %v10857_v60, %v17452_v45  ;;  %v17456_v60 = vld [vmem:[#allocation127_spill] sm:$0xff] }
 0x667   : > { %5622 = vrot.lane.b32.xlu0 %v5321_v16, %s10907_s28  ;;  %5624 = vrot.lane.b32.xlu1 %v5322_v25, %s10907_s28  ;;  %v5591_v25 = vsel %vm2118_vm3, %v15296_v57, %v15548_v40  ;;  %v5639_v57 = vsel %vm2167_vm4, %v15338_v7, %v5605_v36  ;;  %v17450_v7 = vld [vmem:[#allocation76_spill] sm:$0xff]  ;;  %v5838_v62 = vadd.f32 %v5822_v29, %v5806_v4 }
 0x668   : > { %v5775_v40 = vadd.f32 %v5591_v25, %v5279_v37  ;;  %v5281_v36 = vmul.f32 %v10855_v28, %v17450_v7  ;;  %v10858_v29 = vld [vmem:[%s16641_s4 + $0x230] sm:$0xff] }
 0x669   : > { %v5653_v51 = vpop.permute.xlu0 %5652  ;;  %v15708_v15 = vpop.permute.xlu1 %5704  ;;  %v5282_v6 = vmul.f32 %v10858_v29, %v17453_v23  ;;  %v10864_v29 = vld [vmem:[%s16641_s4 + $0x468] sm:$0xff]  ;;  %v17463_v23 = vld [vmem:[#allocation161_spill] sm:$0xff] }
 0x66a   : > { %v5687_v52 = vsel %vm2216_vm5, %v15386_v18, %v5653_v51  ;;  %v10856_v18 = vld [vmem:[%s16641_s4 + $0x70] sm:$0xff]  ;;  %v5777_v37 = vadd.f32 %v5589_v55, %v5281_v36 }
 0x66b   : > { %v5791_v16 = vadd.f32 %v5687_v52, %v5639_v57  ;;  %5670 = vrot.lane.b32.xlu0 %v5337_v49, %s10908_s10  ;;  %5672 = vrot.lane.b32.xlu1 %v5338_v32, %s10908_s10  ;;  %v5226_v61 = vmul.f32 %v10856_v18, %v17451_v46  ;;  %v17454_v49 = vld [vmem:[#allocation93_spill] sm:$0xff]  ;;  %v5735_v57 = vsel %vm2265_vm9, %v15388_v48, %v15668_v31 }
 0x66c   : > { %v5736_v52 = vsel %vm2265_vm9, %v15354_v58, %v15388_v48  ;;  %v5778_v18 = vadd.f32 %v5588_v26, %v5282_v6  ;;  %v5636_v46 = vsel %vm2167_vm4, %v15607_v54, %v15666_v59  ;;  %v10861_v54 = vld [vmem:[%s16641_s4 + $0x2f8] sm:$0xff]  ;;  %v5353_v6 = vmul.f32 %v10864_v29, %v17463_v23  ;;  %v17471_v29 = vld [vmem:[#allocation7_spill] sm:$0xff] }
 0x66d   : > { %v5823_v32 = vadd.f32 %v5791_v16, %v5775_v40  ;;  %v5655_v34 = vpop.permute.xlu0 %5654  ;;  %v15738_v27 = vpop.permute.xlu1 %5374  ;;  %v15777_v36 = vadd.f32 %v5838_v62, %v5736_v52  ;;  %v10867_v52 = vld [vmem:[%s16641_s4 + $0x238] sm:$0xff] }
 0x66e   : > { %v5685_v38 = vsel %vm2216_vm5, %v5655_v34, %v15619_v41  ;;  %v5686_v25 = vsel %vm2216_vm5, %v5653_v51, %v5655_v34  ;;  %v5258_v51 = vmul.f32 %v10859_v20, %v17454_v49  ;;  %v17459_v34 = vld [vmem:[#allocation35_spill] sm:$0xff]  ;;  %v17464_v20 = vld [vmem:[#allocation30_spill] sm:$0xff]  ;;  %v10865_v49 = vld [vmem:[%s16641_s4 + $0x470] sm:$0xff] }
 0x66f   : > { %v5792_v43 = vadd.f32 %v5686_v25, %v15630_v8  ;;  %v5793_v10 = vadd.f32 %v5685_v38, %v5637_v33  ;;  %5384 = vrot.lane.b32.xlu0 %v5226_v61, %s10902_s14  ;;  %5432 = vrot.lane.b32.xlu1 %v5242_v11, %s10903_s19  ;;  %v5839_v17 = vadd.f32 %v5823_v32, %v5807_v42  ;;  %v10860_v8 = vld [vmem:[%s16641_s4 + $0x1f0] sm:$0xff]  ;;  %v17457_v11 = vld [vmem:[#allocation55_spill] sm:$0xff]  ;;  %v10863_v38 = vld [vmem:[%s16641_s4 + $0x3f8] sm:$0xff] }
 0x670   : > { %v5274_v4 = vmul.f32 %v10860_v8, %v17455_v19  ;;  %v17461_v25 = vld [vmem:[#allocation158_spill] sm:$0xff] }
 0x671   : > { %v5824_v40 = vadd.f32 %v5792_v43, %v15581_v39  ;;  %v5825_v55 = vadd.f32 %v5793_v10, %v5777_v37  ;;  %v5659_v16 = vpop.permute.xlu0 %5658  ;;  %v15773_v28 = vpop.permute.xlu1 %5422  ;;  %v15775_v7 = vadd.f32 %v5839_v17, %v5735_v57  ;;  %v5339_v43 = vmul.f32 %v10863_v38, %v17461_v25  ;;  %v17462_v10 = vld [vmem:[#allocation27_spill] sm:$0xff] }
 0x672   : > { %v5684_v48 = vsel %vm2216_vm5, %v15619_v41, %v5659_v16  ;;  %v5307_v41 = vmul.f32 %v10861_v54, %v17456_v60 }
 0x673   : > { %v5794_v58 = vadd.f32 %v5684_v48, %v5636_v46  ;;  %6002 = vmatprep.mubr.f32.mxu1 %v15775_v7  ;;  %5480 = vrot.lane.b32.xlu0 %v5258_v51, %s10904_s12  ;;  %v5840_v39 = vadd.f32 %v5824_v40, %v15532_v56  ;;  %v15790_v61 = vadd.f32 %v5825_v55, %v15569_v12  ;;  %v10862_v56 = vld [vmem:[%s16641_s4 + $0x378] sm:$0xff]  ;;  %v17458_v12 = vld [vmem:[#allocation155_spill] sm:$0xff] }
 0x674   : > { %5528 = vrot.lane.b32.xlu1 %v5274_v4, %s10905_s23  ;;  %6003 = vmatmul.mubr.f32.vlgmr.msra.gmra.mrb[176].mxu1 %v15777_v36  ;;  %v5323_v26 = vmul.f32 %v10862_v56, %v17458_v12  ;;  %v17465_v51 = vld [vmem:[#allocation159_spill] sm:$0xff]  ;;  %v10866_v4 = vld [vmem:[%s16641_s4 + $0x478] sm:$0xff]  ;;  %v6431_v21 = vmul.f32 %v15775_v7, %v15775_v7 }
 0x675   : > { %v5826_v45 = vadd.f32 %v5794_v58, %v5778_v18  ;;  %10291 = vmatpush3.bf16.msra.mxu1 %v17457_v11  ;;  %v15799_v42 = vpop.permute.xlu0 %5702  ;;  %v15801_v62 = vpop.permute.xlu1 %5564  ;;  %v5354_v8 = vmul.f32 %v10865_v49, %v17465_v51  ;;  %v5355_v57 = vmul.f32 %v10866_v4, %v15256_v30  ;;  %v17466_v40 = vld [vmem:[#allocation75_spill] sm:$0xff]  ;;  %v17467_v18 = vld [vmem:[#allocation38_spill] sm:$0xff]  ;;  %v17476_v4 = vld [vmem:[#allocation164_spill] sm:$0xff] }
 0x676   : > { %v5734_v32 = vsel %vm2265_vm9, %v15668_v31, %v15799_v42  ;;  %10293 = vmatprep.subr.bf16.mxu1 %v17459_v34  ;;  %v5587_v19 = vsel %vm2118_vm3, %v15595_v14, %v15801_v62  ;;  %v5283_v55 = vmul.f32 %v10867_v52, %v17466_v40  ;;  %v17473_v51 = vld [vmem:[#allocation2_spill] sm:$0xff] }
 0x677   : > { %v15812_v37 = vadd.f32 %v5840_v39, %v5734_v32  ;;  %5578 = vrot.lane.b32.xlu0 %v5307_v41, %s10906_s13  ;;  %v15816_v33 = vadd.f32 %v5826_v45, %v15571_v22  ;;  %v5540_v22 = vsel %vm2069_vm2, %v15536_v2, %v15573_v0  ;;  %v5492_v2 = vsel %vm2020_vm7, %v15494_v35, %v15534_v13  ;;  %v17468_v39 = vld [vmem:[#allocation52_spill] sm:$0xff]  ;;  %v17470_v32 = vld [vmem:[#allocation66_spill] sm:$0xff] }
 0x678   : > { %5626 = vrot.lane.b32.xlu1 %v5323_v26, %s10907_s28  ;;  %v5763_v35 = vadd.f32 %v5540_v22, %v5492_v2  ;;  %v5779_v54 = vadd.f32 %v5587_v19, %v5283_v55  ;;  %v17475_v2 = vld [vmem:[#allocation162_spill] sm:$0xff]  ;;  %s280_s28 = scalar_lea.vmem %s16644_s7, %s8355_s27 }
 0x679   : > { %17460 = vst [vmem:[#allocation78_spill] sm:$0xff] %v15812_v37  ;;  %10295 = vmatpush3.bf16.msra.mxu1 %v17462_v10  ;;  %v15824_v31 = vpop.permute.xlu0 %5706  ;;  %v15826_v17 = vpop.permute.xlu1 %5612  ;;  %v10868_v55 = vld [vmem:[%s16641_s4 + $0x200] sm:$0xff] }
 0x67a   : > { %10297 = vmatprep.subr.bf16.mxu1 %v17464_v20  ;;  %v5635_v14 = vsel %vm2167_vm4, %v15666_v59, %v15826_v17  ;;  %v5811_v41 = vadd.f32 %v5763_v35, %v15499_v63  ;;  %v17469_v59 = vld [vmem:[#allocation69_spill] sm:$0xff]  ;;  %v17478_v35 = vld [vmem:[#allocation39_spill] sm:$0xff] }
 0x67b   : > { %5674 = vrot.lane.b32.xlu0 %v5339_v43, %s10908_s10 }
 0x67c   : > { %5718 = vrot.lane.b32.xlu1 %v5353_v6, %s10909_s25 }
 0x67d   : > { %10299 = vmatpush3.bf16.msra.mxu1 %v17467_v18  ;;  %v5373_v46 = vpop.permute.xlu0 %5372  ;;  %v15860_v48 = vpop.permute.xlu1 %5660 }
 0x67e   : > { %v5395_v30 = vsel %vm1922_vm8, %v15463_v3, %v5373_v46  ;;  %v5683_v58 = vsel %vm2216_vm5, %v5659_v16, %v15860_v48  ;;  %10301 = vmatprep.subr.bf16.mxu1 %v17468_v39  ;;  %v5394_v3 = vsel %vm1922_vm8, %v5373_v46, %v15738_v27  ;;  %v5276_v46 = vmul.f32 %v10868_v55, %v17478_v35 }
 0x67f   : > { %v5795_v60 = vadd.f32 %v5683_v58, %v5635_v14  ;;  %5720 = vrot.lane.b32.xlu0 %v5354_v8, %s10909_s25  ;;  %v17474_v8 = vld [vmem:[#allocation163_spill] sm:$0xff] }
 0x680   : > { %5722 = vrot.lane.b32.xlu1 %v5355_v57, %s10909_s25  ;;  %v5594_v19 = vsel %vm2118_vm3, %v17475_v2, %v17474_v8  ;;  %v17477_v57 = vld [vmem:[#allocation165_spill] sm:$0xff]  ;;  %v17483_v8 = vld [vmem:[#allocation74_spill] sm:$0xff] }
 0x681   : > { %v5827_v45 = vadd.f32 %v5795_v60, %v5779_v54  ;;  %10303 = vmatpush3.bf16.msra.mxu1 %v17469_v59  ;;  %v5421_v56 = vpop.permute.xlu0 %5420  ;;  %v15877_v12 = vpop.permute.xlu1 %5708  ;;  %v5642_v52 = vsel %vm2167_vm4, %v17477_v57, %v17476_v4  ;;  %v17480_v60 = vld [vmem:[#allocation160_spill] sm:$0xff] }
 0x682   : > { %v5442_v16 = vsel %vm1971_vm6, %v5421_v56, %v15773_v28  ;;  %v5443_v26 = vsel %vm1971_vm6, %v15492_v44, %v5421_v56  ;;  %10305 = vmatprep.subr.bf16.mxu1 %v17470_v32  ;;  %v5731_v43 = vsel %vm2265_vm9, %v15824_v31, %v15877_v12  ;;  %v17472_v44 = vld [vmem:[#allocation166_spill] sm:$0xff] }
 0x683   : > { %v5748_v63 = vadd.f32 %v5443_v26, %v5395_v30  ;;  %v15889_v38 = vadd.f32 %v5442_v16, %v5394_v3  ;;  %v5843_v25 = vadd.f32 %v5827_v45, %v5811_v41  ;;  %v5690_v49 = vsel %vm2216_vm5, %v17472_v44, %v15340_v24  ;;  %v17479_v30 = vld [vmem:[#allocation5_spill] sm:$0xff] }
 0x684   : > { %v5788_v14 = vadd.f32 %v5690_v49, %v5642_v52  ;;  %v17481_v41 = vld [vmem:[#allocation77_spill] sm:$0xff]  ;;  %v5772_v45 = vadd.f32 %v5594_v19, %v5276_v46  ;;  %v5738_v19 = vsel %vm2265_vm9, %v15412_v9, %v15424_v5  ;;  %v5733_v52 = vsel %vm2265_vm9, %v15799_v42, %v15708_v15 }
 0x685   : > { %v15895_v22 = vadd.f32 %v5843_v25, %v5731_v43  ;;  %10307 = vmatpush3.bf16.msra.mxu1 %v17471_v29  ;;  %v15898_v23 = vpop.permute.xlu0 %5386  ;;  %v15900_v6 = vpop.permute.xlu1 %5434  ;;  %v17482_v25 = vld [vmem:[#allocation8_spill] sm:$0xff] }
 0x686   : > { %10309 = vmatprep.subr.bf16.mxu1 %v17473_v51  ;;  %v5403_v40 = vsel %vm1922_vm8, %v15898_v23, %v15120_v47  ;;  %v5451_v24 = vsel %vm1971_vm6, %v15900_v6, %v15164_v50  ;;  %v5820_v16 = vadd.f32 %v5788_v14, %v5772_v45  ;;  %v17486_v14 = vld [vmem:[#allocation67_spill] sm:$0xff]  ;;  %v17525_v29 = vld [vmem:[#allocation16_spill] sm:$0xff] }
 0x687   : > { %6142 = vmatprep.mubr.f32.mxu1 %v15895_v22  ;;  %v5740_v56 = vadd.f32 %v5451_v24, %v5403_v40  ;;  %v17484_v24 = vld [vmem:[#allocation56_spill] sm:$0xff] }
 0x689   : > { %10311 = vmatpush3.bf16.msra.mxu1 %v17479_v30  ;;  %v15929_v58 = vpop.permute.xlu0 %5482  ;;  %v15931_v54 = vpop.permute.xlu1 %5530 }
 0x68a   : > { %v5499_v47 = vsel %vm2020_vm7, %v15929_v58, %v15208_v1  ;;  %v5547_v50 = vsel %vm2069_vm2, %v15931_v54, %v17480_v60  ;;  %10313 = vmatprep.subr.bf16.mxu1 %v17481_v41  ;;  %v5732_v1 = vsel %vm2265_vm9, %v15708_v15, %v15824_v31  ;;  %v15974_v15 = vadd.f32 %v15790_v61, %v5733_v52  ;;  %v17489_v61 = vld [vmem:[#allocation90_spill] sm:$0xff]  ;;  %v17502_v41 = vld [vmem:[#allocation104_spill] sm:$0xff] }
 0x68b   : > { %v5756_v3 = vadd.f32 %v5547_v50, %v5499_v47  ;;  %v15964_v31 = vadd.f32 %v15816_v33, %v5732_v1  ;;  %v17487_v47 = vld [vmem:[#allocation88_spill] sm:$0xff]  ;;  %v17488_v33 = vld [vmem:[#allocation83_spill] sm:$0xff] }
 0x68c   : > { %v17492_v1 = vld [vmem:[#allocation95_spill] sm:$0xff] }
 0x68d   : > { %v5804_v26 = vadd.f32 %v5756_v3, %v5740_v56  ;;  %10315 = vmatpush3.bf16.msra.mxu1 %v17482_v25  ;;  %v5469_v43 = vpop.permute.xlu0 %5468  ;;  %v15943_v49 = vpop.permute.xlu1 %5470  ;;  %17485 = vst [vmem:[#allocation152_spill] sm:$0xff] %v15964_v31  ;;  %v17490_v3 = vld [vmem:[#allocation92_spill] sm:$0xff] }
 0x68e   : > { %10317 = vmatprep.subr.bf16.mxu1 %v17483_v8  ;;  %v5491_v46 = vsel %vm2020_vm7, %v15534_v13, %v5469_v43  ;;  %v10869_v13 = vld [vmem:[%s16641_s4 + $0x240] sm:$0xff] }
 0x68f   : > { %v5836_v4 = vadd.f32 %v5820_v16, %v5804_v26  ;;  %v5284_v60 = vmul.f32 %v10869_v13, %v17488_v33  ;;  %v17491_v26 = vld [vmem:[#allocation94_spill] sm:$0xff]  ;;  %v17496_v13 = vld [vmem:[#allocation99_spill] sm:$0xff] }
 0x690   : > { %v10870_v33 = vld [vmem:[%s16641_s4 + $0x248] sm:$0xff] }
 0x691   : > { %v15958_v40 = vadd.f32 %v5836_v4, %v5738_v19  ;;  %10319 = vmatpush3.bf16.msra.mxu1 %v17484_v24  ;;  %v5517_v55 = vpop.permute.xlu0 %5516  ;;  %v15961_v35 = vpop.permute.xlu1 %5518  ;;  %v17493_v19 = vld [vmem:[#allocation96_spill] sm:$0xff] }
 0x692   : > { %v5539_v5 = vsel %vm2069_vm2, %v15573_v0, %v5517_v55  ;;  %10353 = vmatprep.subr.bf16.mxu1 %v17486_v14  ;;  %v5538_v52 = vsel %vm2069_vm2, %v5517_v55, %v15961_v35 }
 0x693   : > { %v5764_v42 = vadd.f32 %v5539_v5, %v5491_v46  ;;  %5933 = vmatmul.mubr.f32.vlgmr.msra.gmra.mrb[176].mxu0 %v15958_v40  ;;  %v17494_v46 = vld [vmem:[#allocation97_spill] sm:$0xff]  ;;  %v17495_v5 = vld [vmem:[#allocation98_spill] sm:$0xff] }
 0x694   : > { %10259 = vmatpush3.bf16.msra.mxu0 %v17487_v47  ;;  %6143 = vmatmul.mubr.f32.vlgmr.msra.gmra.mrb[178].mxu1 %v15964_v31  ;;  %v17500_v31 = vld [vmem:[#allocation102_spill] sm:$0xff] }
 0x695   : > { %v5812_v50 = vadd.f32 %v5764_v42, %v5748_v63  ;;  %6072 = vmatprep.mubr.f32.mxu0 %v15974_v15  ;;  %v5567_v0 = vpop.permute.xlu0 %5566  ;;  %v15984_v45 = vpop.permute.xlu1 %5568  ;;  %10261 = vmatprep.subr.bf16.mxu0 %v17489_v61 }
 0x696   : > { %v5586_v56 = vsel %vm2118_vm3, %v15801_v62, %v5567_v0  ;;  %10355 = vmatpush3.bf16.msra.mxu1 %v17490_v3  ;;  %v5490_v62 = vsel %vm2020_vm7, %v5469_v43, %v15943_v49  ;;  %v5585_v42 = vsel %vm2118_vm3, %v5567_v0, %v15984_v45 }
 0x697   : > { %v5780_v16 = vadd.f32 %v5586_v56, %v5284_v60  ;;  %10357 = vmatprep.subr.bf16.mxu1 %v17491_v26  ;;  %v17497_v60 = vld [vmem:[#allocation80_spill] sm:$0xff]  ;;  %v5765_v56 = vadd.f32 %v5538_v52, %v5490_v62  ;;  %v17499_v62 = vld [vmem:[#allocation101_spill] sm:$0xff] }
 0x698   : > { %10263 = vmatpush3.bf16.msra.mxu0 %v17492_v1  ;;  %v5285_v55 = vmul.f32 %v10870_v33, %v17497_v60 }
 0x699   : > { %v5615_v4 = vpop.permute.xlu0 %5614  ;;  %v15993_v63 = vpop.permute.xlu1 %5616  ;;  %10265 = vmatprep.subr.bf16.mxu0 %v17493_v19  ;;  %v5813_v24 = vadd.f32 %v5765_v56, %v15889_v38  ;;  %v17506_v38 = vld [vmem:[#allocation108_spill] sm:$0xff]  ;;  %v17509_v56 = vld [vmem:[#allocation111_spill] sm:$0xff] }
 0x69a   : > { %10359 = vmatpush3.bf16.msra.mxu1 %v17494_v46  ;;  %v5634_v43 = vsel %vm2167_vm4, %v15826_v17, %v5615_v4  ;;  %v5633_v0 = vsel %vm2167_vm4, %v5615_v4, %v15993_v63  ;;  %v5781_v33 = vadd.f32 %v5585_v42, %v5285_v55  ;;  %v17501_v17 = vld [vmem:[#allocation103_spill] sm:$0xff] }
 0x69b   : > { %10361 = vmatprep.subr.bf16.mxu1 %v17495_v5  ;;  %v17498_v5 = vld [vmem:[#allocation100_spill] sm:$0xff]  ;;  %v17505_v55 = vld [vmem:[#allocation107_spill] sm:$0xff] }
 0x69c   : > { %10267 = vmatpush3.bf16.msra.mxu0 %v17496_v13 }
 0x69d   : > { %v5663_v46 = vpop.permute.xlu0 %5662  ;;  %v16012_v26 = vpop.permute.xlu1 %5664  ;;  %10269 = vmatprep.subr.bf16.mxu0 %v17498_v5 }
 0x69e   : > { %v5682_v3 = vsel %vm2216_vm5, %v15860_v48, %v5663_v46  ;;  %v5681_v52 = vsel %vm2216_vm5, %v5663_v46, %v16012_v26  ;;  %10363 = vmatpush3.bf16.msra.mxu1 %v17499_v62  ;;  %v17503_v46 = vld [vmem:[#allocation105_spill] sm:$0xff] }
 0x69f   : > { %v5796_v60 = vadd.f32 %v5682_v3, %v5634_v43  ;;  %v5797_v14 = vadd.f32 %v5681_v52, %v5633_v0  ;;  %10365 = vmatprep.subr.bf16.mxu1 %v17500_v31  ;;  %v17504_v3 = vld [vmem:[#allocation106_spill] sm:$0xff] }
 0x6a0   : > { %10271 = vmatpush3.bf16.msra.mxu0 %v17501_v17 }
 0x6a1   : > { %v5828_v4 = vadd.f32 %v5796_v60, %v5780_v16  ;;  %v5829_v8 = vadd.f32 %v5797_v14, %v5781_v33  ;;  %v16031_v25 = vpop.permute.xlu0 %5376  ;;  %v16033_v48 = vpop.permute.xlu1 %5378  ;;  %10273 = vmatprep.subr.bf16.mxu0 %v17502_v41  ;;  %v17508_v16 = vld [vmem:[#allocation110_spill] sm:$0xff]  ;;  %v17510_v60 = vld [vmem:[#allocation112_spill] sm:$0xff] }
 0x6a2   : > { %10367 = vmatpush3.bf16.msra.mxu1 %v17503_v46  ;;  %v5393_v14 = vsel %vm1922_vm8, %v15738_v27, %v16031_v25  ;;  %v17512_v27 = vld [vmem:[#allocation6_spill] sm:$0xff] }
 0x6a3   : > { %v5844_v62 = vadd.f32 %v5828_v4, %v5812_v50  ;;  %v5845_v42 = vadd.f32 %v5829_v8, %v5813_v24  ;;  %10369 = vmatprep.subr.bf16.mxu1 %v17504_v3  ;;  %v17507_v24 = vld [vmem:[#allocation109_spill] sm:$0xff]  ;;  %v17513_v3 = vld [vmem:[#allocation50_spill] sm:$0xff] }
 0x6a4   : > { %10275 = vmatpush3.bf16.msra.mxu0 %v17505_v55  ;;  %v17511_v4 = vld [vmem:[#allocation113_spill] sm:$0xff]  ;;  %v17526_v55 = vld [vmem:[#allocation4_spill] sm:$0xff] }
 0x6a5   : > { %v16039_v43 = vpop.permute.xlu0 %5424  ;;  %v16041_v0 = vpop.permute.xlu1 %5426  ;;  %10277 = vmatprep.subr.bf16.mxu0 %v17506_v38 }
 0x6a6   : > { %v5441_v8 = vsel %vm1971_vm6, %v15773_v28, %v16039_v43  ;;  %10371 = vmatpush3.bf16.msra.mxu1 %v17507_v24  ;;  %v17517_v24 = vld [vmem:[#allocation115_spill] sm:$0xff] }
 0x6a7   : > { %v5750_v50 = vadd.f32 %v5441_v8, %v5393_v14  ;;  %10373 = vmatprep.subr.bf16.mxu1 %v17508_v16  ;;  %v17514_v14 = vld [vmem:[#allocation61_spill] sm:$0xff]  ;;  %v17515_v8 = vld [vmem:[#allocation44_spill] sm:$0xff]  ;;  %v17516_v16 = vld [vmem:[#allocation114_spill] sm:$0xff] }
 0x6a8   : > { %10279 = vmatpush3.bf16.msra.mxu0 %v17509_v56 }
 0x6a9   : > { %v16055_v52 = vpop.permute.xlu0 %5472  ;;  %v16057_v33 = vpop.permute.xlu1 %5474  ;;  %10281 = vmatprep.subr.bf16.mxu0 %v17510_v60  ;;  %v17518_v60 = vld [vmem:[#allocation116_spill] sm:$0xff] }
 0x6aa   : > { %10375 = vmatpush3.bf16.msra.mxu1 %v17511_v4  ;;  %v17519_v4 = vld [vmem:[#allocation54_spill] sm:$0xff] }
 0x6ab   : > { %10377 = vmatprep.subr.bf16.mxu1 %v17512_v27  ;;  %v17520_v27 = vld [vmem:[#allocation117_spill] sm:$0xff] }
 0x6ac   : > { %10283 = vmatpush3.bf16.msra.mxu0 %v17513_v3  ;;  %v17521_v3 = vld [vmem:[#allocation118_spill] sm:$0xff] }
 0x6ad   : > { %v5521_v28 = vpop.permute.xlu0 %5520  ;;  %v16063_v46 = vpop.permute.xlu1 %5522  ;;  %10285 = vmatprep.subr.bf16.mxu0 %v17514_v14 }
 0x6ae   : > { %10379 = vmatpush3.bf16.msra.mxu1 %v17515_v8  ;;  %v17522_v8 = vld [vmem:[#allocation120_spill] sm:$0xff] }
 0x6af   : > { %10381 = vmatprep.subr.bf16.mxu1 %v17516_v16  ;;  %v5537_v16 = vsel %vm2069_vm2, %v15961_v35, %v5521_v28 }
 0x6b0   : > { %10287 = vmatpush3.bf16.msra.mxu0 %v17517_v24 }
 0x6b1   : > { %v5571_v31 = vpop.permute.xlu0 %5570  ;;  %v16069_v30 = vpop.permute.xlu1 %5712  ;;  %10321 = vmatprep.subr.bf16.mxu0 %v17518_v60  ;;  %v17523_v60 = vld [vmem:[#allocation121_spill] sm:$0xff] }
 0x6b2   : > { %10383 = vmatpush3.bf16.msra.mxu1 %v17519_v4  ;;  %v5489_v4 = vsel %vm2020_vm7, %v15943_v49, %v16055_v52 }
 0x6b3   : > { %6073 = vmatmul.mubr.f32.vlgmr.msra.gmra.mrb[178].mxu0 %v15812_v37  ;;  %10417 = vmatprep.subr.bf16.mxu1 %v17520_v27  ;;  %v5584_v27 = vsel %vm2118_vm3, %v15984_v45, %v5571_v31  ;;  %v5766_v24 = vadd.f32 %v5537_v16, %v5489_v4 }
 0x6b4   : > { %10323 = vmatpush3.bf16.msra.mxu0 %v17521_v3  ;;  %v10871_v3 = vld [vmem:[%s16641_s4 + $0x250] sm:$0xff] }
 0x6b5   : > { %v5619_v14 = vpop.permute.xlu0 %5618  ;;  %v16076_v56 = vpop.permute.xlu1 %5382  ;;  %10325 = vmatprep.subr.bf16.mxu0 %v17522_v8  ;;  %v17524_v8 = vld [vmem:[#allocation42_spill] sm:$0xff]  ;;  %v5814_v32 = vadd.f32 %v5766_v24, %v5750_v50  ;;  %v17530_v24 = vld [vmem:[#allocation3_spill] sm:$0xff] }
 0x6b6   : > { %v5286_v37 = vmul.f32 %v10871_v3, %v17524_v8  ;;  %v5632_v49 = vsel %vm2167_vm4, %v15993_v63, %v5619_v14  ;;  %v17527_v8 = vld [vmem:[#allocation70_spill] sm:$0xff] }
 0x6b8   : > { %10327 = vmatpush3.bf16.msra.mxu0 %v17523_v60  ;;  %v5782_v60 = vadd.f32 %v5584_v27, %v5286_v37 }
 0x6b9   : > { %v5667_v51 = vpop.permute.xlu0 %5666  ;;  %v16094_v35 = vpop.permute.xlu1 %5430  ;;  %10329 = vmatprep.subr.bf16.mxu0 %v17525_v29 }
 0x6ba   : > { %v5680_v45 = vsel %vm2216_vm5, %v16012_v26, %v5667_v51 }
 0x6bb   : > { %v5798_v38 = vadd.f32 %v5680_v45, %v5632_v49  ;;  %v17532_v49 = vld [vmem:[#allocation123_spill] sm:$0xff] }
 0x6bc   : > { %10331 = vmatpush3.bf16.msra.mxu0 %v17526_v55  ;;  %v5392_v55 = vsel %vm1922_vm8, %v16031_v25, %v16033_v48 }
 0x6bd   : > { %v5830_v3 = vadd.f32 %v5798_v38, %v5782_v60  ;;  %v5711_v16 = vpop.permute.xlu0 %5710  ;;  %v16104_v4 = vpop.permute.xlu1 %5478  ;;  %10333 = vmatprep.subr.bf16.mxu0 %v17527_v8  ;;  %v17531_v60 = vld [vmem:[#allocation58_spill] sm:$0xff] }
 0x6be   : > { %v5729_v29 = vsel %vm2265_vm9, %v5711_v16, %v16069_v30  ;;  %v5730_v63 = vsel %vm2265_vm9, %v15877_v12, %v5711_v16  ;;  %v17533_v12 = vld [vmem:[#allocation64_spill] sm:$0xff] }
 0x6bf   : > { %v16113_v26 = vadd.f32 %v5844_v62, %v5730_v63  ;;  %v16115_v37 = vadd.f32 %v5845_v42, %v5729_v29  ;;  %v5846_v27 = vadd.f32 %v5830_v3, %v5814_v32  ;;  %v5536_v32 = vsel %vm2069_vm2, %v5521_v28, %v16063_v46  ;;  %v17534_v62 = vld [vmem:[#allocation14_spill] sm:$0xff]  ;;  %v10872_v42 = vld [vmem:[%s16641_s4 + $0x258] sm:$0xff]  ;;  %v17535_v3 = vld [vmem:[#allocation79_spill] sm:$0xff] }
 0x6c0   : > { %10335 = vmatpush3.bf16.msra.mxu0 %v17530_v24  ;;  %v5287_v16 = vmul.f32 %v10872_v42, %v17535_v3  ;;  %v5440_v63 = vsel %vm1971_vm6, %v16039_v43, %v16041_v0  ;;  %v5488_v28 = vsel %vm2020_vm7, %v16055_v52, %v16057_v33 }
 0x6c1   : > { %17528 = vst [vmem:[#allocation85_spill] sm:$0xff] %v16113_v26  ;;  %17529 = vst [vmem:[#allocation91_spill] sm:$0xff] %v16115_v37  ;;  %v5715_v38 = vpop.permute.xlu0 %5714  ;;  %6212 = vmatprep.mubr.f32.mxu0 %v16115_v37  ;;  %v5573_v50 = vpop.permute.xlu1 %5572  ;;  %10337 = vmatprep.subr.bf16.mxu0 %v17531_v60  ;;  %v17537_v37 = vld [vmem:[#allocation34_spill] sm:$0xff] }
 0x6c2   : > { %v5583_v29 = vsel %vm2118_vm3, %v5571_v31, %v5573_v50 }
 0x6c3   : > { %v5783_v60 = vadd.f32 %v5583_v29, %v5287_v16  ;;  %v5728_v29 = vsel %vm2265_vm9, %v16069_v30, %v5715_v38 }
 0x6c4   : > { %10339 = vmatpush3.bf16.msra.mxu0 %v17532_v49  ;;  %v5767_v49 = vadd.f32 %v5536_v32, %v5488_v28  ;;  %v17539_v32 = vld [vmem:[#allocation84_spill] sm:$0xff] }
 0x6c5   : > { %v16121_v45 = vpop.permute.xlu0 %5380  ;;  %v16123_v8 = vpop.permute.xlu1 %5620  ;;  %10341 = vmatprep.subr.bf16.mxu0 %v17533_v12 }
 0x6c6   : > { %v5391_v42 = vsel %vm1922_vm8, %v16033_v48, %v16121_v45  ;;  %v5631_v3 = vsel %vm2167_vm4, %v5619_v14, %v16123_v8  ;;  %v5751_v14 = vadd.f32 %v5440_v63, %v5392_v55  ;;  %v17540_v48 = vld [vmem:[#allocation13_spill] sm:$0xff]  ;;  %v17542_v63 = vld [vmem:[#allocation15_spill] sm:$0xff] }
 0x6c8   : > { %10343 = vmatpush3.bf16.msra.mxu0 %v17534_v62  ;;  %v17536_v62 = vld [vmem:[#allocation63_spill] sm:$0xff] }
 0x6c9   : > { %v16144_v12 = vpop.permute.xlu0 %5428  ;;  %v5669_v31 = vpop.permute.xlu1 %5668  ;;  %10345 = vmatprep.subr.bf16.mxu0 %v17536_v62 }
 0x6ca   : > { %v5439_v43 = vsel %vm1971_vm6, %v16041_v0, %v16144_v12  ;;  %v5679_v52 = vsel %vm2216_vm5, %v5667_v51, %v5669_v31  ;;  %v17538_v0 = vld [vmem:[#allocation82_spill] sm:$0xff]  ;;  %v5815_v51 = vadd.f32 %v5767_v49, %v5751_v14 }
 0x6cb   : > { %v5752_v62 = vadd.f32 %v5439_v43, %v5391_v42  ;;  %v5799_v24 = vadd.f32 %v5679_v52, %v5631_v3  ;;  %v17545_v43 = vld [vmem:[#allocation128_spill] sm:$0xff]  ;;  %v17546_v52 = vld [vmem:[#allocation129_spill] sm:$0xff] }
 0x6cc   : > { %10347 = vmatpush3.bf16.msra.mxu0 %v17537_v37 }
 0x6cd   : > { %v5831_v59 = vadd.f32 %v5799_v24, %v5783_v60  ;;  %v16165_v41 = vpop.permute.xlu0 %5476  ;;  %v16167_v17 = vpop.permute.xlu1 %5526  ;;  %10349 = vmatprep.subr.bf16.mxu0 %v17538_v0 }
 0x6ce   : > { %v5487_v55 = vsel %vm2020_vm7, %v16057_v33, %v16165_v41 }
 0x6cf   : > { %v5847_v28 = vadd.f32 %v5831_v59, %v5815_v51  ;;  %v16190_v59 = vadd.f32 %v5846_v27, %v5728_v29  ;;  %v17547_v51 = vld [vmem:[#allocation130_spill] sm:$0xff] }
 0x6d0   : > { %10351 = vmatpush3.bf16.msra.mxu0 %v17539_v32 }
 0x6d1   : > { %v5525_v16 = vpop.permute.xlu0 %5524  ;;  %v16174_v25 = vpop.permute.xlu1 %5716  ;;  %10385 = vmatprep.subr.bf16.mxu0 %v17540_v48  ;;  %17541 = vst [vmem:[#allocation153_spill] sm:$0xff] %v16190_v59  ;;  %v17556_v48 = vld [vmem:[#allocation138_spill] sm:$0xff] }
 0x6d2   : > { %v5535_v24 = vsel %vm2069_vm2, %v16063_v46, %v5525_v16  ;;  %v5727_v60 = vsel %vm2265_vm9, %v5715_v38, %v16174_v25  ;;  %v17543_v46 = vld [vmem:[#allocation124_spill] sm:$0xff]  ;;  %v17544_v38 = vld [vmem:[#allocation126_spill] sm:$0xff] }
 0x6d3   : > { %v5768_v30 = vadd.f32 %v5535_v24, %v5487_v55  ;;  %v16187_v49 = vadd.f32 %v5847_v28, %v5727_v60  ;;  %6213 = vmatmul.mubr.f32.vlgmr.msra.gmra.mrb[180].mxu0 %v16113_v26  ;;  %v17549_v28 = vld [vmem:[#allocation132_spill] sm:$0xff]  ;;  %v17550_v55 = vld [vmem:[#allocation133_spill] sm:$0xff]  ;;  %v10873_v24 = vld [vmem:[%s16641_s4 + $0x260] sm:$0xff] }
 0x6d4   : > { %10387 = vmatpush3.bf16.msra.mxu0 %v17542_v63  ;;  %v17551_v60 = vld [vmem:[#allocation119_spill] sm:$0xff]  ;;  %v17555_v63 = vld [vmem:[#allocation137_spill] sm:$0xff] }
 0x6d5   : > { %v5816_v42 = vadd.f32 %v5768_v30, %v5752_v62  ;;  %v5575_v3 = vpop.permute.xlu0 %5574  ;;  %6282 = vmatprep.mubr.f32.mxu1 %v16187_v49  ;;  %v16194_v33 = vpop.permute.xlu1 %5576  ;;  %10389 = vmatprep.subr.bf16.mxu0 %v17543_v46  ;;  %v17548_v62 = vld [vmem:[#allocation131_spill] sm:$0xff]  ;;  %v5288_v30 = vmul.f32 %v10873_v24, %v17551_v60  ;;  %v17554_v46 = vld [vmem:[#allocation136_spill] sm:$0xff] }
 0x6d6   : > { %6283 = vmatmul.mubr.f32.vlgmr.msra.gmra.mrb[180].mxu1 %v16190_v59  ;;  %v5582_v29 = vsel %vm2118_vm3, %v5573_v50, %v5575_v3 }
 0x6d7   : > { %10419 = vmatpush3.bf16.msra.mxu1 %v17544_v38  ;;  %v17552_v38 = vld [vmem:[#allocation134_spill] sm:$0xff] }
 0x6d8   : > { %10391 = vmatpush3.bf16.msra.mxu0 %v17545_v43  ;;  %10421 = vmatprep.subr.bf16.mxu1 %v17546_v52 }
 0x6d9   : > { %v5623_v27 = vpop.permute.xlu0 %5622  ;;  %v16201_v14 = vpop.permute.xlu1 %5624  ;;  %10393 = vmatprep.subr.bf16.mxu0 %v17547_v51  ;;  %v17553_v51 = vld [vmem:[#allocation135_spill] sm:$0xff] }
 0x6db   : > { %10423 = vmatpush3.bf16.msra.mxu1 %v17548_v62  ;;  %v5630_v62 = vsel %vm2167_vm4, %v16123_v8, %v5623_v27 }
 0x6dc   : > { %10395 = vmatpush3.bf16.msra.mxu0 %v17549_v28  ;;  %10425 = vmatprep.subr.bf16.mxu1 %v17550_v55  ;;  %v5784_v28 = vadd.f32 %v5582_v29, %v5288_v30  ;;  %v5534_v29 = vsel %vm2069_vm2, %v5525_v16, %v16167_v17  ;;  %v17560_v30 = vld [vmem:[#allocation140_spill] sm:$0xff]  ;;  %v5390_v16 = vsel %vm1922_vm8, %v16121_v45, %v16076_v56 }
 0x6dd   : > { %v5671_v43 = vpop.permute.xlu0 %5670  ;;  %v16213_v52 = vpop.permute.xlu1 %5672  ;;  %10397 = vmatprep.subr.bf16.mxu0 %v17552_v38  ;;  %v17557_v38 = vld [vmem:[#allocation43_spill] sm:$0xff] }
 0x6de   : > { %v5678_v50 = vsel %vm2216_vm5, %v5669_v31, %v5671_v43  ;;  %v5677_v8 = vsel %vm2216_vm5, %v5671_v43, %v16213_v52  ;;  %v17558_v31 = vld [vmem:[#allocation47_spill] sm:$0xff]  ;;  %v17561_v43 = vld [vmem:[#allocation125_spill] sm:$0xff] }
 0x6df   : > { %v5800_v55 = vadd.f32 %v5678_v50, %v5630_v62  ;;  %10427 = vmatpush3.bf16.msra.mxu1 %v17553_v51  ;;  %v17559_v62 = vld [vmem:[#allocation48_spill] sm:$0xff] }
 0x6e0   : > { %10399 = vmatpush3.bf16.msra.mxu0 %v17554_v46  ;;  %10429 = vmatprep.subr.bf16.mxu1 %v17555_v63 }
 0x6e1   : > { %v5832_v24 = vadd.f32 %v5800_v55, %v5784_v28  ;;  %v5385_v60 = vpop.permute.xlu0 %5384  ;;  %v5433_v59 = vpop.permute.xlu1 %5432  ;;  %10401 = vmatprep.subr.bf16.mxu0 %v17556_v48  ;;  %v5581_v28 = vsel %vm2118_vm3, %v5575_v3, %v16194_v33  ;;  %v5486_v3 = vsel %vm2020_vm7, %v16165_v41, %v16104_v4  ;;  %v17564_v48 = vld [vmem:[#allocation142_spill] sm:$0xff] }
 0x6e2   : > { %v5388_v45 = vsel %vm1922_vm8, %v5385_v60, %v15898_v23  ;;  %v5389_v41 = vsel %vm1922_vm8, %v16076_v56, %v5385_v60  ;;  %v5437_v23 = vsel %vm1971_vm6, %v16094_v35, %v5433_v59  ;;  %v10875_v60 = vld [vmem:[%s16641_s4 + $0x270] sm:$0xff] }
 0x6e3   : > { %10431 = vmatpush3.bf16.msra.mxu1 %v17557_v38  ;;  %v16226_v26 = vadd.f32 %v5832_v24, %v5816_v42  ;;  %v10874_v42 = vld [vmem:[%s16641_s4 + $0x268] sm:$0xff]  ;;  %v5629_v24 = vsel %vm2167_vm4, %v5623_v27, %v16201_v14  ;;  %v5769_v27 = vadd.f32 %v5534_v29, %v5486_v3  ;;  %v17563_v38 = vld [vmem:[#allocation141_spill] sm:$0xff] }
 0x6e4   : > { %10403 = vmatpush3.bf16.msra.mxu0 %v17558_v31  ;;  %10433 = vmatprep.subr.bf16.mxu1 %v17559_v62  ;;  %v5289_v50 = vmul.f32 %v10874_v42, %v17561_v43  ;;  %v17562_v62 = vld [vmem:[#allocation139_spill] sm:$0xff]  ;;  %v5438_v42 = vsel %vm1971_vm6, %v16144_v12, %v16094_v35  ;;  %v17567_v35 = vld [vmem:[#allocation81_spill] sm:$0xff] }
 0x6e5   : > { %v5481_v55 = vpop.permute.xlu0 %5480  ;;  %10405 = vmatprep.subr.bf16.mxu0 %v17560_v30  ;;  %v5801_v30 = vadd.f32 %v5677_v8, %v5629_v24  ;;  %v17566_v24 = vld [vmem:[#allocation122_spill] sm:$0xff] }
 0x6e6   : > { %v5529_v31 = vpop.permute.xlu1 %5528  ;;  %v5785_v43 = vadd.f32 %v5581_v28, %v5289_v50  ;;  %v5485_v8 = vsel %vm2020_vm7, %v16104_v4, %v5481_v55  ;;  %v17565_v28 = vld [vmem:[#allocation144_spill] sm:$0xff]  ;;  %v5436_v50 = vsel %vm1971_vm6, %v5433_v59, %v15900_v6  ;;  %v5484_v56 = vsel %vm2020_vm7, %v5481_v55, %v15929_v58  ;;  %v10876_v6 = vld [vmem:[%s16641_s4 + $0x278] sm:$0xff]  ;;  %v17568_v58 = vld [vmem:[#allocation143_spill] sm:$0xff] }
 0x6e7   : > { %10435 = vmatpush3.bf16.msra.mxu1 %v17562_v62  ;;  %v5533_v12 = vsel %vm2069_vm2, %v16167_v17, %v5529_v31  ;;  %v5532_v4 = vsel %vm2069_vm2, %v5529_v31, %v15931_v54  ;;  %v5290_v3 = vmul.f32 %v10875_v60, %v17566_v24  ;;  %v5291_v59 = vmul.f32 %v10876_v6, %v17567_v35  ;;  %v17569_v60 = vld [vmem:[#allocation145_spill] sm:$0xff]  ;;  %v17570_v24 = vld [vmem:[#allocation146_spill] sm:$0xff] }
 0x6e8   : > { %10407 = vmatpush3.bf16.msra.mxu0 %v17563_v38  ;;  %10437 = vmatprep.subr.bf16.mxu1 %v17564_v48  ;;  %v5833_v38 = vadd.f32 %v5801_v30, %v5785_v43  ;;  %v5770_v55 = vadd.f32 %v5533_v12, %v5485_v8  ;;  %v5754_v62 = vadd.f32 %v5437_v23, %v5389_v41  ;;  %v17573_v23 = vld [vmem:[#allocation149_spill] sm:$0xff] }
 0x6e9   : > { %v5579_v29 = vpop.permute.xlu0 %5578  ;;  %10409 = vmatprep.subr.bf16.mxu0 %v17565_v28  ;;  %v5753_v28 = vadd.f32 %v5438_v42, %v5390_v16  ;;  %v5755_v6 = vadd.f32 %v5436_v50, %v5388_v45  ;;  %v5771_v16 = vadd.f32 %v5532_v4, %v5484_v56  ;;  %v17571_v42 = vld [vmem:[#allocation148_spill] sm:$0xff] }
 0x6ea   : > { %v5627_v17 = vpop.permute.xlu1 %5626  ;;  %v5580_v54 = vsel %vm2118_vm3, %v16194_v33, %v5579_v29  ;;  %v5595_v31 = vsel %vm2118_vm3, %v5579_v29, %v17475_v2 }
 0x6eb   : > { %10439 = vmatpush3.bf16.msra.mxu1 %v17568_v58  ;;  %v5817_v48 = vadd.f32 %v5769_v27, %v5753_v28  ;;  %v5628_v43 = vsel %vm2167_vm4, %v16201_v14, %v5627_v17  ;;  %v5643_v33 = vsel %vm2167_vm4, %v5627_v17, %v17477_v57  ;;  %v5786_v41 = vadd.f32 %v5580_v54, %v5290_v3  ;;  %v17572_v28 = vld [vmem:[#allocation147_spill] sm:$0xff]  ;;  %v17574_v57 = vld [vmem:[#allocation150_spill] sm:$0xff] }
 0x6ec   : > { %10411 = vmatpush3.bf16.msra.mxu0 %v17569_v60  ;;  %10441 = vmatprep.subr.bf16.mxu1 %v17570_v24  ;;  %v5787_v8 = vadd.f32 %v5595_v31, %v5291_v59  ;;  %v5818_v14 = vadd.f32 %v5770_v55, %v5754_v62  ;;  %v5819_v56 = vadd.f32 %v5771_v16, %v5755_v6  ;;  %v17575_v3 = vld [vmem:[#allocation31_spill] sm:$0xff]  ;;  %v17577_v6 = vld [vmem:[#allocation9_spill] sm:$0xff] }
 0x6ed   : > { %v5675_v30 = vpop.permute.xlu0 %5674  ;;  %10413 = vmatprep.subr.bf16.mxu0 %v17571_v42  ;;  %v5849_v50 = vadd.f32 %v5833_v38, %v5817_v48  ;;  %v17576_v55 = vld [vmem:[#allocation151_spill] sm:$0xff] }
 0x6ee   : > { %v5676_v2 = vsel %vm2216_vm5, %v16213_v52, %v5675_v30  ;;  %v5691_v27 = vsel %vm2216_vm5, %v5675_v30, %v17472_v44  ;;  %v5719_v45 = vpop.permute.xlu1 %5718 }
 0x6ef   : > { %v5802_v12 = vadd.f32 %v5676_v2, %v5628_v43  ;;  %v5803_v29 = vadd.f32 %v5691_v27, %v5643_v33  ;;  %10443 = vmatpush3.bf16.msra.mxu1 %v17572_v28  ;;  %v5726_v44 = vsel %vm2265_vm9, %v16174_v25, %v5719_v45  ;;  %v17578_v43 = vld [vmem:[#allocation32_spill] sm:$0xff]  ;;  %v17581_v2 = vld [vmem:[#allocation11_spill] sm:$0xff]  ;;  %v17582_v27 = vld [vmem:[#allocation37_spill] sm:$0xff] }
 0x6f0   : > { %10415 = vmatpush3.bf16.msra.mxu0 %v17573_v23  ;;  %10445 = vmatprep.subr.bf16.mxu1 %v17574_v57  ;;  %v16330_v54 = vadd.f32 %v16226_v26, %v5726_v44  ;;  %v6429_v26 = vmul.f32 %v15430_v53, %v15430_v53  ;;  %v17580_v33 = vld [vmem:[#allocation36_spill] sm:$0xff]  ;;  %v17593_v44 = vld [vmem:[#allocation21_spill] sm:$0xff] }
 0x6f1   : > { %v5834_v4 = vadd.f32 %v5802_v12, %v5786_v41  ;;  %v5835_v52 = vadd.f32 %v5803_v29, %v5787_v8  ;;  %v5721_v17 = vpop.permute.xlu0 %5720  ;;  %10449 = vmatprep.subr.bf16.mxu0 %v17575_v3  ;;  %v17584_v41 = vld [vmem:[#allocation12_spill] sm:$0xff]  ;;  %v17585_v8 = vld [vmem:[#allocation17_spill] sm:$0xff]  ;;  %v17587_v29 = vld [vmem:[#allocation46_spill] sm:$0xff] }
 0x6f2   : > { %v5725_v35 = vsel %vm2265_vm9, %v5719_v45, %v5721_v17  ;;  %v5723_v59 = vpop.permute.xlu1 %5722  ;;  %v17583_v45 = vld [vmem:[#allocation40_spill] sm:$0xff]  ;;  %v17586_v12 = vld [vmem:[#allocation41_spill] sm:$0xff] }
 0x6f3   : > { %v16326_v62 = vadd.f32 %v5849_v50, %v5725_v35  ;;  %v5850_v48 = vadd.f32 %v5834_v4, %v5818_v14  ;;  %v5851_v38 = vadd.f32 %v5835_v52, %v5819_v56  ;;  %10447 = vmatpush3.bf16.msra.mxu1 %v17576_v55  ;;  %v5724_v31 = vsel %vm2265_vm9, %v5721_v17, %v5723_v59  ;;  %v17588_v14 = vld [vmem:[#allocation18_spill] sm:$0xff]  ;;  %v17589_v50 = vld [vmem:[#allocation19_spill] sm:$0xff]  ;;  %v17590_v56 = vld [vmem:[#allocation49_spill] sm:$0xff] }
 0x6f4   : > { %v5739_v25 = vsel %vm2265_vm9, %v5723_v59, %v15412_v9  ;;  %10481 = vmatprep.subr.bf16.mxu1 %v17577_v6  ;;  %v17579_v9 = vld [vmem:[#allocation10_spill] sm:$0xff]  ;;  %v17591_v4 = vld [vmem:[#allocation51_spill] sm:$0xff]  ;;  %v17592_v52 = vld [vmem:[#allocation20_spill] sm:$0xff] }
 0x6f5   : > { %v16338_v16 = vadd.f32 %v5850_v48, %v5724_v31  ;;  %v16340_v30 = vadd.f32 %v5851_v38, %v5739_v25  ;;  %6352 = vmatprep.mubr.f32.mxu0 %v16326_v62  ;;  %v17594_v17 = vld [vmem:[#allocation53_spill] sm:$0xff]  ;;  %v17596_v35 = vld [vmem:[#allocation22_spill] sm:$0xff]  ;;  %v17597_v59 = vld [vmem:[#allocation23_spill] sm:$0xff] }
 0x6f6   : > { %6353 = vmatmul.mubr.f32.vlgmr.msra.gmra.mrb[182].mxu0 %v16330_v54  ;;  %v17595_v3 = vld [vmem:[#allocation57_spill] sm:$0xff]  ;;  %v17598_v48 = vld [vmem:[#allocation59_spill] sm:$0xff]  ;;  %v17599_v38 = vld [vmem:[#allocation62_spill] sm:$0xff] }
 0x6f7   : > { %10451 = vmatpush3.bf16.msra.mxu0 %v17578_v43  ;;  %6422 = vmatprep.mubr.f32.mxu1 %v16340_v30  ;;  %v17600_v31 = vld [vmem:[#allocation24_spill] sm:$0xff]  ;;  %v17601_v25 = vld [vmem:[#allocation25_spill] sm:$0xff]  ;;  %v17604_v43 = vld [vmem:[#allocation26_spill] sm:$0xff] }
 0x6f8   : > { %6508 = vmatprep.mubr.f32.mxu0 %v6429_v26  ;;  %6423 = vmatmul.mubr.f32.vlgmr.msra.gmra.mrb[182].mxu1 %v16338_v16  ;;  %v17602_v6 = vld [vmem:[#allocation65_spill] sm:$0xff]  ;;  %v17603_v26 = vld [vmem:[#allocation68_spill] sm:$0xff] }
 0x6f9   : > { %10483 = vmatpush3.bf16.msra.mxu1 %v17579_v9  ;;  %10453 = vmatprep.subr.bf16.mxu0 %v17580_v33  ;;  %v17606_v9 = vld [vmem:[#allocation71_spill] sm:$0xff]  ;;  %v6428_v33 = vmul.f32 %v15958_v40, %v15958_v40 }
 0x6fa   : > { %6578 = vmatprep.mubr.f32.mxu1 %v6431_v21  ;;  %10485 = vmatprep.subr.bf16.mxu1 %v17581_v2  ;;  %v17605_v21 = vld [vmem:[#allocation28_spill] sm:$0xff] }
 0x6fb   : > { %10455 = vmatpush3.bf16.msra.mxu0 %v17582_v27  ;;  %v17607_v2 = vld [vmem:[#allocation72_spill] sm:$0xff]  ;;  %v17608_v27 = vld [vmem:[#allocation29_spill] sm:$0xff] }
 0x6fc   : > { %10457 = vmatprep.subr.bf16.mxu0 %v17583_v45  ;;  %v6433_v45 = vmul.f32 %v15974_v15, %v15974_v15 }
 0x6fd   : > { %10487 = vmatpush3.bf16.msra.mxu1 %v17584_v41  ;;  %v6430_v41 = vmul.f32 %v15777_v36, %v15777_v36 }
 0x6fe   : > { %10489 = vmatprep.subr.bf16.mxu1 %v17585_v8  ;;  %v17609_v8 = vld [vmem:[#allocation33_spill] sm:$0xff] }
 0x6ff   : > { %10459 = vmatpush3.bf16.msra.mxu0 %v17586_v12  ;;  %v6435_v12 = vmul.f32 %v15895_v22, %v15895_v22 }
 0x700   : > { %10461 = vmatprep.subr.bf16.mxu0 %v17587_v29  ;;  %v17622_v29 = vld [vmem:[#allocation50_spill] sm:$0xff] }
 0x701   : > { %10491 = vmatpush3.bf16.msra.mxu1 %v17588_v14  ;;  %v17623_v14 = vld [vmem:[#allocation61_spill] sm:$0xff] }
 0x702   : > { %10493 = vmatprep.subr.bf16.mxu1 %v17589_v50  ;;  %v17624_v50 = vld [vmem:[#allocation8_spill] sm:$0xff] }
 0x703   : > { %10463 = vmatpush3.bf16.msra.mxu0 %v17590_v56  ;;  %v17625_v56 = vld [vmem:[#allocation74_spill] sm:$0xff] }
 0x704   : > { %10465 = vmatprep.subr.bf16.mxu0 %v17591_v4  ;;  %v17626_v4 = vld [vmem:[#allocation115_spill] sm:$0xff] }
 0x705   : > { %10495 = vmatpush3.bf16.msra.mxu1 %v17592_v52  ;;  %v17627_v52 = vld [vmem:[#allocation78_spill] sm:$0xff] }
 0x706   : > { %10497 = vmatprep.subr.bf16.mxu1 %v17593_v44  ;;  %v6432_v44 = vmul.f32 %v17627_v52, %v17627_v52 }
 0x707   : > { %10467 = vmatpush3.bf16.msra.mxu0 %v17594_v17  ;;  %v17628_v17 = vld [vmem:[#allocation116_spill] sm:$0xff] }
 0x708   : > { %10469 = vmatprep.subr.bf16.mxu0 %v17595_v3  ;;  %v17629_v3 = vld [vmem:[#allocation56_spill] sm:$0xff] }
 0x709   : > { %10499 = vmatpush3.bf16.msra.mxu1 %v17596_v35  ;;  %v17630_v35 = vld [vmem:[#allocation91_spill] sm:$0xff] }
 0x70a   : > { %10501 = vmatprep.subr.bf16.mxu1 %v17597_v59  ;;  %v6437_v59 = vmul.f32 %v17630_v35, %v17630_v35 }
 0x70b   : > { %10471 = vmatpush3.bf16.msra.mxu0 %v17598_v48  ;;  %v17631_v48 = vld [vmem:[#allocation152_spill] sm:$0xff] }
 0x70c   : > { %10473 = vmatprep.subr.bf16.mxu0 %v17599_v38  ;;  %v6434_v38 = vmul.f32 %v17631_v48, %v17631_v48 }
 0x70d   : > { %10503 = vmatpush3.bf16.msra.mxu1 %v17600_v31  ;;  %v17632_v31 = vld [vmem:[#allocation67_spill] sm:$0xff] }
 0x70e   : > { %10505 = vmatprep.subr.bf16.mxu1 %v17601_v25  ;;  %v17633_v25 = vld [vmem:[#allocation118_spill] sm:$0xff] }
 0x70f   : > { %10475 = vmatpush3.bf16.msra.mxu0 %v17602_v6  ;;  %v6439_v6 = vmul.f32 %v16187_v49, %v16187_v49 }
 0x710   : > { %10477 = vmatprep.subr.bf16.mxu0 %v17603_v26  ;;  %v17634_v26 = vld [vmem:[#allocation120_spill] sm:$0xff] }
 0x711   : > { %10507 = vmatpush3.bf16.msra.mxu1 %v17604_v43  ;;  %v17635_v43 = vld [vmem:[#allocation92_spill] sm:$0xff] }
 0x712   : > { %10509 = vmatprep.subr.bf16.mxu1 %v17605_v21  ;;  %v17636_v21 = vld [vmem:[#allocation94_spill] sm:$0xff] }
 0x713   : > { %10479 = vmatpush3.bf16.msra.mxu0 %v17606_v9  ;;  %v17637_v9 = vld [vmem:[#allocation121_spill] sm:$0xff] }
 0x714   : > { %10513 = vmatprep.subr.bf16.mxu0 %v17607_v2  ;;  %v17639_v2 = vld [vmem:[#allocation97_spill] sm:$0xff] }
 0x715   : > { %10511 = vmatpush3.bf16.msra.mxu1 %v17608_v27  ;;  %v17640_v27 = vld [vmem:[#allocation98_spill] sm:$0xff] }
 0x716   : > { %6509 = vmatmul.mubr.f32.vlgmr.msra.gmra.mrb[184].mxu0 %v6428_v33  ;;  %10545 = vmatprep.subr.bf16.mxu1 %v17609_v8  ;;  %v17638_v33 = vld [vmem:[#allocation16_spill] sm:$0xff]  ;;  %v17643_v8 = vld [vmem:[#allocation101_spill] sm:$0xff] }
 0x717   : > { %10515 = vmatpush3.bf16.msra.mxu0 %v17487_v47  ;;  %6648 = vmatprep.mubr.f32.mxu0 %v6433_v45  ;;  %v17611_v47 = vld [vmem:[#allocation104_spill] sm:$0xff] }
 0x718   : > { %6579 = vmatmul.mubr.f32.vlgmr.msra.gmra.mrb[184].mxu1 %v6430_v41  ;;  %10517 = vmatprep.subr.bf16.mxu0 %v17489_v61  ;;  %v17613_v61 = vld [vmem:[#allocation66_spill] sm:$0xff]  ;;  %v17641_v45 = vld [vmem:[#allocation4_spill] sm:$0xff] }
 0x719   : > { %10547 = vmatpush3.bf16.msra.mxu1 %v17457_v11  ;;  %6718 = vmatprep.mubr.f32.mxu1 %v6435_v12  ;;  %v17610_v11 = vld [vmem:[#allocation103_spill] sm:$0xff]  ;;  %v17642_v41 = vld [vmem:[#allocation70_spill] sm:$0xff] }
 0x71a   : > { %10549 = vmatprep.subr.bf16.mxu1 %v17459_v34  ;;  %v17612_v34 = vld [vmem:[#allocation69_spill] sm:$0xff]  ;;  %v17644_v12 = vld [vmem:[#allocation102_spill] sm:$0xff] }
 0x71b   : > { %10519 = vmatpush3.bf16.msra.mxu0 %v17492_v1  ;;  %v17614_v1 = vld [vmem:[#allocation107_spill] sm:$0xff] }
 0x71c   : > { %10521 = vmatprep.subr.bf16.mxu0 %v17493_v19  ;;  %v17617_v19 = vld [vmem:[#allocation2_spill] sm:$0xff] }
 0x71d   : > { %10551 = vmatpush3.bf16.msra.mxu1 %v17462_v10  ;;  %v17615_v10 = vld [vmem:[#allocation108_spill] sm:$0xff] }
 0x71e   : > { %10553 = vmatprep.subr.bf16.mxu1 %v17464_v20  ;;  %v17616_v20 = vld [vmem:[#allocation7_spill] sm:$0xff] }
 0x71f   : > { %10523 = vmatpush3.bf16.msra.mxu0 %v17496_v13  ;;  %v17621_v13 = vld [vmem:[#allocation77_spill] sm:$0xff] }
 0x720   : > { %10525 = vmatprep.subr.bf16.mxu0 %v17498_v5  ;;  %v17618_v5 = vld [vmem:[#allocation111_spill] sm:$0xff] }
 0x721   : > { %10555 = vmatpush3.bf16.msra.mxu1 %v17467_v18  ;;  %v17619_v18 = vld [vmem:[#allocation112_spill] sm:$0xff] }
 0x722   : > { %10557 = vmatprep.subr.bf16.mxu1 %v17468_v39  ;;  %v17620_v39 = vld [vmem:[#allocation5_spill] sm:$0xff] }
 0x723   : > { %10527 = vmatpush3.bf16.msra.mxu0 %v17610_v11  ;;  %v17645_v11 = vld [vmem:[#allocation3_spill] sm:$0xff] }
 0x724   : > { %10529 = vmatprep.subr.bf16.mxu0 %v17611_v47  ;;  %v17646_v47 = vld [vmem:[#allocation58_spill] sm:$0xff] }
 0x725   : > { %10559 = vmatpush3.bf16.msra.mxu1 %v17612_v34  ;;  %v17647_v34 = vld [vmem:[#allocation105_spill] sm:$0xff] }
 0x726   : > { %10561 = vmatprep.subr.bf16.mxu1 %v17613_v61  ;;  %v17648_v61 = vld [vmem:[#allocation106_spill] sm:$0xff] }
 0x727   : > { %10531 = vmatpush3.bf16.msra.mxu0 %v17614_v1  ;;  %v17649_v1 = vld [vmem:[#allocation123_spill] sm:$0xff] }
 0x728   : > { %10533 = vmatprep.subr.bf16.mxu0 %v17615_v10 }
 0x729   : > { %10563 = vmatpush3.bf16.msra.mxu1 %v17616_v20 }
 0x72a   : > { %10565 = vmatprep.subr.bf16.mxu1 %v17617_v19  ;;  %v17650_v19 = vld [vmem:[#allocation64_spill] sm:$0xff] }
 0x72b   : > { %10535 = vmatpush3.bf16.msra.mxu0 %v17618_v5 }
 0x72c   : > { %10537 = vmatprep.subr.bf16.mxu0 %v17619_v18  ;;  %v17651_v18 = vld [vmem:[#allocation109_spill] sm:$0xff] }
 0x72d   : > { %10567 = vmatpush3.bf16.msra.mxu1 %v17620_v39  ;;  %v17652_v39 = vld [vmem:[#allocation110_spill] sm:$0xff] }
 0x72e   : > { %10569 = vmatprep.subr.bf16.mxu1 %v17621_v13  ;;  %v17653_v13 = vld [vmem:[#allocation14_spill] sm:$0xff] }
 0x72f   : > { %10539 = vmatpush3.bf16.msra.mxu0 %v17622_v29  ;;  %v17654_v29 = vld [vmem:[#allocation63_spill] sm:$0xff] }
 0x730   : > { %10541 = vmatprep.subr.bf16.mxu0 %v17623_v14  ;;  %v17655_v14 = vld [vmem:[#allocation113_spill] sm:$0xff] }
 0x731   : > { %10571 = vmatpush3.bf16.msra.mxu1 %v17624_v50  ;;  %v17656_v50 = vld [vmem:[#allocation6_spill] sm:$0xff] }
 0x732   : > { %10573 = vmatprep.subr.bf16.mxu1 %v17625_v56  ;;  %v17657_v56 = vld [vmem:[#allocation44_spill] sm:$0xff] }
 0x733   : > { %10543 = vmatpush3.bf16.msra.mxu0 %v17626_v4  ;;  %v17658_v4 = vld [vmem:[#allocation114_spill] sm:$0xff] }
 0x734   : > { %10577 = vmatprep.subr.bf16.mxu0 %v17628_v17 }
 0x735   : > { %10575 = vmatpush3.bf16.msra.mxu1 %v17629_v3  ;;  %v17660_v3 = vld [vmem:[#allocation13_spill] sm:$0xff] }
 0x736   : > { %6649 = vmatmul.mubr.f32.vlgmr.msra.gmra.mrb[186].mxu0 %v6432_v44  ;;  %10609 = vmatprep.subr.bf16.mxu1 %v17632_v31  ;;  %v17659_v44 = vld [vmem:[#allocation85_spill] sm:$0xff] }
 0x737   : > { %10579 = vmatpush3.bf16.msra.mxu0 %v17633_v25  ;;  %6788 = vmatprep.mubr.f32.mxu0 %v6437_v59  ;;  %v6436_v17 = vmul.f32 %v17659_v44, %v17659_v44  ;;  %v17661_v59 = vld [vmem:[#allocation54_spill] sm:$0xff]  ;;  %v17662_v31 = vld [vmem:[#allocation153_spill] sm:$0xff]  ;;  %v17664_v25 = vld [vmem:[#allocation15_spill] sm:$0xff] }
 0x738   : > { %6719 = vmatmul.mubr.f32.vlgmr.msra.gmra.mrb[186].mxu1 %v6434_v38  ;;  %10581 = vmatprep.subr.bf16.mxu0 %v17634_v26  ;;  %v6441_v38 = vmul.f32 %v16326_v62, %v16326_v62  ;;  %v17666_v26 = vld [vmem:[#allocation126_spill] sm:$0xff] }
 0x739   : > { %10611 = vmatpush3.bf16.msra.mxu1 %v17635_v43  ;;  %6858 = vmatprep.mubr.f32.mxu1 %v6439_v6  ;;  %v17665_v6 = vld [vmem:[#allocation124_spill] sm:$0xff]  ;;  %v17667_v43 = vld [vmem:[#allocation129_spill] sm:$0xff] }
 0x73a   : > { %10613 = vmatprep.subr.bf16.mxu1 %v17636_v21  ;;  %v17668_v21 = vld [vmem:[#allocation128_spill] sm:$0xff] }
 0x73b   : > { %10583 = vmatpush3.bf16.msra.mxu0 %v17637_v9  ;;  %v17669_v9 = vld [vmem:[#allocation130_spill] sm:$0xff] }
 0x73c   : > { %10585 = vmatprep.subr.bf16.mxu0 %v17638_v33  ;;  %v17670_v33 = vld [vmem:[#allocation131_spill] sm:$0xff] }
 0x73d   : > { %10615 = vmatpush3.bf16.msra.mxu1 %v17639_v2  ;;  %v17671_v2 = vld [vmem:[#allocation133_spill] sm:$0xff] }
 0x73e   : > { %10617 = vmatprep.subr.bf16.mxu1 %v17640_v27  ;;  %v17672_v27 = vld [vmem:[#allocation132_spill] sm:$0xff] }
 0x73f   : > { %10587 = vmatpush3.bf16.msra.mxu0 %v17641_v45  ;;  %v17673_v45 = vld [vmem:[#allocation134_spill] sm:$0xff] }
 0x740   : > { %10589 = vmatprep.subr.bf16.mxu0 %v17642_v41  ;;  %v17674_v41 = vld [vmem:[#allocation138_spill] sm:$0xff] }
 0x741   : > { %10619 = vmatpush3.bf16.msra.mxu1 %v17643_v8  ;;  %v17675_v8 = vld [vmem:[#allocation43_spill] sm:$0xff] }
 0x742   : > { %10621 = vmatprep.subr.bf16.mxu1 %v17644_v12 }
 0x743   : > { %10591 = vmatpush3.bf16.msra.mxu0 %v17645_v11  ;;  %v17676_v11 = vld [vmem:[#allocation48_spill] sm:$0xff] }
 0x744   : > { %10593 = vmatprep.subr.bf16.mxu0 %v17646_v47 }
 0x745   : > { %10623 = vmatpush3.bf16.msra.mxu1 %v17647_v34  ;;  %v17677_v34 = vld [vmem:[#allocation47_spill] sm:$0xff] }
 0x746   : > { %10625 = vmatprep.subr.bf16.mxu1 %v17648_v61 }
 0x747   : > { %10595 = vmatpush3.bf16.msra.mxu0 %v17649_v1  ;;  %v9187_v10 = vpop.f32.mrb[176].mxu1 }
 0x748   : > { %v9188_v20 = vpop.f32.mrb[177].mxu1  ;;  %10597 = vmatprep.subr.bf16.mxu0 %v17650_v19  ;;  %v17679_v19 = vld [vmem:[#allocation139_spill] sm:$0xff] }
 0x749   : > { %v9189_v5 = vadd.f32 %v9188_v20, %v9187_v10  ;;  %10627 = vmatpush3.bf16.msra.mxu1 %v17651_v18  ;;  %v17678_v20 = vld [vmem:[#allocation140_spill] sm:$0xff]  ;;  %v17681_v18 = vld [vmem:[#allocation141_spill] sm:$0xff] }
 0x74a   : > { %10629 = vmatprep.subr.bf16.mxu1 %v17652_v39  ;;  %v17682_v39 = vld [vmem:[#allocation144_spill] sm:$0xff] }
 0x74b   : > { %10599 = vmatpush3.bf16.msra.mxu0 %v17653_v13  ;;  %v10877_v13 = vld [vmem:[%s16643_s6 + $0x8] sm:$0xff] }
 0x74c   : > { %10601 = vmatprep.subr.bf16.mxu0 %v17654_v29 }
 0x74d   : > { %10631 = vmatpush3.bf16.msra.mxu1 %v17655_v14 }
 0x74e   : > { %10633 = vmatprep.subr.bf16.mxu1 %v17656_v50 }
 0x74f   : > { %10603 = vmatpush3.bf16.msra.mxu0 %v17537_v37  ;;  %v6438_v37 = vmul.f32 %v17662_v31, %v17662_v31 }
 0x750   : > { %10605 = vmatprep.subr.bf16.mxu0 %v17538_v0  ;;  %v17663_v0 = vld [vmem:[#allocation117_spill] sm:$0xff] }
 0x751   : > { %10635 = vmatpush3.bf16.msra.mxu1 %v17657_v56 }
 0x752   : > { %10637 = vmatprep.subr.bf16.mxu1 %v17658_v4 }
 0x753   : > { %10607 = vmatpush3.bf16.msra.mxu0 %v17539_v32  ;;  %v6443_v32 = vmul.f32 %v16340_v30, %v16340_v30 }
 0x754   : > { %10641 = vmatprep.subr.bf16.mxu0 %v17660_v3 }
 0x755   : > { %10639 = vmatpush3.bf16.msra.mxu1 %v17661_v59 }
 0x756   : > { %6789 = vmatmul.mubr.f32.vlgmr.msra.gmra.mrb[188].mxu0 %v6436_v17  ;;  %10673 = vmatprep.subr.bf16.mxu1 %v17663_v0 }
 0x757   : > { %10643 = vmatpush3.bf16.msra.mxu0 %v17664_v25  ;;  %6928 = vmatprep.mubr.f32.mxu0 %v6441_v38 }
 0x758   : > { %6859 = vmatmul.mubr.f32.vlgmr.msra.gmra.mrb[188].mxu1 %v6438_v37  ;;  %10645 = vmatprep.subr.bf16.mxu0 %v17665_v6 }
 0x759   : > { %10675 = vmatpush3.bf16.msra.mxu1 %v17666_v26  ;;  %6998 = vmatprep.mubr.f32.mxu1 %v6443_v32 }
 0x75a   : > { %10677 = vmatprep.subr.bf16.mxu1 %v17667_v43 }
 0x75b   : > { %10647 = vmatpush3.bf16.msra.mxu0 %v17668_v21 }
 0x75c   : > { %10649 = vmatprep.subr.bf16.mxu0 %v17669_v9 }
 0x75d   : > { %10679 = vmatpush3.bf16.msra.mxu1 %v17670_v33 }
 0x75e   : > { %10681 = vmatprep.subr.bf16.mxu1 %v17671_v2 }
 0x75f   : > { %10651 = vmatpush3.bf16.msra.mxu0 %v17672_v27 }
 0x760   : > { %10653 = vmatprep.subr.bf16.mxu0 %v17673_v45 }
 0x761   : > { %10683 = vmatpush3.bf16.msra.mxu1 %v17553_v51 }
 0x762   : > { %10685 = vmatprep.subr.bf16.mxu1 %v17555_v63 }
 0x763   : > { %10655 = vmatpush3.bf16.msra.mxu0 %v17554_v46  ;;  %v17680_v46 = vld [vmem:[#allocation142_spill] sm:$0xff] }
 0x764   : > { %10657 = vmatprep.subr.bf16.mxu0 %v17674_v41 }
 0x765   : > { %10687 = vmatpush3.bf16.msra.mxu1 %v17675_v8 }
 0x766   : > { %v9152_v12 = vpop.f32.mrb[176].mxu0  ;;  %10689 = vmatprep.subr.bf16.mxu1 %v17676_v11 }
 0x767   : > { %v9257_v47 = vpop.f32.mrb[178].mxu1  ;;  %10659 = vmatpush3.bf16.msra.mxu0 %v17677_v34  ;;  %v9153_v61 = vpop.f32.mrb[177].mxu0 }
 0x768   : > { %v9154_v1 = vadd.f32 %v9153_v61, %v9152_v12  ;;  %v9258_v10 = vpop.f32.mrb[179].mxu1  ;;  %10661 = vmatprep.subr.bf16.mxu0 %v17678_v20 }
 0x769   : > { %v9259_v51 = vadd.f32 %v9258_v10, %v9257_v47  ;;  %10691 = vmatpush3.bf16.msra.mxu1 %v17679_v19 }
 0x76a   : > { %v6005_v63 = vadd.f32 %v9189_v5, %v9154_v1  ;;  %10693 = vmatprep.subr.bf16.mxu1 %v17680_v46  ;;  %v6440_v5 = vmul.f32 %v16330_v54, %v16330_v54 }
 0x76b   : > { %10663 = vmatpush3.bf16.msra.mxu0 %v17681_v18 }
 0x76c   : > { %10665 = vmatprep.subr.bf16.mxu0 %v17682_v39 }
 0x76d   : > { %10695 = vmatpush3.bf16.msra.mxu1 %v17568_v58  ;;  %v6442_v58 = vmul.f32 %v16338_v16, %v16338_v16 }
 0x76e   : > { %10697 = vmatprep.subr.bf16.mxu1 %v17570_v24  ;;  %v10879_v24 = vld [vmem:[%s16643_s6] sm:$0xff] }
 0x76f   : > { %10667 = vmatpush3.bf16.msra.mxu0 %v17569_v60  ;;  %v10878_v60 = vld [vmem:[%s16643_s6 + $0x18] sm:$0xff] }
 0x770   : > { %10669 = vmatprep.subr.bf16.mxu0 %v17571_v42  ;;  %v17683_v42 = vmov 0.0  }
 0x771   : > { %10699 = vmatpush3.bf16.msra.mxu1 %v17572_v28  ;;  %v10880_v28 = vld [vmem:[%s16643_s6 + $0x28] sm:$0xff] }
 0x772   : > { %10701 = vmatprep.subr.bf16.mxu1 %v17574_v57  ;;  %v10882_v57 = vld [vmem:[%s16643_s6 + $0x38] sm:$0xff] }
 0x773   : > { %10671 = vmatpush3.bf16.msra.mxu0 %v17573_v23  ;;  %v10881_v23 = vld [vmem:[%s16643_s6 + $0x10] sm:$0xff] }
 0x774   : > { %7017 = vmatprep.subr.mxu0 %v10877_v13 }
 0x775   : > { %10703 = vmatpush3.bf16.msra.mxu1 %v17576_v55 }
 0x776   : > { %6929 = vmatmul.mubr.f32.vlgmr.msra.gmra.mrb[190].mxu0 %v6440_v5  ;;  %7094 = vmatprep.subr.mxu1 %v10878_v60 }
 0x777   : > { %7018 = vmatpush1.msra.mxu0 %v10879_v24  ;;  %7081 = vmatprep.mubr.f32.mxu0 %v17683_v42 }
 0x778   : > { %6999 = vmatmul.mubr.f32.vlgmr.msra.gmra.mrb[190].mxu1 %v6442_v58  ;;  %7171 = vmatprep.subr.mxu0 %v10880_v28 }
 0x779   : > { %7095 = vmatpush1.msra.mxu1 %v10881_v23  ;;  %7158 = vmatprep.mubr.f32.mxu1 %v17683_v42 }
 0x77a   : > { %7248 = vmatprep.subr.mxu1 %v10882_v57 }
 0x786   : > { %v9222_v55 = vpop.f32.mrb[178].mxu0 }
 0x787   : > { %v9223_v29 = vpop.f32.mrb[179].mxu0 }
 0x788   : > { %v9224_v14 = vadd.f32 %v9223_v29, %v9222_v55 }
 0x78a   : > { %v6075_v50 = vadd.f32 %v9224_v14, %v6005_v63 }
 0x78c   : > { %v6145_v56 = vadd.f32 %v9259_v51, %v6075_v50 }
 0x7a6   : > { %v9292_v4 = vpop.f32.mrb[180].mxu0 }
 0x7a7   : > { %v9293_v17 = vpop.f32.mrb[181].mxu0 }
 0x7a8   : > { %v9294_v3 = vadd.f32 %v9293_v17, %v9292_v4 }
 0x7a9   : > { %v9327_v59 = vpop.f32.mrb[180].mxu1 }
 0x7aa   : > { %v6215_v38 = vadd.f32 %v9294_v3, %v6145_v56  ;;  %v9328_v37 = vpop.f32.mrb[181].mxu1 }
 0x7ab   : > { %v9329_v0 = vadd.f32 %v9328_v37, %v9327_v59 }
 0x7ad   : > { %v6285_v25 = vadd.f32 %v9329_v0, %v6215_v38 }
 0x7c9   : > { %v9362_v32 = vpop.f32.mrb[182].mxu0 }
 0x7ca   : > { %v9363_v6 = vpop.f32.mrb[183].mxu0 }
 0x7cb   : > { %v9364_v26 = vadd.f32 %v9363_v6, %v9362_v32  ;;  %v9397_v43 = vpop.f32.mrb[182].mxu1  ;;  %v10884_v32 = vld [vmem:[%s16643_s6 + $0x30] sm:$0xff]  ;;  %v10885_v6 = vld [vmem:[%s16643_s6 + $0x48] sm:$0xff] }
 0x7cc   : > { %v9398_v21 = vpop.f32.mrb[183].mxu1 }
 0x7cd   : > { %v6355_v9 = vadd.f32 %v9364_v26, %v6285_v25  ;;  %v9399_v33 = vadd.f32 %v9398_v21, %v9397_v43  ;;  %v10883_v25 = vld [vmem:[%s16643_s6 + $0x20] sm:$0xff]  ;;  %v10886_v26 = vld [vmem:[%s16643_s6 + $0x58] sm:$0xff]  ;;  %v10888_v21 = vld [vmem:[%s16643_s6 + $0x50] sm:$0xff] }
 0x7ce   : > { %v10887_v43 = vld [vmem:[%s16643_s6 + $0x40] sm:$0xff] }
 0x7cf   : > { %v6425_v2 = vadd.f32 %v9399_v33, %v6355_v9  ;;  %v10889_v9 = vld [vmem:[%s16643_s6 + $0x68] sm:$0xff]  ;;  %v10890_v33 = vld [vmem:[%s16643_s6 + $0x78] sm:$0xff] }
 0x7d1   : > { %v7004_v56 = vmul.f32 %v6425_v2, %v6425_v2  ;;  %v7009_v38 = vsub.f32 0.0, %v6425_v2  ;;  %v10891_v2 = vld [vmem:[%s16643_s6 + $0x60] sm:$0xff] }
 0x7e9   : > { %v9432_v27 = vpop.f32.mrb[184].mxu0 }
 0x7ea   : > { %v9433_v45 = vpop.f32.mrb[185].mxu0 }
 0x7eb   : > { %v9434_v41 = vadd.f32 %v9433_v45, %v9432_v27  ;;  %v9467_v8 = vpop.f32.mrb[184].mxu1  ;;  %v10892_v27 = vld [vmem:[%s16643_s6 + $0x70] sm:$0xff] }
 0x7ec   : > { %v9468_v12 = vpop.f32.mrb[185].mxu1 }
 0x7ed   : > { %v9469_v11 = vadd.f32 %v9468_v12, %v9467_v8 }
 0x7ef   : > { %v6581_v47 = vadd.f32 %v9469_v11, %v9434_v41 }
 0x809   : > { %v9502_v34 = vpop.f32.mrb[186].mxu0 }
 0x80a   : > { %v9503_v61 = vpop.f32.mrb[187].mxu0 }
 0x80b   : > { %v9504_v1 = vadd.f32 %v9503_v61, %v9502_v34  ;;  %v9537_v10 = vpop.f32.mrb[186].mxu1 }
 0x80c   : > { %v9538_v20 = vpop.f32.mrb[187].mxu1 }
 0x80d   : > { %v6651_v51 = vadd.f32 %v9504_v1, %v6581_v47  ;;  %v9539_v19 = vadd.f32 %v9538_v20, %v9537_v10 }
 0x80f   : > { %v6721_v63 = vadd.f32 %v9539_v19, %v6651_v51 }
 0x829   : > { %v9572_v46 = vpop.f32.mrb[188].mxu0 }
 0x82a   : > { %v9573_v18 = vpop.f32.mrb[189].mxu0 }
 0x82b   : > { %v9574_v39 = vadd.f32 %v9573_v18, %v9572_v46  ;;  %v9607_v5 = vpop.f32.mrb[188].mxu1 }
 0x82c   : > { %v9608_v13 = vpop.f32.mrb[189].mxu1 }
 0x82d   : > { %v6791_v58 = vadd.f32 %v9574_v39, %v6721_v63  ;;  %v9609_v60 = vadd.f32 %v9608_v13, %v9607_v5 }
 0x82f   : > { %v6861_v24 = vadd.f32 %v9609_v60, %v6791_v58 }
 0x849   : > { %v9642_v28 = vpop.f32.mrb[190].mxu0 }
 0x84a   : > { %v9643_v23 = vpop.f32.mrb[191].mxu0 }
 0x84b   : > { %v9644_v57 = vadd.f32 %v9643_v23, %v9642_v28  ;;  %v9677_v55 = vpop.f32.mrb[190].mxu1 }
 0x84c   : > { %v9678_v29 = vpop.f32.mrb[191].mxu1 }
 0x84d   : > { %v6931_v14 = vadd.f32 %v9644_v57, %v6861_v24  ;;  %v9679_v50 = vadd.f32 %v9678_v29, %v9677_v55 }
 0x84f   : > { %v7001_v4 = vadd.f32 %v9679_v50, %v6931_v14 }
 0x851   : > { %v7005_v17 = vsub.f32 %v7001_v4, %v7004_v56 }
 0x853   : > { %v7006_v3 = vmax.f32 %v7005_v17, 0.0 }
 0x855   : > { %v7007_v59 = vadd.f32 1e-05, %v7006_v3 }
 0x857   : > { %10731 = vrsqrt.f32 %v7007_v59 }
 0x861   : > { %v10732_v37 = vpop.eup %10731 }
 0x862   : > { %8534 = vmatmul.mubr.msk.f32.vlgmr.msra.gmra.mrb[192].mxu0 %vm3553_vm10, %v10732_v37  ;;  %8536 = vmatmul.mubr.msk.f32.vlgmr.msra.gmra.mrb[192].mxu1 %vm3553_vm10, %v10732_v37  ;;  %v7010_v0 = vmul.f32 %v10732_v37, %v7009_v38 }
 0x863   : > { %7087 = vmatprep.mubr.f32.mxu0 %v17683_v42  ;;  %7164 = vmatprep.mubr.f32.mxu1 %v17683_v42 }
 0x864   : > { %7172 = vmatpush1.msra.mxu0 %v10883_v25  ;;  %7249 = vmatpush1.msra.mxu1 %v10884_v32 }
 0x865   : > { %7325 = vmatprep.subr.mxu0 %v10885_v6  ;;  %7402 = vmatprep.subr.mxu1 %v10886_v26 }
 0x866   : > { %8535 = vmatmul.mubr.msk.f32.gmra.mrb[194].mxu0 %vm3553_vm10, %v7010_v0  ;;  %8537 = vmatmul.mubr.msk.f32.gmra.mrb[194].mxu1 %vm3553_vm10, %v7010_v0 }
 0x867   : > { %7235 = vmatprep.mubr.f32.mxu0 %v17683_v42  ;;  %7312 = vmatprep.mubr.f32.mxu1 %v17683_v42 }
 0x86a   : > { %8538 = vmatmul.mubr.msk.f32.vlgmr.msra.gmra.mrb[196].mxu0 %vm3553_vm10, %v10732_v37  ;;  %8540 = vmatmul.mubr.msk.f32.vlgmr.msra.gmra.mrb[196].mxu1 %vm3553_vm10, %v10732_v37 }
 0x86b   : > { %7241 = vmatprep.mubr.f32.mxu0 %v17683_v42  ;;  %7318 = vmatprep.mubr.f32.mxu1 %v17683_v42 }
 0x86c   : > { %7326 = vmatpush1.msra.mxu0 %v10887_v43  ;;  %7403 = vmatpush1.msra.mxu1 %v10888_v21 }
 0x86d   : > { %7479 = vmatprep.subr.mxu0 %v10889_v9  ;;  %7556 = vmatprep.subr.mxu1 %v10890_v33 }
 0x86e   : > { %8539 = vmatmul.mubr.msk.f32.gmra.mrb[198].mxu0 %vm3553_vm10, %v7010_v0  ;;  %8541 = vmatmul.mubr.msk.f32.gmra.mrb[198].mxu1 %vm3553_vm10, %v7010_v0 }
 0x86f   : > { %7389 = vmatprep.mubr.f32.mxu0 %v17683_v42  ;;  %7466 = vmatprep.mubr.f32.mxu1 %v17683_v42 }
 0x872   : > { %8542 = vmatmul.mubr.msk.f32.vlgmr.msra.gmra.mrb[200].mxu0 %vm3553_vm10, %v10732_v37  ;;  %8544 = vmatmul.mubr.msk.f32.vlgmr.msra.gmra.mrb[200].mxu1 %vm3553_vm10, %v10732_v37 }
 0x873   : > { %7395 = vmatprep.mubr.f32.mxu0 %v17683_v42  ;;  %7472 = vmatprep.mubr.f32.mxu1 %v17683_v42 }
 0x874   : > { %7480 = vmatpush1.msra.mxu0 %v10891_v2  ;;  %7557 = vmatpush1.msra.mxu1 %v10892_v27 }
 0x876   : > { %8543 = vmatmul.mubr.msk.f32.gmra.mrb[202].mxu0 %vm3553_vm10, %v7010_v0  ;;  %8545 = vmatmul.mubr.msk.f32.gmra.mrb[202].mxu1 %vm3553_vm10, %v7010_v0 }
 0x877   : > { %7543 = vmatprep.mubr.f32.mxu0 %v17683_v42  ;;  %7620 = vmatprep.mubr.f32.mxu1 %v17683_v42 }
 0x87a   : > { %8546 = vmatmul.mubr.msk.f32.vlgmr.msra.gmra.mrb[204].mxu0 %vm3553_vm10, %v10732_v37  ;;  %8548 = vmatmul.mubr.msk.f32.vlgmr.msra.gmra.mrb[204].mxu1 %vm3553_vm10, %v10732_v37 }
 0x87b   : > { %7549 = vmatprep.mubr.f32.mxu0 %v17683_v42  ;;  %7626 = vmatprep.mubr.f32.mxu1 %v17683_v42 }
 0x87e   : > { %8547 = vmatmul.mubr.msk.f32.gmra.mrb[206].mxu0 %vm3553_vm10, %v7010_v0  ;;  %8549 = vmatmul.mubr.msk.f32.gmra.mrb[206].mxu1 %vm3553_vm10, %v7010_v0 }
 0x87f   : > { %7749 = vmatprep.mubr.f32.mxu0 %v17683_v42  ;;  %7820 = vmatprep.mubr.f32.mxu1 %v17683_v42 }
 0x935   : > { %v7083_v45 = vpop.f32.mrb[192].mxu0  ;;  %v7160_v41 = vpop.f32.mrb[192].mxu1 }
 0x936   : > { %v7085_v8 = vpop.f32.mrb[193].mxu0  ;;  %v7162_v12 = vpop.f32.mrb[193].mxu1  ;;  %v7633_v11 = vmul.f32 %v7083_v45, %v15958_v40  ;;  %v7635_v47 = vmul.f32 %v7160_v41, %v15777_v36 }
 0x937   : > { %v7634_v34 = vmul.f32 %v7085_v8, %v15430_v53  ;;  %v7636_v61 = vmul.f32 %v7162_v12, %v15775_v7  ;;  %v16593_v53 = vld [vmem:[%s16640_s3] sm:$0xf] }
 0x939   : > { %v7089_v1 = vpop.f32.mrb[194].mxu0  ;;  %v7166_v10 = vpop.f32.mrb[194].mxu1 }
 0x93a   : > { %v7649_v20 = vadd.f32 %v7633_v11, %v7089_v1  ;;  %v7651_v51 = vadd.f32 %v7635_v47, %v7166_v10  ;;  %v7091_v19 = vpop.f32.mrb[195].mxu0  ;;  %v7168_v63 = vpop.f32.mrb[195].mxu1 }
 0x93b   : > { %v7650_v46 = vadd.f32 %v7634_v34, %v7091_v19  ;;  %v7652_v18 = vadd.f32 %v7636_v61, %v7168_v63 }
 0x93c   : > { %v7665_v60 = vmax.f32 %v7649_v20, 0.0  ;;  %v7667_v40 = vmax.f32 %v7651_v51, 0.0 }
 0x93d   : > { %v7666_v39 = vmax.f32 %v7650_v46, 0.0  ;;  %v7668_v5 = vmax.f32 %v7652_v18, 0.0  ;;  %v7237_v13 = vpop.f32.mrb[196].mxu0  ;;  %v7314_v58 = vpop.f32.mrb[196].mxu1 }
 0x93e   : > { %v7239_v24 = vpop.f32.mrb[197].mxu0  ;;  %v7316_v36 = vpop.f32.mrb[197].mxu1  ;;  %v7637_v7 = vmul.f32 %v7237_v13, %v17627_v52  ;;  %v7639_v28 = vmul.f32 %v7314_v58, %v17631_v48 }
 0x93f   : > { %7685 = vmatprep.subr.mxu0 %v7666_v39  ;;  %7756 = vmatprep.subr.mxu1 %v7668_v5  ;;  %v7638_v23 = vmul.f32 %v7239_v24, %v15974_v15  ;;  %v7640_v57 = vmul.f32 %v7316_v36, %v15895_v22 }
 0x940   : > { %7686 = vmatpush1.msra.mxu0 %v7665_v60  ;;  %7757 = vmatpush1.msra.mxu1 %v7667_v40 }
 0x941   : > { %v7243_v55 = vpop.f32.mrb[198].mxu0  ;;  %v7320_v29 = vpop.f32.mrb[198].mxu1  ;;  %8550 = vmatmul.mubr.msk.f32.vlgmr.msra.gmra.mrb[208].mxu0 %vm3553_vm10, %v16593_v53  ;;  %8551 = vmatmul.mubr.msk.f32.vlgmr.msra.gmra.mrb[208].mxu1 %vm3553_vm10, %v16593_v53 }
 0x942   : > { %v7653_v14 = vadd.f32 %v7637_v7, %v7243_v55  ;;  %v7655_v50 = vadd.f32 %v7639_v28, %v7320_v29  ;;  %v7245_v56 = vpop.f32.mrb[199].mxu0  ;;  %v7322_v52 = vpop.f32.mrb[199].mxu1  ;;  %7891 = vmatprep.mubr.f32.mxu0 %v17683_v42  ;;  %7962 = vmatprep.mubr.f32.mxu1 %v17683_v42 }
 0x943   : > { %v7654_v48 = vadd.f32 %v7638_v23, %v7245_v56  ;;  %v7656_v15 = vadd.f32 %v7640_v57, %v7322_v52 }
 0x944   : > { %v7669_v59 = vmax.f32 %v7653_v14, 0.0  ;;  %v7671_v38 = vmax.f32 %v7655_v50, 0.0 }
 0x945   : > { %v7670_v4 = vmax.f32 %v7654_v48, 0.0  ;;  %v7672_v22 = vmax.f32 %v7656_v15, 0.0  ;;  %v7391_v17 = vpop.f32.mrb[200].mxu0  ;;  %v7468_v3 = vpop.f32.mrb[200].mxu1 }
 0x946   : > { %v7393_v37 = vpop.f32.mrb[201].mxu0  ;;  %v7470_v0 = vpop.f32.mrb[201].mxu1  ;;  %v7641_v25 = vmul.f32 %v7391_v17, %v17659_v44  ;;  %v7643_v32 = vmul.f32 %v7468_v3, %v17662_v31 }
 0x947   : > { %7827 = vmatprep.subr.mxu0 %v7670_v4  ;;  %7898 = vmatprep.subr.mxu1 %v7672_v22  ;;  %v7642_v6 = vmul.f32 %v7393_v37, %v17630_v35  ;;  %v7644_v26 = vmul.f32 %v7470_v0, %v16187_v49 }
 0x948   : > { %7828 = vmatpush1.msra.mxu0 %v7669_v59  ;;  %7899 = vmatpush1.msra.mxu1 %v7671_v38 }
 0x949   : > { %v7397_v43 = vpop.f32.mrb[202].mxu0  ;;  %v7474_v21 = vpop.f32.mrb[202].mxu1  ;;  %8552 = vmatmul.mubr.msk.f32.vlgmr.msra.gmra.mrb[210].mxu0 %vm3553_vm10, %v16593_v53  ;;  %8553 = vmatmul.mubr.msk.f32.vlgmr.msra.gmra.mrb[210].mxu1 %vm3553_vm10, %v16593_v53 }
 0x94a   : > { %v7657_v9 = vadd.f32 %v7641_v25, %v7397_v43  ;;  %v7659_v33 = vadd.f32 %v7643_v32, %v7474_v21  ;;  %v7399_v2 = vpop.f32.mrb[203].mxu0  ;;  %v7476_v44 = vpop.f32.mrb[203].mxu1  ;;  %8033 = vmatprep.mubr.f32.mxu0 %v17683_v42  ;;  %8104 = vmatprep.mubr.f32.mxu1 %v17683_v42 }
 0x94b   : > { %v7658_v31 = vadd.f32 %v7642_v6, %v7399_v2  ;;  %v7660_v35 = vadd.f32 %v7644_v26, %v7476_v44 }
 0x94c   : > { %v7673_v8 = vmax.f32 %v7657_v9, 0.0  ;;  %v7675_v12 = vmax.f32 %v7659_v33, 0.0 }
 0x94d   : > { %v7674_v27 = vmax.f32 %v7658_v31, 0.0  ;;  %v7676_v49 = vmax.f32 %v7660_v35, 0.0  ;;  %v7545_v45 = vpop.f32.mrb[204].mxu0  ;;  %v7622_v41 = vpop.f32.mrb[204].mxu1 }
 0x94e   : > { %v7547_v11 = vpop.f32.mrb[205].mxu0  ;;  %v7624_v47 = vpop.f32.mrb[205].mxu1  ;;  %v7645_v34 = vmul.f32 %v7545_v45, %v16330_v54  ;;  %v7647_v61 = vmul.f32 %v7622_v41, %v16338_v16 }
 0x94f   : > { %7969 = vmatprep.subr.mxu0 %v7674_v27  ;;  %8040 = vmatprep.subr.mxu1 %v7676_v49  ;;  %v7646_v1 = vmul.f32 %v7547_v11, %v16326_v62  ;;  %v7648_v10 = vmul.f32 %v7624_v47, %v16340_v30 }
 0x950   : > { %7970 = vmatpush1.msra.mxu0 %v7673_v8  ;;  %8041 = vmatpush1.msra.mxu1 %v7675_v12 }
 0x951   : > { %v7551_v20 = vpop.f32.mrb[206].mxu0  ;;  %v7628_v51 = vpop.f32.mrb[206].mxu1  ;;  %8554 = vmatmul.mubr.msk.f32.vlgmr.msra.gmra.mrb[212].mxu0 %vm3553_vm10, %v16593_v53  ;;  %8555 = vmatmul.mubr.msk.f32.vlgmr.msra.gmra.mrb[212].mxu1 %vm3553_vm10, %v16593_v53 }
 0x952   : > { %v7661_v19 = vadd.f32 %v7645_v34, %v7551_v20  ;;  %v7663_v63 = vadd.f32 %v7647_v61, %v7628_v51  ;;  %v7553_v46 = vpop.f32.mrb[207].mxu0  ;;  %v7630_v54 = vpop.f32.mrb[207].mxu1  ;;  %8175 = vmatprep.mubr.f32.mxu0 %v17683_v42  ;;  %8246 = vmatprep.mubr.f32.mxu1 %v17683_v42 }
 0x953   : > { %v7662_v62 = vadd.f32 %v7646_v1, %v7553_v46  ;;  %v7664_v16 = vadd.f32 %v7648_v10, %v7630_v54 }
 0x954   : > { %v7677_v39 = vmax.f32 %v7661_v19, 0.0  ;;  %v7679_v5 = vmax.f32 %v7663_v63, 0.0 }
 0x955   : > { %v7678_v30 = vmax.f32 %v7662_v62, 0.0  ;;  %v7680_v18 = vmax.f32 %v7664_v16, 0.0 }
 0x957   : > { %8111 = vmatprep.subr.mxu0 %v7678_v30  ;;  %8182 = vmatprep.subr.mxu1 %v7680_v18 }
 0x958   : > { %8112 = vmatpush1.msra.mxu0 %v7677_v39  ;;  %8183 = vmatpush1.msra.mxu1 %v7679_v5 }
 0x959   : > { %8556 = vmatmul.mubr.msk.f32.vlgmr.msra.gmra.mrb[214].mxu0 %vm3553_vm10, %v16593_v53  ;;  %8557 = vmatmul.mubr.msk.f32.vlgmr.msra.gmra.mrb[214].mxu1 %vm3553_vm10, %v16593_v53 }
 0xa14   : > { %v7751_v13 = vpop.f32.mrb[208].mxu0  ;;  %v7822_v58 = vpop.f32.mrb[208].mxu1 }
 0xa15   : > { %v7753_v42 = vpop.f32.mrb[209].mxu0  ;;  %v7824_v60 = vpop.f32.mrb[209].mxu1 }
 0xa16   : > { %v8269_v40 = vcombine.low %v7751_v13, %v7753_v42  ;;  %v8270_v24 = vcombine.low %v7822_v58, %v7824_v60 }
 0xa18   : > { %8285 = vst [vmem:[%s280_s28] sm:$0xff] %v8269_v40  ;;  %8286 = vst [vmem:[%s280_s28 + $0x8] sm:$0xff] %v8270_v24 }
 0xa1c   : > { %v7893_v36 = vpop.f32.mrb[210].mxu0  ;;  %v7964_v7 = vpop.f32.mrb[210].mxu1 }
 0xa1d   : > { %v7895_v28 = vpop.f32.mrb[211].mxu0  ;;  %v7966_v23 = vpop.f32.mrb[211].mxu1 }
 0xa1e   : > { %v8271_v57 = vcombine.low %v7893_v36, %v7895_v28  ;;  %v8272_v55 = vcombine.low %v7964_v7, %v7966_v23 }
 0xa20   : > { %8287 = vst [vmem:[%s280_s28 + $0x10] sm:$0xff] %v8271_v57  ;;  %8288 = vst [vmem:[%s280_s28 + $0x18] sm:$0xff] %v8272_v55 }
 0xa24   : > { %v8035_v53 = vpop.f32.mrb[212].mxu0  ;;  %v8106_v29 = vpop.f32.mrb[212].mxu1 }
 0xa25   : > { %v8037_v14 = vpop.f32.mrb[213].mxu0  ;;  %v8108_v50 = vpop.f32.mrb[213].mxu1 }
 0xa26   : > { %v8273_v56 = vcombine.low %v8035_v53, %v8037_v14  ;;  %v8274_v52 = vcombine.low %v8106_v29, %v8108_v50 }
 0xa28   : > { %8289 = vst [vmem:[%s280_s28 + $0x20] sm:$0xff] %v8273_v56  ;;  %8290 = vst [vmem:[%s280_s28 + $0x28] sm:$0xff] %v8274_v52 }
 0xa2c   : > { %v8177_v48 = vpop.f32.mrb[214].mxu0  ;;  %v8248_v15 = vpop.f32.mrb[214].mxu1 }
 0xa2d   : > { %v8179_v4 = vpop.f32.mrb[215].mxu0  ;;  %v8250_v22 = vpop.f32.mrb[215].mxu1 }
 0xa2e   : > { %v8275_v17 = vcombine.low %v8177_v48, %v8179_v4  ;;  %v8276_v3 = vcombine.low %v8248_v15, %v8250_v22 }
 0xa30   : > { %8291 = vst [vmem:[%s280_s28 + $0x30] sm:$0xff] %v8275_v17  ;;  %8292 = vst [vmem:[%s280_s28 + $0x38] sm:$0xff] %v8276_v3 }
 0xa31 PF: > { %s17_s24 = sadd.s32 1, %s10899_s24  }
 0xa32   : > { %p14_p4 = scmp.ge.s32.totalorder %s17_s24, 4  }
 0xa34   :  { %16 = sbr.rel (!%p14_p4) target bundleno = 1 (0x1), region = 78 }

</bundles_post_ra>
